<compile_context>
chip_gen: v7x
topology: tpu7x:2x2x1
jax: 0.10.0
libtpu: 0.0.40
codegen_flags: <defaults>
</compile_context>

<pallas_src>
import functools
import math
from types import SimpleNamespace

import jax
import jax.numpy as jnp
from jax import lax
from jax.experimental import pallas as pl
from jax.experimental.pallas import tpu as pltpu


ATTN_HEADS = 4
ATTN_DIM_HEAD = 32
_EPS = 1e-12
_MAX_TILE_ROWS = 512          # L-tile cap: bounds per-step VMEM at large L (v7x: 64 MiB VMEM)

_vmem_limit_cache = None


def _vmem_limit():
    """~3/4 of physical VMEM, capped at 96 MiB; falls back to 48 MiB (safe on v5e/v6e/v7x)."""
    global _vmem_limit_cache
    if _vmem_limit_cache is None:
        try:
            cap = int(pltpu.get_tpu_info().vmem_capacity_bytes)
            _vmem_limit_cache = min((cap * 3) // 4, 96 * 1024 * 1024)
        except Exception:
            _vmem_limit_cache = 48 * 1024 * 1024
    return _vmem_limit_cache


def _choose_ltile(lout):
    """Pick an L tile: full length when small, otherwise a multiple-of-8 divisor."""
    if lout <= _MAX_TILE_ROWS:
        return lout, 1
    for tl in range(_MAX_TILE_ROWS, 7, -1):
        if tl % 8 == 0 and lout % tl == 0:
            return tl, lout // tl
    return lout, 1


# ----------------------------------------------------------------------------
# Pallas kernels
# ----------------------------------------------------------------------------

def _rms_normalize(x, g, c):
    # F.normalize(x, dim=channel) * g * sqrt(C)   (lucidrains RMSNorm, eps=1e-12), exact divide.
    ssq = jnp.sum(x * x, axis=-1, keepdims=True)
    return x / jnp.maximum(jnp.sqrt(ssq), _EPS) * g * (c ** 0.5)


def _softmax(x, axis):
    m = jnp.max(x, axis=axis, keepdims=True)
    e = jnp.exp(x - m)
    return e * pl.reciprocal(jnp.sum(e, axis=axis, keepdims=True), approx=True)


def _conv_kernel(*refs, K, TL, NL, pad, has_x2, pre_norm, post_norm, has_ss, act):
    """Fused conv1d: optional fused skip-concat + pre-RMSNorm, in-VMEM zero pad, K taps packed
    along lanes into one bf16 MXU matmul (f32 accumulate), fused RMSNorm/FiLM/SiLU epilogue."""
    refs = list(refs)
    o_ref = refs.pop()
    it = iter(refs)
    x_ref = next(it)
    x2_ref = next(it) if has_x2 else None
    w_ref = next(it)
    b_ref = next(it)
    gin_ref = next(it) if pre_norm else None
    gout_ref = next(it) if post_norm else None
    ss_ref = next(it) if has_ss else None

    x = x_ref[0].astype(jnp.float32)                                   # (L, C1)
    if has_x2:                                                          # fused skip concat (VMEM)
        x = jnp.concatenate([x, x2_ref[0].astype(jnp.float32)], axis=-1)
    cin = x.shape[-1]
    if pre_norm:                                                        # PreNorm fused into qkv conv
        x = _rms_normalize(x, gin_ref[...], cin)
    if pad:                                                             # zero pad in VMEM, not HBM
        z = jnp.zeros((pad, cin), jnp.float32)
        x = jnp.concatenate([z, x, z], axis=0)
    xb = x.astype(jnp.bfloat16)                                         # single cast for all taps

    if NL == 1:
        win = xb                                                        # (TL + K - 1, Cin)
    else:
        start = pl.multiple_of(pl.program_id(1) * TL, TL)
        win = lax.dynamic_slice_in_dim(xb, start, TL + K - 1, axis=0)

    taps = [win[k:k + TL, :] for k in range(K)]                         # static shifted slices
    xk = taps[0] if K == 1 else jnp.concatenate(taps, axis=-1)          # (TL, K*Cin)
    y = jnp.dot(xk, w_ref[...], preferred_element_type=jnp.float32) + b_ref[...]

    cout = y.shape[-1]
    if post_norm:                                                       # Block / LinAttn out-norm
        y = _rms_normalize(y, gout_ref[...], cout)
    if has_ss:                                                          # time-embedding FiLM
        ss = ss_ref[0]                                                  # (2, Cout): [scale; shift]
        y = y * (ss[0:1, :] + 1.0) + ss[1:2, :]
    if act:                                                             # SiLU
        y = y * jax.nn.sigmoid(y)
    o_ref[0] = y.astype(o_ref.dtype)


def pallas_conv1d(x, p, x2=None, *, stride=1, padding=0, pre_norm_g=None,
                  post_norm_g=None, scale_shift=None, act=False,
                  out_dtype=jnp.bfloat16):
    """Conv1d (channels-last) with fused skip concat, pre/post norm, FiLM and SiLU."""
    B, L, C1 = x.shape
    C2 = 0 if x2 is None else x2.shape[-1]
    cin = C1 + C2
    K = p["k"]
    cout = p["w"].shape[-1]
    assert p["w"].shape[1] == cin
    lout = L + 2 * padding - K + 1
    TL, NL = _choose_ltile(lout)

    w = p["w"].reshape(K * cin, cout).astype(jnp.bfloat16)
    bias = (p["b"] if p["b"] is not None
            else jnp.zeros((cout,), jnp.float32)).reshape(1, cout).astype(jnp.float32)

    operands = [x]
    in_specs = [pl.BlockSpec((1, L, C1), lambda b, l: (b, 0, 0))]
    if x2 is not None:
        operands.append(x2)
        in_specs.append(pl.BlockSpec((1, L, C2), lambda b, l: (b, 0, 0)))
    operands += [w, bias]
    in_specs += [pl.BlockSpec((K * cin, cout), lambda b, l: (0, 0)),
                 pl.BlockSpec((1, cout), lambda b, l: (0, 0))]
    if pre_norm_g is not None:
        operands.append(pre_norm_g.reshape(1, cin).astype(jnp.float32))
        in_specs.append(pl.BlockSpec((1, cin), lambda b, l: (0, 0)))
    if post_norm_g is not None:
        operands.append(post_norm_g.reshape(1, cout).astype(jnp.float32))
        in_specs.append(pl.BlockSpec((1, cout), lambda b, l: (0, 0)))
    if scale_shift is not None:
        operands.append(scale_shift.astype(jnp.float32))                # (B, 2, Cout)
        in_specs.append(pl.BlockSpec((1, 2, cout), lambda b, l: (b, 0, 0)))

    kern = functools.partial(
        _conv_kernel, K=K, TL=TL, NL=NL, pad=padding,
        has_x2=x2 is not None, pre_norm=pre_norm_g is not None,
        post_norm=post_norm_g is not None, has_ss=scale_shift is not None, act=act)

    out = pl.pallas_call(
        kern,
        out_shape=jax.ShapeDtypeStruct((B, lout, cout), out_dtype),
        grid=(B, NL),
        in_specs=in_specs,
        out_specs=pl.BlockSpec((1, TL, cout), lambda b, l: (b, l, 0)),
        compiler_params=pltpu.CompilerParams(
            dimension_semantics=("parallel", "parallel"),
            vmem_limit_bytes=_vmem_limit()),
    )(*operands)

    if stride > 1:
        # TODO(synk): compute only strided rows in-kernel (strided tap slices) for the k=4
        # stride-2 Downsample to halve MXU work; wrapper slicing kept for lowering robustness.
        out = out[:, ::stride, :]
    return out


def _attention_kernel(qkv_ref, o_ref, *, heads, dh, scale, linear):
    # one batch element; all heads via static lane slices; single lane-dense (L, heads*dh) store.
    qkv = qkv_ref[0].astype(jnp.float32)                                # (L, 3*H)
    H = heads * dh
    outs = []
    for h in range(heads):
        q = qkv[:, h * dh:(h + 1) * dh]                                 # (L, dh)
        k = qkv[:, H + h * dh:H + (h + 1) * dh]
        v = qkv[:, 2 * H + h * dh:2 * H + (h + 1) * dh]
        if linear:
            q = _softmax(q, -1) * scale                                 # softmax over channel dim
            k = _softmax(k, 0)                                          # softmax over sequence dim
            ctx = lax.dot_general(                                      # k^T @ v, no explicit .T
                k.astype(jnp.bfloat16), v.astype(jnp.bfloat16),
                (((0,), (0,)), ((), ())), preferred_element_type=jnp.float32)   # (dh, dh)
            oh = jnp.dot(q.astype(jnp.bfloat16), ctx.astype(jnp.bfloat16),
                         preferred_element_type=jnp.float32)                    # (L, dh)
        else:
            sim = lax.dot_general(                                      # q @ k^T, no explicit .T
                (q * scale).astype(jnp.bfloat16), k.astype(jnp.bfloat16),
                (((1,), (1,)), ((), ())), preferred_element_type=jnp.float32)   # (L, L)
            probs = _softmax(sim, -1)
            oh = jnp.dot(probs.astype(jnp.bfloat16), v.astype(jnp.bfloat16),
                         preferred_element_type=jnp.float32)                    # (L, dh)
        outs.append(oh)
    o_ref[0] = jnp.concatenate(outs, axis=-1).astype(o_ref.dtype)       # (L, heads*dh)


def pallas_attention(qkv, heads, dh, scale, linear):
    # TODO(synk): KV-tile the mid full attention (online softmax) for long sequences;
    # at L<=16 a single per-batch step is both smaller and faster.
    B, L, H3 = qkv.shape
    H = heads * dh
    kern = functools.partial(_attention_kernel, heads=heads, dh=dh, scale=scale, linear=linear)
    return pl.pallas_call(
        kern,
        out_shape=jax.ShapeDtypeStruct((B, L, H), jnp.bfloat16),
        grid=(B,),
        in_specs=[pl.BlockSpec((1, L, H3), lambda b: (b, 0, 0))],
        out_specs=pl.BlockSpec((1, L, H), lambda b: (b, 0, 0)),
        compiler_params=pltpu.CompilerParams(
            dimension_semantics=("parallel",), vmem_limit_bytes=_vmem_limit()),
    )(qkv)


def _wmse_kernel(p_ref, t_ref, w_ref, o_ref):
    d = p_ref[0].astype(jnp.float32) - t_ref[0]                         # (L, C)
    m = jnp.mean(d * d, axis=1, keepdims=True)                          # (L, 1)
    o_ref[0] = jnp.mean(m, axis=0, keepdims=True) * w_ref[0]            # (1, 1)


def pallas_weighted_mse(pred, target, w):
    B, L, C = pred.shape
    per_b = pl.pallas_call(
        _wmse_kernel,
        out_shape=jax.ShapeDtypeStruct((B, 1, 1), jnp.float32),
        grid=(B,),
        in_specs=[
            pl.BlockSpec((1, L, C), lambda b: (b, 0, 0)),
            pl.BlockSpec((1, L, C), lambda b: (b, 0, 0)),
            pl.BlockSpec((1, 1, 1), lambda b: (b, 0, 0)),
        ],
        out_specs=pl.BlockSpec((1, 1, 1), lambda b: (b, 0, 0)),
        compiler_params=pltpu.CompilerParams(
            dimension_semantics=("parallel",), vmem_limit_bytes=_vmem_limit()),
    )(pred.astype(jnp.float32), target.astype(jnp.float32),
      w.reshape(B, 1, 1).astype(jnp.float32))
    return jnp.mean(per_b)


# ----------------------------------------------------------------------------
# Deterministic parameter construction
# ----------------------------------------------------------------------------

class ParamGen:
    def __init__(self, seed=0):
        self.key = jax.random.PRNGKey(seed)

    def normal(self, shape, std=0.05):
        self.key, sub = jax.random.split(self.key)
        return jax.random.normal(sub, shape, jnp.float32) * std


def make_conv(pg, cin, cout, k, bias=True):
    return {
        "w": pg.normal((k, cin, cout)),              # per-tap (Cin, Cout)
        "b": jnp.zeros((cout,), jnp.float32) if bias else None,
        "k": k,
    }


def make_attn_params(pg, c, linear):
    hidden = ATTN_HEADS * ATTN_DIM_HEAD
    p = {
        "norm_g": jnp.ones((c,), jnp.float32),       # PreNorm RMSNorm
        "to_qkv": make_conv(pg, c, hidden * 3, 1, bias=False),
        "to_out": make_conv(pg, hidden, c, 1),
    }
    if linear:
        p["out_norm_g"] = jnp.ones((c,), jnp.float32)   # RMSNorm after to_out conv
    return p


def init_unet_params(pg, cfg):
    dim = cfg.unet_dim
    channels = cfg.in_channels
    init_dim = dim
    dims = [init_dim] + [dim * m for m in cfg.dim_mults]
    in_out = list(zip(dims[:-1], dims[1:]))
    n = len(in_out)
    time_dim = dim * 4

    def make_block(cin, cout):
        return {"proj": make_conv(pg, cin, cout, 3), "g": jnp.ones((cout,), jnp.float32)}

    def make_resnet(cin, cout):
        return {
            "mlp_w": pg.normal((time_dim, 2 * cout)),
            "mlp_b": jnp.zeros((2 * cout,), jnp.float32),
            "block1": make_block(cin, cout),
            "block2": make_block(cout, cout),
            "res_conv": make_conv(pg, cin, cout, 1) if cin != cout else None,
            "dim_out": cout,
        }

    P = {
        "init_conv": make_conv(pg, channels, init_dim, 7),
        "time_w1": pg.normal((dim, time_dim)),
        "time_b1": jnp.zeros((time_dim,), jnp.float32),
        "time_w2": pg.normal((time_dim, time_dim)),
        "time_b2": jnp.zeros((time_dim,), jnp.float32),
    }

    downs = []
    for ind, (din, dout) in enumerate(in_out):
        is_last = ind >= n - 1
        downs.append({
            "block1": make_resnet(din, din),
            "block2": make_resnet(din, din),
            "attn": make_attn_params(pg, din, linear=True),
            "down": make_conv(pg, din, dout, 4) if not is_last else None,
            "down_conv3": make_conv(pg, din, dout, 3) if is_last else None,
        })
    P["downs"] = downs

    mid = dims[-1]
    P["mid_block1"] = make_resnet(mid, mid)
    P["mid_attn"] = make_attn_params(pg, mid, linear=False)
    P["mid_block2"] = make_resnet(mid, mid)

    ups = []
    for ind, (din, dout) in enumerate(reversed(in_out)):
        is_last = ind == n - 1
        ups.append({
            "block1": make_resnet(dout + din, dout),
            "block2": make_resnet(dout + din, dout),
            "attn": make_attn_params(pg, dout, linear=True),
            "up": make_conv(pg, dout, din, 3) if not is_last else None,
            "up_conv3": make_conv(pg, dout, din, 3) if is_last else None,
        })
    P["ups"] = ups

    P["final_res_block"] = make_resnet(dim * 2, dim)
    P["final_conv"] = make_conv(pg, dim, channels, 1)   # out_dim == channels (pred_noise)
    return P


# ----------------------------------------------------------------------------
# Unet1D forward
# ----------------------------------------------------------------------------

def sinusoidal_pos_emb(t, dim):
    half = dim // 2
    emb = math.log(10000.0) / (half - 1)
    freqs = jnp.exp(jnp.arange(half, dtype=jnp.float32) * -emb)
    args = t.astype(jnp.float32)[:, None] * freqs[None, :]
    return jnp.concatenate([jnp.sin(args), jnp.cos(args)], axis=-1)


def resnet_apply(p, x, temb_silu, skip=None):
    d = p["dim_out"]
    # FiLM linear ((B<=2, 64) @ (64, 2*dim_out)) is left to XLA per the perf review;
    # the (scale, shift) modulation itself is fused into the first conv kernel below.
    ss = (jnp.dot(temb_silu, p["mlp_w"]) + p["mlp_b"]).reshape(-1, 2, d)
    b1, b2 = p["block1"], p["block2"]
    # conv3 -> RMSNorm -> (scale+1, shift) -> SiLU fused in one kernel (skip concat fused too)
    h = pallas_conv1d(x, b1["proj"], skip, padding=1, post_norm_g=b1["g"],
                      scale_shift=ss, act=True)
    h = pallas_conv1d(h, b2["proj"], padding=1, post_norm_g=b2["g"], act=True)
    if p["res_conv"] is not None:
        res = pallas_conv1d(x, p["res_conv"], skip)
    else:
        res = x
    return h + res


def attn_apply(p, x, linear):
    # Residual(PreNorm(dim, (Linear)Attention(dim)))
    qkv = pallas_conv1d(x, p["to_qkv"], pre_norm_g=p["norm_g"])   # PreNorm fused into 1x1 conv
    out = pallas_attention(qkv, ATTN_HEADS, ATTN_DIM_HEAD,
                           ATTN_DIM_HEAD ** -0.5, linear)
    out = pallas_conv1d(out, p["to_out"],
                        post_norm_g=p["out_norm_g"] if linear else None)
    return x + out


def unet_apply(P, x, t, cfg):
    dim = cfg.unet_dim
    x = pallas_conv1d(x, P["init_conv"], padding=3)
    r = x
    # trunk time MLP: (B<=2)x16->64->64 -- left to XLA (pallas dispatch overhead > FLOPs).
    # SiLU hoisted: every ResnetBlock mlp starts with SiLU(temb).
    temb = sinusoidal_pos_emb(t, dim)
    temb = jnp.dot(temb, P["time_w1"]) + P["time_b1"]
    temb = jax.nn.gelu(temb, approximate=False)
    temb = jnp.dot(temb, P["time_w2"]) + P["time_b2"]
    temb_silu = jax.nn.silu(temb)

    h = []
    for lvl in P["downs"]:
        x = resnet_apply(lvl["block1"], x, temb_silu)
        h.append(x)
        x = resnet_apply(lvl["block2"], x, temb_silu)
        x = attn_apply(lvl["attn"], x, linear=True)
        h.append(x)
        if lvl["down"] is not None:
            x = pallas_conv1d(x, lvl["down"], stride=2, padding=1)
        else:
            x = pallas_conv1d(x, lvl["down_conv3"], padding=1)

    x = resnet_apply(P["mid_block1"], x, temb_silu)
    x = attn_apply(P["mid_attn"], x, linear=False)
    x = resnet_apply(P["mid_block2"], x, temb_silu)

    for lvl in P["ups"]:
        x = resnet_apply(lvl["block1"], x, temb_silu, skip=h.pop())   # concat fused into conv
        x = resnet_apply(lvl["block2"], x, temb_silu, skip=h.pop())
        x = attn_apply(lvl["attn"], x, linear=True)
        if lvl["up"] is not None:
            # TODO(synk): fuse the nearest upsample (row l//2 gather) into the next conv kernel;
            # kept as an XLA repeat on a small bf16 tensor for lowering robustness.
            x = jnp.repeat(x, 2, axis=1)
            x = pallas_conv1d(x, lvl["up"], padding=1)
        else:
            x = pallas_conv1d(x, lvl["up_conv3"], padding=1)

    x = resnet_apply(P["final_res_block"], x, temb_silu, skip=r)       # concat with r fused
    return pallas_conv1d(x, P["final_conv"], out_dtype=jnp.float32)    # (B, L, channels)


# ----------------------------------------------------------------------------
# GaussianDiffusion1D (training loss, objective='pred_noise', cosine schedule)
# ----------------------------------------------------------------------------

def make_diffusion_consts(T):
    s = 0.008
    steps = T + 1
    xs = jnp.linspace(0.0, T, steps)
    ac = jnp.cos(((xs / T) + s) / (1 + s) * jnp.pi * 0.5) ** 2
    ac = ac / ac[0]
    betas = jnp.clip(1.0 - ac[1:] / ac[:-1], 0.0, 0.999)
    alphas_cumprod = jnp.cumprod(1.0 - betas)
    return {
        "sqrt_ac": jnp.sqrt(alphas_cumprod),
        "sqrt_1mac": jnp.sqrt(1.0 - alphas_cumprod),
        "loss_weight": jnp.ones((T,), jnp.float32),       # pred_noise: snr / snr == 1
    }


def model_forward(params, consts, cfg, x, key):
    # PyTorch: x (B, seq_length, channels).permute(0,2,1) -> (B, C, L); here kept as (B, L, C).
    B = x.shape[0]
    k_t, k_n = jax.random.split(key)
    t = jax.random.randint(k_t, (B,), 0, cfg.timesteps)            # random timesteps
    x0 = x.astype(jnp.float32) * 2.0 - 1.0                         # auto_normalize
    noise = jax.random.normal(k_n, x0.shape, jnp.float32)
    x_t = (consts["sqrt_ac"][t][:, None, None] * x0
           + consts["sqrt_1mac"][t][:, None, None] * noise)        # q_sample
    model_out = unet_apply(params, x_t, t, cfg)                    # predicted noise
    return pallas_weighted_mse(model_out, noise, consts["loss_weight"][t])


# ----------------------------------------------------------------------------

if __name__ == "__main__":
    cfg = SimpleNamespace(
        seq_length=16, timesteps=8, unet_dim=16, dim_mults=(1, 2),
        in_channels=2, out_length=16,
    )

    params = init_unet_params(ParamGen(seed=0), cfg)
    consts = make_diffusion_consts(cfg.timesteps)

    key = jax.random.PRNGKey(0)
    k_x, k_fwd = jax.random.split(key)
    x = jax.random.uniform(k_x, (2, cfg.seq_length, cfg.in_channels), jnp.float32)

    loss_fn = jax.jit(functools.partial(model_forward, params, consts, cfg))
    loss = loss_fn(x, k_fwd)
    jax.block_until_ready(loss)
    assert loss.shape == () and bool(jnp.isfinite(loss))
    print("KERNEL_OK")
</pallas_src>

<mosaic_0001>
module attributes {stable_mosaic.version = 11 : i64} {
  func.func @_conv_kernel(%arg0: i32, %arg1: i32, %arg2: memref<1x16x2xf32, #tpu.memory_space<vmem>>, %arg3: memref<14x16xbf16, #tpu.memory_space<vmem>>, %arg4: memref<1x16xf32, #tpu.memory_space<vmem>>, %arg5: memref<1x16x16xbf16, #tpu.memory_space<vmem>>) attributes {dimension_semantics = [#tpu.dimension_semantics<parallel>, #tpu.dimension_semantics<parallel>], iteration_bounds = array<i64: 2, 1>, scalar_prefetch = 0 : i64, scratch_operands = 0 : i64, tpu.core_type = #tpu.core_type<tc>, window_params = [{transform_indices = @transform_0, window_bounds = array<i64: 1, 16, 2>}, {pipeline_mode = #tpu.pipeline_mode<synchronous>, transform_indices = @transform_1, window_bounds = array<i64: 14, 16>}, {pipeline_mode = #tpu.pipeline_mode<synchronous>, transform_indices = @transform_2, window_bounds = array<i64: 1, 16>}, {transform_indices = @transform_3, window_bounds = array<i64: 1, 16, 16>}]} {
    %c0 = arith.constant 0 : index
    %c0_0 = arith.constant 0 : index
    %c0_1 = arith.constant 0 : index
    %0 = vector.load %arg2[%c0, %c0_0, %c0_1] : memref<1x16x2xf32, #tpu.memory_space<vmem>>, vector<1x16x2xf32>
    %1 = vector.shape_cast %0 : vector<1x16x2xf32> to vector<16x2xf32>
    %cst = arith.constant 0.000000e+00 : f32
    %2 = vector.broadcast %cst : f32 to vector<3x2xf32>
    %3 = tpu.concatenate %2, %1, %2 in 0 : vector<3x2xf32>, vector<16x2xf32>, vector<3x2xf32> -> vector<22x2xf32>
    %4 = arith.truncf %3 : vector<22x2xf32> to vector<22x2xbf16>
    %5 = vector.extract_strided_slice %4 {offsets = [0, 0], sizes = [16, 2], strides = [1, 1]} : vector<22x2xbf16> to vector<16x2xbf16>
    %6 = vector.extract_strided_slice %4 {offsets = [1, 0], sizes = [16, 2], strides = [1, 1]} : vector<22x2xbf16> to vector<16x2xbf16>
    %7 = vector.extract_strided_slice %4 {offsets = [2, 0], sizes = [16, 2], strides = [1, 1]} : vector<22x2xbf16> to vector<16x2xbf16>
    %8 = vector.extract_strided_slice %4 {offsets = [3, 0], sizes = [16, 2], strides = [1, 1]} : vector<22x2xbf16> to vector<16x2xbf16>
    %9 = vector.extract_strided_slice %4 {offsets = [4, 0], sizes = [16, 2], strides = [1, 1]} : vector<22x2xbf16> to vector<16x2xbf16>
    %10 = vector.extract_strided_slice %4 {offsets = [5, 0], sizes = [16, 2], strides = [1, 1]} : vector<22x2xbf16> to vector<16x2xbf16>
    %11 = vector.extract_strided_slice %4 {offsets = [6, 0], sizes = [16, 2], strides = [1, 1]} : vector<22x2xbf16> to vector<16x2xbf16>
    %12 = tpu.concatenate %5, %6, %7, %8, %9, %10, %11 in 1 : vector<16x2xbf16>, vector<16x2xbf16>, vector<16x2xbf16>, vector<16x2xbf16>, vector<16x2xbf16>, vector<16x2xbf16>, vector<16x2xbf16> -> vector<16x14xbf16>
    %c0_2 = arith.constant 0 : index
    %c0_3 = arith.constant 0 : index
    %13 = vector.load %arg3[%c0_2, %c0_3] : memref<14x16xbf16, #tpu.memory_space<vmem>>, vector<14x16xbf16>
    %cst_4 = arith.constant dense<0.000000e+00> : vector<16x16xf32>
    %14 = tpu.matmul %12, %13, %cst_4 {dimension_numbers = #tpu.dot_dimension_numbers<[1], [0], [0], [1], [0, 0, 1, 1], [], []>} : vector<16x14xbf16>, vector<14x16xbf16>, vector<16x16xf32> -> vector<16x16xf32>
    %c0_5 = arith.constant 0 : index
    %c0_6 = arith.constant 0 : index
    %15 = vector.load %arg4[%c0_5, %c0_6] : memref<1x16xf32, #tpu.memory_space<vmem>>, vector<1x16xf32>
    %16 = vector.broadcast %15 : vector<1x16xf32> to vector<16x16xf32>
    %17 = arith.addf %14, %16 : vector<16x16xf32>
    %18 = arith.truncf %17 : vector<16x16xf32> to vector<16x16xbf16>
    %c0_7 = arith.constant 0 : index
    %c0_8 = arith.constant 0 : index
    %c0_9 = arith.constant 0 : index
    %19 = vector.load %arg5[%c0_7, %c0_8, %c0_9] : memref<1x16x16xbf16, #tpu.memory_space<vmem>>, vector<1x16x16xbf16>
    %20 = vector.shape_cast %19 : vector<1x16x16xbf16> to vector<16x16xbf16>
    %21 = vector.shape_cast %18 : vector<16x16xbf16> to vector<1x16x16xbf16>
    tpu.vector_store %arg5[%c0_7, %c0_8, %c0_9], %21 {strides = array<i32>} : memref<1x16x16xbf16, #tpu.memory_space<vmem>>, vector<1x16x16xbf16>,
    return
  }
  func.func @transform_0(%arg0: i32, %arg1: i32) -> (i32, i32, i32) {
    %c0_i32 = arith.constant 0 : i32
    %c0_i32_0 = arith.constant 0 : i32
    %c0_i32_1 = arith.constant 0 : i32
    return %arg0, %c0_i32, %c0_i32_0 : i32, i32, i32
  }
  func.func @transform_1(%arg0: i32, %arg1: i32) -> (i32, i32) {
    %c0_i32 = arith.constant 0 : i32
    %c0_i32_0 = arith.constant 0 : i32
    %c0_i32_1 = arith.constant 0 : i32
    return %c0_i32, %c0_i32_0 : i32, i32
  }
  func.func @transform_2(%arg0: i32, %arg1: i32) -> (i32, i32) {
    %c0_i32 = arith.constant 0 : i32
    %c0_i32_0 = arith.constant 0 : i32
    %c0_i32_1 = arith.constant 0 : i32
    return %c0_i32, %c0_i32_0 : i32, i32
  }
  func.func @transform_3(%arg0: i32, %arg1: i32) -> (i32, i32, i32) {
    %c0_i32 = arith.constant 0 : i32
    %c0_i32_0 = arith.constant 0 : i32
    return %arg0, %arg1, %c0_i32 : i32, i32, i32
  }
}

module attributes {stable_mosaic.version = 11 : i64} {
  func.func @_conv_kernel(%arg0: i32, %arg1: i32, %arg2: memref<1x16x16xbf16, #tpu.memory_space<vmem>>, %arg3: memref<48x16xbf16, #tpu.memory_space<vmem>>, %arg4: memref<1x16xf32, #tpu.memory_space<vmem>>, %arg5: memref<1x16xf32, #tpu.memory_space<vmem>>, %arg6: memref<1x2x16xf32, #tpu.memory_space<vmem>>, %arg7: memref<1x16x16xbf16, #tpu.memory_space<vmem>>) attributes {dimension_semantics = [#tpu.dimension_semantics<parallel>, #tpu.dimension_semantics<parallel>], iteration_bounds = array<i64: 2, 1>, scalar_prefetch = 0 : i64, scratch_operands = 0 : i64, tpu.core_type = #tpu.core_type<tc>, window_params = [{transform_indices = @transform_0, window_bounds = array<i64: 1, 16, 16>}, {pipeline_mode = #tpu.pipeline_mode<synchronous>, transform_indices = @transform_1, window_bounds = array<i64: 48, 16>}, {pipeline_mode = #tpu.pipeline_mode<synchronous>, transform_indices = @transform_2, window_bounds = array<i64: 1, 16>}, {pipeline_mode = #tpu.pipeline_mode<synchronous>, transform_indices = @transform_3, window_bounds = array<i64: 1, 16>}, {transform_indices = @transform_4, window_bounds = array<i64: 1, 2, 16>}, {transform_indices = @transform_5, window_bounds = array<i64: 1, 16, 16>}]} {
    %c0 = arith.constant 0 : index
    %c0_0 = arith.constant 0 : index
    %c0_1 = arith.constant 0 : index
    %0 = vector.load %arg2[%c0, %c0_0, %c0_1] : memref<1x16x16xbf16, #tpu.memory_space<vmem>>, vector<1x16x16xbf16>
    %1 = vector.shape_cast %0 : vector<1x16x16xbf16> to vector<16x16xbf16>
    %2 = arith.extf %1 : vector<16x16xbf16> to vector<16x16xf32>
    %cst = arith.constant 0.000000e+00 : f32
    %3 = vector.broadcast %cst : f32 to vector<1x16xf32>
    %4 = tpu.concatenate %3, %2, %3 in 0 : vector<1x16xf32>, vector<16x16xf32>, vector<1x16xf32> -> vector<18x16xf32>
    %5 = arith.truncf %4 : vector<18x16xf32> to vector<18x16xbf16>
    %6 = vector.extract_strided_slice %5 {offsets = [0, 0], sizes = [16, 16], strides = [1, 1]} : vector<18x16xbf16> to vector<16x16xbf16>
    %7 = vector.extract_strided_slice %5 {offsets = [1, 0], sizes = [16, 16], strides = [1, 1]} : vector<18x16xbf16> to vector<16x16xbf16>
    %8 = vector.extract_strided_slice %5 {offsets = [2, 0], sizes = [16, 16], strides = [1, 1]} : vector<18x16xbf16> to vector<16x16xbf16>
    %9 = tpu.concatenate %6, %7, %8 in 1 : vector<16x16xbf16>, vector<16x16xbf16>, vector<16x16xbf16> -> vector<16x48xbf16>
    %c0_2 = arith.constant 0 : index
    %c0_3 = arith.constant 0 : index
    %10 = vector.load %arg3[%c0_2, %c0_3] : memref<48x16xbf16, #tpu.memory_space<vmem>>, vector<48x16xbf16>
    %cst_4 = arith.constant dense<0.000000e+00> : vector<16x16xf32>
    %11 = tpu.matmul %9, %10, %cst_4 {dimension_numbers = #tpu.dot_dimension_numbers<[1], [0], [0], [1], [0, 0, 1, 1], [], []>} : vector<16x48xbf16>, vector<48x16xbf16>, vector<16x16xf32> -> vector<16x16xf32>
    %c0_5 = arith.constant 0 : index
    %c0_6 = arith.constant 0 : index
    %12 = vector.load %arg4[%c0_5, %c0_6] : memref<1x16xf32, #tpu.memory_space<vmem>>, vector<1x16xf32>
    %13 = vector.broadcast %12 : vector<1x16xf32> to vector<16x16xf32>
    %14 = arith.addf %11, %13 : vector<16x16xf32>
    %c0_7 = arith.constant 0 : index
    %c0_8 = arith.constant 0 : index
    %15 = vector.load %arg5[%c0_7, %c0_8] : memref<1x16xf32, #tpu.memory_space<vmem>>, vector<1x16xf32>
    %16 = arith.mulf %14, %14 : vector<16x16xf32>
    %cst_9 = arith.constant dense<0.000000e+00> : vector<16xf32>
    %17 = vector.multi_reduction <add>, %16, %cst_9 [1] : vector<16x16xf32> to vector<16xf32>
    %18 = vector.shape_cast %17 : vector<16xf32> to vector<16x1xf32>
    %19 = math.sqrt %18 : vector<16x1xf32>
    %cst_10 = arith.constant 9.99999996E-13 : f32
    %20 = vector.broadcast %cst_10 : f32 to vector<16x1xf32>
    %21 = arith.maximumf %19, %20 : vector<16x1xf32>
    %22 = vector.broadcast %21 : vector<16x1xf32> to vector<16x16xf32>
    %23 = arith.divf %14, %22 : vector<16x16xf32>
    %24 = vector.broadcast %15 : vector<1x16xf32> to vector<16x16xf32>
    %25 = arith.mulf %23, %24 : vector<16x16xf32>
    %cst_11 = arith.constant 4.000000e+00 : f32
    %26 = vector.broadcast %cst_11 : f32 to vector<16x16xf32>
    %27 = arith.mulf %25, %26 : vector<16x16xf32>
    %c0_12 = arith.constant 0 : index
    %c0_13 = arith.constant 0 : index
    %c0_14 = arith.constant 0 : index
    %28 = vector.load %arg6[%c0_12, %c0_13, %c0_14] : memref<1x2x16xf32, #tpu.memory_space<vmem>>, vector<1x2x16xf32>
    %29 = vector.shape_cast %28 : vector<1x2x16xf32> to vector<2x16xf32>
    %30 = vector.extract_strided_slice %29 {offsets = [0, 0], sizes = [1, 16], strides = [1, 1]} : vector<2x16xf32> to vector<1x16xf32>
    %cst_15 = arith.constant 1.000000e+00 : f32
    %31 = vector.broadcast %cst_15 : f32 to vector<1x16xf32>
    %32 = arith.addf %30, %31 : vector<1x16xf32>
    %33 = vector.broadcast %32 : vector<1x16xf32> to vector<16x16xf32>
    %34 = arith.mulf %27, %33 : vector<16x16xf32>
    %35 = vector.extract_strided_slice %29 {offsets = [1, 0], sizes = [1, 16], strides = [1, 1]} : vector<2x16xf32> to vector<1x16xf32>
    %36 = vector.broadcast %35 : vector<1x16xf32> to vector<16x16xf32>
    %37 = arith.addf %34, %36 : vector<16x16xf32>
    %38 = arith.negf %37 : vector<16x16xf32>
    %39 = math.exp %38 : vector<16x16xf32>
    %cst_16 = arith.constant 1.000000e+00 : f32
    %40 = vector.broadcast %cst_16 : f32 to vector<16x16xf32>
    %41 = arith.addf %40, %39 : vector<16x16xf32>
    %42 = arith.divf %40, %41 : vector<16x16xf32>
    %43 = arith.mulf %37, %42 : vector<16x16xf32>
    %44 = arith.truncf %43 : vector<16x16xf32> to vector<16x16xbf16>
    %c0_17 = arith.constant 0 : index
    %c0_18 = arith.constant 0 : index
    %c0_19 = arith.constant 0 : index
    %45 = vector.load %arg7[%c0_17, %c0_18, %c0_19] : memref<1x16x16xbf16, #tpu.memory_space<vmem>>, vector<1x16x16xbf16>
    %46 = vector.shape_cast %45 : vector<1x16x16xbf16> to vector<16x16xbf16>
    %47 = vector.shape_cast %44 : vector<16x16xbf16> to vector<1x16x16xbf16>
    tpu.vector_store %arg7[%c0_17, %c0_18, %c0_19], %47 {strides = array<i32>} : memref<1x16x16xbf16, #tpu.memory_space<vmem>>, vector<1x16x16xbf16>,
    return
  }
  func.func @transform_0(%arg0: i32, %arg1: i32) -> (i32, i32, i32) {
    %c0_i32 = arith.constant 0 : i32
    %c0_i32_0 = arith.constant 0 : i32
    %c0_i32_1 = arith.constant 0 : i32
    return %arg0, %c0_i32, %c0_i32_0 : i32, i32, i32
  }
  func.func @transform_1(%arg0: i32, %arg1: i32) -> (i32, i32) {
    %c0_i32 = arith.constant 0 : i32
    %c0_i32_0 = arith.constant 0 : i32
    %c0_i32_1 = arith.constant 0 : i32
    return %c0_i32, %c0_i32_0 : i32, i32
  }
  func.func @transform_2(%arg0: i32, %arg1: i32) -> (i32, i32) {
    %c0_i32 = arith.constant 0 : i32
    %c0_i32_0 = arith.constant 0 : i32
    %c0_i32_1 = arith.constant 0 : i32
    return %c0_i32, %c0_i32_0 : i32, i32
  }
  func.func @transform_3(%arg0: i32, %arg1: i32) -> (i32, i32) {
    %c0_i32 = arith.constant 0 : i32
    %c0_i32_0 = arith.constant 0 : i32
    %c0_i32_1 = arith.constant 0 : i32
    return %c0_i32, %c0_i32_0 : i32, i32
  }
  func.func @transform_4(%arg0: i32, %arg1: i32) -> (i32, i32, i32) {
    %c0_i32 = arith.constant 0 : i32
    %c0_i32_0 = arith.constant 0 : i32
    %c0_i32_1 = arith.constant 0 : i32
    return %arg0, %c0_i32, %c0_i32_0 : i32, i32, i32
  }
  func.func @transform_5(%arg0: i32, %arg1: i32) -> (i32, i32, i32) {
    %c0_i32 = arith.constant 0 : i32
    %c0_i32_0 = arith.constant 0 : i32
    return %arg0, %arg1, %c0_i32 : i32, i32, i32
  }
}

module attributes {stable_mosaic.version = 11 : i64} {
  func.func @_conv_kernel(%arg0: i32, %arg1: i32, %arg2: memref<1x16x16xbf16, #tpu.memory_space<vmem>>, %arg3: memref<48x16xbf16, #tpu.memory_space<vmem>>, %arg4: memref<1x16xf32, #tpu.memory_space<vmem>>, %arg5: memref<1x16xf32, #tpu.memory_space<vmem>>, %arg6: memref<1x16x16xbf16, #tpu.memory_space<vmem>>) attributes {dimension_semantics = [#tpu.dimension_semantics<parallel>, #tpu.dimension_semantics<parallel>], iteration_bounds = array<i64: 2, 1>, scalar_prefetch = 0 : i64, scratch_operands = 0 : i64, tpu.core_type = #tpu.core_type<tc>, window_params = [{transform_indices = @transform_0, window_bounds = array<i64: 1, 16, 16>}, {pipeline_mode = #tpu.pipeline_mode<synchronous>, transform_indices = @transform_1, window_bounds = array<i64: 48, 16>}, {pipeline_mode = #tpu.pipeline_mode<synchronous>, transform_indices = @transform_2, window_bounds = array<i64: 1, 16>}, {pipeline_mode = #tpu.pipeline_mode<synchronous>, transform_indices = @transform_3, window_bounds = array<i64: 1, 16>}, {transform_indices = @transform_4, window_bounds = array<i64: 1, 16, 16>}]} {
    %c0 = arith.constant 0 : index
    %c0_0 = arith.constant 0 : index
    %c0_1 = arith.constant 0 : index
    %0 = vector.load %arg2[%c0, %c0_0, %c0_1] : memref<1x16x16xbf16, #tpu.memory_space<vmem>>, vector<1x16x16xbf16>
    %1 = vector.shape_cast %0 : vector<1x16x16xbf16> to vector<16x16xbf16>
    %2 = arith.extf %1 : vector<16x16xbf16> to vector<16x16xf32>
    %cst = arith.constant 0.000000e+00 : f32
    %3 = vector.broadcast %cst : f32 to vector<1x16xf32>
    %4 = tpu.concatenate %3, %2, %3 in 0 : vector<1x16xf32>, vector<16x16xf32>, vector<1x16xf32> -> vector<18x16xf32>
    %5 = arith.truncf %4 : vector<18x16xf32> to vector<18x16xbf16>
    %6 = vector.extract_strided_slice %5 {offsets = [0, 0], sizes = [16, 16], strides = [1, 1]} : vector<18x16xbf16> to vector<16x16xbf16>
    %7 = vector.extract_strided_slice %5 {offsets = [1, 0], sizes = [16, 16], strides = [1, 1]} : vector<18x16xbf16> to vector<16x16xbf16>
    %8 = vector.extract_strided_slice %5 {offsets = [2, 0], sizes = [16, 16], strides = [1, 1]} : vector<18x16xbf16> to vector<16x16xbf16>
    %9 = tpu.concatenate %6, %7, %8 in 1 : vector<16x16xbf16>, vector<16x16xbf16>, vector<16x16xbf16> -> vector<16x48xbf16>
    %c0_2 = arith.constant 0 : index
    %c0_3 = arith.constant 0 : index
    %10 = vector.load %arg3[%c0_2, %c0_3] : memref<48x16xbf16, #tpu.memory_space<vmem>>, vector<48x16xbf16>
    %cst_4 = arith.constant dense<0.000000e+00> : vector<16x16xf32>
    %11 = tpu.matmul %9, %10, %cst_4 {dimension_numbers = #tpu.dot_dimension_numbers<[1], [0], [0], [1], [0, 0, 1, 1], [], []>} : vector<16x48xbf16>, vector<48x16xbf16>, vector<16x16xf32> -> vector<16x16xf32>
    %c0_5 = arith.constant 0 : index
    %c0_6 = arith.constant 0 : index
    %12 = vector.load %arg4[%c0_5, %c0_6] : memref<1x16xf32, #tpu.memory_space<vmem>>, vector<1x16xf32>
    %13 = vector.broadcast %12 : vector<1x16xf32> to vector<16x16xf32>
    %14 = arith.addf %11, %13 : vector<16x16xf32>
    %c0_7 = arith.constant 0 : index
    %c0_8 = arith.constant 0 : index
    %15 = vector.load %arg5[%c0_7, %c0_8] : memref<1x16xf32, #tpu.memory_space<vmem>>, vector<1x16xf32>
    %16 = arith.mulf %14, %14 : vector<16x16xf32>
    %cst_9 = arith.constant dense<0.000000e+00> : vector<16xf32>
    %17 = vector.multi_reduction <add>, %16, %cst_9 [1] : vector<16x16xf32> to vector<16xf32>
    %18 = vector.shape_cast %17 : vector<16xf32> to vector<16x1xf32>
    %19 = math.sqrt %18 : vector<16x1xf32>
    %cst_10 = arith.constant 9.99999996E-13 : f32
    %20 = vector.broadcast %cst_10 : f32 to vector<16x1xf32>
    %21 = arith.maximumf %19, %20 : vector<16x1xf32>
    %22 = vector.broadcast %21 : vector<16x1xf32> to vector<16x16xf32>
    %23 = arith.divf %14, %22 : vector<16x16xf32>
    %24 = vector.broadcast %15 : vector<1x16xf32> to vector<16x16xf32>
    %25 = arith.mulf %23, %24 : vector<16x16xf32>
    %cst_11 = arith.constant 4.000000e+00 : f32
    %26 = vector.broadcast %cst_11 : f32 to vector<16x16xf32>
    %27 = arith.mulf %25, %26 : vector<16x16xf32>
    %28 = arith.negf %27 : vector<16x16xf32>
    %29 = math.exp %28 : vector<16x16xf32>
    %cst_12 = arith.constant 1.000000e+00 : f32
    %30 = vector.broadcast %cst_12 : f32 to vector<16x16xf32>
    %31 = arith.addf %30, %29 : vector<16x16xf32>
    %32 = arith.divf %30, %31 : vector<16x16xf32>
    %33 = arith.mulf %27, %32 : vector<16x16xf32>
    %34 = arith.truncf %33 : vector<16x16xf32> to vector<16x16xbf16>
    %c0_13 = arith.constant 0 : index
    %c0_14 = arith.constant 0 : index
    %c0_15 = arith.constant 0 : index
    %35 = vector.load %arg6[%c0_13, %c0_14, %c0_15] : memref<1x16x16xbf16, #tpu.memory_space<vmem>>, vector<1x16x16xbf16>
    %36 = vector.shape_cast %35 : vector<1x16x16xbf16> to vector<16x16xbf16>
    %37 = vector.shape_cast %34 : vector<16x16xbf16> to vector<1x16x16xbf16>
    tpu.vector_store %arg6[%c0_13, %c0_14, %c0_15], %37 {strides = array<i32>} : memref<1x16x16xbf16, #tpu.memory_space<vmem>>, vector<1x16x16xbf16>,
    return
  }
  func.func @transform_0(%arg0: i32, %arg1: i32) -> (i32, i32, i32) {
    %c0_i32 = arith.constant 0 : i32
    %c0_i32_0 = arith.constant 0 : i32
    %c0_i32_1 = arith.constant 0 : i32
    return %arg0, %c0_i32, %c0_i32_0 : i32, i32, i32
  }
  func.func @transform_1(%arg0: i32, %arg1: i32) -> (i32, i32) {
    %c0_i32 = arith.constant 0 : i32
    %c0_i32_0 = arith.constant 0 : i32
    %c0_i32_1 = arith.constant 0 : i32
    return %c0_i32, %c0_i32_0 : i32, i32
  }
  func.func @transform_2(%arg0: i32, %arg1: i32) -> (i32, i32) {
    %c0_i32 = arith.constant 0 : i32
    %c0_i32_0 = arith.constant 0 : i32
    %c0_i32_1 = arith.constant 0 : i32
    return %c0_i32, %c0_i32_0 : i32, i32
  }
  func.func @transform_3(%arg0: i32, %arg1: i32) -> (i32, i32) {
    %c0_i32 = arith.constant 0 : i32
    %c0_i32_0 = arith.constant 0 : i32
    %c0_i32_1 = arith.constant 0 : i32
    return %c0_i32, %c0_i32_0 : i32, i32
  }
  func.func @transform_4(%arg0: i32, %arg1: i32) -> (i32, i32, i32) {
    %c0_i32 = arith.constant 0 : i32
    %c0_i32_0 = arith.constant 0 : i32
    return %arg0, %arg1, %c0_i32 : i32, i32, i32
  }
}

module attributes {stable_mosaic.version = 11 : i64} {
  func.func @_conv_kernel(%arg0: i32, %arg1: i32, %arg2: memref<1x16x16xbf16, #tpu.memory_space<vmem>>, %arg3: memref<16x384xbf16, #tpu.memory_space<vmem>>, %arg4: memref<1x384xf32, #tpu.memory_space<vmem>>, %arg5: memref<1x16xf32, #tpu.memory_space<vmem>>, %arg6: memref<1x16x384xbf16, #tpu.memory_space<vmem>>) attributes {dimension_semantics = [#tpu.dimension_semantics<parallel>, #tpu.dimension_semantics<parallel>], iteration_bounds = array<i64: 2, 1>, scalar_prefetch = 0 : i64, scratch_operands = 0 : i64, tpu.core_type = #tpu.core_type<tc>, window_params = [{transform_indices = @transform_0, window_bounds = array<i64: 1, 16, 16>}, {pipeline_mode = #tpu.pipeline_mode<synchronous>, transform_indices = @transform_1, window_bounds = array<i64: 16, 384>}, {pipeline_mode = #tpu.pipeline_mode<synchronous>, transform_indices = @transform_2, window_bounds = array<i64: 1, 384>}, {pipeline_mode = #tpu.pipeline_mode<synchronous>, transform_indices = @transform_3, window_bounds = array<i64: 1, 16>}, {transform_indices = @transform_4, window_bounds = array<i64: 1, 16, 384>}]} {
    %c0 = arith.constant 0 : index
    %c0_0 = arith.constant 0 : index
    %c0_1 = arith.constant 0 : index
    %0 = vector.load %arg2[%c0, %c0_0, %c0_1] : memref<1x16x16xbf16, #tpu.memory_space<vmem>>, vector<1x16x16xbf16>
    %1 = vector.shape_cast %0 : vector<1x16x16xbf16> to vector<16x16xbf16>
    %2 = arith.extf %1 : vector<16x16xbf16> to vector<16x16xf32>
    %c0_2 = arith.constant 0 : index
    %c0_3 = arith.constant 0 : index
    %3 = vector.load %arg5[%c0_2, %c0_3] : memref<1x16xf32, #tpu.memory_space<vmem>>, vector<1x16xf32>
    %4 = arith.mulf %2, %2 : vector<16x16xf32>
    %cst = arith.constant dense<0.000000e+00> : vector<16xf32>
    %5 = vector.multi_reduction <add>, %4, %cst [1] : vector<16x16xf32> to vector<16xf32>
    %6 = vector.shape_cast %5 : vector<16xf32> to vector<16x1xf32>
    %7 = math.sqrt %6 : vector<16x1xf32>
    %cst_4 = arith.constant 9.99999996E-13 : f32
    %8 = vector.broadcast %cst_4 : f32 to vector<16x1xf32>
    %9 = arith.maximumf %7, %8 : vector<16x1xf32>
    %10 = vector.broadcast %9 : vector<16x1xf32> to vector<16x16xf32>
    %11 = arith.divf %2, %10 : vector<16x16xf32>
    %12 = vector.broadcast %3 : vector<1x16xf32> to vector<16x16xf32>
    %13 = arith.mulf %11, %12 : vector<16x16xf32>
    %cst_5 = arith.constant 4.000000e+00 : f32
    %14 = vector.broadcast %cst_5 : f32 to vector<16x16xf32>
    %15 = arith.mulf %13, %14 : vector<16x16xf32>
    %16 = arith.truncf %15 : vector<16x16xf32> to vector<16x16xbf16>
    %c0_6 = arith.constant 0 : index
    %c0_7 = arith.constant 0 : index
    %17 = vector.load %arg3[%c0_6, %c0_7] : memref<16x384xbf16, #tpu.memory_space<vmem>>, vector<16x384xbf16>
    %cst_8 = arith.constant dense<0.000000e+00> : vector<16x384xf32>
    %18 = tpu.matmul %16, %17, %cst_8 {dimension_numbers = #tpu.dot_dimension_numbers<[1], [0], [0], [1], [0, 0, 1, 1], [], []>} : vector<16x16xbf16>, vector<16x384xbf16>, vector<16x384xf32> -> vector<16x384xf32>
    %c0_9 = arith.constant 0 : index
    %c0_10 = arith.constant 0 : index
    %19 = vector.load %arg4[%c0_9, %c0_10] : memref<1x384xf32, #tpu.memory_space<vmem>>, vector<1x384xf32>
    %20 = vector.broadcast %19 : vector<1x384xf32> to vector<16x384xf32>
    %21 = arith.addf %18, %20 : vector<16x384xf32>
    %22 = arith.truncf %21 : vector<16x384xf32> to vector<16x384xbf16>
    %c0_11 = arith.constant 0 : index
    %c0_12 = arith.constant 0 : index
    %c0_13 = arith.constant 0 : index
    %23 = vector.load %arg6[%c0_11, %c0_12, %c0_13] : memref<1x16x384xbf16, #tpu.memory_space<vmem>>, vector<1x16x384xbf16>
    %24 = vector.shape_cast %23 : vector<1x16x384xbf16> to vector<16x384xbf16>
    %25 = vector.shape_cast %22 : vector<16x384xbf16> to vector<1x16x384xbf16>
    tpu.vector_store %arg6[%c0_11, %c0_12, %c0_13], %25 {strides = array<i32>} : memref<1x16x384xbf16, #tpu.memory_space<vmem>>, vector<1x16x384xbf16>,
    return
  }
  func.func @transform_0(%arg0: i32, %arg1: i32) -> (i32, i32, i32) {
    %c0_i32 = arith.constant 0 : i32
    %c0_i32_0 = arith.constant 0 : i32
    %c0_i32_1 = arith.constant 0 : i32
    return %arg0, %c0_i32, %c0_i32_0 : i32, i32, i32
  }
  func.func @transform_1(%arg0: i32, %arg1: i32) -> (i32, i32) {
    %c0_i32 = arith.constant 0 : i32
    %c0_i32_0 = arith.constant 0 : i32
    %c0_i32_1 = arith.constant 0 : i32
    return %c0_i32, %c0_i32_0 : i32, i32
  }
  func.func @transform_2(%arg0: i32, %arg1: i32) -> (i32, i32) {
    %c0_i32 = arith.constant 0 : i32
    %c0_i32_0 = arith.constant 0 : i32
    %c0_i32_1 = arith.constant 0 : i32
    return %c0_i32, %c0_i32_0 : i32, i32
  }
  func.func @transform_3(%arg0: i32, %arg1: i32) -> (i32, i32) {
    %c0_i32 = arith.constant 0 : i32
    %c0_i32_0 = arith.constant 0 : i32
    %c0_i32_1 = arith.constant 0 : i32
    return %c0_i32, %c0_i32_0 : i32, i32
  }
  func.func @transform_4(%arg0: i32, %arg1: i32) -> (i32, i32, i32) {
    %c0_i32 = arith.constant 0 : i32
    %c0_i32_0 = arith.constant 0 : i32
    return %arg0, %arg1, %c0_i32 : i32, i32, i32
  }
}

module attributes {stable_mosaic.version = 11 : i64} {
  func.func @_conv_kernel(%arg0: i32, %arg1: i32, %arg2: memref<1x16x128xbf16, #tpu.memory_space<vmem>>, %arg3: memref<128x16xbf16, #tpu.memory_space<vmem>>, %arg4: memref<1x16xf32, #tpu.memory_space<vmem>>, %arg5: memref<1x16xf32, #tpu.memory_space<vmem>>, %arg6: memref<1x16x16xbf16, #tpu.memory_space<vmem>>) attributes {dimension_semantics = [#tpu.dimension_semantics<parallel>, #tpu.dimension_semantics<parallel>], iteration_bounds = array<i64: 2, 1>, scalar_prefetch = 0 : i64, scratch_operands = 0 : i64, tpu.core_type = #tpu.core_type<tc>, window_params = [{transform_indices = @transform_0, window_bounds = array<i64: 1, 16, 128>}, {pipeline_mode = #tpu.pipeline_mode<synchronous>, transform_indices = @transform_1, window_bounds = array<i64: 128, 16>}, {pipeline_mode = #tpu.pipeline_mode<synchronous>, transform_indices = @transform_2, window_bounds = array<i64: 1, 16>}, {pipeline_mode = #tpu.pipeline_mode<synchronous>, transform_indices = @transform_3, window_bounds = array<i64: 1, 16>}, {transform_indices = @transform_4, window_bounds = array<i64: 1, 16, 16>}]} {
    %c0 = arith.constant 0 : index
    %c0_0 = arith.constant 0 : index
    %c0_1 = arith.constant 0 : index
    %0 = vector.load %arg2[%c0, %c0_0, %c0_1] : memref<1x16x128xbf16, #tpu.memory_space<vmem>>, vector<1x16x128xbf16>
    %1 = vector.shape_cast %0 : vector<1x16x128xbf16> to vector<16x128xbf16>
    %2 = arith.extf %1 : vector<16x128xbf16> to vector<16x128xf32>
    %3 = arith.truncf %2 : vector<16x128xf32> to vector<16x128xbf16>
    %c0_2 = arith.constant 0 : index
    %c0_3 = arith.constant 0 : index
    %4 = vector.load %arg3[%c0_2, %c0_3] : memref<128x16xbf16, #tpu.memory_space<vmem>>, vector<128x16xbf16>
    %cst = arith.constant dense<0.000000e+00> : vector<16x16xf32>
    %5 = tpu.matmul %3, %4, %cst {dimension_numbers = #tpu.dot_dimension_numbers<[1], [0], [0], [1], [0, 0, 1, 1], [], []>} : vector<16x128xbf16>, vector<128x16xbf16>, vector<16x16xf32> -> vector<16x16xf32>
    %c0_4 = arith.constant 0 : index
    %c0_5 = arith.constant 0 : index
    %6 = vector.load %arg4[%c0_4, %c0_5] : memref<1x16xf32, #tpu.memory_space<vmem>>, vector<1x16xf32>
    %7 = vector.broadcast %6 : vector<1x16xf32> to vector<16x16xf32>
    %8 = arith.addf %5, %7 : vector<16x16xf32>
    %c0_6 = arith.constant 0 : index
    %c0_7 = arith.constant 0 : index
    %9 = vector.load %arg5[%c0_6, %c0_7] : memref<1x16xf32, #tpu.memory_space<vmem>>, vector<1x16xf32>
    %10 = arith.mulf %8, %8 : vector<16x16xf32>
    %cst_8 = arith.constant dense<0.000000e+00> : vector<16xf32>
    %11 = vector.multi_reduction <add>, %10, %cst_8 [1] : vector<16x16xf32> to vector<16xf32>
    %12 = vector.shape_cast %11 : vector<16xf32> to vector<16x1xf32>
    %13 = math.sqrt %12 : vector<16x1xf32>
    %cst_9 = arith.constant 9.99999996E-13 : f32
    %14 = vector.broadcast %cst_9 : f32 to vector<16x1xf32>
    %15 = arith.maximumf %13, %14 : vector<16x1xf32>
    %16 = vector.broadcast %15 : vector<16x1xf32> to vector<16x16xf32>
    %17 = arith.divf %8, %16 : vector<16x16xf32>
    %18 = vector.broadcast %9 : vector<1x16xf32> to vector<16x16xf32>
    %19 = arith.mulf %17, %18 : vector<16x16xf32>
    %cst_10 = arith.constant 4.000000e+00 : f32
    %20 = vector.broadcast %cst_10 : f32 to vector<16x16xf32>
    %21 = arith.mulf %19, %20 : vector<16x16xf32>
    %22 = arith.truncf %21 : vector<16x16xf32> to vector<16x16xbf16>
    %c0_11 = arith.constant 0 : index
    %c0_12 = arith.constant 0 : index
    %c0_13 = arith.constant 0 : index
    %23 = vector.load %arg6[%c0_11, %c0_12, %c0_13] : memref<1x16x16xbf16, #tpu.memory_space<vmem>>, vector<1x16x16xbf16>
    %24 = vector.shape_cast %23 : vector<1x16x16xbf16> to vector<16x16xbf16>
    %25 = vector.shape_cast %22 : vector<16x16xbf16> to vector<1x16x16xbf16>
    tpu.vector_store %arg6[%c0_11, %c0_12, %c0_13], %25 {strides = array<i32>} : memref<1x16x16xbf16, #tpu.memory_space<vmem>>, vector<1x16x16xbf16>,
    return
  }
  func.func @transform_0(%arg0: i32, %arg1: i32) -> (i32, i32, i32) {
    %c0_i32 = arith.constant 0 : i32
    %c0_i32_0 = arith.constant 0 : i32
    %c0_i32_1 = arith.constant 0 : i32
    return %arg0, %c0_i32, %c0_i32_0 : i32, i32, i32
  }
  func.func @transform_1(%arg0: i32, %arg1: i32) -> (i32, i32) {
    %c0_i32 = arith.constant 0 : i32
    %c0_i32_0 = arith.constant 0 : i32
    %c0_i32_1 = arith.constant 0 : i32
    return %c0_i32, %c0_i32_0 : i32, i32
  }
  func.func @transform_2(%arg0: i32, %arg1: i32) -> (i32, i32) {
    %c0_i32 = arith.constant 0 : i32
    %c0_i32_0 = arith.constant 0 : i32
    %c0_i32_1 = arith.constant 0 : i32
    return %c0_i32, %c0_i32_0 : i32, i32
  }
  func.func @transform_3(%arg0: i32, %arg1: i32) -> (i32, i32) {
    %c0_i32 = arith.constant 0 : i32
    %c0_i32_0 = arith.constant 0 : i32
    %c0_i32_1 = arith.constant 0 : i32
    return %c0_i32, %c0_i32_0 : i32, i32
  }
  func.func @transform_4(%arg0: i32, %arg1: i32) -> (i32, i32, i32) {
    %c0_i32 = arith.constant 0 : i32
    %c0_i32_0 = arith.constant 0 : i32
    return %arg0, %arg1, %c0_i32 : i32, i32, i32
  }
}

module attributes {stable_mosaic.version = 11 : i64} {
  func.func @_attention_kernel(%arg0: i32, %arg1: memref<1x16x384xbf16, #tpu.memory_space<vmem>>, %arg2: memref<1x16x128xbf16, #tpu.memory_space<vmem>>) attributes {dimension_semantics = [#tpu.dimension_semantics<parallel>], iteration_bounds = array<i64: 2>, scalar_prefetch = 0 : i64, scratch_operands = 0 : i64, tpu.core_type = #tpu.core_type<tc>, window_params = [{transform_indices = @transform_0, window_bounds = array<i64: 1, 16, 384>}, {transform_indices = @transform_1, window_bounds = array<i64: 1, 16, 128>}]} {
    %c0 = arith.constant 0 : index
    %c0_0 = arith.constant 0 : index
    %c0_1 = arith.constant 0 : index
    %0 = vector.load %arg1[%c0, %c0_0, %c0_1] : memref<1x16x384xbf16, #tpu.memory_space<vmem>>, vector<1x16x384xbf16>
    %1 = vector.shape_cast %0 : vector<1x16x384xbf16> to vector<16x384xbf16>
    %2 = arith.extf %1 : vector<16x384xbf16> to vector<16x384xf32>
    %3 = vector.extract_strided_slice %2 {offsets = [0, 0], sizes = [16, 32], strides = [1, 1]} : vector<16x384xf32> to vector<16x32xf32>
    %4 = vector.extract_strided_slice %2 {offsets = [0, 128], sizes = [16, 32], strides = [1, 1]} : vector<16x384xf32> to vector<16x32xf32>
    %5 = vector.extract_strided_slice %2 {offsets = [0, 256], sizes = [16, 32], strides = [1, 1]} : vector<16x384xf32> to vector<16x32xf32>
    %cst = arith.constant dense<0xFF800000> : vector<16xf32>
    %6 = vector.multi_reduction <maximumf>, %3, %cst [1] : vector<16x32xf32> to vector<16xf32>
    %7 = vector.shape_cast %6 : vector<16xf32> to vector<16x1xf32>
    %8 = vector.broadcast %7 : vector<16x1xf32> to vector<16x32xf32>
    %9 = arith.subf %3, %8 : vector<16x32xf32>
    %10 = math.exp %9 : vector<16x32xf32>
    %cst_2 = arith.constant dense<0.000000e+00> : vector<16xf32>
    %11 = vector.multi_reduction <add>, %10, %cst_2 [1] : vector<16x32xf32> to vector<16xf32>
    %12 = vector.shape_cast %11 : vector<16xf32> to vector<16x1xf32>
    %13 = tpu.reciprocal %12 {approx = true} : vector<16x1xf32> -> vector<16x1xf32>
    %14 = vector.broadcast %13 : vector<16x1xf32> to vector<16x32xf32>
    %15 = arith.mulf %10, %14 : vector<16x32xf32>
    %cst_3 = arith.constant 0.176776692 : f32
    %16 = vector.broadcast %cst_3 : f32 to vector<16x32xf32>
    %17 = arith.mulf %15, %16 : vector<16x32xf32>
    %cst_4 = arith.constant dense<0xFF800000> : vector<32xf32>
    %18 = vector.multi_reduction <maximumf>, %4, %cst_4 [0] : vector<16x32xf32> to vector<32xf32>
    %19 = vector.shape_cast %18 : vector<32xf32> to vector<1x32xf32>
    %20 = vector.broadcast %19 : vector<1x32xf32> to vector<16x32xf32>
    %21 = arith.subf %4, %20 : vector<16x32xf32>
    %22 = math.exp %21 : vector<16x32xf32>
    %cst_5 = arith.constant dense<0.000000e+00> : vector<32xf32>
    %23 = vector.multi_reduction <add>, %22, %cst_5 [0] : vector<16x32xf32> to vector<32xf32>
    %24 = vector.shape_cast %23 : vector<32xf32> to vector<1x32xf32>
    %25 = tpu.reciprocal %24 {approx = true} : vector<1x32xf32> -> vector<1x32xf32>
    %26 = vector.broadcast %25 : vector<1x32xf32> to vector<16x32xf32>
    %27 = arith.mulf %22, %26 : vector<16x32xf32>
    %28 = arith.truncf %27 : vector<16x32xf32> to vector<16x32xbf16>
    %29 = arith.truncf %5 : vector<16x32xf32> to vector<16x32xbf16>
    %cst_6 = arith.constant dense<0.000000e+00> : vector<32x32xf32>
    %30 = tpu.matmul %28, %29, %cst_6 {dimension_numbers = #tpu.dot_dimension_numbers<[0], [0], [1], [1], [0, 1, 1, 1], [], []>} : vector<16x32xbf16>, vector<16x32xbf16>, vector<32x32xf32> -> vector<32x32xf32>
    %31 = arith.truncf %17 : vector<16x32xf32> to vector<16x32xbf16>
    %32 = arith.truncf %30 : vector<32x32xf32> to vector<32x32xbf16>
    %cst_7 = arith.constant dense<0.000000e+00> : vector<16x32xf32>
    %33 = tpu.matmul %31, %32, %cst_7 {dimension_numbers = #tpu.dot_dimension_numbers<[1], [0], [0], [1], [0, 0, 1, 1], [], []>} : vector<16x32xbf16>, vector<32x32xbf16>, vector<16x32xf32> -> vector<16x32xf32>
    %34 = vector.extract_strided_slice %2 {offsets = [0, 32], sizes = [16, 32], strides = [1, 1]} : vector<16x384xf32> to vector<16x32xf32>
    %35 = vector.extract_strided_slice %2 {offsets = [0, 160], sizes = [16, 32], strides = [1, 1]} : vector<16x384xf32> to vector<16x32xf32>
    %36 = vector.extract_strided_slice %2 {offsets = [0, 288], sizes = [16, 32], strides = [1, 1]} : vector<16x384xf32> to vector<16x32xf32>
    %cst_8 = arith.constant dense<0xFF800000> : vector<16xf32>
    %37 = vector.multi_reduction <maximumf>, %34, %cst_8 [1] : vector<16x32xf32> to vector<16xf32>
    %38 = vector.shape_cast %37 : vector<16xf32> to vector<16x1xf32>
    %39 = vector.broadcast %38 : vector<16x1xf32> to vector<16x32xf32>
    %40 = arith.subf %34, %39 : vector<16x32xf32>
    %41 = math.exp %40 : vector<16x32xf32>
    %cst_9 = arith.constant dense<0.000000e+00> : vector<16xf32>
    %42 = vector.multi_reduction <add>, %41, %cst_9 [1] : vector<16x32xf32> to vector<16xf32>
    %43 = vector.shape_cast %42 : vector<16xf32> to vector<16x1xf32>
    %44 = tpu.reciprocal %43 {approx = true} : vector<16x1xf32> -> vector<16x1xf32>
    %45 = vector.broadcast %44 : vector<16x1xf32> to vector<16x32xf32>
    %46 = arith.mulf %41, %45 : vector<16x32xf32>
    %cst_10 = arith.constant 0.176776692 : f32
    %47 = vector.broadcast %cst_10 : f32 to vector<16x32xf32>
    %48 = arith.mulf %46, %47 : vector<16x32xf32>
    %cst_11 = arith.constant dense<0xFF800000> : vector<32xf32>
    %49 = vector.multi_reduction <maximumf>, %35, %cst_11 [0] : vector<16x32xf32> to vector<32xf32>
    %50 = vector.shape_cast %49 : vector<32xf32> to vector<1x32xf32>
    %51 = vector.broadcast %50 : vector<1x32xf32> to vector<16x32xf32>
    %52 = arith.subf %35, %51 : vector<16x32xf32>
    %53 = math.exp %52 : vector<16x32xf32>
    %cst_12 = arith.constant dense<0.000000e+00> : vector<32xf32>
    %54 = vector.multi_reduction <add>, %53, %cst_12 [0] : vector<16x32xf32> to vector<32xf32>
    %55 = vector.shape_cast %54 : vector<32xf32> to vector<1x32xf32>
    %56 = tpu.reciprocal %55 {approx = true} : vector<1x32xf32> -> vector<1x32xf32>
    %57 = vector.broadcast %56 : vector<1x32xf32> to vector<16x32xf32>
    %58 = arith.mulf %53, %57 : vector<16x32xf32>
    %59 = arith.truncf %58 : vector<16x32xf32> to vector<16x32xbf16>
    %60 = arith.truncf %36 : vector<16x32xf32> to vector<16x32xbf16>
    %cst_13 = arith.constant dense<0.000000e+00> : vector<32x32xf32>
    %61 = tpu.matmul %59, %60, %cst_13 {dimension_numbers = #tpu.dot_dimension_numbers<[0], [0], [1], [1], [0, 1, 1, 1], [], []>} : vector<16x32xbf16>, vector<16x32xbf16>, vector<32x32xf32> -> vector<32x32xf32>
    %62 = arith.truncf %48 : vector<16x32xf32> to vector<16x32xbf16>
    %63 = arith.truncf %61 : vector<32x32xf32> to vector<32x32xbf16>
    %cst_14 = arith.constant dense<0.000000e+00> : vector<16x32xf32>
    %64 = tpu.matmul %62, %63, %cst_14 {dimension_numbers = #tpu.dot_dimension_numbers<[1], [0], [0], [1], [0, 0, 1, 1], [], []>} : vector<16x32xbf16>, vector<32x32xbf16>, vector<16x32xf32> -> vector<16x32xf32>
    %65 = vector.extract_strided_slice %2 {offsets = [0, 64], sizes = [16, 32], strides = [1, 1]} : vector<16x384xf32> to vector<16x32xf32>
    %66 = vector.extract_strided_slice %2 {offsets = [0, 192], sizes = [16, 32], strides = [1, 1]} : vector<16x384xf32> to vector<16x32xf32>
    %67 = vector.extract_strided_slice %2 {offsets = [0, 320], sizes = [16, 32], strides = [1, 1]} : vector<16x384xf32> to vector<16x32xf32>
    %cst_15 = arith.constant dense<0xFF800000> : vector<16xf32>
    %68 = vector.multi_reduction <maximumf>, %65, %cst_15 [1] : vector<16x32xf32> to vector<16xf32>
    %69 = vector.shape_cast %68 : vector<16xf32> to vector<16x1xf32>
    %70 = vector.broadcast %69 : vector<16x1xf32> to vector<16x32xf32>
    %71 = arith.subf %65, %70 : vector<16x32xf32>
    %72 = math.exp %71 : vector<16x32xf32>
    %cst_16 = arith.constant dense<0.000000e+00> : vector<16xf32>
    %73 = vector.multi_reduction <add>, %72, %cst_16 [1] : vector<16x32xf32> to vector<16xf32>
    %74 = vector.shape_cast %73 : vector<16xf32> to vector<16x1xf32>
    %75 = tpu.reciprocal %74 {approx = true} : vector<16x1xf32> -> vector<16x1xf32>
    %76 = vector.broadcast %75 : vector<16x1xf32> to vector<16x32xf32>
    %77 = arith.mulf %72, %76 : vector<16x32xf32>
    %cst_17 = arith.constant 0.176776692 : f32
    %78 = vector.broadcast %cst_17 : f32 to vector<16x32xf32>
    %79 = arith.mulf %77, %78 : vector<16x32xf32>
    %cst_18 = arith.constant dense<0xFF800000> : vector<32xf32>
    %80 = vector.multi_reduction <maximumf>, %66, %cst_18 [0] : vector<16x32xf32> to vector<32xf32>
    %81 = vector.shape_cast %80 : vector<32xf32> to vector<1x32xf32>
    %82 = vector.broadcast %81 : vector<1x32xf32> to vector<16x32xf32>
    %83 = arith.subf %66, %82 : vector<16x32xf32>
    %84 = math.exp %83 : vector<16x32xf32>
    %cst_19 = arith.constant dense<0.000000e+00> : vector<32xf32>
    %85 = vector.multi_reduction <add>, %84, %cst_19 [0] : vector<16x32xf32> to vector<32xf32>
    %86 = vector.shape_cast %85 : vector<32xf32> to vector<1x32xf32>
    %87 = tpu.reciprocal %86 {approx = true} : vector<1x32xf32> -> vector<1x32xf32>
    %88 = vector.broadcast %87 : vector<1x32xf32> to vector<16x32xf32>
    %89 = arith.mulf %84, %88 : vector<16x32xf32>
    %90 = arith.truncf %89 : vector<16x32xf32> to vector<16x32xbf16>
    %91 = arith.truncf %67 : vector<16x32xf32> to vector<16x32xbf16>
    %cst_20 = arith.constant dense<0.000000e+00> : vector<32x32xf32>
    %92 = tpu.matmul %90, %91, %cst_20 {dimension_numbers = #tpu.dot_dimension_numbers<[0], [0], [1], [1], [0, 1, 1, 1], [], []>} : vector<16x32xbf16>, vector<16x32xbf16>, vector<32x32xf32> -> vector<32x32xf32>
    %93 = arith.truncf %79 : vector<16x32xf32> to vector<16x32xbf16>
    %94 = arith.truncf %92 : vector<32x32xf32> to vector<32x32xbf16>
    %cst_21 = arith.constant dense<0.000000e+00> : vector<16x32xf32>
    %95 = tpu.matmul %93, %94, %cst_21 {dimension_numbers = #tpu.dot_dimension_numbers<[1], [0], [0], [1], [0, 0, 1, 1], [], []>} : vector<16x32xbf16>, vector<32x32xbf16>, vector<16x32xf32> -> vector<16x32xf32>
    %96 = vector.extract_strided_slice %2 {offsets = [0, 96], sizes = [16, 32], strides = [1, 1]} : vector<16x384xf32> to vector<16x32xf32>
    %97 = vector.extract_strided_slice %2 {offsets = [0, 224], sizes = [16, 32], strides = [1, 1]} : vector<16x384xf32> to vector<16x32xf32>
    %98 = vector.extract_strided_slice %2 {offsets = [0, 352], sizes = [16, 32], strides = [1, 1]} : vector<16x384xf32> to vector<16x32xf32>
    %cst_22 = arith.constant dense<0xFF800000> : vector<16xf32>
    %99 = vector.multi_reduction <maximumf>, %96, %cst_22 [1] : vector<16x32xf32> to vector<16xf32>
    %100 = vector.shape_cast %99 : vector<16xf32> to vector<16x1xf32>
    %101 = vector.broadcast %100 : vector<16x1xf32> to vector<16x32xf32>
    %102 = arith.subf %96, %101 : vector<16x32xf32>
    %103 = math.exp %102 : vector<16x32xf32>
    %cst_23 = arith.constant dense<0.000000e+00> : vector<16xf32>
    %104 = vector.multi_reduction <add>, %103, %cst_23 [1] : vector<16x32xf32> to vector<16xf32>
    %105 = vector.shape_cast %104 : vector<16xf32> to vector<16x1xf32>
    %106 = tpu.reciprocal %105 {approx = true} : vector<16x1xf32> -> vector<16x1xf32>
    %107 = vector.broadcast %106 : vector<16x1xf32> to vector<16x32xf32>
    %108 = arith.mulf %103, %107 : vector<16x32xf32>
    %cst_24 = arith.constant 0.176776692 : f32
    %109 = vector.broadcast %cst_24 : f32 to vector<16x32xf32>
    %110 = arith.mulf %108, %109 : vector<16x32xf32>
    %cst_25 = arith.constant dense<0xFF800000> : vector<32xf32>
    %111 = vector.multi_reduction <maximumf>, %97, %cst_25 [0] : vector<16x32xf32> to vector<32xf32>
    %112 = vector.shape_cast %111 : vector<32xf32> to vector<1x32xf32>
    %113 = vector.broadcast %112 : vector<1x32xf32> to vector<16x32xf32>
    %114 = arith.subf %97, %113 : vector<16x32xf32>
    %115 = math.exp %114 : vector<16x32xf32>
    %cst_26 = arith.constant dense<0.000000e+00> : vector<32xf32>
    %116 = vector.multi_reduction <add>, %115, %cst_26 [0] : vector<16x32xf32> to vector<32xf32>
    %117 = vector.shape_cast %116 : vector<32xf32> to vector<1x32xf32>
    %118 = tpu.reciprocal %117 {approx = true} : vector<1x32xf32> -> vector<1x32xf32>
    %119 = vector.broadcast %118 : vector<1x32xf32> to vector<16x32xf32>
    %120 = arith.mulf %115, %119 : vector<16x32xf32>
    %121 = arith.truncf %120 : vector<16x32xf32> to vector<16x32xbf16>
    %122 = arith.truncf %98 : vector<16x32xf32> to vector<16x32xbf16>
    %cst_27 = arith.constant dense<0.000000e+00> : vector<32x32xf32>
    %123 = tpu.matmul %121, %122, %cst_27 {dimension_numbers = #tpu.dot_dimension_numbers<[0], [0], [1], [1], [0, 1, 1, 1], [], []>} : vector<16x32xbf16>, vector<16x32xbf16>, vector<32x32xf32> -> vector<32x32xf32>
    %124 = arith.truncf %110 : vector<16x32xf32> to vector<16x32xbf16>
    %125 = arith.truncf %123 : vector<32x32xf32> to vector<32x32xbf16>
    %cst_28 = arith.constant dense<0.000000e+00> : vector<16x32xf32>
    %126 = tpu.matmul %124, %125, %cst_28 {dimension_numbers = #tpu.dot_dimension_numbers<[1], [0], [0], [1], [0, 0, 1, 1], [], []>} : vector<16x32xbf16>, vector<32x32xbf16>, vector<16x32xf32> -> vector<16x32xf32>
    %127 = tpu.concatenate %33, %64, %95, %126 in 1 : vector<16x32xf32>, vector<16x32xf32>, vector<16x32xf32>, vector<16x32xf32> -> vector<16x128xf32>
    %128 = arith.truncf %127 : vector<16x128xf32> to vector<16x128xbf16>
    %c0_29 = arith.constant 0 : index
    %c0_30 = arith.constant 0 : index
    %c0_31 = arith.constant 0 : index
    %129 = vector.load %arg2[%c0_29, %c0_30, %c0_31] : memref<1x16x128xbf16, #tpu.memory_space<vmem>>, vector<1x16x128xbf16>
    %130 = vector.shape_cast %129 : vector<1x16x128xbf16> to vector<16x128xbf16>
    %131 = vector.shape_cast %128 : vector<16x128xbf16> to vector<1x16x128xbf16>
    tpu.vector_store %arg2[%c0_29, %c0_30, %c0_31], %131 {strides = array<i32>} : memref<1x16x128xbf16, #tpu.memory_space<vmem>>, vector<1x16x128xbf16>,
    return
  }
  func.func @transform_0(%arg0: i32) -> (i32, i32, i32) {
    %c0_i32 = arith.constant 0 : i32
    %c0_i32_0 = arith.constant 0 : i32
    %c0_i32_1 = arith.constant 0 : i32
    return %arg0, %c0_i32, %c0_i32_0 : i32, i32, i32
  }
  func.func @transform_1(%arg0: i32) -> (i32, i32, i32) {
    %c0_i32 = arith.constant 0 : i32
    %c0_i32_0 = arith.constant 0 : i32
    %c0_i32_1 = arith.constant 0 : i32
    return %arg0, %c0_i32, %c0_i32_0 : i32, i32, i32
  }
}

module attributes {stable_mosaic.version = 11 : i64} {
  func.func @_conv_kernel(%arg0: i32, %arg1: i32, %arg2: memref<1x16x16xbf16, #tpu.memory_space<vmem>>, %arg3: memref<64x16xbf16, #tpu.memory_space<vmem>>, %arg4: memref<1x16xf32, #tpu.memory_space<vmem>>, %arg5: memref<1x15x16xbf16, #tpu.memory_space<vmem>>) attributes {dimension_semantics = [#tpu.dimension_semantics<parallel>, #tpu.dimension_semantics<parallel>], iteration_bounds = array<i64: 2, 1>, scalar_prefetch = 0 : i64, scratch_operands = 0 : i64, tpu.core_type = #tpu.core_type<tc>, window_params = [{transform_indices = @transform_0, window_bounds = array<i64: 1, 16, 16>}, {pipeline_mode = #tpu.pipeline_mode<synchronous>, transform_indices = @transform_1, window_bounds = array<i64: 64, 16>}, {pipeline_mode = #tpu.pipeline_mode<synchronous>, transform_indices = @transform_2, window_bounds = array<i64: 1, 16>}, {transform_indices = @transform_3, window_bounds = array<i64: 1, 15, 16>}]} {
    %c0 = arith.constant 0 : index
    %c0_0 = arith.constant 0 : index
    %c0_1 = arith.constant 0 : index
    %0 = vector.load %arg2[%c0, %c0_0, %c0_1] : memref<1x16x16xbf16, #tpu.memory_space<vmem>>, vector<1x16x16xbf16>
    %1 = vector.shape_cast %0 : vector<1x16x16xbf16> to vector<16x16xbf16>
    %2 = arith.extf %1 : vector<16x16xbf16> to vector<16x16xf32>
    %cst = arith.constant 0.000000e+00 : f32
    %3 = vector.broadcast %cst : f32 to vector<1x16xf32>
    %4 = tpu.concatenate %3, %2, %3 in 0 : vector<1x16xf32>, vector<16x16xf32>, vector<1x16xf32> -> vector<18x16xf32>
    %5 = arith.truncf %4 : vector<18x16xf32> to vector<18x16xbf16>
    %6 = vector.extract_strided_slice %5 {offsets = [0, 0], sizes = [15, 16], strides = [1, 1]} : vector<18x16xbf16> to vector<15x16xbf16>
    %7 = vector.extract_strided_slice %5 {offsets = [1, 0], sizes = [15, 16], strides = [1, 1]} : vector<18x16xbf16> to vector<15x16xbf16>
    %8 = vector.extract_strided_slice %5 {offsets = [2, 0], sizes = [15, 16], strides = [1, 1]} : vector<18x16xbf16> to vector<15x16xbf16>
    %9 = vector.extract_strided_slice %5 {offsets = [3, 0], sizes = [15, 16], strides = [1, 1]} : vector<18x16xbf16> to vector<15x16xbf16>
    %10 = tpu.concatenate %6, %7, %8, %9 in 1 : vector<15x16xbf16>, vector<15x16xbf16>, vector<15x16xbf16>, vector<15x16xbf16> -> vector<15x64xbf16>
    %c0_2 = arith.constant 0 : index
    %c0_3 = arith.constant 0 : index
    %11 = vector.load %arg3[%c0_2, %c0_3] : memref<64x16xbf16, #tpu.memory_space<vmem>>, vector<64x16xbf16>
    %cst_4 = arith.constant dense<0.000000e+00> : vector<15x16xf32>
    %12 = tpu.matmul %10, %11, %cst_4 {dimension_numbers = #tpu.dot_dimension_numbers<[1], [0], [0], [1], [0, 0, 1, 1], [], []>} : vector<15x64xbf16>, vector<64x16xbf16>, vector<15x16xf32> -> vector<15x16xf32>
    %c0_5 = arith.constant 0 : index
    %c0_6 = arith.constant 0 : index
    %13 = vector.load %arg4[%c0_5, %c0_6] : memref<1x16xf32, #tpu.memory_space<vmem>>, vector<1x16xf32>
    %14 = vector.broadcast %13 : vector<1x16xf32> to vector<15x16xf32>
    %15 = arith.addf %12, %14 : vector<15x16xf32>
    %16 = arith.truncf %15 : vector<15x16xf32> to vector<15x16xbf16>
    %c0_7 = arith.constant 0 : index
    %c0_8 = arith.constant 0 : index
    %c0_9 = arith.constant 0 : index
    %17 = vector.load %arg5[%c0_7, %c0_8, %c0_9] : memref<1x15x16xbf16, #tpu.memory_space<vmem>>, vector<1x15x16xbf16>
    %18 = vector.shape_cast %17 : vector<1x15x16xbf16> to vector<15x16xbf16>
    %19 = vector.shape_cast %16 : vector<15x16xbf16> to vector<1x15x16xbf16>
    tpu.vector_store %arg5[%c0_7, %c0_8, %c0_9], %19 {strides = array<i32>} : memref<1x15x16xbf16, #tpu.memory_space<vmem>>, vector<1x15x16xbf16>,
    return
  }
  func.func @transform_0(%arg0: i32, %arg1: i32) -> (i32, i32, i32) {
    %c0_i32 = arith.constant 0 : i32
    %c0_i32_0 = arith.constant 0 : i32
    %c0_i32_1 = arith.constant 0 : i32
    return %arg0, %c0_i32, %c0_i32_0 : i32, i32, i32
  }
  func.func @transform_1(%arg0: i32, %arg1: i32) -> (i32, i32) {
    %c0_i32 = arith.constant 0 : i32
    %c0_i32_0 = arith.constant 0 : i32
    %c0_i32_1 = arith.constant 0 : i32
    return %c0_i32, %c0_i32_0 : i32, i32
  }
  func.func @transform_2(%arg0: i32, %arg1: i32) -> (i32, i32) {
    %c0_i32 = arith.constant 0 : i32
    %c0_i32_0 = arith.constant 0 : i32
    %c0_i32_1 = arith.constant 0 : i32
    return %c0_i32, %c0_i32_0 : i32, i32
  }
  func.func @transform_3(%arg0: i32, %arg1: i32) -> (i32, i32, i32) {
    %c0_i32 = arith.constant 0 : i32
    %c0_i32_0 = arith.constant 0 : i32
    return %arg0, %arg1, %c0_i32 : i32, i32, i32
  }
}

module attributes {stable_mosaic.version = 11 : i64} {
  func.func @_conv_kernel(%arg0: i32, %arg1: i32, %arg2: memref<1x8x16xbf16, #tpu.memory_space<vmem>>, %arg3: memref<48x16xbf16, #tpu.memory_space<vmem>>, %arg4: memref<1x16xf32, #tpu.memory_space<vmem>>, %arg5: memref<1x16xf32, #tpu.memory_space<vmem>>, %arg6: memref<1x2x16xf32, #tpu.memory_space<vmem>>, %arg7: memref<1x8x16xbf16, #tpu.memory_space<vmem>>) attributes {dimension_semantics = [#tpu.dimension_semantics<parallel>, #tpu.dimension_semantics<parallel>], iteration_bounds = array<i64: 2, 1>, scalar_prefetch = 0 : i64, scratch_operands = 0 : i64, tpu.core_type = #tpu.core_type<tc>, window_params = [{transform_indices = @transform_0, window_bounds = array<i64: 1, 8, 16>}, {pipeline_mode = #tpu.pipeline_mode<synchronous>, transform_indices = @transform_1, window_bounds = array<i64: 48, 16>}, {pipeline_mode = #tpu.pipeline_mode<synchronous>, transform_indices = @transform_2, window_bounds = array<i64: 1, 16>}, {pipeline_mode = #tpu.pipeline_mode<synchronous>, transform_indices = @transform_3, window_bounds = array<i64: 1, 16>}, {transform_indices = @transform_4, window_bounds = array<i64: 1, 2, 16>}, {transform_indices = @transform_5, window_bounds = array<i64: 1, 8, 16>}]} {
    %c0 = arith.constant 0 : index
    %c0_0 = arith.constant 0 : index
    %c0_1 = arith.constant 0 : index
    %0 = vector.load %arg2[%c0, %c0_0, %c0_1] : memref<1x8x16xbf16, #tpu.memory_space<vmem>>, vector<1x8x16xbf16>
    %1 = vector.shape_cast %0 : vector<1x8x16xbf16> to vector<8x16xbf16>
    %2 = arith.extf %1 : vector<8x16xbf16> to vector<8x16xf32>
    %cst = arith.constant 0.000000e+00 : f32
    %3 = vector.broadcast %cst : f32 to vector<1x16xf32>
    %4 = tpu.concatenate %3, %2, %3 in 0 : vector<1x16xf32>, vector<8x16xf32>, vector<1x16xf32> -> vector<10x16xf32>
    %5 = arith.truncf %4 : vector<10x16xf32> to vector<10x16xbf16>
    %6 = vector.extract_strided_slice %5 {offsets = [0, 0], sizes = [8, 16], strides = [1, 1]} : vector<10x16xbf16> to vector<8x16xbf16>
    %7 = vector.extract_strided_slice %5 {offsets = [1, 0], sizes = [8, 16], strides = [1, 1]} : vector<10x16xbf16> to vector<8x16xbf16>
    %8 = vector.extract_strided_slice %5 {offsets = [2, 0], sizes = [8, 16], strides = [1, 1]} : vector<10x16xbf16> to vector<8x16xbf16>
    %9 = tpu.concatenate %6, %7, %8 in 1 : vector<8x16xbf16>, vector<8x16xbf16>, vector<8x16xbf16> -> vector<8x48xbf16>
    %c0_2 = arith.constant 0 : index
    %c0_3 = arith.constant 0 : index
    %10 = vector.load %arg3[%c0_2, %c0_3] : memref<48x16xbf16, #tpu.memory_space<vmem>>, vector<48x16xbf16>
    %cst_4 = arith.constant dense<0.000000e+00> : vector<8x16xf32>
    %11 = tpu.matmul %9, %10, %cst_4 {dimension_numbers = #tpu.dot_dimension_numbers<[1], [0], [0], [1], [0, 0, 1, 1], [], []>} : vector<8x48xbf16>, vector<48x16xbf16>, vector<8x16xf32> -> vector<8x16xf32>
    %c0_5 = arith.constant 0 : index
    %c0_6 = arith.constant 0 : index
    %12 = vector.load %arg4[%c0_5, %c0_6] : memref<1x16xf32, #tpu.memory_space<vmem>>, vector<1x16xf32>
    %13 = vector.broadcast %12 : vector<1x16xf32> to vector<8x16xf32>
    %14 = arith.addf %11, %13 : vector<8x16xf32>
    %c0_7 = arith.constant 0 : index
    %c0_8 = arith.constant 0 : index
    %15 = vector.load %arg5[%c0_7, %c0_8] : memref<1x16xf32, #tpu.memory_space<vmem>>, vector<1x16xf32>
    %16 = arith.mulf %14, %14 : vector<8x16xf32>
    %cst_9 = arith.constant dense<0.000000e+00> : vector<8xf32>
    %17 = vector.multi_reduction <add>, %16, %cst_9 [1] : vector<8x16xf32> to vector<8xf32>
    %18 = vector.shape_cast %17 : vector<8xf32> to vector<8x1xf32>
    %19 = math.sqrt %18 : vector<8x1xf32>
    %cst_10 = arith.constant 9.99999996E-13 : f32
    %20 = vector.broadcast %cst_10 : f32 to vector<8x1xf32>
    %21 = arith.maximumf %19, %20 : vector<8x1xf32>
    %22 = vector.broadcast %21 : vector<8x1xf32> to vector<8x16xf32>
    %23 = arith.divf %14, %22 : vector<8x16xf32>
    %24 = vector.broadcast %15 : vector<1x16xf32> to vector<8x16xf32>
    %25 = arith.mulf %23, %24 : vector<8x16xf32>
    %cst_11 = arith.constant 4.000000e+00 : f32
    %26 = vector.broadcast %cst_11 : f32 to vector<8x16xf32>
    %27 = arith.mulf %25, %26 : vector<8x16xf32>
    %c0_12 = arith.constant 0 : index
    %c0_13 = arith.constant 0 : index
    %c0_14 = arith.constant 0 : index
    %28 = vector.load %arg6[%c0_12, %c0_13, %c0_14] : memref<1x2x16xf32, #tpu.memory_space<vmem>>, vector<1x2x16xf32>
    %29 = vector.shape_cast %28 : vector<1x2x16xf32> to vector<2x16xf32>
    %30 = vector.extract_strided_slice %29 {offsets = [0, 0], sizes = [1, 16], strides = [1, 1]} : vector<2x16xf32> to vector<1x16xf32>
    %cst_15 = arith.constant 1.000000e+00 : f32
    %31 = vector.broadcast %cst_15 : f32 to vector<1x16xf32>
    %32 = arith.addf %30, %31 : vector<1x16xf32>
    %33 = vector.broadcast %32 : vector<1x16xf32> to vector<8x16xf32>
    %34 = arith.mulf %27, %33 : vector<8x16xf32>
    %35 = vector.extract_strided_slice %29 {offsets = [1, 0], sizes = [1, 16], strides = [1, 1]} : vector<2x16xf32> to vector<1x16xf32>
    %36 = vector.broadcast %35 : vector<1x16xf32> to vector<8x16xf32>
    %37 = arith.addf %34, %36 : vector<8x16xf32>
    %38 = arith.negf %37 : vector<8x16xf32>
    %39 = math.exp %38 : vector<8x16xf32>
    %cst_16 = arith.constant 1.000000e+00 : f32
    %40 = vector.broadcast %cst_16 : f32 to vector<8x16xf32>
    %41 = arith.addf %40, %39 : vector<8x16xf32>
    %42 = arith.divf %40, %41 : vector<8x16xf32>
    %43 = arith.mulf %37, %42 : vector<8x16xf32>
    %44 = arith.truncf %43 : vector<8x16xf32> to vector<8x16xbf16>
    %c0_17 = arith.constant 0 : index
    %c0_18 = arith.constant 0 : index
    %c0_19 = arith.constant 0 : index
    %45 = vector.load %arg7[%c0_17, %c0_18, %c0_19] : memref<1x8x16xbf16, #tpu.memory_space<vmem>>, vector<1x8x16xbf16>
    %46 = vector.shape_cast %45 : vector<1x8x16xbf16> to vector<8x16xbf16>
    %47 = vector.shape_cast %44 : vector<8x16xbf16> to vector<1x8x16xbf16>
    tpu.vector_store %arg7[%c0_17, %c0_18, %c0_19], %47 {strides = array<i32>} : memref<1x8x16xbf16, #tpu.memory_space<vmem>>, vector<1x8x16xbf16>,
    return
  }
  func.func @transform_0(%arg0: i32, %arg1: i32) -> (i32, i32, i32) {
    %c0_i32 = arith.constant 0 : i32
    %c0_i32_0 = arith.constant 0 : i32
    %c0_i32_1 = arith.constant 0 : i32
    return %arg0, %c0_i32, %c0_i32_0 : i32, i32, i32
  }
  func.func @transform_1(%arg0: i32, %arg1: i32) -> (i32, i32) {
    %c0_i32 = arith.constant 0 : i32
    %c0_i32_0 = arith.constant 0 : i32
    %c0_i32_1 = arith.constant 0 : i32
    return %c0_i32, %c0_i32_0 : i32, i32
  }
  func.func @transform_2(%arg0: i32, %arg1: i32) -> (i32, i32) {
    %c0_i32 = arith.constant 0 : i32
    %c0_i32_0 = arith.constant 0 : i32
    %c0_i32_1 = arith.constant 0 : i32
    return %c0_i32, %c0_i32_0 : i32, i32
  }
  func.func @transform_3(%arg0: i32, %arg1: i32) -> (i32, i32) {
    %c0_i32 = arith.constant 0 : i32
    %c0_i32_0 = arith.constant 0 : i32
    %c0_i32_1 = arith.constant 0 : i32
    return %c0_i32, %c0_i32_0 : i32, i32
  }
  func.func @transform_4(%arg0: i32, %arg1: i32) -> (i32, i32, i32) {
    %c0_i32 = arith.constant 0 : i32
    %c0_i32_0 = arith.constant 0 : i32
    %c0_i32_1 = arith.constant 0 : i32
    return %arg0, %c0_i32, %c0_i32_0 : i32, i32, i32
  }
  func.func @transform_5(%arg0: i32, %arg1: i32) -> (i32, i32, i32) {
    %c0_i32 = arith.constant 0 : i32
    %c0_i32_0 = arith.constant 0 : i32
    return %arg0, %arg1, %c0_i32 : i32, i32, i32
  }
}

module attributes {stable_mosaic.version = 11 : i64} {
  func.func @_conv_kernel(%arg0: i32, %arg1: i32, %arg2: memref<1x8x16xbf16, #tpu.memory_space<vmem>>, %arg3: memref<48x16xbf16, #tpu.memory_space<vmem>>, %arg4: memref<1x16xf32, #tpu.memory_space<vmem>>, %arg5: memref<1x16xf32, #tpu.memory_space<vmem>>, %arg6: memref<1x8x16xbf16, #tpu.memory_space<vmem>>) attributes {dimension_semantics = [#tpu.dimension_semantics<parallel>, #tpu.dimension_semantics<parallel>], iteration_bounds = array<i64: 2, 1>, scalar_prefetch = 0 : i64, scratch_operands = 0 : i64, tpu.core_type = #tpu.core_type<tc>, window_params = [{transform_indices = @transform_0, window_bounds = array<i64: 1, 8, 16>}, {pipeline_mode = #tpu.pipeline_mode<synchronous>, transform_indices = @transform_1, window_bounds = array<i64: 48, 16>}, {pipeline_mode = #tpu.pipeline_mode<synchronous>, transform_indices = @transform_2, window_bounds = array<i64: 1, 16>}, {pipeline_mode = #tpu.pipeline_mode<synchronous>, transform_indices = @transform_3, window_bounds = array<i64: 1, 16>}, {transform_indices = @transform_4, window_bounds = array<i64: 1, 8, 16>}]} {
    %c0 = arith.constant 0 : index
    %c0_0 = arith.constant 0 : index
    %c0_1 = arith.constant 0 : index
    %0 = vector.load %arg2[%c0, %c0_0, %c0_1] : memref<1x8x16xbf16, #tpu.memory_space<vmem>>, vector<1x8x16xbf16>
    %1 = vector.shape_cast %0 : vector<1x8x16xbf16> to vector<8x16xbf16>
    %2 = arith.extf %1 : vector<8x16xbf16> to vector<8x16xf32>
    %cst = arith.constant 0.000000e+00 : f32
    %3 = vector.broadcast %cst : f32 to vector<1x16xf32>
    %4 = tpu.concatenate %3, %2, %3 in 0 : vector<1x16xf32>, vector<8x16xf32>, vector<1x16xf32> -> vector<10x16xf32>
    %5 = arith.truncf %4 : vector<10x16xf32> to vector<10x16xbf16>
    %6 = vector.extract_strided_slice %5 {offsets = [0, 0], sizes = [8, 16], strides = [1, 1]} : vector<10x16xbf16> to vector<8x16xbf16>
    %7 = vector.extract_strided_slice %5 {offsets = [1, 0], sizes = [8, 16], strides = [1, 1]} : vector<10x16xbf16> to vector<8x16xbf16>
    %8 = vector.extract_strided_slice %5 {offsets = [2, 0], sizes = [8, 16], strides = [1, 1]} : vector<10x16xbf16> to vector<8x16xbf16>
    %9 = tpu.concatenate %6, %7, %8 in 1 : vector<8x16xbf16>, vector<8x16xbf16>, vector<8x16xbf16> -> vector<8x48xbf16>
    %c0_2 = arith.constant 0 : index
    %c0_3 = arith.constant 0 : index
    %10 = vector.load %arg3[%c0_2, %c0_3] : memref<48x16xbf16, #tpu.memory_space<vmem>>, vector<48x16xbf16>
    %cst_4 = arith.constant dense<0.000000e+00> : vector<8x16xf32>
    %11 = tpu.matmul %9, %10, %cst_4 {dimension_numbers = #tpu.dot_dimension_numbers<[1], [0], [0], [1], [0, 0, 1, 1], [], []>} : vector<8x48xbf16>, vector<48x16xbf16>, vector<8x16xf32> -> vector<8x16xf32>
    %c0_5 = arith.constant 0 : index
    %c0_6 = arith.constant 0 : index
    %12 = vector.load %arg4[%c0_5, %c0_6] : memref<1x16xf32, #tpu.memory_space<vmem>>, vector<1x16xf32>
    %13 = vector.broadcast %12 : vector<1x16xf32> to vector<8x16xf32>
    %14 = arith.addf %11, %13 : vector<8x16xf32>
    %c0_7 = arith.constant 0 : index
    %c0_8 = arith.constant 0 : index
    %15 = vector.load %arg5[%c0_7, %c0_8] : memref<1x16xf32, #tpu.memory_space<vmem>>, vector<1x16xf32>
    %16 = arith.mulf %14, %14 : vector<8x16xf32>
    %cst_9 = arith.constant dense<0.000000e+00> : vector<8xf32>
    %17 = vector.multi_reduction <add>, %16, %cst_9 [1] : vector<8x16xf32> to vector<8xf32>
    %18 = vector.shape_cast %17 : vector<8xf32> to vector<8x1xf32>
    %19 = math.sqrt %18 : vector<8x1xf32>
    %cst_10 = arith.constant 9.99999996E-13 : f32
    %20 = vector.broadcast %cst_10 : f32 to vector<8x1xf32>
    %21 = arith.maximumf %19, %20 : vector<8x1xf32>
    %22 = vector.broadcast %21 : vector<8x1xf32> to vector<8x16xf32>
    %23 = arith.divf %14, %22 : vector<8x16xf32>
    %24 = vector.broadcast %15 : vector<1x16xf32> to vector<8x16xf32>
    %25 = arith.mulf %23, %24 : vector<8x16xf32>
    %cst_11 = arith.constant 4.000000e+00 : f32
    %26 = vector.broadcast %cst_11 : f32 to vector<8x16xf32>
    %27 = arith.mulf %25, %26 : vector<8x16xf32>
    %28 = arith.negf %27 : vector<8x16xf32>
    %29 = math.exp %28 : vector<8x16xf32>
    %cst_12 = arith.constant 1.000000e+00 : f32
    %30 = vector.broadcast %cst_12 : f32 to vector<8x16xf32>
    %31 = arith.addf %30, %29 : vector<8x16xf32>
    %32 = arith.divf %30, %31 : vector<8x16xf32>
    %33 = arith.mulf %27, %32 : vector<8x16xf32>
    %34 = arith.truncf %33 : vector<8x16xf32> to vector<8x16xbf16>
    %c0_13 = arith.constant 0 : index
    %c0_14 = arith.constant 0 : index
    %c0_15 = arith.constant 0 : index
    %35 = vector.load %arg6[%c0_13, %c0_14, %c0_15] : memref<1x8x16xbf16, #tpu.memory_space<vmem>>, vector<1x8x16xbf16>
    %36 = vector.shape_cast %35 : vector<1x8x16xbf16> to vector<8x16xbf16>
    %37 = vector.shape_cast %34 : vector<8x16xbf16> to vector<1x8x16xbf16>
    tpu.vector_store %arg6[%c0_13, %c0_14, %c0_15], %37 {strides = array<i32>} : memref<1x8x16xbf16, #tpu.memory_space<vmem>>, vector<1x8x16xbf16>,
    return
  }
  func.func @transform_0(%arg0: i32, %arg1: i32) -> (i32, i32, i32) {
    %c0_i32 = arith.constant 0 : i32
    %c0_i32_0 = arith.constant 0 : i32
    %c0_i32_1 = arith.constant 0 : i32
    return %arg0, %c0_i32, %c0_i32_0 : i32, i32, i32
  }
  func.func @transform_1(%arg0: i32, %arg1: i32) -> (i32, i32) {
    %c0_i32 = arith.constant 0 : i32
    %c0_i32_0 = arith.constant 0 : i32
    %c0_i32_1 = arith.constant 0 : i32
    return %c0_i32, %c0_i32_0 : i32, i32
  }
  func.func @transform_2(%arg0: i32, %arg1: i32) -> (i32, i32) {
    %c0_i32 = arith.constant 0 : i32
    %c0_i32_0 = arith.constant 0 : i32
    %c0_i32_1 = arith.constant 0 : i32
    return %c0_i32, %c0_i32_0 : i32, i32
  }
  func.func @transform_3(%arg0: i32, %arg1: i32) -> (i32, i32) {
    %c0_i32 = arith.constant 0 : i32
    %c0_i32_0 = arith.constant 0 : i32
    %c0_i32_1 = arith.constant 0 : i32
    return %c0_i32, %c0_i32_0 : i32, i32
  }
  func.func @transform_4(%arg0: i32, %arg1: i32) -> (i32, i32, i32) {
    %c0_i32 = arith.constant 0 : i32
    %c0_i32_0 = arith.constant 0 : i32
    return %arg0, %arg1, %c0_i32 : i32, i32, i32
  }
}

module attributes {stable_mosaic.version = 11 : i64} {
  func.func @_conv_kernel(%arg0: i32, %arg1: i32, %arg2: memref<1x8x16xbf16, #tpu.memory_space<vmem>>, %arg3: memref<16x384xbf16, #tpu.memory_space<vmem>>, %arg4: memref<1x384xf32, #tpu.memory_space<vmem>>, %arg5: memref<1x16xf32, #tpu.memory_space<vmem>>, %arg6: memref<1x8x384xbf16, #tpu.memory_space<vmem>>) attributes {dimension_semantics = [#tpu.dimension_semantics<parallel>, #tpu.dimension_semantics<parallel>], iteration_bounds = array<i64: 2, 1>, scalar_prefetch = 0 : i64, scratch_operands = 0 : i64, tpu.core_type = #tpu.core_type<tc>, window_params = [{transform_indices = @transform_0, window_bounds = array<i64: 1, 8, 16>}, {pipeline_mode = #tpu.pipeline_mode<synchronous>, transform_indices = @transform_1, window_bounds = array<i64: 16, 384>}, {pipeline_mode = #tpu.pipeline_mode<synchronous>, transform_indices = @transform_2, window_bounds = array<i64: 1, 384>}, {pipeline_mode = #tpu.pipeline_mode<synchronous>, transform_indices = @transform_3, window_bounds = array<i64: 1, 16>}, {transform_indices = @transform_4, window_bounds = array<i64: 1, 8, 384>}]} {
    %c0 = arith.constant 0 : index
    %c0_0 = arith.constant 0 : index
    %c0_1 = arith.constant 0 : index
    %0 = vector.load %arg2[%c0, %c0_0, %c0_1] : memref<1x8x16xbf16, #tpu.memory_space<vmem>>, vector<1x8x16xbf16>
    %1 = vector.shape_cast %0 : vector<1x8x16xbf16> to vector<8x16xbf16>
    %2 = arith.extf %1 : vector<8x16xbf16> to vector<8x16xf32>
    %c0_2 = arith.constant 0 : index
    %c0_3 = arith.constant 0 : index
    %3 = vector.load %arg5[%c0_2, %c0_3] : memref<1x16xf32, #tpu.memory_space<vmem>>, vector<1x16xf32>
    %4 = arith.mulf %2, %2 : vector<8x16xf32>
    %cst = arith.constant dense<0.000000e+00> : vector<8xf32>
    %5 = vector.multi_reduction <add>, %4, %cst [1] : vector<8x16xf32> to vector<8xf32>
    %6 = vector.shape_cast %5 : vector<8xf32> to vector<8x1xf32>
    %7 = math.sqrt %6 : vector<8x1xf32>
    %cst_4 = arith.constant 9.99999996E-13 : f32
    %8 = vector.broadcast %cst_4 : f32 to vector<8x1xf32>
    %9 = arith.maximumf %7, %8 : vector<8x1xf32>
    %10 = vector.broadcast %9 : vector<8x1xf32> to vector<8x16xf32>
    %11 = arith.divf %2, %10 : vector<8x16xf32>
    %12 = vector.broadcast %3 : vector<1x16xf32> to vector<8x16xf32>
    %13 = arith.mulf %11, %12 : vector<8x16xf32>
    %cst_5 = arith.constant 4.000000e+00 : f32
    %14 = vector.broadcast %cst_5 : f32 to vector<8x16xf32>
    %15 = arith.mulf %13, %14 : vector<8x16xf32>
    %16 = arith.truncf %15 : vector<8x16xf32> to vector<8x16xbf16>
    %c0_6 = arith.constant 0 : index
    %c0_7 = arith.constant 0 : index
    %17 = vector.load %arg3[%c0_6, %c0_7] : memref<16x384xbf16, #tpu.memory_space<vmem>>, vector<16x384xbf16>
    %cst_8 = arith.constant dense<0.000000e+00> : vector<8x384xf32>
    %18 = tpu.matmul %16, %17, %cst_8 {dimension_numbers = #tpu.dot_dimension_numbers<[1], [0], [0], [1], [0, 0, 1, 1], [], []>} : vector<8x16xbf16>, vector<16x384xbf16>, vector<8x384xf32> -> vector<8x384xf32>
    %c0_9 = arith.constant 0 : index
    %c0_10 = arith.constant 0 : index
    %19 = vector.load %arg4[%c0_9, %c0_10] : memref<1x384xf32, #tpu.memory_space<vmem>>, vector<1x384xf32>
    %20 = vector.broadcast %19 : vector<1x384xf32> to vector<8x384xf32>
    %21 = arith.addf %18, %20 : vector<8x384xf32>
    %22 = arith.truncf %21 : vector<8x384xf32> to vector<8x384xbf16>
    %c0_11 = arith.constant 0 : index
    %c0_12 = arith.constant 0 : index
    %c0_13 = arith.constant 0 : index
    %23 = vector.load %arg6[%c0_11, %c0_12, %c0_13] : memref<1x8x384xbf16, #tpu.memory_space<vmem>>, vector<1x8x384xbf16>
    %24 = vector.shape_cast %23 : vector<1x8x384xbf16> to vector<8x384xbf16>
    %25 = vector.shape_cast %22 : vector<8x384xbf16> to vector<1x8x384xbf16>
    tpu.vector_store %arg6[%c0_11, %c0_12, %c0_13], %25 {strides = array<i32>} : memref<1x8x384xbf16, #tpu.memory_space<vmem>>, vector<1x8x384xbf16>,
    return
  }
  func.func @transform_0(%arg0: i32, %arg1: i32) -> (i32, i32, i32) {
    %c0_i32 = arith.constant 0 : i32
    %c0_i32_0 = arith.constant 0 : i32
    %c0_i32_1 = arith.constant 0 : i32
    return %arg0, %c0_i32, %c0_i32_0 : i32, i32, i32
  }
  func.func @transform_1(%arg0: i32, %arg1: i32) -> (i32, i32) {
    %c0_i32 = arith.constant 0 : i32
    %c0_i32_0 = arith.constant 0 : i32
    %c0_i32_1 = arith.constant 0 : i32
    return %c0_i32, %c0_i32_0 : i32, i32
  }
  func.func @transform_2(%arg0: i32, %arg1: i32) -> (i32, i32) {
    %c0_i32 = arith.constant 0 : i32
    %c0_i32_0 = arith.constant 0 : i32
    %c0_i32_1 = arith.constant 0 : i32
    return %c0_i32, %c0_i32_0 : i32, i32
  }
  func.func @transform_3(%arg0: i32, %arg1: i32) -> (i32, i32) {
    %c0_i32 = arith.constant 0 : i32
    %c0_i32_0 = arith.constant 0 : i32
    %c0_i32_1 = arith.constant 0 : i32
    return %c0_i32, %c0_i32_0 : i32, i32
  }
  func.func @transform_4(%arg0: i32, %arg1: i32) -> (i32, i32, i32) {
    %c0_i32 = arith.constant 0 : i32
    %c0_i32_0 = arith.constant 0 : i32
    return %arg0, %arg1, %c0_i32 : i32, i32, i32
  }
}

module attributes {stable_mosaic.version = 11 : i64} {
  func.func @_attention_kernel(%arg0: i32, %arg1: memref<1x8x384xbf16, #tpu.memory_space<vmem>>, %arg2: memref<1x8x128xbf16, #tpu.memory_space<vmem>>) attributes {dimension_semantics = [#tpu.dimension_semantics<parallel>], iteration_bounds = array<i64: 2>, scalar_prefetch = 0 : i64, scratch_operands = 0 : i64, tpu.core_type = #tpu.core_type<tc>, window_params = [{transform_indices = @transform_0, window_bounds = array<i64: 1, 8, 384>}, {transform_indices = @transform_1, window_bounds = array<i64: 1, 8, 128>}]} {
    %c0 = arith.constant 0 : index
    %c0_0 = arith.constant 0 : index
    %c0_1 = arith.constant 0 : index
    %0 = vector.load %arg1[%c0, %c0_0, %c0_1] : memref<1x8x384xbf16, #tpu.memory_space<vmem>>, vector<1x8x384xbf16>
    %1 = vector.shape_cast %0 : vector<1x8x384xbf16> to vector<8x384xbf16>
    %2 = arith.extf %1 : vector<8x384xbf16> to vector<8x384xf32>
    %3 = vector.extract_strided_slice %2 {offsets = [0, 0], sizes = [8, 32], strides = [1, 1]} : vector<8x384xf32> to vector<8x32xf32>
    %4 = vector.extract_strided_slice %2 {offsets = [0, 128], sizes = [8, 32], strides = [1, 1]} : vector<8x384xf32> to vector<8x32xf32>
    %5 = vector.extract_strided_slice %2 {offsets = [0, 256], sizes = [8, 32], strides = [1, 1]} : vector<8x384xf32> to vector<8x32xf32>
    %cst = arith.constant dense<0xFF800000> : vector<8xf32>
    %6 = vector.multi_reduction <maximumf>, %3, %cst [1] : vector<8x32xf32> to vector<8xf32>
    %7 = vector.shape_cast %6 : vector<8xf32> to vector<8x1xf32>
    %8 = vector.broadcast %7 : vector<8x1xf32> to vector<8x32xf32>
    %9 = arith.subf %3, %8 : vector<8x32xf32>
    %10 = math.exp %9 : vector<8x32xf32>
    %cst_2 = arith.constant dense<0.000000e+00> : vector<8xf32>
    %11 = vector.multi_reduction <add>, %10, %cst_2 [1] : vector<8x32xf32> to vector<8xf32>
    %12 = vector.shape_cast %11 : vector<8xf32> to vector<8x1xf32>
    %13 = tpu.reciprocal %12 {approx = true} : vector<8x1xf32> -> vector<8x1xf32>
    %14 = vector.broadcast %13 : vector<8x1xf32> to vector<8x32xf32>
    %15 = arith.mulf %10, %14 : vector<8x32xf32>
    %cst_3 = arith.constant 0.176776692 : f32
    %16 = vector.broadcast %cst_3 : f32 to vector<8x32xf32>
    %17 = arith.mulf %15, %16 : vector<8x32xf32>
    %cst_4 = arith.constant dense<0xFF800000> : vector<32xf32>
    %18 = vector.multi_reduction <maximumf>, %4, %cst_4 [0] : vector<8x32xf32> to vector<32xf32>
    %19 = vector.shape_cast %18 : vector<32xf32> to vector<1x32xf32>
    %20 = vector.broadcast %19 : vector<1x32xf32> to vector<8x32xf32>
    %21 = arith.subf %4, %20 : vector<8x32xf32>
    %22 = math.exp %21 : vector<8x32xf32>
    %cst_5 = arith.constant dense<0.000000e+00> : vector<32xf32>
    %23 = vector.multi_reduction <add>, %22, %cst_5 [0] : vector<8x32xf32> to vector<32xf32>
    %24 = vector.shape_cast %23 : vector<32xf32> to vector<1x32xf32>
    %25 = tpu.reciprocal %24 {approx = true} : vector<1x32xf32> -> vector<1x32xf32>
    %26 = vector.broadcast %25 : vector<1x32xf32> to vector<8x32xf32>
    %27 = arith.mulf %22, %26 : vector<8x32xf32>
    %28 = arith.truncf %27 : vector<8x32xf32> to vector<8x32xbf16>
    %29 = arith.truncf %5 : vector<8x32xf32> to vector<8x32xbf16>
    %cst_6 = arith.constant dense<0.000000e+00> : vector<32x32xf32>
    %30 = tpu.matmul %28, %29, %cst_6 {dimension_numbers = #tpu.dot_dimension_numbers<[0], [0], [1], [1], [0, 1, 1, 1], [], []>} : vector<8x32xbf16>, vector<8x32xbf16>, vector<32x32xf32> -> vector<32x32xf32>
    %31 = arith.truncf %17 : vector<8x32xf32> to vector<8x32xbf16>
    %32 = arith.truncf %30 : vector<32x32xf32> to vector<32x32xbf16>
    %cst_7 = arith.constant dense<0.000000e+00> : vector<8x32xf32>
    %33 = tpu.matmul %31, %32, %cst_7 {dimension_numbers = #tpu.dot_dimension_numbers<[1], [0], [0], [1], [0, 0, 1, 1], [], []>} : vector<8x32xbf16>, vector<32x32xbf16>, vector<8x32xf32> -> vector<8x32xf32>
    %34 = vector.extract_strided_slice %2 {offsets = [0, 32], sizes = [8, 32], strides = [1, 1]} : vector<8x384xf32> to vector<8x32xf32>
    %35 = vector.extract_strided_slice %2 {offsets = [0, 160], sizes = [8, 32], strides = [1, 1]} : vector<8x384xf32> to vector<8x32xf32>
    %36 = vector.extract_strided_slice %2 {offsets = [0, 288], sizes = [8, 32], strides = [1, 1]} : vector<8x384xf32> to vector<8x32xf32>
    %cst_8 = arith.constant dense<0xFF800000> : vector<8xf32>
    %37 = vector.multi_reduction <maximumf>, %34, %cst_8 [1] : vector<8x32xf32> to vector<8xf32>
    %38 = vector.shape_cast %37 : vector<8xf32> to vector<8x1xf32>
    %39 = vector.broadcast %38 : vector<8x1xf32> to vector<8x32xf32>
    %40 = arith.subf %34, %39 : vector<8x32xf32>
    %41 = math.exp %40 : vector<8x32xf32>
    %cst_9 = arith.constant dense<0.000000e+00> : vector<8xf32>
    %42 = vector.multi_reduction <add>, %41, %cst_9 [1] : vector<8x32xf32> to vector<8xf32>
    %43 = vector.shape_cast %42 : vector<8xf32> to vector<8x1xf32>
    %44 = tpu.reciprocal %43 {approx = true} : vector<8x1xf32> -> vector<8x1xf32>
    %45 = vector.broadcast %44 : vector<8x1xf32> to vector<8x32xf32>
    %46 = arith.mulf %41, %45 : vector<8x32xf32>
    %cst_10 = arith.constant 0.176776692 : f32
    %47 = vector.broadcast %cst_10 : f32 to vector<8x32xf32>
    %48 = arith.mulf %46, %47 : vector<8x32xf32>
    %cst_11 = arith.constant dense<0xFF800000> : vector<32xf32>
    %49 = vector.multi_reduction <maximumf>, %35, %cst_11 [0] : vector<8x32xf32> to vector<32xf32>
    %50 = vector.shape_cast %49 : vector<32xf32> to vector<1x32xf32>
    %51 = vector.broadcast %50 : vector<1x32xf32> to vector<8x32xf32>
    %52 = arith.subf %35, %51 : vector<8x32xf32>
    %53 = math.exp %52 : vector<8x32xf32>
    %cst_12 = arith.constant dense<0.000000e+00> : vector<32xf32>
    %54 = vector.multi_reduction <add>, %53, %cst_12 [0] : vector<8x32xf32> to vector<32xf32>
    %55 = vector.shape_cast %54 : vector<32xf32> to vector<1x32xf32>
    %56 = tpu.reciprocal %55 {approx = true} : vector<1x32xf32> -> vector<1x32xf32>
    %57 = vector.broadcast %56 : vector<1x32xf32> to vector<8x32xf32>
    %58 = arith.mulf %53, %57 : vector<8x32xf32>
    %59 = arith.truncf %58 : vector<8x32xf32> to vector<8x32xbf16>
    %60 = arith.truncf %36 : vector<8x32xf32> to vector<8x32xbf16>
    %cst_13 = arith.constant dense<0.000000e+00> : vector<32x32xf32>
    %61 = tpu.matmul %59, %60, %cst_13 {dimension_numbers = #tpu.dot_dimension_numbers<[0], [0], [1], [1], [0, 1, 1, 1], [], []>} : vector<8x32xbf16>, vector<8x32xbf16>, vector<32x32xf32> -> vector<32x32xf32>
    %62 = arith.truncf %48 : vector<8x32xf32> to vector<8x32xbf16>
    %63 = arith.truncf %61 : vector<32x32xf32> to vector<32x32xbf16>
    %cst_14 = arith.constant dense<0.000000e+00> : vector<8x32xf32>
    %64 = tpu.matmul %62, %63, %cst_14 {dimension_numbers = #tpu.dot_dimension_numbers<[1], [0], [0], [1], [0, 0, 1, 1], [], []>} : vector<8x32xbf16>, vector<32x32xbf16>, vector<8x32xf32> -> vector<8x32xf32>
    %65 = vector.extract_strided_slice %2 {offsets = [0, 64], sizes = [8, 32], strides = [1, 1]} : vector<8x384xf32> to vector<8x32xf32>
    %66 = vector.extract_strided_slice %2 {offsets = [0, 192], sizes = [8, 32], strides = [1, 1]} : vector<8x384xf32> to vector<8x32xf32>
    %67 = vector.extract_strided_slice %2 {offsets = [0, 320], sizes = [8, 32], strides = [1, 1]} : vector<8x384xf32> to vector<8x32xf32>
    %cst_15 = arith.constant dense<0xFF800000> : vector<8xf32>
    %68 = vector.multi_reduction <maximumf>, %65, %cst_15 [1] : vector<8x32xf32> to vector<8xf32>
    %69 = vector.shape_cast %68 : vector<8xf32> to vector<8x1xf32>
    %70 = vector.broadcast %69 : vector<8x1xf32> to vector<8x32xf32>
    %71 = arith.subf %65, %70 : vector<8x32xf32>
    %72 = math.exp %71 : vector<8x32xf32>
    %cst_16 = arith.constant dense<0.000000e+00> : vector<8xf32>
    %73 = vector.multi_reduction <add>, %72, %cst_16 [1] : vector<8x32xf32> to vector<8xf32>
    %74 = vector.shape_cast %73 : vector<8xf32> to vector<8x1xf32>
    %75 = tpu.reciprocal %74 {approx = true} : vector<8x1xf32> -> vector<8x1xf32>
    %76 = vector.broadcast %75 : vector<8x1xf32> to vector<8x32xf32>
    %77 = arith.mulf %72, %76 : vector<8x32xf32>
    %cst_17 = arith.constant 0.176776692 : f32
    %78 = vector.broadcast %cst_17 : f32 to vector<8x32xf32>
    %79 = arith.mulf %77, %78 : vector<8x32xf32>
    %cst_18 = arith.constant dense<0xFF800000> : vector<32xf32>
    %80 = vector.multi_reduction <maximumf>, %66, %cst_18 [0] : vector<8x32xf32> to vector<32xf32>
    %81 = vector.shape_cast %80 : vector<32xf32> to vector<1x32xf32>
    %82 = vector.broadcast %81 : vector<1x32xf32> to vector<8x32xf32>
    %83 = arith.subf %66, %82 : vector<8x32xf32>
    %84 = math.exp %83 : vector<8x32xf32>
    %cst_19 = arith.constant dense<0.000000e+00> : vector<32xf32>
    %85 = vector.multi_reduction <add>, %84, %cst_19 [0] : vector<8x32xf32> to vector<32xf32>
    %86 = vector.shape_cast %85 : vector<32xf32> to vector<1x32xf32>
    %87 = tpu.reciprocal %86 {approx = true} : vector<1x32xf32> -> vector<1x32xf32>
    %88 = vector.broadcast %87 : vector<1x32xf32> to vector<8x32xf32>
    %89 = arith.mulf %84, %88 : vector<8x32xf32>
    %90 = arith.truncf %89 : vector<8x32xf32> to vector<8x32xbf16>
    %91 = arith.truncf %67 : vector<8x32xf32> to vector<8x32xbf16>
    %cst_20 = arith.constant dense<0.000000e+00> : vector<32x32xf32>
    %92 = tpu.matmul %90, %91, %cst_20 {dimension_numbers = #tpu.dot_dimension_numbers<[0], [0], [1], [1], [0, 1, 1, 1], [], []>} : vector<8x32xbf16>, vector<8x32xbf16>, vector<32x32xf32> -> vector<32x32xf32>
    %93 = arith.truncf %79 : vector<8x32xf32> to vector<8x32xbf16>
    %94 = arith.truncf %92 : vector<32x32xf32> to vector<32x32xbf16>
    %cst_21 = arith.constant dense<0.000000e+00> : vector<8x32xf32>
    %95 = tpu.matmul %93, %94, %cst_21 {dimension_numbers = #tpu.dot_dimension_numbers<[1], [0], [0], [1], [0, 0, 1, 1], [], []>} : vector<8x32xbf16>, vector<32x32xbf16>, vector<8x32xf32> -> vector<8x32xf32>
    %96 = vector.extract_strided_slice %2 {offsets = [0, 96], sizes = [8, 32], strides = [1, 1]} : vector<8x384xf32> to vector<8x32xf32>
    %97 = vector.extract_strided_slice %2 {offsets = [0, 224], sizes = [8, 32], strides = [1, 1]} : vector<8x384xf32> to vector<8x32xf32>
    %98 = vector.extract_strided_slice %2 {offsets = [0, 352], sizes = [8, 32], strides = [1, 1]} : vector<8x384xf32> to vector<8x32xf32>
    %cst_22 = arith.constant dense<0xFF800000> : vector<8xf32>
    %99 = vector.multi_reduction <maximumf>, %96, %cst_22 [1] : vector<8x32xf32> to vector<8xf32>
    %100 = vector.shape_cast %99 : vector<8xf32> to vector<8x1xf32>
    %101 = vector.broadcast %100 : vector<8x1xf32> to vector<8x32xf32>
    %102 = arith.subf %96, %101 : vector<8x32xf32>
    %103 = math.exp %102 : vector<8x32xf32>
    %cst_23 = arith.constant dense<0.000000e+00> : vector<8xf32>
    %104 = vector.multi_reduction <add>, %103, %cst_23 [1] : vector<8x32xf32> to vector<8xf32>
    %105 = vector.shape_cast %104 : vector<8xf32> to vector<8x1xf32>
    %106 = tpu.reciprocal %105 {approx = true} : vector<8x1xf32> -> vector<8x1xf32>
    %107 = vector.broadcast %106 : vector<8x1xf32> to vector<8x32xf32>
    %108 = arith.mulf %103, %107 : vector<8x32xf32>
    %cst_24 = arith.constant 0.176776692 : f32
    %109 = vector.broadcast %cst_24 : f32 to vector<8x32xf32>
    %110 = arith.mulf %108, %109 : vector<8x32xf32>
    %cst_25 = arith.constant dense<0xFF800000> : vector<32xf32>
    %111 = vector.multi_reduction <maximumf>, %97, %cst_25 [0] : vector<8x32xf32> to vector<32xf32>
    %112 = vector.shape_cast %111 : vector<32xf32> to vector<1x32xf32>
    %113 = vector.broadcast %112 : vector<1x32xf32> to vector<8x32xf32>
    %114 = arith.subf %97, %113 : vector<8x32xf32>
    %115 = math.exp %114 : vector<8x32xf32>
    %cst_26 = arith.constant dense<0.000000e+00> : vector<32xf32>
    %116 = vector.multi_reduction <add>, %115, %cst_26 [0] : vector<8x32xf32> to vector<32xf32>
    %117 = vector.shape_cast %116 : vector<32xf32> to vector<1x32xf32>
    %118 = tpu.reciprocal %117 {approx = true} : vector<1x32xf32> -> vector<1x32xf32>
    %119 = vector.broadcast %118 : vector<1x32xf32> to vector<8x32xf32>
    %120 = arith.mulf %115, %119 : vector<8x32xf32>
    %121 = arith.truncf %120 : vector<8x32xf32> to vector<8x32xbf16>
    %122 = arith.truncf %98 : vector<8x32xf32> to vector<8x32xbf16>
    %cst_27 = arith.constant dense<0.000000e+00> : vector<32x32xf32>
    %123 = tpu.matmul %121, %122, %cst_27 {dimension_numbers = #tpu.dot_dimension_numbers<[0], [0], [1], [1], [0, 1, 1, 1], [], []>} : vector<8x32xbf16>, vector<8x32xbf16>, vector<32x32xf32> -> vector<32x32xf32>
    %124 = arith.truncf %110 : vector<8x32xf32> to vector<8x32xbf16>
    %125 = arith.truncf %123 : vector<32x32xf32> to vector<32x32xbf16>
    %cst_28 = arith.constant dense<0.000000e+00> : vector<8x32xf32>
    %126 = tpu.matmul %124, %125, %cst_28 {dimension_numbers = #tpu.dot_dimension_numbers<[1], [0], [0], [1], [0, 0, 1, 1], [], []>} : vector<8x32xbf16>, vector<32x32xbf16>, vector<8x32xf32> -> vector<8x32xf32>
    %127 = tpu.concatenate %33, %64, %95, %126 in 1 : vector<8x32xf32>, vector<8x32xf32>, vector<8x32xf32>, vector<8x32xf32> -> vector<8x128xf32>
    %128 = arith.truncf %127 : vector<8x128xf32> to vector<8x128xbf16>
    %c0_29 = arith.constant 0 : index
    %c0_30 = arith.constant 0 : index
    %c0_31 = arith.constant 0 : index
    %129 = vector.load %arg2[%c0_29, %c0_30, %c0_31] : memref<1x8x128xbf16, #tpu.memory_space<vmem>>, vector<1x8x128xbf16>
    %130 = vector.shape_cast %129 : vector<1x8x128xbf16> to vector<8x128xbf16>
    %131 = vector.shape_cast %128 : vector<8x128xbf16> to vector<1x8x128xbf16>
    tpu.vector_store %arg2[%c0_29, %c0_30, %c0_31], %131 {strides = array<i32>} : memref<1x8x128xbf16, #tpu.memory_space<vmem>>, vector<1x8x128xbf16>,
    return
  }
  func.func @transform_0(%arg0: i32) -> (i32, i32, i32) {
    %c0_i32 = arith.constant 0 : i32
    %c0_i32_0 = arith.constant 0 : i32
    %c0_i32_1 = arith.constant 0 : i32
    return %arg0, %c0_i32, %c0_i32_0 : i32, i32, i32
  }
  func.func @transform_1(%arg0: i32) -> (i32, i32, i32) {
    %c0_i32 = arith.constant 0 : i32
    %c0_i32_0 = arith.constant 0 : i32
    %c0_i32_1 = arith.constant 0 : i32
    return %arg0, %c0_i32, %c0_i32_0 : i32, i32, i32
  }
}

module attributes {stable_mosaic.version = 11 : i64} {
  func.func @_conv_kernel(%arg0: i32, %arg1: i32, %arg2: memref<1x8x128xbf16, #tpu.memory_space<vmem>>, %arg3: memref<128x16xbf16, #tpu.memory_space<vmem>>, %arg4: memref<1x16xf32, #tpu.memory_space<vmem>>, %arg5: memref<1x16xf32, #tpu.memory_space<vmem>>, %arg6: memref<1x8x16xbf16, #tpu.memory_space<vmem>>) attributes {dimension_semantics = [#tpu.dimension_semantics<parallel>, #tpu.dimension_semantics<parallel>], iteration_bounds = array<i64: 2, 1>, scalar_prefetch = 0 : i64, scratch_operands = 0 : i64, tpu.core_type = #tpu.core_type<tc>, window_params = [{transform_indices = @transform_0, window_bounds = array<i64: 1, 8, 128>}, {pipeline_mode = #tpu.pipeline_mode<synchronous>, transform_indices = @transform_1, window_bounds = array<i64: 128, 16>}, {pipeline_mode = #tpu.pipeline_mode<synchronous>, transform_indices = @transform_2, window_bounds = array<i64: 1, 16>}, {pipeline_mode = #tpu.pipeline_mode<synchronous>, transform_indices = @transform_3, window_bounds = array<i64: 1, 16>}, {transform_indices = @transform_4, window_bounds = array<i64: 1, 8, 16>}]} {
    %c0 = arith.constant 0 : index
    %c0_0 = arith.constant 0 : index
    %c0_1 = arith.constant 0 : index
    %0 = vector.load %arg2[%c0, %c0_0, %c0_1] : memref<1x8x128xbf16, #tpu.memory_space<vmem>>, vector<1x8x128xbf16>
    %1 = vector.shape_cast %0 : vector<1x8x128xbf16> to vector<8x128xbf16>
    %2 = arith.extf %1 : vector<8x128xbf16> to vector<8x128xf32>
    %3 = arith.truncf %2 : vector<8x128xf32> to vector<8x128xbf16>
    %c0_2 = arith.constant 0 : index
    %c0_3 = arith.constant 0 : index
    %4 = vector.load %arg3[%c0_2, %c0_3] : memref<128x16xbf16, #tpu.memory_space<vmem>>, vector<128x16xbf16>
    %cst = arith.constant dense<0.000000e+00> : vector<8x16xf32>
    %5 = tpu.matmul %3, %4, %cst {dimension_numbers = #tpu.dot_dimension_numbers<[1], [0], [0], [1], [0, 0, 1, 1], [], []>} : vector<8x128xbf16>, vector<128x16xbf16>, vector<8x16xf32> -> vector<8x16xf32>
    %c0_4 = arith.constant 0 : index
    %c0_5 = arith.constant 0 : index
    %6 = vector.load %arg4[%c0_4, %c0_5] : memref<1x16xf32, #tpu.memory_space<vmem>>, vector<1x16xf32>
    %7 = vector.broadcast %6 : vector<1x16xf32> to vector<8x16xf32>
    %8 = arith.addf %5, %7 : vector<8x16xf32>
    %c0_6 = arith.constant 0 : index
    %c0_7 = arith.constant 0 : index
    %9 = vector.load %arg5[%c0_6, %c0_7] : memref<1x16xf32, #tpu.memory_space<vmem>>, vector<1x16xf32>
    %10 = arith.mulf %8, %8 : vector<8x16xf32>
    %cst_8 = arith.constant dense<0.000000e+00> : vector<8xf32>
    %11 = vector.multi_reduction <add>, %10, %cst_8 [1] : vector<8x16xf32> to vector<8xf32>
    %12 = vector.shape_cast %11 : vector<8xf32> to vector<8x1xf32>
    %13 = math.sqrt %12 : vector<8x1xf32>
    %cst_9 = arith.constant 9.99999996E-13 : f32
    %14 = vector.broadcast %cst_9 : f32 to vector<8x1xf32>
    %15 = arith.maximumf %13, %14 : vector<8x1xf32>
    %16 = vector.broadcast %15 : vector<8x1xf32> to vector<8x16xf32>
    %17 = arith.divf %8, %16 : vector<8x16xf32>
    %18 = vector.broadcast %9 : vector<1x16xf32> to vector<8x16xf32>
    %19 = arith.mulf %17, %18 : vector<8x16xf32>
    %cst_10 = arith.constant 4.000000e+00 : f32
    %20 = vector.broadcast %cst_10 : f32 to vector<8x16xf32>
    %21 = arith.mulf %19, %20 : vector<8x16xf32>
    %22 = arith.truncf %21 : vector<8x16xf32> to vector<8x16xbf16>
    %c0_11 = arith.constant 0 : index
    %c0_12 = arith.constant 0 : index
    %c0_13 = arith.constant 0 : index
    %23 = vector.load %arg6[%c0_11, %c0_12, %c0_13] : memref<1x8x16xbf16, #tpu.memory_space<vmem>>, vector<1x8x16xbf16>
    %24 = vector.shape_cast %23 : vector<1x8x16xbf16> to vector<8x16xbf16>
    %25 = vector.shape_cast %22 : vector<8x16xbf16> to vector<1x8x16xbf16>
    tpu.vector_store %arg6[%c0_11, %c0_12, %c0_13], %25 {strides = array<i32>} : memref<1x8x16xbf16, #tpu.memory_space<vmem>>, vector<1x8x16xbf16>,
    return
  }
  func.func @transform_0(%arg0: i32, %arg1: i32) -> (i32, i32, i32) {
    %c0_i32 = arith.constant 0 : i32
    %c0_i32_0 = arith.constant 0 : i32
    %c0_i32_1 = arith.constant 0 : i32
    return %arg0, %c0_i32, %c0_i32_0 : i32, i32, i32
  }
  func.func @transform_1(%arg0: i32, %arg1: i32) -> (i32, i32) {
    %c0_i32 = arith.constant 0 : i32
    %c0_i32_0 = arith.constant 0 : i32
    %c0_i32_1 = arith.constant 0 : i32
    return %c0_i32, %c0_i32_0 : i32, i32
  }
  func.func @transform_2(%arg0: i32, %arg1: i32) -> (i32, i32) {
    %c0_i32 = arith.constant 0 : i32
    %c0_i32_0 = arith.constant 0 : i32
    %c0_i32_1 = arith.constant 0 : i32
    return %c0_i32, %c0_i32_0 : i32, i32
  }
  func.func @transform_3(%arg0: i32, %arg1: i32) -> (i32, i32) {
    %c0_i32 = arith.constant 0 : i32
    %c0_i32_0 = arith.constant 0 : i32
    %c0_i32_1 = arith.constant 0 : i32
    return %c0_i32, %c0_i32_0 : i32, i32
  }
  func.func @transform_4(%arg0: i32, %arg1: i32) -> (i32, i32, i32) {
    %c0_i32 = arith.constant 0 : i32
    %c0_i32_0 = arith.constant 0 : i32
    return %arg0, %arg1, %c0_i32 : i32, i32, i32
  }
}

module attributes {stable_mosaic.version = 11 : i64} {
  func.func @_conv_kernel(%arg0: i32, %arg1: i32, %arg2: memref<1x8x16xbf16, #tpu.memory_space<vmem>>, %arg3: memref<48x32xbf16, #tpu.memory_space<vmem>>, %arg4: memref<1x32xf32, #tpu.memory_space<vmem>>, %arg5: memref<1x8x32xbf16, #tpu.memory_space<vmem>>) attributes {dimension_semantics = [#tpu.dimension_semantics<parallel>, #tpu.dimension_semantics<parallel>], iteration_bounds = array<i64: 2, 1>, scalar_prefetch = 0 : i64, scratch_operands = 0 : i64, tpu.core_type = #tpu.core_type<tc>, window_params = [{transform_indices = @transform_0, window_bounds = array<i64: 1, 8, 16>}, {pipeline_mode = #tpu.pipeline_mode<synchronous>, transform_indices = @transform_1, window_bounds = array<i64: 48, 32>}, {pipeline_mode = #tpu.pipeline_mode<synchronous>, transform_indices = @transform_2, window_bounds = array<i64: 1, 32>}, {transform_indices = @transform_3, window_bounds = array<i64: 1, 8, 32>}]} {
    %c0 = arith.constant 0 : index
    %c0_0 = arith.constant 0 : index
    %c0_1 = arith.constant 0 : index
    %0 = vector.load %arg2[%c0, %c0_0, %c0_1] : memref<1x8x16xbf16, #tpu.memory_space<vmem>>, vector<1x8x16xbf16>
    %1 = vector.shape_cast %0 : vector<1x8x16xbf16> to vector<8x16xbf16>
    %2 = arith.extf %1 : vector<8x16xbf16> to vector<8x16xf32>
    %cst = arith.constant 0.000000e+00 : f32
    %3 = vector.broadcast %cst : f32 to vector<1x16xf32>
    %4 = tpu.concatenate %3, %2, %3 in 0 : vector<1x16xf32>, vector<8x16xf32>, vector<1x16xf32> -> vector<10x16xf32>
    %5 = arith.truncf %4 : vector<10x16xf32> to vector<10x16xbf16>
    %6 = vector.extract_strided_slice %5 {offsets = [0, 0], sizes = [8, 16], strides = [1, 1]} : vector<10x16xbf16> to vector<8x16xbf16>
    %7 = vector.extract_strided_slice %5 {offsets = [1, 0], sizes = [8, 16], strides = [1, 1]} : vector<10x16xbf16> to vector<8x16xbf16>
    %8 = vector.extract_strided_slice %5 {offsets = [2, 0], sizes = [8, 16], strides = [1, 1]} : vector<10x16xbf16> to vector<8x16xbf16>
    %9 = tpu.concatenate %6, %7, %8 in 1 : vector<8x16xbf16>, vector<8x16xbf16>, vector<8x16xbf16> -> vector<8x48xbf16>
    %c0_2 = arith.constant 0 : index
    %c0_3 = arith.constant 0 : index
    %10 = vector.load %arg3[%c0_2, %c0_3] : memref<48x32xbf16, #tpu.memory_space<vmem>>, vector<48x32xbf16>
    %cst_4 = arith.constant dense<0.000000e+00> : vector<8x32xf32>
    %11 = tpu.matmul %9, %10, %cst_4 {dimension_numbers = #tpu.dot_dimension_numbers<[1], [0], [0], [1], [0, 0, 1, 1], [], []>} : vector<8x48xbf16>, vector<48x32xbf16>, vector<8x32xf32> -> vector<8x32xf32>
    %c0_5 = arith.constant 0 : index
    %c0_6 = arith.constant 0 : index
    %12 = vector.load %arg4[%c0_5, %c0_6] : memref<1x32xf32, #tpu.memory_space<vmem>>, vector<1x32xf32>
    %13 = vector.broadcast %12 : vector<1x32xf32> to vector<8x32xf32>
    %14 = arith.addf %11, %13 : vector<8x32xf32>
    %15 = arith.truncf %14 : vector<8x32xf32> to vector<8x32xbf16>
    %c0_7 = arith.constant 0 : index
    %c0_8 = arith.constant 0 : index
    %c0_9 = arith.constant 0 : index
    %16 = vector.load %arg5[%c0_7, %c0_8, %c0_9] : memref<1x8x32xbf16, #tpu.memory_space<vmem>>, vector<1x8x32xbf16>
    %17 = vector.shape_cast %16 : vector<1x8x32xbf16> to vector<8x32xbf16>
    %18 = vector.shape_cast %15 : vector<8x32xbf16> to vector<1x8x32xbf16>
    tpu.vector_store %arg5[%c0_7, %c0_8, %c0_9], %18 {strides = array<i32>} : memref<1x8x32xbf16, #tpu.memory_space<vmem>>, vector<1x8x32xbf16>,
    return
  }
  func.func @transform_0(%arg0: i32, %arg1: i32) -> (i32, i32, i32) {
    %c0_i32 = arith.constant 0 : i32
    %c0_i32_0 = arith.constant 0 : i32
    %c0_i32_1 = arith.constant 0 : i32
    return %arg0, %c0_i32, %c0_i32_0 : i32, i32, i32
  }
  func.func @transform_1(%arg0: i32, %arg1: i32) -> (i32, i32) {
    %c0_i32 = arith.constant 0 : i32
    %c0_i32_0 = arith.constant 0 : i32
    %c0_i32_1 = arith.constant 0 : i32
    return %c0_i32, %c0_i32_0 : i32, i32
  }
  func.func @transform_2(%arg0: i32, %arg1: i32) -> (i32, i32) {
    %c0_i32 = arith.constant 0 : i32
    %c0_i32_0 = arith.constant 0 : i32
    %c0_i32_1 = arith.constant 0 : i32
    return %c0_i32, %c0_i32_0 : i32, i32
  }
  func.func @transform_3(%arg0: i32, %arg1: i32) -> (i32, i32, i32) {
    %c0_i32 = arith.constant 0 : i32
    %c0_i32_0 = arith.constant 0 : i32
    return %arg0, %arg1, %c0_i32 : i32, i32, i32
  }
}

module attributes {stable_mosaic.version = 11 : i64} {
  func.func @_conv_kernel(%arg0: i32, %arg1: i32, %arg2: memref<1x8x32xbf16, #tpu.memory_space<vmem>>, %arg3: memref<96x32xbf16, #tpu.memory_space<vmem>>, %arg4: memref<1x32xf32, #tpu.memory_space<vmem>>, %arg5: memref<1x32xf32, #tpu.memory_space<vmem>>, %arg6: memref<1x8x32xbf16, #tpu.memory_space<vmem>>) attributes {dimension_semantics = [#tpu.dimension_semantics<parallel>, #tpu.dimension_semantics<parallel>], iteration_bounds = array<i64: 2, 1>, scalar_prefetch = 0 : i64, scratch_operands = 0 : i64, tpu.core_type = #tpu.core_type<tc>, window_params = [{transform_indices = @transform_0, window_bounds = array<i64: 1, 8, 32>}, {pipeline_mode = #tpu.pipeline_mode<synchronous>, transform_indices = @transform_1, window_bounds = array<i64: 96, 32>}, {pipeline_mode = #tpu.pipeline_mode<synchronous>, transform_indices = @transform_2, window_bounds = array<i64: 1, 32>}, {pipeline_mode = #tpu.pipeline_mode<synchronous>, transform_indices = @transform_3, window_bounds = array<i64: 1, 32>}, {transform_indices = @transform_4, window_bounds = array<i64: 1, 8, 32>}]} {
    %c0 = arith.constant 0 : index
    %c0_0 = arith.constant 0 : index
    %c0_1 = arith.constant 0 : index
    %0 = vector.load %arg2[%c0, %c0_0, %c0_1] : memref<1x8x32xbf16, #tpu.memory_space<vmem>>, vector<1x8x32xbf16>
    %1 = vector.shape_cast %0 : vector<1x8x32xbf16> to vector<8x32xbf16>
    %2 = arith.extf %1 : vector<8x32xbf16> to vector<8x32xf32>
    %cst = arith.constant 0.000000e+00 : f32
    %3 = vector.broadcast %cst : f32 to vector<1x32xf32>
    %4 = tpu.concatenate %3, %2, %3 in 0 : vector<1x32xf32>, vector<8x32xf32>, vector<1x32xf32> -> vector<10x32xf32>
    %5 = arith.truncf %4 : vector<10x32xf32> to vector<10x32xbf16>
    %6 = vector.extract_strided_slice %5 {offsets = [0, 0], sizes = [8, 32], strides = [1, 1]} : vector<10x32xbf16> to vector<8x32xbf16>
    %7 = vector.extract_strided_slice %5 {offsets = [1, 0], sizes = [8, 32], strides = [1, 1]} : vector<10x32xbf16> to vector<8x32xbf16>
    %8 = vector.extract_strided_slice %5 {offsets = [2, 0], sizes = [8, 32], strides = [1, 1]} : vector<10x32xbf16> to vector<8x32xbf16>
    %9 = tpu.concatenate %6, %7, %8 in 1 : vector<8x32xbf16>, vector<8x32xbf16>, vector<8x32xbf16> -> vector<8x96xbf16>
    %c0_2 = arith.constant 0 : index
    %c0_3 = arith.constant 0 : index
    %10 = vector.load %arg3[%c0_2, %c0_3] : memref<96x32xbf16, #tpu.memory_space<vmem>>, vector<96x32xbf16>
    %cst_4 = arith.constant dense<0.000000e+00> : vector<8x32xf32>
    %11 = tpu.matmul %9, %10, %cst_4 {dimension_numbers = #tpu.dot_dimension_numbers<[1], [0], [0], [1], [0, 0, 1, 1], [], []>} : vector<8x96xbf16>, vector<96x32xbf16>, vector<8x32xf32> -> vector<8x32xf32>
    %c0_5 = arith.constant 0 : index
    %c0_6 = arith.constant 0 : index
    %12 = vector.load %arg4[%c0_5, %c0_6] : memref<1x32xf32, #tpu.memory_space<vmem>>, vector<1x32xf32>
    %13 = vector.broadcast %12 : vector<1x32xf32> to vector<8x32xf32>
    %14 = arith.addf %11, %13 : vector<8x32xf32>
    %c0_7 = arith.constant 0 : index
    %c0_8 = arith.constant 0 : index
    %15 = vector.load %arg5[%c0_7, %c0_8] : memref<1x32xf32, #tpu.memory_space<vmem>>, vector<1x32xf32>
    %16 = arith.mulf %14, %14 : vector<8x32xf32>
    %cst_9 = arith.constant dense<0.000000e+00> : vector<8xf32>
    %17 = vector.multi_reduction <add>, %16, %cst_9 [1] : vector<8x32xf32> to vector<8xf32>
    %18 = vector.shape_cast %17 : vector<8xf32> to vector<8x1xf32>
    %19 = math.sqrt %18 : vector<8x1xf32>
    %cst_10 = arith.constant 9.99999996E-13 : f32
    %20 = vector.broadcast %cst_10 : f32 to vector<8x1xf32>
    %21 = arith.maximumf %19, %20 : vector<8x1xf32>
    %22 = vector.broadcast %21 : vector<8x1xf32> to vector<8x32xf32>
    %23 = arith.divf %14, %22 : vector<8x32xf32>
    %24 = vector.broadcast %15 : vector<1x32xf32> to vector<8x32xf32>
    %25 = arith.mulf %23, %24 : vector<8x32xf32>
    %cst_11 = arith.constant 5.65685415 : f32
    %26 = vector.broadcast %cst_11 : f32 to vector<8x32xf32>
    %27 = arith.mulf %25, %26 : vector<8x32xf32>
    %28 = arith.negf %27 : vector<8x32xf32>
    %29 = math.exp %28 : vector<8x32xf32>
    %cst_12 = arith.constant 1.000000e+00 : f32
    %30 = vector.broadcast %cst_12 : f32 to vector<8x32xf32>
    %31 = arith.addf %30, %29 : vector<8x32xf32>
    %32 = arith.divf %30, %31 : vector<8x32xf32>
    %33 = arith.mulf %27, %32 : vector<8x32xf32>
    %34 = arith.truncf %33 : vector<8x32xf32> to vector<8x32xbf16>
    %c0_13 = arith.constant 0 : index
    %c0_14 = arith.constant 0 : index
    %c0_15 = arith.constant 0 : index
    %35 = vector.load %arg6[%c0_13, %c0_14, %c0_15] : memref<1x8x32xbf16, #tpu.memory_space<vmem>>, vector<1x8x32xbf16>
    %36 = vector.shape_cast %35 : vector<1x8x32xbf16> to vector<8x32xbf16>
    %37 = vector.shape_cast %34 : vector<8x32xbf16> to vector<1x8x32xbf16>
    tpu.vector_store %arg6[%c0_13, %c0_14, %c0_15], %37 {strides = array<i32>} : memref<1x8x32xbf16, #tpu.memory_space<vmem>>, vector<1x8x32xbf16>,
    return
  }
  func.func @transform_0(%arg0: i32, %arg1: i32) -> (i32, i32, i32) {
    %c0_i32 = arith.constant 0 : i32
    %c0_i32_0 = arith.constant 0 : i32
    %c0_i32_1 = arith.constant 0 : i32
    return %arg0, %c0_i32, %c0_i32_0 : i32, i32, i32
  }
  func.func @transform_1(%arg0: i32, %arg1: i32) -> (i32, i32) {
    %c0_i32 = arith.constant 0 : i32
    %c0_i32_0 = arith.constant 0 : i32
    %c0_i32_1 = arith.constant 0 : i32
    return %c0_i32, %c0_i32_0 : i32, i32
  }
  func.func @transform_2(%arg0: i32, %arg1: i32) -> (i32, i32) {
    %c0_i32 = arith.constant 0 : i32
    %c0_i32_0 = arith.constant 0 : i32
    %c0_i32_1 = arith.constant 0 : i32
    return %c0_i32, %c0_i32_0 : i32, i32
  }
  func.func @transform_3(%arg0: i32, %arg1: i32) -> (i32, i32) {
    %c0_i32 = arith.constant 0 : i32
    %c0_i32_0 = arith.constant 0 : i32
    %c0_i32_1 = arith.constant 0 : i32
    return %c0_i32, %c0_i32_0 : i32, i32
  }
  func.func @transform_4(%arg0: i32, %arg1: i32) -> (i32, i32, i32) {
    %c0_i32 = arith.constant 0 : i32
    %c0_i32_0 = arith.constant 0 : i32
    return %arg0, %arg1, %c0_i32 : i32, i32, i32
  }
}

module attributes {stable_mosaic.version = 11 : i64} {
  func.func @_conv_kernel(%arg0: i32, %arg1: i32, %arg2: memref<1x8x32xbf16, #tpu.memory_space<vmem>>, %arg3: memref<96x32xbf16, #tpu.memory_space<vmem>>, %arg4: memref<1x32xf32, #tpu.memory_space<vmem>>, %arg5: memref<1x32xf32, #tpu.memory_space<vmem>>, %arg6: memref<1x2x32xf32, #tpu.memory_space<vmem>>, %arg7: memref<1x8x32xbf16, #tpu.memory_space<vmem>>) attributes {dimension_semantics = [#tpu.dimension_semantics<parallel>, #tpu.dimension_semantics<parallel>], iteration_bounds = array<i64: 2, 1>, scalar_prefetch = 0 : i64, scratch_operands = 0 : i64, tpu.core_type = #tpu.core_type<tc>, window_params = [{transform_indices = @transform_0, window_bounds = array<i64: 1, 8, 32>}, {pipeline_mode = #tpu.pipeline_mode<synchronous>, transform_indices = @transform_1, window_bounds = array<i64: 96, 32>}, {pipeline_mode = #tpu.pipeline_mode<synchronous>, transform_indices = @transform_2, window_bounds = array<i64: 1, 32>}, {pipeline_mode = #tpu.pipeline_mode<synchronous>, transform_indices = @transform_3, window_bounds = array<i64: 1, 32>}, {transform_indices = @transform_4, window_bounds = array<i64: 1, 2, 32>}, {transform_indices = @transform_5, window_bounds = array<i64: 1, 8, 32>}]} {
    %c0 = arith.constant 0 : index
    %c0_0 = arith.constant 0 : index
    %c0_1 = arith.constant 0 : index
    %0 = vector.load %arg2[%c0, %c0_0, %c0_1] : memref<1x8x32xbf16, #tpu.memory_space<vmem>>, vector<1x8x32xbf16>
    %1 = vector.shape_cast %0 : vector<1x8x32xbf16> to vector<8x32xbf16>
    %2 = arith.extf %1 : vector<8x32xbf16> to vector<8x32xf32>
    %cst = arith.constant 0.000000e+00 : f32
    %3 = vector.broadcast %cst : f32 to vector<1x32xf32>
    %4 = tpu.concatenate %3, %2, %3 in 0 : vector<1x32xf32>, vector<8x32xf32>, vector<1x32xf32> -> vector<10x32xf32>
    %5 = arith.truncf %4 : vector<10x32xf32> to vector<10x32xbf16>
    %6 = vector.extract_strided_slice %5 {offsets = [0, 0], sizes = [8, 32], strides = [1, 1]} : vector<10x32xbf16> to vector<8x32xbf16>
    %7 = vector.extract_strided_slice %5 {offsets = [1, 0], sizes = [8, 32], strides = [1, 1]} : vector<10x32xbf16> to vector<8x32xbf16>
    %8 = vector.extract_strided_slice %5 {offsets = [2, 0], sizes = [8, 32], strides = [1, 1]} : vector<10x32xbf16> to vector<8x32xbf16>
    %9 = tpu.concatenate %6, %7, %8 in 1 : vector<8x32xbf16>, vector<8x32xbf16>, vector<8x32xbf16> -> vector<8x96xbf16>
    %c0_2 = arith.constant 0 : index
    %c0_3 = arith.constant 0 : index
    %10 = vector.load %arg3[%c0_2, %c0_3] : memref<96x32xbf16, #tpu.memory_space<vmem>>, vector<96x32xbf16>
    %cst_4 = arith.constant dense<0.000000e+00> : vector<8x32xf32>
    %11 = tpu.matmul %9, %10, %cst_4 {dimension_numbers = #tpu.dot_dimension_numbers<[1], [0], [0], [1], [0, 0, 1, 1], [], []>} : vector<8x96xbf16>, vector<96x32xbf16>, vector<8x32xf32> -> vector<8x32xf32>
    %c0_5 = arith.constant 0 : index
    %c0_6 = arith.constant 0 : index
    %12 = vector.load %arg4[%c0_5, %c0_6] : memref<1x32xf32, #tpu.memory_space<vmem>>, vector<1x32xf32>
    %13 = vector.broadcast %12 : vector<1x32xf32> to vector<8x32xf32>
    %14 = arith.addf %11, %13 : vector<8x32xf32>
    %c0_7 = arith.constant 0 : index
    %c0_8 = arith.constant 0 : index
    %15 = vector.load %arg5[%c0_7, %c0_8] : memref<1x32xf32, #tpu.memory_space<vmem>>, vector<1x32xf32>
    %16 = arith.mulf %14, %14 : vector<8x32xf32>
    %cst_9 = arith.constant dense<0.000000e+00> : vector<8xf32>
    %17 = vector.multi_reduction <add>, %16, %cst_9 [1] : vector<8x32xf32> to vector<8xf32>
    %18 = vector.shape_cast %17 : vector<8xf32> to vector<8x1xf32>
    %19 = math.sqrt %18 : vector<8x1xf32>
    %cst_10 = arith.constant 9.99999996E-13 : f32
    %20 = vector.broadcast %cst_10 : f32 to vector<8x1xf32>
    %21 = arith.maximumf %19, %20 : vector<8x1xf32>
    %22 = vector.broadcast %21 : vector<8x1xf32> to vector<8x32xf32>
    %23 = arith.divf %14, %22 : vector<8x32xf32>
    %24 = vector.broadcast %15 : vector<1x32xf32> to vector<8x32xf32>
    %25 = arith.mulf %23, %24 : vector<8x32xf32>
    %cst_11 = arith.constant 5.65685415 : f32
    %26 = vector.broadcast %cst_11 : f32 to vector<8x32xf32>
    %27 = arith.mulf %25, %26 : vector<8x32xf32>
    %c0_12 = arith.constant 0 : index
    %c0_13 = arith.constant 0 : index
    %c0_14 = arith.constant 0 : index
    %28 = vector.load %arg6[%c0_12, %c0_13, %c0_14] : memref<1x2x32xf32, #tpu.memory_space<vmem>>, vector<1x2x32xf32>
    %29 = vector.shape_cast %28 : vector<1x2x32xf32> to vector<2x32xf32>
    %30 = vector.extract_strided_slice %29 {offsets = [0, 0], sizes = [1, 32], strides = [1, 1]} : vector<2x32xf32> to vector<1x32xf32>
    %cst_15 = arith.constant 1.000000e+00 : f32
    %31 = vector.broadcast %cst_15 : f32 to vector<1x32xf32>
    %32 = arith.addf %30, %31 : vector<1x32xf32>
    %33 = vector.broadcast %32 : vector<1x32xf32> to vector<8x32xf32>
    %34 = arith.mulf %27, %33 : vector<8x32xf32>
    %35 = vector.extract_strided_slice %29 {offsets = [1, 0], sizes = [1, 32], strides = [1, 1]} : vector<2x32xf32> to vector<1x32xf32>
    %36 = vector.broadcast %35 : vector<1x32xf32> to vector<8x32xf32>
    %37 = arith.addf %34, %36 : vector<8x32xf32>
    %38 = arith.negf %37 : vector<8x32xf32>
    %39 = math.exp %38 : vector<8x32xf32>
    %cst_16 = arith.constant 1.000000e+00 : f32
    %40 = vector.broadcast %cst_16 : f32 to vector<8x32xf32>
    %41 = arith.addf %40, %39 : vector<8x32xf32>
    %42 = arith.divf %40, %41 : vector<8x32xf32>
    %43 = arith.mulf %37, %42 : vector<8x32xf32>
    %44 = arith.truncf %43 : vector<8x32xf32> to vector<8x32xbf16>
    %c0_17 = arith.constant 0 : index
    %c0_18 = arith.constant 0 : index
    %c0_19 = arith.constant 0 : index
    %45 = vector.load %arg7[%c0_17, %c0_18, %c0_19] : memref<1x8x32xbf16, #tpu.memory_space<vmem>>, vector<1x8x32xbf16>
    %46 = vector.shape_cast %45 : vector<1x8x32xbf16> to vector<8x32xbf16>
    %47 = vector.shape_cast %44 : vector<8x32xbf16> to vector<1x8x32xbf16>
    tpu.vector_store %arg7[%c0_17, %c0_18, %c0_19], %47 {strides = array<i32>} : memref<1x8x32xbf16, #tpu.memory_space<vmem>>, vector<1x8x32xbf16>,
    return
  }
  func.func @transform_0(%arg0: i32, %arg1: i32) -> (i32, i32, i32) {
    %c0_i32 = arith.constant 0 : i32
    %c0_i32_0 = arith.constant 0 : i32
    %c0_i32_1 = arith.constant 0 : i32
    return %arg0, %c0_i32, %c0_i32_0 : i32, i32, i32
  }
  func.func @transform_1(%arg0: i32, %arg1: i32) -> (i32, i32) {
    %c0_i32 = arith.constant 0 : i32
    %c0_i32_0 = arith.constant 0 : i32
    %c0_i32_1 = arith.constant 0 : i32
    return %c0_i32, %c0_i32_0 : i32, i32
  }
  func.func @transform_2(%arg0: i32, %arg1: i32) -> (i32, i32) {
    %c0_i32 = arith.constant 0 : i32
    %c0_i32_0 = arith.constant 0 : i32
    %c0_i32_1 = arith.constant 0 : i32
    return %c0_i32, %c0_i32_0 : i32, i32
  }
  func.func @transform_3(%arg0: i32, %arg1: i32) -> (i32, i32) {
    %c0_i32 = arith.constant 0 : i32
    %c0_i32_0 = arith.constant 0 : i32
    %c0_i32_1 = arith.constant 0 : i32
    return %c0_i32, %c0_i32_0 : i32, i32
  }
  func.func @transform_4(%arg0: i32, %arg1: i32) -> (i32, i32, i32) {
    %c0_i32 = arith.constant 0 : i32
    %c0_i32_0 = arith.constant 0 : i32
    %c0_i32_1 = arith.constant 0 : i32
    return %arg0, %c0_i32, %c0_i32_0 : i32, i32, i32
  }
  func.func @transform_5(%arg0: i32, %arg1: i32) -> (i32, i32, i32) {
    %c0_i32 = arith.constant 0 : i32
    %c0_i32_0 = arith.constant 0 : i32
    return %arg0, %arg1, %c0_i32 : i32, i32, i32
  }
}

module attributes {stable_mosaic.version = 11 : i64} {
  func.func @_conv_kernel(%arg0: i32, %arg1: i32, %arg2: memref<1x8x32xbf16, #tpu.memory_space<vmem>>, %arg3: memref<32x384xbf16, #tpu.memory_space<vmem>>, %arg4: memref<1x384xf32, #tpu.memory_space<vmem>>, %arg5: memref<1x32xf32, #tpu.memory_space<vmem>>, %arg6: memref<1x8x384xbf16, #tpu.memory_space<vmem>>) attributes {dimension_semantics = [#tpu.dimension_semantics<parallel>, #tpu.dimension_semantics<parallel>], iteration_bounds = array<i64: 2, 1>, scalar_prefetch = 0 : i64, scratch_operands = 0 : i64, tpu.core_type = #tpu.core_type<tc>, window_params = [{transform_indices = @transform_0, window_bounds = array<i64: 1, 8, 32>}, {pipeline_mode = #tpu.pipeline_mode<synchronous>, transform_indices = @transform_1, window_bounds = array<i64: 32, 384>}, {pipeline_mode = #tpu.pipeline_mode<synchronous>, transform_indices = @transform_2, window_bounds = array<i64: 1, 384>}, {pipeline_mode = #tpu.pipeline_mode<synchronous>, transform_indices = @transform_3, window_bounds = array<i64: 1, 32>}, {transform_indices = @transform_4, window_bounds = array<i64: 1, 8, 384>}]} {
    %c0 = arith.constant 0 : index
    %c0_0 = arith.constant 0 : index
    %c0_1 = arith.constant 0 : index
    %0 = vector.load %arg2[%c0, %c0_0, %c0_1] : memref<1x8x32xbf16, #tpu.memory_space<vmem>>, vector<1x8x32xbf16>
    %1 = vector.shape_cast %0 : vector<1x8x32xbf16> to vector<8x32xbf16>
    %2 = arith.extf %1 : vector<8x32xbf16> to vector<8x32xf32>
    %c0_2 = arith.constant 0 : index
    %c0_3 = arith.constant 0 : index
    %3 = vector.load %arg5[%c0_2, %c0_3] : memref<1x32xf32, #tpu.memory_space<vmem>>, vector<1x32xf32>
    %4 = arith.mulf %2, %2 : vector<8x32xf32>
    %cst = arith.constant dense<0.000000e+00> : vector<8xf32>
    %5 = vector.multi_reduction <add>, %4, %cst [1] : vector<8x32xf32> to vector<8xf32>
    %6 = vector.shape_cast %5 : vector<8xf32> to vector<8x1xf32>
    %7 = math.sqrt %6 : vector<8x1xf32>
    %cst_4 = arith.constant 9.99999996E-13 : f32
    %8 = vector.broadcast %cst_4 : f32 to vector<8x1xf32>
    %9 = arith.maximumf %7, %8 : vector<8x1xf32>
    %10 = vector.broadcast %9 : vector<8x1xf32> to vector<8x32xf32>
    %11 = arith.divf %2, %10 : vector<8x32xf32>
    %12 = vector.broadcast %3 : vector<1x32xf32> to vector<8x32xf32>
    %13 = arith.mulf %11, %12 : vector<8x32xf32>
    %cst_5 = arith.constant 5.65685415 : f32
    %14 = vector.broadcast %cst_5 : f32 to vector<8x32xf32>
    %15 = arith.mulf %13, %14 : vector<8x32xf32>
    %16 = arith.truncf %15 : vector<8x32xf32> to vector<8x32xbf16>
    %c0_6 = arith.constant 0 : index
    %c0_7 = arith.constant 0 : index
    %17 = vector.load %arg3[%c0_6, %c0_7] : memref<32x384xbf16, #tpu.memory_space<vmem>>, vector<32x384xbf16>
    %cst_8 = arith.constant dense<0.000000e+00> : vector<8x384xf32>
    %18 = tpu.matmul %16, %17, %cst_8 {dimension_numbers = #tpu.dot_dimension_numbers<[1], [0], [0], [1], [0, 0, 1, 1], [], []>} : vector<8x32xbf16>, vector<32x384xbf16>, vector<8x384xf32> -> vector<8x384xf32>
    %c0_9 = arith.constant 0 : index
    %c0_10 = arith.constant 0 : index
    %19 = vector.load %arg4[%c0_9, %c0_10] : memref<1x384xf32, #tpu.memory_space<vmem>>, vector<1x384xf32>
    %20 = vector.broadcast %19 : vector<1x384xf32> to vector<8x384xf32>
    %21 = arith.addf %18, %20 : vector<8x384xf32>
    %22 = arith.truncf %21 : vector<8x384xf32> to vector<8x384xbf16>
    %c0_11 = arith.constant 0 : index
    %c0_12 = arith.constant 0 : index
    %c0_13 = arith.constant 0 : index
    %23 = vector.load %arg6[%c0_11, %c0_12, %c0_13] : memref<1x8x384xbf16, #tpu.memory_space<vmem>>, vector<1x8x384xbf16>
    %24 = vector.shape_cast %23 : vector<1x8x384xbf16> to vector<8x384xbf16>
    %25 = vector.shape_cast %22 : vector<8x384xbf16> to vector<1x8x384xbf16>
    tpu.vector_store %arg6[%c0_11, %c0_12, %c0_13], %25 {strides = array<i32>} : memref<1x8x384xbf16, #tpu.memory_space<vmem>>, vector<1x8x384xbf16>,
    return
  }
  func.func @transform_0(%arg0: i32, %arg1: i32) -> (i32, i32, i32) {
    %c0_i32 = arith.constant 0 : i32
    %c0_i32_0 = arith.constant 0 : i32
    %c0_i32_1 = arith.constant 0 : i32
    return %arg0, %c0_i32, %c0_i32_0 : i32, i32, i32
  }
  func.func @transform_1(%arg0: i32, %arg1: i32) -> (i32, i32) {
    %c0_i32 = arith.constant 0 : i32
    %c0_i32_0 = arith.constant 0 : i32
    %c0_i32_1 = arith.constant 0 : i32
    return %c0_i32, %c0_i32_0 : i32, i32
  }
  func.func @transform_2(%arg0: i32, %arg1: i32) -> (i32, i32) {
    %c0_i32 = arith.constant 0 : i32
    %c0_i32_0 = arith.constant 0 : i32
    %c0_i32_1 = arith.constant 0 : i32
    return %c0_i32, %c0_i32_0 : i32, i32
  }
  func.func @transform_3(%arg0: i32, %arg1: i32) -> (i32, i32) {
    %c0_i32 = arith.constant 0 : i32
    %c0_i32_0 = arith.constant 0 : i32
    %c0_i32_1 = arith.constant 0 : i32
    return %c0_i32, %c0_i32_0 : i32, i32
  }
  func.func @transform_4(%arg0: i32, %arg1: i32) -> (i32, i32, i32) {
    %c0_i32 = arith.constant 0 : i32
    %c0_i32_0 = arith.constant 0 : i32
    return %arg0, %arg1, %c0_i32 : i32, i32, i32
  }
}

module attributes {stable_mosaic.version = 11 : i64} {
  func.func @_attention_kernel(%arg0: i32, %arg1: memref<1x8x384xbf16, #tpu.memory_space<vmem>>, %arg2: memref<1x8x128xbf16, #tpu.memory_space<vmem>>) attributes {dimension_semantics = [#tpu.dimension_semantics<parallel>], iteration_bounds = array<i64: 2>, scalar_prefetch = 0 : i64, scratch_operands = 0 : i64, tpu.core_type = #tpu.core_type<tc>, window_params = [{transform_indices = @transform_0, window_bounds = array<i64: 1, 8, 384>}, {transform_indices = @transform_1, window_bounds = array<i64: 1, 8, 128>}]} {
    %c0 = arith.constant 0 : index
    %c0_0 = arith.constant 0 : index
    %c0_1 = arith.constant 0 : index
    %0 = vector.load %arg1[%c0, %c0_0, %c0_1] : memref<1x8x384xbf16, #tpu.memory_space<vmem>>, vector<1x8x384xbf16>
    %1 = vector.shape_cast %0 : vector<1x8x384xbf16> to vector<8x384xbf16>
    %2 = arith.extf %1 : vector<8x384xbf16> to vector<8x384xf32>
    %3 = vector.extract_strided_slice %2 {offsets = [0, 0], sizes = [8, 32], strides = [1, 1]} : vector<8x384xf32> to vector<8x32xf32>
    %4 = vector.extract_strided_slice %2 {offsets = [0, 128], sizes = [8, 32], strides = [1, 1]} : vector<8x384xf32> to vector<8x32xf32>
    %5 = vector.extract_strided_slice %2 {offsets = [0, 256], sizes = [8, 32], strides = [1, 1]} : vector<8x384xf32> to vector<8x32xf32>
    %cst = arith.constant 0.176776692 : f32
    %6 = vector.broadcast %cst : f32 to vector<8x32xf32>
    %7 = arith.mulf %3, %6 : vector<8x32xf32>
    %8 = arith.truncf %7 : vector<8x32xf32> to vector<8x32xbf16>
    %9 = arith.truncf %4 : vector<8x32xf32> to vector<8x32xbf16>
    %cst_2 = arith.constant dense<0.000000e+00> : vector<8x8xf32>
    %10 = tpu.matmul %8, %9, %cst_2 {dimension_numbers = #tpu.dot_dimension_numbers<[1], [1], [0], [0], [0, 0, 1, 0], [], []>} : vector<8x32xbf16>, vector<8x32xbf16>, vector<8x8xf32> -> vector<8x8xf32>
    %cst_3 = arith.constant dense<0xFF800000> : vector<8xf32>
    %11 = vector.multi_reduction <maximumf>, %10, %cst_3 [1] : vector<8x8xf32> to vector<8xf32>
    %12 = vector.shape_cast %11 : vector<8xf32> to vector<8x1xf32>
    %13 = vector.broadcast %12 : vector<8x1xf32> to vector<8x8xf32>
    %14 = arith.subf %10, %13 : vector<8x8xf32>
    %15 = math.exp %14 : vector<8x8xf32>
    %cst_4 = arith.constant dense<0.000000e+00> : vector<8xf32>
    %16 = vector.multi_reduction <add>, %15, %cst_4 [1] : vector<8x8xf32> to vector<8xf32>
    %17 = vector.shape_cast %16 : vector<8xf32> to vector<8x1xf32>
    %18 = tpu.reciprocal %17 {approx = true} : vector<8x1xf32> -> vector<8x1xf32>
    %19 = vector.broadcast %18 : vector<8x1xf32> to vector<8x8xf32>
    %20 = arith.mulf %15, %19 : vector<8x8xf32>
    %21 = arith.truncf %20 : vector<8x8xf32> to vector<8x8xbf16>
    %22 = arith.truncf %5 : vector<8x32xf32> to vector<8x32xbf16>
    %cst_5 = arith.constant dense<0.000000e+00> : vector<8x32xf32>
    %23 = tpu.matmul %21, %22, %cst_5 {dimension_numbers = #tpu.dot_dimension_numbers<[1], [0], [0], [1], [0, 0, 1, 1], [], []>} : vector<8x8xbf16>, vector<8x32xbf16>, vector<8x32xf32> -> vector<8x32xf32>
    %24 = vector.extract_strided_slice %2 {offsets = [0, 32], sizes = [8, 32], strides = [1, 1]} : vector<8x384xf32> to vector<8x32xf32>
    %25 = vector.extract_strided_slice %2 {offsets = [0, 160], sizes = [8, 32], strides = [1, 1]} : vector<8x384xf32> to vector<8x32xf32>
    %26 = vector.extract_strided_slice %2 {offsets = [0, 288], sizes = [8, 32], strides = [1, 1]} : vector<8x384xf32> to vector<8x32xf32>
    %cst_6 = arith.constant 0.176776692 : f32
    %27 = vector.broadcast %cst_6 : f32 to vector<8x32xf32>
    %28 = arith.mulf %24, %27 : vector<8x32xf32>
    %29 = arith.truncf %28 : vector<8x32xf32> to vector<8x32xbf16>
    %30 = arith.truncf %25 : vector<8x32xf32> to vector<8x32xbf16>
    %cst_7 = arith.constant dense<0.000000e+00> : vector<8x8xf32>
    %31 = tpu.matmul %29, %30, %cst_7 {dimension_numbers = #tpu.dot_dimension_numbers<[1], [1], [0], [0], [0, 0, 1, 0], [], []>} : vector<8x32xbf16>, vector<8x32xbf16>, vector<8x8xf32> -> vector<8x8xf32>
    %cst_8 = arith.constant dense<0xFF800000> : vector<8xf32>
    %32 = vector.multi_reduction <maximumf>, %31, %cst_8 [1] : vector<8x8xf32> to vector<8xf32>
    %33 = vector.shape_cast %32 : vector<8xf32> to vector<8x1xf32>
    %34 = vector.broadcast %33 : vector<8x1xf32> to vector<8x8xf32>
    %35 = arith.subf %31, %34 : vector<8x8xf32>
    %36 = math.exp %35 : vector<8x8xf32>
    %cst_9 = arith.constant dense<0.000000e+00> : vector<8xf32>
    %37 = vector.multi_reduction <add>, %36, %cst_9 [1] : vector<8x8xf32> to vector<8xf32>
    %38 = vector.shape_cast %37 : vector<8xf32> to vector<8x1xf32>
    %39 = tpu.reciprocal %38 {approx = true} : vector<8x1xf32> -> vector<8x1xf32>
    %40 = vector.broadcast %39 : vector<8x1xf32> to vector<8x8xf32>
    %41 = arith.mulf %36, %40 : vector<8x8xf32>
    %42 = arith.truncf %41 : vector<8x8xf32> to vector<8x8xbf16>
    %43 = arith.truncf %26 : vector<8x32xf32> to vector<8x32xbf16>
    %cst_10 = arith.constant dense<0.000000e+00> : vector<8x32xf32>
    %44 = tpu.matmul %42, %43, %cst_10 {dimension_numbers = #tpu.dot_dimension_numbers<[1], [0], [0], [1], [0, 0, 1, 1], [], []>} : vector<8x8xbf16>, vector<8x32xbf16>, vector<8x32xf32> -> vector<8x32xf32>
    %45 = vector.extract_strided_slice %2 {offsets = [0, 64], sizes = [8, 32], strides = [1, 1]} : vector<8x384xf32> to vector<8x32xf32>
    %46 = vector.extract_strided_slice %2 {offsets = [0, 192], sizes = [8, 32], strides = [1, 1]} : vector<8x384xf32> to vector<8x32xf32>
    %47 = vector.extract_strided_slice %2 {offsets = [0, 320], sizes = [8, 32], strides = [1, 1]} : vector<8x384xf32> to vector<8x32xf32>
    %cst_11 = arith.constant 0.176776692 : f32
    %48 = vector.broadcast %cst_11 : f32 to vector<8x32xf32>
    %49 = arith.mulf %45, %48 : vector<8x32xf32>
    %50 = arith.truncf %49 : vector<8x32xf32> to vector<8x32xbf16>
    %51 = arith.truncf %46 : vector<8x32xf32> to vector<8x32xbf16>
    %cst_12 = arith.constant dense<0.000000e+00> : vector<8x8xf32>
    %52 = tpu.matmul %50, %51, %cst_12 {dimension_numbers = #tpu.dot_dimension_numbers<[1], [1], [0], [0], [0, 0, 1, 0], [], []>} : vector<8x32xbf16>, vector<8x32xbf16>, vector<8x8xf32> -> vector<8x8xf32>
    %cst_13 = arith.constant dense<0xFF800000> : vector<8xf32>
    %53 = vector.multi_reduction <maximumf>, %52, %cst_13 [1] : vector<8x8xf32> to vector<8xf32>
    %54 = vector.shape_cast %53 : vector<8xf32> to vector<8x1xf32>
    %55 = vector.broadcast %54 : vector<8x1xf32> to vector<8x8xf32>
    %56 = arith.subf %52, %55 : vector<8x8xf32>
    %57 = math.exp %56 : vector<8x8xf32>
    %cst_14 = arith.constant dense<0.000000e+00> : vector<8xf32>
    %58 = vector.multi_reduction <add>, %57, %cst_14 [1] : vector<8x8xf32> to vector<8xf32>
    %59 = vector.shape_cast %58 : vector<8xf32> to vector<8x1xf32>
    %60 = tpu.reciprocal %59 {approx = true} : vector<8x1xf32> -> vector<8x1xf32>
    %61 = vector.broadcast %60 : vector<8x1xf32> to vector<8x8xf32>
    %62 = arith.mulf %57, %61 : vector<8x8xf32>
    %63 = arith.truncf %62 : vector<8x8xf32> to vector<8x8xbf16>
    %64 = arith.truncf %47 : vector<8x32xf32> to vector<8x32xbf16>
    %cst_15 = arith.constant dense<0.000000e+00> : vector<8x32xf32>
    %65 = tpu.matmul %63, %64, %cst_15 {dimension_numbers = #tpu.dot_dimension_numbers<[1], [0], [0], [1], [0, 0, 1, 1], [], []>} : vector<8x8xbf16>, vector<8x32xbf16>, vector<8x32xf32> -> vector<8x32xf32>
    %66 = vector.extract_strided_slice %2 {offsets = [0, 96], sizes = [8, 32], strides = [1, 1]} : vector<8x384xf32> to vector<8x32xf32>
    %67 = vector.extract_strided_slice %2 {offsets = [0, 224], sizes = [8, 32], strides = [1, 1]} : vector<8x384xf32> to vector<8x32xf32>
    %68 = vector.extract_strided_slice %2 {offsets = [0, 352], sizes = [8, 32], strides = [1, 1]} : vector<8x384xf32> to vector<8x32xf32>
    %cst_16 = arith.constant 0.176776692 : f32
    %69 = vector.broadcast %cst_16 : f32 to vector<8x32xf32>
    %70 = arith.mulf %66, %69 : vector<8x32xf32>
    %71 = arith.truncf %70 : vector<8x32xf32> to vector<8x32xbf16>
    %72 = arith.truncf %67 : vector<8x32xf32> to vector<8x32xbf16>
    %cst_17 = arith.constant dense<0.000000e+00> : vector<8x8xf32>
    %73 = tpu.matmul %71, %72, %cst_17 {dimension_numbers = #tpu.dot_dimension_numbers<[1], [1], [0], [0], [0, 0, 1, 0], [], []>} : vector<8x32xbf16>, vector<8x32xbf16>, vector<8x8xf32> -> vector<8x8xf32>
    %cst_18 = arith.constant dense<0xFF800000> : vector<8xf32>
    %74 = vector.multi_reduction <maximumf>, %73, %cst_18 [1] : vector<8x8xf32> to vector<8xf32>
    %75 = vector.shape_cast %74 : vector<8xf32> to vector<8x1xf32>
    %76 = vector.broadcast %75 : vector<8x1xf32> to vector<8x8xf32>
    %77 = arith.subf %73, %76 : vector<8x8xf32>
    %78 = math.exp %77 : vector<8x8xf32>
    %cst_19 = arith.constant dense<0.000000e+00> : vector<8xf32>
    %79 = vector.multi_reduction <add>, %78, %cst_19 [1] : vector<8x8xf32> to vector<8xf32>
    %80 = vector.shape_cast %79 : vector<8xf32> to vector<8x1xf32>
    %81 = tpu.reciprocal %80 {approx = true} : vector<8x1xf32> -> vector<8x1xf32>
    %82 = vector.broadcast %81 : vector<8x1xf32> to vector<8x8xf32>
    %83 = arith.mulf %78, %82 : vector<8x8xf32>
    %84 = arith.truncf %83 : vector<8x8xf32> to vector<8x8xbf16>
    %85 = arith.truncf %68 : vector<8x32xf32> to vector<8x32xbf16>
    %cst_20 = arith.constant dense<0.000000e+00> : vector<8x32xf32>
    %86 = tpu.matmul %84, %85, %cst_20 {dimension_numbers = #tpu.dot_dimension_numbers<[1], [0], [0], [1], [0, 0, 1, 1], [], []>} : vector<8x8xbf16>, vector<8x32xbf16>, vector<8x32xf32> -> vector<8x32xf32>
    %87 = tpu.concatenate %23, %44, %65, %86 in 1 : vector<8x32xf32>, vector<8x32xf32>, vector<8x32xf32>, vector<8x32xf32> -> vector<8x128xf32>
    %88 = arith.truncf %87 : vector<8x128xf32> to vector<8x128xbf16>
    %c0_21 = arith.constant 0 : index
    %c0_22 = arith.constant 0 : index
    %c0_23 = arith.constant 0 : index
    %89 = vector.load %arg2[%c0_21, %c0_22, %c0_23] : memref<1x8x128xbf16, #tpu.memory_space<vmem>>, vector<1x8x128xbf16>
    %90 = vector.shape_cast %89 : vector<1x8x128xbf16> to vector<8x128xbf16>
    %91 = vector.shape_cast %88 : vector<8x128xbf16> to vector<1x8x128xbf16>
    tpu.vector_store %arg2[%c0_21, %c0_22, %c0_23], %91 {strides = array<i32>} : memref<1x8x128xbf16, #tpu.memory_space<vmem>>, vector<1x8x128xbf16>,
    return
  }
  func.func @transform_0(%arg0: i32) -> (i32, i32, i32) {
    %c0_i32 = arith.constant 0 : i32
    %c0_i32_0 = arith.constant 0 : i32
    %c0_i32_1 = arith.constant 0 : i32
    return %arg0, %c0_i32, %c0_i32_0 : i32, i32, i32
  }
  func.func @transform_1(%arg0: i32) -> (i32, i32, i32) {
    %c0_i32 = arith.constant 0 : i32
    %c0_i32_0 = arith.constant 0 : i32
    %c0_i32_1 = arith.constant 0 : i32
    return %arg0, %c0_i32, %c0_i32_0 : i32, i32, i32
  }
}

module attributes {stable_mosaic.version = 11 : i64} {
  func.func @_conv_kernel(%arg0: i32, %arg1: i32, %arg2: memref<1x8x128xbf16, #tpu.memory_space<vmem>>, %arg3: memref<128x32xbf16, #tpu.memory_space<vmem>>, %arg4: memref<1x32xf32, #tpu.memory_space<vmem>>, %arg5: memref<1x8x32xbf16, #tpu.memory_space<vmem>>) attributes {dimension_semantics = [#tpu.dimension_semantics<parallel>, #tpu.dimension_semantics<parallel>], iteration_bounds = array<i64: 2, 1>, scalar_prefetch = 0 : i64, scratch_operands = 0 : i64, tpu.core_type = #tpu.core_type<tc>, window_params = [{transform_indices = @transform_0, window_bounds = array<i64: 1, 8, 128>}, {pipeline_mode = #tpu.pipeline_mode<synchronous>, transform_indices = @transform_1, window_bounds = array<i64: 128, 32>}, {pipeline_mode = #tpu.pipeline_mode<synchronous>, transform_indices = @transform_2, window_bounds = array<i64: 1, 32>}, {transform_indices = @transform_3, window_bounds = array<i64: 1, 8, 32>}]} {
    %c0 = arith.constant 0 : index
    %c0_0 = arith.constant 0 : index
    %c0_1 = arith.constant 0 : index
    %0 = vector.load %arg2[%c0, %c0_0, %c0_1] : memref<1x8x128xbf16, #tpu.memory_space<vmem>>, vector<1x8x128xbf16>
    %1 = vector.shape_cast %0 : vector<1x8x128xbf16> to vector<8x128xbf16>
    %2 = arith.extf %1 : vector<8x128xbf16> to vector<8x128xf32>
    %3 = arith.truncf %2 : vector<8x128xf32> to vector<8x128xbf16>
    %c0_2 = arith.constant 0 : index
    %c0_3 = arith.constant 0 : index
    %4 = vector.load %arg3[%c0_2, %c0_3] : memref<128x32xbf16, #tpu.memory_space<vmem>>, vector<128x32xbf16>
    %cst = arith.constant dense<0.000000e+00> : vector<8x32xf32>
    %5 = tpu.matmul %3, %4, %cst {dimension_numbers = #tpu.dot_dimension_numbers<[1], [0], [0], [1], [0, 0, 1, 1], [], []>} : vector<8x128xbf16>, vector<128x32xbf16>, vector<8x32xf32> -> vector<8x32xf32>
    %c0_4 = arith.constant 0 : index
    %c0_5 = arith.constant 0 : index
    %6 = vector.load %arg4[%c0_4, %c0_5] : memref<1x32xf32, #tpu.memory_space<vmem>>, vector<1x32xf32>
    %7 = vector.broadcast %6 : vector<1x32xf32> to vector<8x32xf32>
    %8 = arith.addf %5, %7 : vector<8x32xf32>
    %9 = arith.truncf %8 : vector<8x32xf32> to vector<8x32xbf16>
    %c0_6 = arith.constant 0 : index
    %c0_7 = arith.constant 0 : index
    %c0_8 = arith.constant 0 : index
    %10 = vector.load %arg5[%c0_6, %c0_7, %c0_8] : memref<1x8x32xbf16, #tpu.memory_space<vmem>>, vector<1x8x32xbf16>
    %11 = vector.shape_cast %10 : vector<1x8x32xbf16> to vector<8x32xbf16>
    %12 = vector.shape_cast %9 : vector<8x32xbf16> to vector<1x8x32xbf16>
    tpu.vector_store %arg5[%c0_6, %c0_7, %c0_8], %12 {strides = array<i32>} : memref<1x8x32xbf16, #tpu.memory_space<vmem>>, vector<1x8x32xbf16>,
    return
  }
  func.func @transform_0(%arg0: i32, %arg1: i32) -> (i32, i32, i32) {
    %c0_i32 = arith.constant 0 : i32
    %c0_i32_0 = arith.constant 0 : i32
    %c0_i32_1 = arith.constant 0 : i32
    return %arg0, %c0_i32, %c0_i32_0 : i32, i32, i32
  }
  func.func @transform_1(%arg0: i32, %arg1: i32) -> (i32, i32) {
    %c0_i32 = arith.constant 0 : i32
    %c0_i32_0 = arith.constant 0 : i32
    %c0_i32_1 = arith.constant 0 : i32
    return %c0_i32, %c0_i32_0 : i32, i32
  }
  func.func @transform_2(%arg0: i32, %arg1: i32) -> (i32, i32) {
    %c0_i32 = arith.constant 0 : i32
    %c0_i32_0 = arith.constant 0 : i32
    %c0_i32_1 = arith.constant 0 : i32
    return %c0_i32, %c0_i32_0 : i32, i32
  }
  func.func @transform_3(%arg0: i32, %arg1: i32) -> (i32, i32, i32) {
    %c0_i32 = arith.constant 0 : i32
    %c0_i32_0 = arith.constant 0 : i32
    return %arg0, %arg1, %c0_i32 : i32, i32, i32
  }
}

module attributes {stable_mosaic.version = 11 : i64} {
  func.func @_conv_kernel(%arg0: i32, %arg1: i32, %arg2: memref<1x8x32xbf16, #tpu.memory_space<vmem>>, %arg3: memref<1x8x16xbf16, #tpu.memory_space<vmem>>, %arg4: memref<48x32xbf16, #tpu.memory_space<vmem>>, %arg5: memref<1x32xf32, #tpu.memory_space<vmem>>, %arg6: memref<1x8x32xbf16, #tpu.memory_space<vmem>>) attributes {dimension_semantics = [#tpu.dimension_semantics<parallel>, #tpu.dimension_semantics<parallel>], iteration_bounds = array<i64: 2, 1>, scalar_prefetch = 0 : i64, scratch_operands = 0 : i64, tpu.core_type = #tpu.core_type<tc>, window_params = [{transform_indices = @transform_0, window_bounds = array<i64: 1, 8, 32>}, {transform_indices = @transform_1, window_bounds = array<i64: 1, 8, 16>}, {pipeline_mode = #tpu.pipeline_mode<synchronous>, transform_indices = @transform_2, window_bounds = array<i64: 48, 32>}, {pipeline_mode = #tpu.pipeline_mode<synchronous>, transform_indices = @transform_3, window_bounds = array<i64: 1, 32>}, {transform_indices = @transform_4, window_bounds = array<i64: 1, 8, 32>}]} {
    %c0 = arith.constant 0 : index
    %c0_0 = arith.constant 0 : index
    %c0_1 = arith.constant 0 : index
    %0 = vector.load %arg2[%c0, %c0_0, %c0_1] : memref<1x8x32xbf16, #tpu.memory_space<vmem>>, vector<1x8x32xbf16>
    %1 = vector.shape_cast %0 : vector<1x8x32xbf16> to vector<8x32xbf16>
    %2 = arith.extf %1 : vector<8x32xbf16> to vector<8x32xf32>
    %c0_2 = arith.constant 0 : index
    %c0_3 = arith.constant 0 : index
    %c0_4 = arith.constant 0 : index
    %3 = vector.load %arg3[%c0_2, %c0_3, %c0_4] : memref<1x8x16xbf16, #tpu.memory_space<vmem>>, vector<1x8x16xbf16>
    %4 = vector.shape_cast %3 : vector<1x8x16xbf16> to vector<8x16xbf16>
    %5 = arith.extf %4 : vector<8x16xbf16> to vector<8x16xf32>
    %6 = tpu.concatenate %2, %5 in 1 : vector<8x32xf32>, vector<8x16xf32> -> vector<8x48xf32>
    %7 = arith.truncf %6 : vector<8x48xf32> to vector<8x48xbf16>
    %c0_5 = arith.constant 0 : index
    %c0_6 = arith.constant 0 : index
    %8 = vector.load %arg4[%c0_5, %c0_6] : memref<48x32xbf16, #tpu.memory_space<vmem>>, vector<48x32xbf16>
    %cst = arith.constant dense<0.000000e+00> : vector<8x32xf32>
    %9 = tpu.matmul %7, %8, %cst {dimension_numbers = #tpu.dot_dimension_numbers<[1], [0], [0], [1], [0, 0, 1, 1], [], []>} : vector<8x48xbf16>, vector<48x32xbf16>, vector<8x32xf32> -> vector<8x32xf32>
    %c0_7 = arith.constant 0 : index
    %c0_8 = arith.constant 0 : index
    %10 = vector.load %arg5[%c0_7, %c0_8] : memref<1x32xf32, #tpu.memory_space<vmem>>, vector<1x32xf32>
    %11 = vector.broadcast %10 : vector<1x32xf32> to vector<8x32xf32>
    %12 = arith.addf %9, %11 : vector<8x32xf32>
    %13 = arith.truncf %12 : vector<8x32xf32> to vector<8x32xbf16>
    %c0_9 = arith.constant 0 : index
    %c0_10 = arith.constant 0 : index
    %c0_11 = arith.constant 0 : index
    %14 = vector.load %arg6[%c0_9, %c0_10, %c0_11] : memref<1x8x32xbf16, #tpu.memory_space<vmem>>, vector<1x8x32xbf16>
    %15 = vector.shape_cast %14 : vector<1x8x32xbf16> to vector<8x32xbf16>
    %16 = vector.shape_cast %13 : vector<8x32xbf16> to vector<1x8x32xbf16>
    tpu.vector_store %arg6[%c0_9, %c0_10, %c0_11], %16 {strides = array<i32>} : memref<1x8x32xbf16, #tpu.memory_space<vmem>>, vector<1x8x32xbf16>,
    return
  }
  func.func @transform_0(%arg0: i32, %arg1: i32) -> (i32, i32, i32) {
    %c0_i32 = arith.constant 0 : i32
    %c0_i32_0 = arith.constant 0 : i32
    %c0_i32_1 = arith.constant 0 : i32
    return %arg0, %c0_i32, %c0_i32_0 : i32, i32, i32
  }
  func.func @transform_1(%arg0: i32, %arg1: i32) -> (i32, i32, i32) {
    %c0_i32 = arith.constant 0 : i32
    %c0_i32_0 = arith.constant 0 : i32
    %c0_i32_1 = arith.constant 0 : i32
    return %arg0, %c0_i32, %c0_i32_0 : i32, i32, i32
  }
  func.func @transform_2(%arg0: i32, %arg1: i32) -> (i32, i32) {
    %c0_i32 = arith.constant 0 : i32
    %c0_i32_0 = arith.constant 0 : i32
    %c0_i32_1 = arith.constant 0 : i32
    return %c0_i32, %c0_i32_0 : i32, i32
  }
  func.func @transform_3(%arg0: i32, %arg1: i32) -> (i32, i32) {
    %c0_i32 = arith.constant 0 : i32
    %c0_i32_0 = arith.constant 0 : i32
    %c0_i32_1 = arith.constant 0 : i32
    return %c0_i32, %c0_i32_0 : i32, i32
  }
  func.func @transform_4(%arg0: i32, %arg1: i32) -> (i32, i32, i32) {
    %c0_i32 = arith.constant 0 : i32
    %c0_i32_0 = arith.constant 0 : i32
    return %arg0, %arg1, %c0_i32 : i32, i32, i32
  }
}

module attributes {stable_mosaic.version = 11 : i64} {
  func.func @_conv_kernel(%arg0: i32, %arg1: i32, %arg2: memref<1x8x32xbf16, #tpu.memory_space<vmem>>, %arg3: memref<1x8x16xbf16, #tpu.memory_space<vmem>>, %arg4: memref<144x32xbf16, #tpu.memory_space<vmem>>, %arg5: memref<1x32xf32, #tpu.memory_space<vmem>>, %arg6: memref<1x32xf32, #tpu.memory_space<vmem>>, %arg7: memref<1x2x32xf32, #tpu.memory_space<vmem>>, %arg8: memref<1x8x32xbf16, #tpu.memory_space<vmem>>) attributes {dimension_semantics = [#tpu.dimension_semantics<parallel>, #tpu.dimension_semantics<parallel>], iteration_bounds = array<i64: 2, 1>, scalar_prefetch = 0 : i64, scratch_operands = 0 : i64, tpu.core_type = #tpu.core_type<tc>, window_params = [{transform_indices = @transform_0, window_bounds = array<i64: 1, 8, 32>}, {transform_indices = @transform_1, window_bounds = array<i64: 1, 8, 16>}, {pipeline_mode = #tpu.pipeline_mode<synchronous>, transform_indices = @transform_2, window_bounds = array<i64: 144, 32>}, {pipeline_mode = #tpu.pipeline_mode<synchronous>, transform_indices = @transform_3, window_bounds = array<i64: 1, 32>}, {pipeline_mode = #tpu.pipeline_mode<synchronous>, transform_indices = @transform_4, window_bounds = array<i64: 1, 32>}, {transform_indices = @transform_5, window_bounds = array<i64: 1, 2, 32>}, {transform_indices = @transform_6, window_bounds = array<i64: 1, 8, 32>}]} {
    %c0 = arith.constant 0 : index
    %c0_0 = arith.constant 0 : index
    %c0_1 = arith.constant 0 : index
    %0 = vector.load %arg2[%c0, %c0_0, %c0_1] : memref<1x8x32xbf16, #tpu.memory_space<vmem>>, vector<1x8x32xbf16>
    %1 = vector.shape_cast %0 : vector<1x8x32xbf16> to vector<8x32xbf16>
    %2 = arith.extf %1 : vector<8x32xbf16> to vector<8x32xf32>
    %c0_2 = arith.constant 0 : index
    %c0_3 = arith.constant 0 : index
    %c0_4 = arith.constant 0 : index
    %3 = vector.load %arg3[%c0_2, %c0_3, %c0_4] : memref<1x8x16xbf16, #tpu.memory_space<vmem>>, vector<1x8x16xbf16>
    %4 = vector.shape_cast %3 : vector<1x8x16xbf16> to vector<8x16xbf16>
    %5 = arith.extf %4 : vector<8x16xbf16> to vector<8x16xf32>
    %6 = tpu.concatenate %2, %5 in 1 : vector<8x32xf32>, vector<8x16xf32> -> vector<8x48xf32>
    %cst = arith.constant 0.000000e+00 : f32
    %7 = vector.broadcast %cst : f32 to vector<1x48xf32>
    %8 = tpu.concatenate %7, %6, %7 in 0 : vector<1x48xf32>, vector<8x48xf32>, vector<1x48xf32> -> vector<10x48xf32>
    %9 = arith.truncf %8 : vector<10x48xf32> to vector<10x48xbf16>
    %10 = vector.extract_strided_slice %9 {offsets = [0, 0], sizes = [8, 48], strides = [1, 1]} : vector<10x48xbf16> to vector<8x48xbf16>
    %11 = vector.extract_strided_slice %9 {offsets = [1, 0], sizes = [8, 48], strides = [1, 1]} : vector<10x48xbf16> to vector<8x48xbf16>
    %12 = vector.extract_strided_slice %9 {offsets = [2, 0], sizes = [8, 48], strides = [1, 1]} : vector<10x48xbf16> to vector<8x48xbf16>
    %13 = tpu.concatenate %10, %11, %12 in 1 : vector<8x48xbf16>, vector<8x48xbf16>, vector<8x48xbf16> -> vector<8x144xbf16>
    %c0_5 = arith.constant 0 : index
    %c0_6 = arith.constant 0 : index
    %14 = vector.load %arg4[%c0_5, %c0_6] : memref<144x32xbf16, #tpu.memory_space<vmem>>, vector<144x32xbf16>
    %cst_7 = arith.constant dense<0.000000e+00> : vector<8x32xf32>
    %15 = tpu.matmul %13, %14, %cst_7 {dimension_numbers = #tpu.dot_dimension_numbers<[1], [0], [0], [1], [0, 0, 1, 1], [], []>} : vector<8x144xbf16>, vector<144x32xbf16>, vector<8x32xf32> -> vector<8x32xf32>
    %c0_8 = arith.constant 0 : index
    %c0_9 = arith.constant 0 : index
    %16 = vector.load %arg5[%c0_8, %c0_9] : memref<1x32xf32, #tpu.memory_space<vmem>>, vector<1x32xf32>
    %17 = vector.broadcast %16 : vector<1x32xf32> to vector<8x32xf32>
    %18 = arith.addf %15, %17 : vector<8x32xf32>
    %c0_10 = arith.constant 0 : index
    %c0_11 = arith.constant 0 : index
    %19 = vector.load %arg6[%c0_10, %c0_11] : memref<1x32xf32, #tpu.memory_space<vmem>>, vector<1x32xf32>
    %20 = arith.mulf %18, %18 : vector<8x32xf32>
    %cst_12 = arith.constant dense<0.000000e+00> : vector<8xf32>
    %21 = vector.multi_reduction <add>, %20, %cst_12 [1] : vector<8x32xf32> to vector<8xf32>
    %22 = vector.shape_cast %21 : vector<8xf32> to vector<8x1xf32>
    %23 = math.sqrt %22 : vector<8x1xf32>
    %cst_13 = arith.constant 9.99999996E-13 : f32
    %24 = vector.broadcast %cst_13 : f32 to vector<8x1xf32>
    %25 = arith.maximumf %23, %24 : vector<8x1xf32>
    %26 = vector.broadcast %25 : vector<8x1xf32> to vector<8x32xf32>
    %27 = arith.divf %18, %26 : vector<8x32xf32>
    %28 = vector.broadcast %19 : vector<1x32xf32> to vector<8x32xf32>
    %29 = arith.mulf %27, %28 : vector<8x32xf32>
    %cst_14 = arith.constant 5.65685415 : f32
    %30 = vector.broadcast %cst_14 : f32 to vector<8x32xf32>
    %31 = arith.mulf %29, %30 : vector<8x32xf32>
    %c0_15 = arith.constant 0 : index
    %c0_16 = arith.constant 0 : index
    %c0_17 = arith.constant 0 : index
    %32 = vector.load %arg7[%c0_15, %c0_16, %c0_17] : memref<1x2x32xf32, #tpu.memory_space<vmem>>, vector<1x2x32xf32>
    %33 = vector.shape_cast %32 : vector<1x2x32xf32> to vector<2x32xf32>
    %34 = vector.extract_strided_slice %33 {offsets = [0, 0], sizes = [1, 32], strides = [1, 1]} : vector<2x32xf32> to vector<1x32xf32>
    %cst_18 = arith.constant 1.000000e+00 : f32
    %35 = vector.broadcast %cst_18 : f32 to vector<1x32xf32>
    %36 = arith.addf %34, %35 : vector<1x32xf32>
    %37 = vector.broadcast %36 : vector<1x32xf32> to vector<8x32xf32>
    %38 = arith.mulf %31, %37 : vector<8x32xf32>
    %39 = vector.extract_strided_slice %33 {offsets = [1, 0], sizes = [1, 32], strides = [1, 1]} : vector<2x32xf32> to vector<1x32xf32>
    %40 = vector.broadcast %39 : vector<1x32xf32> to vector<8x32xf32>
    %41 = arith.addf %38, %40 : vector<8x32xf32>
    %42 = arith.negf %41 : vector<8x32xf32>
    %43 = math.exp %42 : vector<8x32xf32>
    %cst_19 = arith.constant 1.000000e+00 : f32
    %44 = vector.broadcast %cst_19 : f32 to vector<8x32xf32>
    %45 = arith.addf %44, %43 : vector<8x32xf32>
    %46 = arith.divf %44, %45 : vector<8x32xf32>
    %47 = arith.mulf %41, %46 : vector<8x32xf32>
    %48 = arith.truncf %47 : vector<8x32xf32> to vector<8x32xbf16>
    %c0_20 = arith.constant 0 : index
    %c0_21 = arith.constant 0 : index
    %c0_22 = arith.constant 0 : index
    %49 = vector.load %arg8[%c0_20, %c0_21, %c0_22] : memref<1x8x32xbf16, #tpu.memory_space<vmem>>, vector<1x8x32xbf16>
    %50 = vector.shape_cast %49 : vector<1x8x32xbf16> to vector<8x32xbf16>
    %51 = vector.shape_cast %48 : vector<8x32xbf16> to vector<1x8x32xbf16>
    tpu.vector_store %arg8[%c0_20, %c0_21, %c0_22], %51 {strides = array<i32>} : memref<1x8x32xbf16, #tpu.memory_space<vmem>>, vector<1x8x32xbf16>,
    return
  }
  func.func @transform_0(%arg0: i32, %arg1: i32) -> (i32, i32, i32) {
    %c0_i32 = arith.constant 0 : i32
    %c0_i32_0 = arith.constant 0 : i32
    %c0_i32_1 = arith.constant 0 : i32
    return %arg0, %c0_i32, %c0_i32_0 : i32, i32, i32
  }
  func.func @transform_1(%arg0: i32, %arg1: i32) -> (i32, i32, i32) {
    %c0_i32 = arith.constant 0 : i32
    %c0_i32_0 = arith.constant 0 : i32
    %c0_i32_1 = arith.constant 0 : i32
    return %arg0, %c0_i32, %c0_i32_0 : i32, i32, i32
  }
  func.func @transform_2(%arg0: i32, %arg1: i32) -> (i32, i32) {
    %c0_i32 = arith.constant 0 : i32
    %c0_i32_0 = arith.constant 0 : i32
    %c0_i32_1 = arith.constant 0 : i32
    return %c0_i32, %c0_i32_0 : i32, i32
  }
  func.func @transform_3(%arg0: i32, %arg1: i32) -> (i32, i32) {
    %c0_i32 = arith.constant 0 : i32
    %c0_i32_0 = arith.constant 0 : i32
    %c0_i32_1 = arith.constant 0 : i32
    return %c0_i32, %c0_i32_0 : i32, i32
  }
  func.func @transform_4(%arg0: i32, %arg1: i32) -> (i32, i32) {
    %c0_i32 = arith.constant 0 : i32
    %c0_i32_0 = arith.constant 0 : i32
    %c0_i32_1 = arith.constant 0 : i32
    return %c0_i32, %c0_i32_0 : i32, i32
  }
  func.func @transform_5(%arg0: i32, %arg1: i32) -> (i32, i32, i32) {
    %c0_i32 = arith.constant 0 : i32
    %c0_i32_0 = arith.constant 0 : i32
    %c0_i32_1 = arith.constant 0 : i32
    return %arg0, %c0_i32, %c0_i32_0 : i32, i32, i32
  }
  func.func @transform_6(%arg0: i32, %arg1: i32) -> (i32, i32, i32) {
    %c0_i32 = arith.constant 0 : i32
    %c0_i32_0 = arith.constant 0 : i32
    return %arg0, %arg1, %c0_i32 : i32, i32, i32
  }
}

module attributes {stable_mosaic.version = 11 : i64} {
  func.func @_conv_kernel(%arg0: i32, %arg1: i32, %arg2: memref<1x8x128xbf16, #tpu.memory_space<vmem>>, %arg3: memref<128x32xbf16, #tpu.memory_space<vmem>>, %arg4: memref<1x32xf32, #tpu.memory_space<vmem>>, %arg5: memref<1x32xf32, #tpu.memory_space<vmem>>, %arg6: memref<1x8x32xbf16, #tpu.memory_space<vmem>>) attributes {dimension_semantics = [#tpu.dimension_semantics<parallel>, #tpu.dimension_semantics<parallel>], iteration_bounds = array<i64: 2, 1>, scalar_prefetch = 0 : i64, scratch_operands = 0 : i64, tpu.core_type = #tpu.core_type<tc>, window_params = [{transform_indices = @transform_0, window_bounds = array<i64: 1, 8, 128>}, {pipeline_mode = #tpu.pipeline_mode<synchronous>, transform_indices = @transform_1, window_bounds = array<i64: 128, 32>}, {pipeline_mode = #tpu.pipeline_mode<synchronous>, transform_indices = @transform_2, window_bounds = array<i64: 1, 32>}, {pipeline_mode = #tpu.pipeline_mode<synchronous>, transform_indices = @transform_3, window_bounds = array<i64: 1, 32>}, {transform_indices = @transform_4, window_bounds = array<i64: 1, 8, 32>}]} {
    %c0 = arith.constant 0 : index
    %c0_0 = arith.constant 0 : index
    %c0_1 = arith.constant 0 : index
    %0 = vector.load %arg2[%c0, %c0_0, %c0_1] : memref<1x8x128xbf16, #tpu.memory_space<vmem>>, vector<1x8x128xbf16>
    %1 = vector.shape_cast %0 : vector<1x8x128xbf16> to vector<8x128xbf16>
    %2 = arith.extf %1 : vector<8x128xbf16> to vector<8x128xf32>
    %3 = arith.truncf %2 : vector<8x128xf32> to vector<8x128xbf16>
    %c0_2 = arith.constant 0 : index
    %c0_3 = arith.constant 0 : index
    %4 = vector.load %arg3[%c0_2, %c0_3] : memref<128x32xbf16, #tpu.memory_space<vmem>>, vector<128x32xbf16>
    %cst = arith.constant dense<0.000000e+00> : vector<8x32xf32>
    %5 = tpu.matmul %3, %4, %cst {dimension_numbers = #tpu.dot_dimension_numbers<[1], [0], [0], [1], [0, 0, 1, 1], [], []>} : vector<8x128xbf16>, vector<128x32xbf16>, vector<8x32xf32> -> vector<8x32xf32>
    %c0_4 = arith.constant 0 : index
    %c0_5 = arith.constant 0 : index
    %6 = vector.load %arg4[%c0_4, %c0_5] : memref<1x32xf32, #tpu.memory_space<vmem>>, vector<1x32xf32>
    %7 = vector.broadcast %6 : vector<1x32xf32> to vector<8x32xf32>
    %8 = arith.addf %5, %7 : vector<8x32xf32>
    %c0_6 = arith.constant 0 : index
    %c0_7 = arith.constant 0 : index
    %9 = vector.load %arg5[%c0_6, %c0_7] : memref<1x32xf32, #tpu.memory_space<vmem>>, vector<1x32xf32>
    %10 = arith.mulf %8, %8 : vector<8x32xf32>
    %cst_8 = arith.constant dense<0.000000e+00> : vector<8xf32>
    %11 = vector.multi_reduction <add>, %10, %cst_8 [1] : vector<8x32xf32> to vector<8xf32>
    %12 = vector.shape_cast %11 : vector<8xf32> to vector<8x1xf32>
    %13 = math.sqrt %12 : vector<8x1xf32>
    %cst_9 = arith.constant 9.99999996E-13 : f32
    %14 = vector.broadcast %cst_9 : f32 to vector<8x1xf32>
    %15 = arith.maximumf %13, %14 : vector<8x1xf32>
    %16 = vector.broadcast %15 : vector<8x1xf32> to vector<8x32xf32>
    %17 = arith.divf %8, %16 : vector<8x32xf32>
    %18 = vector.broadcast %9 : vector<1x32xf32> to vector<8x32xf32>
    %19 = arith.mulf %17, %18 : vector<8x32xf32>
    %cst_10 = arith.constant 5.65685415 : f32
    %20 = vector.broadcast %cst_10 : f32 to vector<8x32xf32>
    %21 = arith.mulf %19, %20 : vector<8x32xf32>
    %22 = arith.truncf %21 : vector<8x32xf32> to vector<8x32xbf16>
    %c0_11 = arith.constant 0 : index
    %c0_12 = arith.constant 0 : index
    %c0_13 = arith.constant 0 : index
    %23 = vector.load %arg6[%c0_11, %c0_12, %c0_13] : memref<1x8x32xbf16, #tpu.memory_space<vmem>>, vector<1x8x32xbf16>
    %24 = vector.shape_cast %23 : vector<1x8x32xbf16> to vector<8x32xbf16>
    %25 = vector.shape_cast %22 : vector<8x32xbf16> to vector<1x8x32xbf16>
    tpu.vector_store %arg6[%c0_11, %c0_12, %c0_13], %25 {strides = array<i32>} : memref<1x8x32xbf16, #tpu.memory_space<vmem>>, vector<1x8x32xbf16>,
    return
  }
  func.func @transform_0(%arg0: i32, %arg1: i32) -> (i32, i32, i32) {
    %c0_i32 = arith.constant 0 : i32
    %c0_i32_0 = arith.constant 0 : i32
    %c0_i32_1 = arith.constant 0 : i32
    return %arg0, %c0_i32, %c0_i32_0 : i32, i32, i32
  }
  func.func @transform_1(%arg0: i32, %arg1: i32) -> (i32, i32) {
    %c0_i32 = arith.constant 0 : i32
    %c0_i32_0 = arith.constant 0 : i32
    %c0_i32_1 = arith.constant 0 : i32
    return %c0_i32, %c0_i32_0 : i32, i32
  }
  func.func @transform_2(%arg0: i32, %arg1: i32) -> (i32, i32) {
    %c0_i32 = arith.constant 0 : i32
    %c0_i32_0 = arith.constant 0 : i32
    %c0_i32_1 = arith.constant 0 : i32
    return %c0_i32, %c0_i32_0 : i32, i32
  }
  func.func @transform_3(%arg0: i32, %arg1: i32) -> (i32, i32) {
    %c0_i32 = arith.constant 0 : i32
    %c0_i32_0 = arith.constant 0 : i32
    %c0_i32_1 = arith.constant 0 : i32
    return %c0_i32, %c0_i32_0 : i32, i32
  }
  func.func @transform_4(%arg0: i32, %arg1: i32) -> (i32, i32, i32) {
    %c0_i32 = arith.constant 0 : i32
    %c0_i32_0 = arith.constant 0 : i32
    return %arg0, %arg1, %c0_i32 : i32, i32, i32
  }
}

module attributes {stable_mosaic.version = 11 : i64} {
  func.func @_conv_kernel(%arg0: i32, %arg1: i32, %arg2: memref<1x16x32xbf16, #tpu.memory_space<vmem>>, %arg3: memref<96x16xbf16, #tpu.memory_space<vmem>>, %arg4: memref<1x16xf32, #tpu.memory_space<vmem>>, %arg5: memref<1x16x16xbf16, #tpu.memory_space<vmem>>) attributes {dimension_semantics = [#tpu.dimension_semantics<parallel>, #tpu.dimension_semantics<parallel>], iteration_bounds = array<i64: 2, 1>, scalar_prefetch = 0 : i64, scratch_operands = 0 : i64, tpu.core_type = #tpu.core_type<tc>, window_params = [{transform_indices = @transform_0, window_bounds = array<i64: 1, 16, 32>}, {pipeline_mode = #tpu.pipeline_mode<synchronous>, transform_indices = @transform_1, window_bounds = array<i64: 96, 16>}, {pipeline_mode = #tpu.pipeline_mode<synchronous>, transform_indices = @transform_2, window_bounds = array<i64: 1, 16>}, {transform_indices = @transform_3, window_bounds = array<i64: 1, 16, 16>}]} {
    %c0 = arith.constant 0 : index
    %c0_0 = arith.constant 0 : index
    %c0_1 = arith.constant 0 : index
    %0 = vector.load %arg2[%c0, %c0_0, %c0_1] : memref<1x16x32xbf16, #tpu.memory_space<vmem>>, vector<1x16x32xbf16>
    %1 = vector.shape_cast %0 : vector<1x16x32xbf16> to vector<16x32xbf16>
    %2 = arith.extf %1 : vector<16x32xbf16> to vector<16x32xf32>
    %cst = arith.constant 0.000000e+00 : f32
    %3 = vector.broadcast %cst : f32 to vector<1x32xf32>
    %4 = tpu.concatenate %3, %2, %3 in 0 : vector<1x32xf32>, vector<16x32xf32>, vector<1x32xf32> -> vector<18x32xf32>
    %5 = arith.truncf %4 : vector<18x32xf32> to vector<18x32xbf16>
    %6 = vector.extract_strided_slice %5 {offsets = [0, 0], sizes = [16, 32], strides = [1, 1]} : vector<18x32xbf16> to vector<16x32xbf16>
    %7 = vector.extract_strided_slice %5 {offsets = [1, 0], sizes = [16, 32], strides = [1, 1]} : vector<18x32xbf16> to vector<16x32xbf16>
    %8 = vector.extract_strided_slice %5 {offsets = [2, 0], sizes = [16, 32], strides = [1, 1]} : vector<18x32xbf16> to vector<16x32xbf16>
    %9 = tpu.concatenate %6, %7, %8 in 1 : vector<16x32xbf16>, vector<16x32xbf16>, vector<16x32xbf16> -> vector<16x96xbf16>
    %c0_2 = arith.constant 0 : index
    %c0_3 = arith.constant 0 : index
    %10 = vector.load %arg3[%c0_2, %c0_3] : memref<96x16xbf16, #tpu.memory_space<vmem>>, vector<96x16xbf16>
    %cst_4 = arith.constant dense<0.000000e+00> : vector<16x16xf32>
    %11 = tpu.matmul %9, %10, %cst_4 {dimension_numbers = #tpu.dot_dimension_numbers<[1], [0], [0], [1], [0, 0, 1, 1], [], []>} : vector<16x96xbf16>, vector<96x16xbf16>, vector<16x16xf32> -> vector<16x16xf32>
    %c0_5 = arith.constant 0 : index
    %c0_6 = arith.constant 0 : index
    %12 = vector.load %arg4[%c0_5, %c0_6] : memref<1x16xf32, #tpu.memory_space<vmem>>, vector<1x16xf32>
    %13 = vector.broadcast %12 : vector<1x16xf32> to vector<16x16xf32>
    %14 = arith.addf %11, %13 : vector<16x16xf32>
    %15 = arith.truncf %14 : vector<16x16xf32> to vector<16x16xbf16>
    %c0_7 = arith.constant 0 : index
    %c0_8 = arith.constant 0 : index
    %c0_9 = arith.constant 0 : index
    %16 = vector.load %arg5[%c0_7, %c0_8, %c0_9] : memref<1x16x16xbf16, #tpu.memory_space<vmem>>, vector<1x16x16xbf16>
    %17 = vector.shape_cast %16 : vector<1x16x16xbf16> to vector<16x16xbf16>
    %18 = vector.shape_cast %15 : vector<16x16xbf16> to vector<1x16x16xbf16>
    tpu.vector_store %arg5[%c0_7, %c0_8, %c0_9], %18 {strides = array<i32>} : memref<1x16x16xbf16, #tpu.memory_space<vmem>>, vector<1x16x16xbf16>,
    return
  }
  func.func @transform_0(%arg0: i32, %arg1: i32) -> (i32, i32, i32) {
    %c0_i32 = arith.constant 0 : i32
    %c0_i32_0 = arith.constant 0 : i32
    %c0_i32_1 = arith.constant 0 : i32
    return %arg0, %c0_i32, %c0_i32_0 : i32, i32, i32
  }
  func.func @transform_1(%arg0: i32, %arg1: i32) -> (i32, i32) {
    %c0_i32 = arith.constant 0 : i32
    %c0_i32_0 = arith.constant 0 : i32
    %c0_i32_1 = arith.constant 0 : i32
    return %c0_i32, %c0_i32_0 : i32, i32
  }
  func.func @transform_2(%arg0: i32, %arg1: i32) -> (i32, i32) {
    %c0_i32 = arith.constant 0 : i32
    %c0_i32_0 = arith.constant 0 : i32
    %c0_i32_1 = arith.constant 0 : i32
    return %c0_i32, %c0_i32_0 : i32, i32
  }
  func.func @transform_3(%arg0: i32, %arg1: i32) -> (i32, i32, i32) {
    %c0_i32 = arith.constant 0 : i32
    %c0_i32_0 = arith.constant 0 : i32
    return %arg0, %arg1, %c0_i32 : i32, i32, i32
  }
}

module attributes {stable_mosaic.version = 11 : i64} {
  func.func @_conv_kernel(%arg0: i32, %arg1: i32, %arg2: memref<1x16x16xbf16, #tpu.memory_space<vmem>>, %arg3: memref<1x16x16xbf16, #tpu.memory_space<vmem>>, %arg4: memref<32x16xbf16, #tpu.memory_space<vmem>>, %arg5: memref<1x16xf32, #tpu.memory_space<vmem>>, %arg6: memref<1x16x16xbf16, #tpu.memory_space<vmem>>) attributes {dimension_semantics = [#tpu.dimension_semantics<parallel>, #tpu.dimension_semantics<parallel>], iteration_bounds = array<i64: 2, 1>, scalar_prefetch = 0 : i64, scratch_operands = 0 : i64, tpu.core_type = #tpu.core_type<tc>, window_params = [{transform_indices = @transform_0, window_bounds = array<i64: 1, 16, 16>}, {transform_indices = @transform_1, window_bounds = array<i64: 1, 16, 16>}, {pipeline_mode = #tpu.pipeline_mode<synchronous>, transform_indices = @transform_2, window_bounds = array<i64: 32, 16>}, {pipeline_mode = #tpu.pipeline_mode<synchronous>, transform_indices = @transform_3, window_bounds = array<i64: 1, 16>}, {transform_indices = @transform_4, window_bounds = array<i64: 1, 16, 16>}]} {
    %c0 = arith.constant 0 : index
    %c0_0 = arith.constant 0 : index
    %c0_1 = arith.constant 0 : index
    %0 = vector.load %arg2[%c0, %c0_0, %c0_1] : memref<1x16x16xbf16, #tpu.memory_space<vmem>>, vector<1x16x16xbf16>
    %1 = vector.shape_cast %0 : vector<1x16x16xbf16> to vector<16x16xbf16>
    %2 = arith.extf %1 : vector<16x16xbf16> to vector<16x16xf32>
    %c0_2 = arith.constant 0 : index
    %c0_3 = arith.constant 0 : index
    %c0_4 = arith.constant 0 : index
    %3 = vector.load %arg3[%c0_2, %c0_3, %c0_4] : memref<1x16x16xbf16, #tpu.memory_space<vmem>>, vector<1x16x16xbf16>
    %4 = vector.shape_cast %3 : vector<1x16x16xbf16> to vector<16x16xbf16>
    %5 = arith.extf %4 : vector<16x16xbf16> to vector<16x16xf32>
    %6 = tpu.concatenate %2, %5 in 1 : vector<16x16xf32>, vector<16x16xf32> -> vector<16x32xf32>
    %7 = arith.truncf %6 : vector<16x32xf32> to vector<16x32xbf16>
    %c0_5 = arith.constant 0 : index
    %c0_6 = arith.constant 0 : index
    %8 = vector.load %arg4[%c0_5, %c0_6] : memref<32x16xbf16, #tpu.memory_space<vmem>>, vector<32x16xbf16>
    %cst = arith.constant dense<0.000000e+00> : vector<16x16xf32>
    %9 = tpu.matmul %7, %8, %cst {dimension_numbers = #tpu.dot_dimension_numbers<[1], [0], [0], [1], [0, 0, 1, 1], [], []>} : vector<16x32xbf16>, vector<32x16xbf16>, vector<16x16xf32> -> vector<16x16xf32>
    %c0_7 = arith.constant 0 : index
    %c0_8 = arith.constant 0 : index
    %10 = vector.load %arg5[%c0_7, %c0_8] : memref<1x16xf32, #tpu.memory_space<vmem>>, vector<1x16xf32>
    %11 = vector.broadcast %10 : vector<1x16xf32> to vector<16x16xf32>
    %12 = arith.addf %9, %11 : vector<16x16xf32>
    %13 = arith.truncf %12 : vector<16x16xf32> to vector<16x16xbf16>
    %c0_9 = arith.constant 0 : index
    %c0_10 = arith.constant 0 : index
    %c0_11 = arith.constant 0 : index
    %14 = vector.load %arg6[%c0_9, %c0_10, %c0_11] : memref<1x16x16xbf16, #tpu.memory_space<vmem>>, vector<1x16x16xbf16>
    %15 = vector.shape_cast %14 : vector<1x16x16xbf16> to vector<16x16xbf16>
    %16 = vector.shape_cast %13 : vector<16x16xbf16> to vector<1x16x16xbf16>
    tpu.vector_store %arg6[%c0_9, %c0_10, %c0_11], %16 {strides = array<i32>} : memref<1x16x16xbf16, #tpu.memory_space<vmem>>, vector<1x16x16xbf16>,
    return
  }
  func.func @transform_0(%arg0: i32, %arg1: i32) -> (i32, i32, i32) {
    %c0_i32 = arith.constant 0 : i32
    %c0_i32_0 = arith.constant 0 : i32
    %c0_i32_1 = arith.constant 0 : i32
    return %arg0, %c0_i32, %c0_i32_0 : i32, i32, i32
  }
  func.func @transform_1(%arg0: i32, %arg1: i32) -> (i32, i32, i32) {
    %c0_i32 = arith.constant 0 : i32
    %c0_i32_0 = arith.constant 0 : i32
    %c0_i32_1 = arith.constant 0 : i32
    return %arg0, %c0_i32, %c0_i32_0 : i32, i32, i32
  }
  func.func @transform_2(%arg0: i32, %arg1: i32) -> (i32, i32) {
    %c0_i32 = arith.constant 0 : i32
    %c0_i32_0 = arith.constant 0 : i32
    %c0_i32_1 = arith.constant 0 : i32
    return %c0_i32, %c0_i32_0 : i32, i32
  }
  func.func @transform_3(%arg0: i32, %arg1: i32) -> (i32, i32) {
    %c0_i32 = arith.constant 0 : i32
    %c0_i32_0 = arith.constant 0 : i32
    %c0_i32_1 = arith.constant 0 : i32
    return %c0_i32, %c0_i32_0 : i32, i32
  }
  func.func @transform_4(%arg0: i32, %arg1: i32) -> (i32, i32, i32) {
    %c0_i32 = arith.constant 0 : i32
    %c0_i32_0 = arith.constant 0 : i32
    return %arg0, %arg1, %c0_i32 : i32, i32, i32
  }
}

module attributes {stable_mosaic.version = 11 : i64} {
  func.func @_conv_kernel(%arg0: i32, %arg1: i32, %arg2: memref<1x16x16xbf16, #tpu.memory_space<vmem>>, %arg3: memref<1x16x16xbf16, #tpu.memory_space<vmem>>, %arg4: memref<96x16xbf16, #tpu.memory_space<vmem>>, %arg5: memref<1x16xf32, #tpu.memory_space<vmem>>, %arg6: memref<1x16xf32, #tpu.memory_space<vmem>>, %arg7: memref<1x2x16xf32, #tpu.memory_space<vmem>>, %arg8: memref<1x16x16xbf16, #tpu.memory_space<vmem>>) attributes {dimension_semantics = [#tpu.dimension_semantics<parallel>, #tpu.dimension_semantics<parallel>], iteration_bounds = array<i64: 2, 1>, scalar_prefetch = 0 : i64, scratch_operands = 0 : i64, tpu.core_type = #tpu.core_type<tc>, window_params = [{transform_indices = @transform_0, window_bounds = array<i64: 1, 16, 16>}, {transform_indices = @transform_1, window_bounds = array<i64: 1, 16, 16>}, {pipeline_mode = #tpu.pipeline_mode<synchronous>, transform_indices = @transform_2, window_bounds = array<i64: 96, 16>}, {pipeline_mode = #tpu.pipeline_mode<synchronous>, transform_indices = @transform_3, window_bounds = array<i64: 1, 16>}, {pipeline_mode = #tpu.pipeline_mode<synchronous>, transform_indices = @transform_4, window_bounds = array<i64: 1, 16>}, {transform_indices = @transform_5, window_bounds = array<i64: 1, 2, 16>}, {transform_indices = @transform_6, window_bounds = array<i64: 1, 16, 16>}]} {
    %c0 = arith.constant 0 : index
    %c0_0 = arith.constant 0 : index
    %c0_1 = arith.constant 0 : index
    %0 = vector.load %arg2[%c0, %c0_0, %c0_1] : memref<1x16x16xbf16, #tpu.memory_space<vmem>>, vector<1x16x16xbf16>
    %1 = vector.shape_cast %0 : vector<1x16x16xbf16> to vector<16x16xbf16>
    %2 = arith.extf %1 : vector<16x16xbf16> to vector<16x16xf32>
    %c0_2 = arith.constant 0 : index
    %c0_3 = arith.constant 0 : index
    %c0_4 = arith.constant 0 : index
    %3 = vector.load %arg3[%c0_2, %c0_3, %c0_4] : memref<1x16x16xbf16, #tpu.memory_space<vmem>>, vector<1x16x16xbf16>
    %4 = vector.shape_cast %3 : vector<1x16x16xbf16> to vector<16x16xbf16>
    %5 = arith.extf %4 : vector<16x16xbf16> to vector<16x16xf32>
    %6 = tpu.concatenate %2, %5 in 1 : vector<16x16xf32>, vector<16x16xf32> -> vector<16x32xf32>
    %cst = arith.constant 0.000000e+00 : f32
    %7 = vector.broadcast %cst : f32 to vector<1x32xf32>
    %8 = tpu.concatenate %7, %6, %7 in 0 : vector<1x32xf32>, vector<16x32xf32>, vector<1x32xf32> -> vector<18x32xf32>
    %9 = arith.truncf %8 : vector<18x32xf32> to vector<18x32xbf16>
    %10 = vector.extract_strided_slice %9 {offsets = [0, 0], sizes = [16, 32], strides = [1, 1]} : vector<18x32xbf16> to vector<16x32xbf16>
    %11 = vector.extract_strided_slice %9 {offsets = [1, 0], sizes = [16, 32], strides = [1, 1]} : vector<18x32xbf16> to vector<16x32xbf16>
    %12 = vector.extract_strided_slice %9 {offsets = [2, 0], sizes = [16, 32], strides = [1, 1]} : vector<18x32xbf16> to vector<16x32xbf16>
    %13 = tpu.concatenate %10, %11, %12 in 1 : vector<16x32xbf16>, vector<16x32xbf16>, vector<16x32xbf16> -> vector<16x96xbf16>
    %c0_5 = arith.constant 0 : index
    %c0_6 = arith.constant 0 : index
    %14 = vector.load %arg4[%c0_5, %c0_6] : memref<96x16xbf16, #tpu.memory_space<vmem>>, vector<96x16xbf16>
    %cst_7 = arith.constant dense<0.000000e+00> : vector<16x16xf32>
    %15 = tpu.matmul %13, %14, %cst_7 {dimension_numbers = #tpu.dot_dimension_numbers<[1], [0], [0], [1], [0, 0, 1, 1], [], []>} : vector<16x96xbf16>, vector<96x16xbf16>, vector<16x16xf32> -> vector<16x16xf32>
    %c0_8 = arith.constant 0 : index
    %c0_9 = arith.constant 0 : index
    %16 = vector.load %arg5[%c0_8, %c0_9] : memref<1x16xf32, #tpu.memory_space<vmem>>, vector<1x16xf32>
    %17 = vector.broadcast %16 : vector<1x16xf32> to vector<16x16xf32>
    %18 = arith.addf %15, %17 : vector<16x16xf32>
    %c0_10 = arith.constant 0 : index
    %c0_11 = arith.constant 0 : index
    %19 = vector.load %arg6[%c0_10, %c0_11] : memref<1x16xf32, #tpu.memory_space<vmem>>, vector<1x16xf32>
    %20 = arith.mulf %18, %18 : vector<16x16xf32>
    %cst_12 = arith.constant dense<0.000000e+00> : vector<16xf32>
    %21 = vector.multi_reduction <add>, %20, %cst_12 [1] : vector<16x16xf32> to vector<16xf32>
    %22 = vector.shape_cast %21 : vector<16xf32> to vector<16x1xf32>
    %23 = math.sqrt %22 : vector<16x1xf32>
    %cst_13 = arith.constant 9.99999996E-13 : f32
    %24 = vector.broadcast %cst_13 : f32 to vector<16x1xf32>
    %25 = arith.maximumf %23, %24 : vector<16x1xf32>
    %26 = vector.broadcast %25 : vector<16x1xf32> to vector<16x16xf32>
    %27 = arith.divf %18, %26 : vector<16x16xf32>
    %28 = vector.broadcast %19 : vector<1x16xf32> to vector<16x16xf32>
    %29 = arith.mulf %27, %28 : vector<16x16xf32>
    %cst_14 = arith.constant 4.000000e+00 : f32
    %30 = vector.broadcast %cst_14 : f32 to vector<16x16xf32>
    %31 = arith.mulf %29, %30 : vector<16x16xf32>
    %c0_15 = arith.constant 0 : index
    %c0_16 = arith.constant 0 : index
    %c0_17 = arith.constant 0 : index
    %32 = vector.load %arg7[%c0_15, %c0_16, %c0_17] : memref<1x2x16xf32, #tpu.memory_space<vmem>>, vector<1x2x16xf32>
    %33 = vector.shape_cast %32 : vector<1x2x16xf32> to vector<2x16xf32>
    %34 = vector.extract_strided_slice %33 {offsets = [0, 0], sizes = [1, 16], strides = [1, 1]} : vector<2x16xf32> to vector<1x16xf32>
    %cst_18 = arith.constant 1.000000e+00 : f32
    %35 = vector.broadcast %cst_18 : f32 to vector<1x16xf32>
    %36 = arith.addf %34, %35 : vector<1x16xf32>
    %37 = vector.broadcast %36 : vector<1x16xf32> to vector<16x16xf32>
    %38 = arith.mulf %31, %37 : vector<16x16xf32>
    %39 = vector.extract_strided_slice %33 {offsets = [1, 0], sizes = [1, 16], strides = [1, 1]} : vector<2x16xf32> to vector<1x16xf32>
    %40 = vector.broadcast %39 : vector<1x16xf32> to vector<16x16xf32>
    %41 = arith.addf %38, %40 : vector<16x16xf32>
    %42 = arith.negf %41 : vector<16x16xf32>
    %43 = math.exp %42 : vector<16x16xf32>
    %cst_19 = arith.constant 1.000000e+00 : f32
    %44 = vector.broadcast %cst_19 : f32 to vector<16x16xf32>
    %45 = arith.addf %44, %43 : vector<16x16xf32>
    %46 = arith.divf %44, %45 : vector<16x16xf32>
    %47 = arith.mulf %41, %46 : vector<16x16xf32>
    %48 = arith.truncf %47 : vector<16x16xf32> to vector<16x16xbf16>
    %c0_20 = arith.constant 0 : index
    %c0_21 = arith.constant 0 : index
    %c0_22 = arith.constant 0 : index
    %49 = vector.load %arg8[%c0_20, %c0_21, %c0_22] : memref<1x16x16xbf16, #tpu.memory_space<vmem>>, vector<1x16x16xbf16>
    %50 = vector.shape_cast %49 : vector<1x16x16xbf16> to vector<16x16xbf16>
    %51 = vector.shape_cast %48 : vector<16x16xbf16> to vector<1x16x16xbf16>
    tpu.vector_store %arg8[%c0_20, %c0_21, %c0_22], %51 {strides = array<i32>} : memref<1x16x16xbf16, #tpu.memory_space<vmem>>, vector<1x16x16xbf16>,
    return
  }
  func.func @transform_0(%arg0: i32, %arg1: i32) -> (i32, i32, i32) {
    %c0_i32 = arith.constant 0 : i32
    %c0_i32_0 = arith.constant 0 : i32
    %c0_i32_1 = arith.constant 0 : i32
    return %arg0, %c0_i32, %c0_i32_0 : i32, i32, i32
  }
  func.func @transform_1(%arg0: i32, %arg1: i32) -> (i32, i32, i32) {
    %c0_i32 = arith.constant 0 : i32
    %c0_i32_0 = arith.constant 0 : i32
    %c0_i32_1 = arith.constant 0 : i32
    return %arg0, %c0_i32, %c0_i32_0 : i32, i32, i32
  }
  func.func @transform_2(%arg0: i32, %arg1: i32) -> (i32, i32) {
    %c0_i32 = arith.constant 0 : i32
    %c0_i32_0 = arith.constant 0 : i32
    %c0_i32_1 = arith.constant 0 : i32
    return %c0_i32, %c0_i32_0 : i32, i32
  }
  func.func @transform_3(%arg0: i32, %arg1: i32) -> (i32, i32) {
    %c0_i32 = arith.constant 0 : i32
    %c0_i32_0 = arith.constant 0 : i32
    %c0_i32_1 = arith.constant 0 : i32
    return %c0_i32, %c0_i32_0 : i32, i32
  }
  func.func @transform_4(%arg0: i32, %arg1: i32) -> (i32, i32) {
    %c0_i32 = arith.constant 0 : i32
    %c0_i32_0 = arith.constant 0 : i32
    %c0_i32_1 = arith.constant 0 : i32
    return %c0_i32, %c0_i32_0 : i32, i32
  }
  func.func @transform_5(%arg0: i32, %arg1: i32) -> (i32, i32, i32) {
    %c0_i32 = arith.constant 0 : i32
    %c0_i32_0 = arith.constant 0 : i32
    %c0_i32_1 = arith.constant 0 : i32
    return %arg0, %c0_i32, %c0_i32_0 : i32, i32, i32
  }
  func.func @transform_6(%arg0: i32, %arg1: i32) -> (i32, i32, i32) {
    %c0_i32 = arith.constant 0 : i32
    %c0_i32_0 = arith.constant 0 : i32
    return %arg0, %arg1, %c0_i32 : i32, i32, i32
  }
}

module attributes {stable_mosaic.version = 11 : i64} {
  func.func @_conv_kernel(%arg0: i32, %arg1: i32, %arg2: memref<1x16x16xbf16, #tpu.memory_space<vmem>>, %arg3: memref<48x16xbf16, #tpu.memory_space<vmem>>, %arg4: memref<1x16xf32, #tpu.memory_space<vmem>>, %arg5: memref<1x16x16xbf16, #tpu.memory_space<vmem>>) attributes {dimension_semantics = [#tpu.dimension_semantics<parallel>, #tpu.dimension_semantics<parallel>], iteration_bounds = array<i64: 2, 1>, scalar_prefetch = 0 : i64, scratch_operands = 0 : i64, tpu.core_type = #tpu.core_type<tc>, window_params = [{transform_indices = @transform_0, window_bounds = array<i64: 1, 16, 16>}, {pipeline_mode = #tpu.pipeline_mode<synchronous>, transform_indices = @transform_1, window_bounds = array<i64: 48, 16>}, {pipeline_mode = #tpu.pipeline_mode<synchronous>, transform_indices = @transform_2, window_bounds = array<i64: 1, 16>}, {transform_indices = @transform_3, window_bounds = array<i64: 1, 16, 16>}]} {
    %c0 = arith.constant 0 : index
    %c0_0 = arith.constant 0 : index
    %c0_1 = arith.constant 0 : index
    %0 = vector.load %arg2[%c0, %c0_0, %c0_1] : memref<1x16x16xbf16, #tpu.memory_space<vmem>>, vector<1x16x16xbf16>
    %1 = vector.shape_cast %0 : vector<1x16x16xbf16> to vector<16x16xbf16>
    %2 = arith.extf %1 : vector<16x16xbf16> to vector<16x16xf32>
    %cst = arith.constant 0.000000e+00 : f32
    %3 = vector.broadcast %cst : f32 to vector<1x16xf32>
    %4 = tpu.concatenate %3, %2, %3 in 0 : vector<1x16xf32>, vector<16x16xf32>, vector<1x16xf32> -> vector<18x16xf32>
    %5 = arith.truncf %4 : vector<18x16xf32> to vector<18x16xbf16>
    %6 = vector.extract_strided_slice %5 {offsets = [0, 0], sizes = [16, 16], strides = [1, 1]} : vector<18x16xbf16> to vector<16x16xbf16>
    %7 = vector.extract_strided_slice %5 {offsets = [1, 0], sizes = [16, 16], strides = [1, 1]} : vector<18x16xbf16> to vector<16x16xbf16>
    %8 = vector.extract_strided_slice %5 {offsets = [2, 0], sizes = [16, 16], strides = [1, 1]} : vector<18x16xbf16> to vector<16x16xbf16>
    %9 = tpu.concatenate %6, %7, %8 in 1 : vector<16x16xbf16>, vector<16x16xbf16>, vector<16x16xbf16> -> vector<16x48xbf16>
    %c0_2 = arith.constant 0 : index
    %c0_3 = arith.constant 0 : index
    %10 = vector.load %arg3[%c0_2, %c0_3] : memref<48x16xbf16, #tpu.memory_space<vmem>>, vector<48x16xbf16>
    %cst_4 = arith.constant dense<0.000000e+00> : vector<16x16xf32>
    %11 = tpu.matmul %9, %10, %cst_4 {dimension_numbers = #tpu.dot_dimension_numbers<[1], [0], [0], [1], [0, 0, 1, 1], [], []>} : vector<16x48xbf16>, vector<48x16xbf16>, vector<16x16xf32> -> vector<16x16xf32>
    %c0_5 = arith.constant 0 : index
    %c0_6 = arith.constant 0 : index
    %12 = vector.load %arg4[%c0_5, %c0_6] : memref<1x16xf32, #tpu.memory_space<vmem>>, vector<1x16xf32>
    %13 = vector.broadcast %12 : vector<1x16xf32> to vector<16x16xf32>
    %14 = arith.addf %11, %13 : vector<16x16xf32>
    %15 = arith.truncf %14 : vector<16x16xf32> to vector<16x16xbf16>
    %c0_7 = arith.constant 0 : index
    %c0_8 = arith.constant 0 : index
    %c0_9 = arith.constant 0 : index
    %16 = vector.load %arg5[%c0_7, %c0_8, %c0_9] : memref<1x16x16xbf16, #tpu.memory_space<vmem>>, vector<1x16x16xbf16>
    %17 = vector.shape_cast %16 : vector<1x16x16xbf16> to vector<16x16xbf16>
    %18 = vector.shape_cast %15 : vector<16x16xbf16> to vector<1x16x16xbf16>
    tpu.vector_store %arg5[%c0_7, %c0_8, %c0_9], %18 {strides = array<i32>} : memref<1x16x16xbf16, #tpu.memory_space<vmem>>, vector<1x16x16xbf16>,
    return
  }
  func.func @transform_0(%arg0: i32, %arg1: i32) -> (i32, i32, i32) {
    %c0_i32 = arith.constant 0 : i32
    %c0_i32_0 = arith.constant 0 : i32
    %c0_i32_1 = arith.constant 0 : i32
    return %arg0, %c0_i32, %c0_i32_0 : i32, i32, i32
  }
  func.func @transform_1(%arg0: i32, %arg1: i32) -> (i32, i32) {
    %c0_i32 = arith.constant 0 : i32
    %c0_i32_0 = arith.constant 0 : i32
    %c0_i32_1 = arith.constant 0 : i32
    return %c0_i32, %c0_i32_0 : i32, i32
  }
  func.func @transform_2(%arg0: i32, %arg1: i32) -> (i32, i32) {
    %c0_i32 = arith.constant 0 : i32
    %c0_i32_0 = arith.constant 0 : i32
    %c0_i32_1 = arith.constant 0 : i32
    return %c0_i32, %c0_i32_0 : i32, i32
  }
  func.func @transform_3(%arg0: i32, %arg1: i32) -> (i32, i32, i32) {
    %c0_i32 = arith.constant 0 : i32
    %c0_i32_0 = arith.constant 0 : i32
    return %arg0, %arg1, %c0_i32 : i32, i32, i32
  }
}

module attributes {stable_mosaic.version = 11 : i64} {
  func.func @_conv_kernel(%arg0: i32, %arg1: i32, %arg2: memref<1x16x16xbf16, #tpu.memory_space<vmem>>, %arg3: memref<16x2xbf16, #tpu.memory_space<vmem>>, %arg4: memref<1x2xf32, #tpu.memory_space<vmem>>, %arg5: memref<1x16x2xf32, #tpu.memory_space<vmem>>) attributes {dimension_semantics = [#tpu.dimension_semantics<parallel>, #tpu.dimension_semantics<parallel>], iteration_bounds = array<i64: 2, 1>, scalar_prefetch = 0 : i64, scratch_operands = 0 : i64, tpu.core_type = #tpu.core_type<tc>, window_params = [{transform_indices = @transform_0, window_bounds = array<i64: 1, 16, 16>}, {pipeline_mode = #tpu.pipeline_mode<synchronous>, transform_indices = @transform_1, window_bounds = array<i64: 16, 2>}, {pipeline_mode = #tpu.pipeline_mode<synchronous>, transform_indices = @transform_2, window_bounds = array<i64: 1, 2>}, {transform_indices = @transform_3, window_bounds = array<i64: 1, 16, 2>}]} {
    %c0 = arith.constant 0 : index
    %c0_0 = arith.constant 0 : index
    %c0_1 = arith.constant 0 : index
    %0 = vector.load %arg2[%c0, %c0_0, %c0_1] : memref<1x16x16xbf16, #tpu.memory_space<vmem>>, vector<1x16x16xbf16>
    %1 = vector.shape_cast %0 : vector<1x16x16xbf16> to vector<16x16xbf16>
    %2 = arith.extf %1 : vector<16x16xbf16> to vector<16x16xf32>
    %3 = arith.truncf %2 : vector<16x16xf32> to vector<16x16xbf16>
    %c0_2 = arith.constant 0 : index
    %c0_3 = arith.constant 0 : index
    %4 = vector.load %arg3[%c0_2, %c0_3] : memref<16x2xbf16, #tpu.memory_space<vmem>>, vector<16x2xbf16>
    %cst = arith.constant dense<0.000000e+00> : vector<16x2xf32>
    %5 = tpu.matmul %3, %4, %cst {dimension_numbers = #tpu.dot_dimension_numbers<[1], [0], [0], [1], [0, 0, 1, 1], [], []>} : vector<16x16xbf16>, vector<16x2xbf16>, vector<16x2xf32> -> vector<16x2xf32>
    %c0_4 = arith.constant 0 : index
    %c0_5 = arith.constant 0 : index
    %6 = vector.load %arg4[%c0_4, %c0_5] : memref<1x2xf32, #tpu.memory_space<vmem>>, vector<1x2xf32>
    %7 = vector.broadcast %6 : vector<1x2xf32> to vector<16x2xf32>
    %8 = arith.addf %5, %7 : vector<16x2xf32>
    %c0_6 = arith.constant 0 : index
    %c0_7 = arith.constant 0 : index
    %c0_8 = arith.constant 0 : index
    %9 = vector.load %arg5[%c0_6, %c0_7, %c0_8] : memref<1x16x2xf32, #tpu.memory_space<vmem>>, vector<1x16x2xf32>
    %10 = vector.shape_cast %9 : vector<1x16x2xf32> to vector<16x2xf32>
    %11 = vector.shape_cast %8 : vector<16x2xf32> to vector<1x16x2xf32>
    tpu.vector_store %arg5[%c0_6, %c0_7, %c0_8], %11 {strides = array<i32>} : memref<1x16x2xf32, #tpu.memory_space<vmem>>, vector<1x16x2xf32>,
    return
  }
  func.func @transform_0(%arg0: i32, %arg1: i32) -> (i32, i32, i32) {
    %c0_i32 = arith.constant 0 : i32
    %c0_i32_0 = arith.constant 0 : i32
    %c0_i32_1 = arith.constant 0 : i32
    return %arg0, %c0_i32, %c0_i32_0 : i32, i32, i32
  }
  func.func @transform_1(%arg0: i32, %arg1: i32) -> (i32, i32) {
    %c0_i32 = arith.constant 0 : i32
    %c0_i32_0 = arith.constant 0 : i32
    %c0_i32_1 = arith.constant 0 : i32
    return %c0_i32, %c0_i32_0 : i32, i32
  }
  func.func @transform_2(%arg0: i32, %arg1: i32) -> (i32, i32) {
    %c0_i32 = arith.constant 0 : i32
    %c0_i32_0 = arith.constant 0 : i32
    %c0_i32_1 = arith.constant 0 : i32
    return %c0_i32, %c0_i32_0 : i32, i32
  }
  func.func @transform_3(%arg0: i32, %arg1: i32) -> (i32, i32, i32) {
    %c0_i32 = arith.constant 0 : i32
    %c0_i32_0 = arith.constant 0 : i32
    return %arg0, %arg1, %c0_i32 : i32, i32, i32
  }
}

module attributes {stable_mosaic.version = 11 : i64} {
  func.func @_wmse_kernel(%arg0: i32, %arg1: memref<1x16x2xf32, #tpu.memory_space<vmem>>, %arg2: memref<1x16x2xf32, #tpu.memory_space<vmem>>, %arg3: memref<1x1x1xf32, #tpu.memory_space<vmem>>, %arg4: memref<1x1x1xf32, #tpu.memory_space<vmem>>) attributes {dimension_semantics = [#tpu.dimension_semantics<parallel>], iteration_bounds = array<i64: 2>, scalar_prefetch = 0 : i64, scratch_operands = 0 : i64, tpu.core_type = #tpu.core_type<tc>, window_params = [{transform_indices = @transform_0, window_bounds = array<i64: 1, 16, 2>}, {transform_indices = @transform_1, window_bounds = array<i64: 1, 16, 2>}, {transform_indices = @transform_2, window_bounds = array<i64: 1, 1, 1>}, {transform_indices = @transform_3, window_bounds = array<i64: 1, 1, 1>}]} {
    %c0 = arith.constant 0 : index
    %c0_0 = arith.constant 0 : index
    %c0_1 = arith.constant 0 : index
    %0 = vector.load %arg1[%c0, %c0_0, %c0_1] : memref<1x16x2xf32, #tpu.memory_space<vmem>>, vector<1x16x2xf32>
    %1 = vector.shape_cast %0 : vector<1x16x2xf32> to vector<16x2xf32>
    %c0_2 = arith.constant 0 : index
    %c0_3 = arith.constant 0 : index
    %c0_4 = arith.constant 0 : index
    %2 = vector.load %arg2[%c0_2, %c0_3, %c0_4] : memref<1x16x2xf32, #tpu.memory_space<vmem>>, vector<1x16x2xf32>
    %3 = vector.shape_cast %2 : vector<1x16x2xf32> to vector<16x2xf32>
    %4 = arith.subf %1, %3 : vector<16x2xf32>
    %5 = arith.mulf %4, %4 : vector<16x2xf32>
    %cst = arith.constant dense<0.000000e+00> : vector<16xf32>
    %6 = vector.multi_reduction <add>, %5, %cst [1] : vector<16x2xf32> to vector<16xf32>
    %7 = vector.shape_cast %6 : vector<16xf32> to vector<16x1xf32>
    %cst_5 = arith.constant 2.000000e+00 : f32
    %8 = vector.broadcast %cst_5 : f32 to vector<16x1xf32>
    %9 = arith.divf %7, %8 : vector<16x1xf32>
    %cst_6 = arith.constant dense<0.000000e+00> : vector<1xf32>
    %10 = vector.multi_reduction <add>, %9, %cst_6 [0] : vector<16x1xf32> to vector<1xf32>
    %11 = vector.shape_cast %10 : vector<1xf32> to vector<1x1xf32>
    %cst_7 = arith.constant 1.600000e+01 : f32
    %12 = vector.broadcast %cst_7 : f32 to vector<1x1xf32>
    %13 = arith.divf %11, %12 : vector<1x1xf32>
    %c0_8 = arith.constant 0 : index
    %c0_9 = arith.constant 0 : index
    %c0_10 = arith.constant 0 : index
    %14 = vector.load %arg3[%c0_8, %c0_9, %c0_10] : memref<1x1x1xf32, #tpu.memory_space<vmem>>, vector<1x1x1xf32>
    %15 = vector.shape_cast %14 : vector<1x1x1xf32> to vector<1x1xf32>
    %16 = arith.mulf %13, %15 : vector<1x1xf32>
    %c0_11 = arith.constant 0 : index
    %c0_12 = arith.constant 0 : index
    %c0_13 = arith.constant 0 : index
    %17 = vector.load %arg4[%c0_11, %c0_12, %c0_13] : memref<1x1x1xf32, #tpu.memory_space<vmem>>, vector<1x1x1xf32>
    %18 = vector.shape_cast %17 : vector<1x1x1xf32> to vector<1x1xf32>
    %19 = vector.shape_cast %16 : vector<1x1xf32> to vector<1x1x1xf32>
    tpu.vector_store %arg4[%c0_11, %c0_12, %c0_13], %19 {strides = array<i32>} : memref<1x1x1xf32, #tpu.memory_space<vmem>>, vector<1x1x1xf32>,
    return
  }
  func.func @transform_0(%arg0: i32) -> (i32, i32, i32) {
    %c0_i32 = arith.constant 0 : i32
    %c0_i32_0 = arith.constant 0 : i32
    %c0_i32_1 = arith.constant 0 : i32
    return %arg0, %c0_i32, %c0_i32_0 : i32, i32, i32
  }
  func.func @transform_1(%arg0: i32) -> (i32, i32, i32) {
    %c0_i32 = arith.constant 0 : i32
    %c0_i32_0 = arith.constant 0 : i32
    %c0_i32_1 = arith.constant 0 : i32
    return %arg0, %c0_i32, %c0_i32_0 : i32, i32, i32
  }
  func.func @transform_2(%arg0: i32) -> (i32, i32, i32) {
    %c0_i32 = arith.constant 0 : i32
    %c0_i32_0 = arith.constant 0 : i32
    %c0_i32_1 = arith.constant 0 : i32
    return %arg0, %c0_i32, %c0_i32_0 : i32, i32, i32
  }
  func.func @transform_3(%arg0: i32) -> (i32, i32, i32) {
    %c0_i32 = arith.constant 0 : i32
    %c0_i32_0 = arith.constant 0 : i32
    %c0_i32_1 = arith.constant 0 : i32
    return %arg0, %c0_i32, %c0_i32_0 : i32, i32, i32
  }
}

</mosaic_0001>

<bundles_post_ra>
// kernel: model_forward.66
= control target key start
LH: loop header
LB: loop body
LE: loop exit
PB: predicated region body
PF: predicated region fallthrough
CT: control target
= control target key end

     0   :  { %s707_s18 = smov 0   ;;  %s709_s19 = smov 0   ;;  %s769_s0 = inlined_call_operand.vmem [shape: bf16[2,16,16], index: 0, kind: input, shape index: {}]   ;;  %s770_s1 = inlined_call_operand.vmem [shape: bf16[48,16], index: 1, kind: input, shape index: {}]   ;;  %s771_s2 = inlined_call_operand.vmem [shape: f32[1,16], index: 2, kind: input, shape index: {}]   ;;  %s772_s3 = inlined_call_operand.vmem [shape: f32[1,16], index: 3, kind: input, shape index: {}]   ;;  %s773_s4 = inlined_call_operand.vmem [shape: f32[2,2,16], index: 4, kind: input, shape index: {}]   ;;  %s774_s5 = inlined_call_operand.vmem [shape: bf16[2,16,16], index: 5, kind: output, shape index: {}]  }
   0x1   :  { %s711_s20 = smov 0  }
   0x2 LB: > { %s27_s21 = sadd.s32 1, %s667_s19  ;;  %p562_p0 = scmp.ge.s32.totalorder %s671_s20, 1  ;;  %s671_s20 = sphi %s711_s20, %s15_s20   ;;  %s667_s19 = sphi %s709_s19, %s776_s19   ;;  %s663_s18 = sphi %s707_s18, %s775_s18  }
   0x3   : > { %p29_p1 = scmp.ge.s32.totalorder %s27_s21, 2  ;;  %p210_p2 = scmp.lt.s32.totalorder %s671_s20, 3 }
   0x5   : > { %s778_s21 = smov (%p29_p1, %s27_s21), 0  ;;  %p211_p3 = pnand %p562_p0, %p210_p2 }
   0x6   : > { %p246_p4 = scmp.lt.s32.totalorder (!%p211_p3), %s663_s18, 1  ;;  %v673_v0 = vmov (!%p211_p3), 0.0   ;;  %v630_v1 = vld [vmem:[%s770_s1] sm:$0xff] (!%p211_p3)   ;;  %v631_v2 = vld [vmem:[%s770_s1 + $0x8] sm:$0xff] (!%p211_p3)   ;;  %vm272_vm0 = vcmask (!%p211_p3), 1040384   ;;  %v632_v6 = vld [vmem:[%s770_s1 + $0x10] sm:$0xff] (!%p211_p3)   ;;  %v428_v51 = vlaneseq (!%p211_p3) }
   0x7   : > { %214 = sbr.rel (%p211_p3) target bundleno = 584 (0x248), region = 40  ;;  %592 = vmatprep.subr.bf16.mxu0 (!%p211_p3), %v673_v0  ;;  %vm674_vm1 = vmmov (!%p211_p3), 0   ;;  %vm283_vm2 = vsmask.f32 (!%p211_p3), 7424  ;;  %vm300_vm3 = vcmask (!%p211_p3), 1046528   ;;  %s675_s7 = smov (!%p211_p3), 16  }
   0x8   : > { %593 = vmatpush3.bf16.msra.mxu0 (!%p211_p3), %v630_v1  ;;  %598 = vmatprep.mubr.msk.bf16.mxu0 (!%p211_p3), %vm674_vm1, %v673_v0  ;;  %s676_s8 = smov (!%p211_p3), 32   ;;  %vm306_vm4 = vcmask (!%p211_p3), 130048   ;;  %vm309_vm5 = vcmask (!%p211_p3), 261120   ;;  %vm343_vm6 = vcmask (!%p211_p3), 392192   ;;  %v568_v28 = vld [vmem:[%s771_s2] ss:$0 sm:$0xff] (!%p211_p3) }
   0x9   : > { %594 = vmatprep.subr.bf16.mxu0 (!%p211_p3), %v673_v0  ;;  %v429_v54 = vshrl.u32 (!%p211_p3), %v428_v51, 7  ;;  %v573_v59 = vld [vmem:[%s772_s3] ss:$0 sm:$0xff] (!%p211_p3)  ;;  %vm462_vm11 = vcmask (!%p211_p3), 125952  }
   0xb   : > { %v430_v57 = vsub.s32 (!%p211_p3), 0, %v429_v54  ;;  %v436_v60 = vsub.s32 (!%p211_p3), 1, %v429_v54 }
   0xc   : > { %595 = vmatpush3.bf16.msra.mxu0 (!%p211_p3), %v631_v2 }
   0xd   : > { %596 = vmatprep.subr.bf16.mxu0 (!%p211_p3), %v673_v0 }
   0xe   : > { %s780_s18 = smov (!%p246_p4, %s663_s18), 1 }
   0xf   : > { %s580_s24 = sshll.u32 %s780_s18, 3  ;;  %s565_s11 = sshll.u32 %s780_s18, 1 }
  0x10   : > { %s250_s29 = scalar_lea.vmem %s769_s0, %s580_s24  ;;  %597 = vmatpush3.bf16.msra.mxu0 %v632_v6  ;;  %s254_s14 = scalar_lea.vmem %s773_s4, %s565_s11 }
  0x11   : > { %v585_v3 = vld [vmem:[%s250_s29] sm:$0xff]   ;;  %s263_s23 = scalar_lea.vmem %s774_s5, %s580_s24 }
  0x12   : > { %v586_v4 = vunpack.c.l.bf16 %v585_v3  ;;  %v587_v5 = vunpack.c.h.bf16 %v585_v3  ;;  %v426_v55 = vld [vmem:[%s254_s14] sm:$0x3] }
  0x13   : > { %v427_v56 = vadd.f32 1.0, %v426_v55  ;;  %v437_v1 = vrot.slane %v426_v55, %v436_v60 }
  0x14   : > { %v273_v7 = vrot.slane %v586_v4, 7  ;;  %v274_v8 = vrot.slane %v587_v5, 7 }
  0x15   : > { %v431_v62 = vrot.slane %v427_v56, %v430_v57 }
  0x16   : > { %v275_v9 = vsel %vm272_vm0, %v273_v7, %v274_v8  ;;  %v279_v10 = vsel %vm272_vm0, 0.0, %v273_v7  ;;  %v280_v11 = vsel %vm272_vm0, %v274_v8, 0.0 }
  0x17   : > { %v281_v12 = vpack.c.bf16 %v275_v9, %v279_v10  ;;  %v282_v13 = vpack.c.bf16 %v280_v11, %v280_v11 }
  0x19   : > { %v285_v14 = vshrl.u32 %v281_v12, 16  ;;  %v287_v15 = vshll.u32 %v281_v12, 16  ;;  %v292_v16 = vshll.u32 %v282_v13, 16  ;;  %v301_v20 = vrot.slane %v281_v12, 1 }
  0x1a   : > { %v302_v21 = vrot.slane %v282_v13, 1 }
  0x1b   : > { %v289_v17 = vrot.slane %v287_v15, 1  ;;  %v294_v18 = vrot.slane %v292_v16, 1 }
  0x1c   : > { %v303_v23 = vsel %vm300_vm3, %v301_v20, %v302_v21 }
  0x1d   : > { %v290_v19 = vor.u32 %v289_v17, %v285_v14 }
  0x1f   : > { %v295_v22 = vsel %vm283_vm2, %v290_v19, %v294_v18 }
  0x20   : > { %296 = vrot.lane.b32.xlu0 %v295_v22, %s675_s7 }
  0x24   : > { %304 = vrot.lane.b32.xlu0 %v303_v23, %s676_s8 }
  0x92   : > { %v297_v24 = vpop.permute.xlu0 %296 }
  0x93   : > { %v308_v25 = vsel %vm306_vm4, %v281_v12, %v297_v24 }
  0x96   : > { %v305_v26 = vpop.permute.xlu0 %304 }
  0x97   : > { %v311_v27 = vsel %vm309_vm5, %v308_v25, %v305_v26 }
  0x98   : > { %599 = vmatmul.mubr.msk.bf16.vlgmr.msra.gmra.mrb[0].mxu0 %vm343_vm6, %v311_v27 }
 0x16b   : > { %v380_v29 = vpop.f32.mrb[0].mxu0 }
 0x16c   : > { %v381_v30 = vadd.f32 %v568_v28, %v380_v29  ;;  %v600_v31 = vpop.f32.mrb[1].mxu0 }
 0x16d   : > { %v383_v32 = vpop.f32.mrb[2].mxu0 }
 0x16e   : > { %v384_v33 = vadd.f32 %v568_v28, %v383_v32  ;;  %v601_v34 = vpop.f32.mrb[3].mxu0  ;;  %v388_v35 = vmul.f32 %v381_v30, %v381_v30 }
 0x170   : > { %v390_v36 = vsel %vm306_vm4, %v388_v35, 0.0  ;;  %v389_v37 = vmul.f32 %v384_v33, %v384_v33 }
 0x171   : > { %391 = vadd.xlane.f32.xlu1 %v390_v36 }
 0x172   : > { %v393_v38 = vsel %vm306_vm4, %v389_v37, 0.0 }
 0x175   : > { %394 = vadd.xlane.f32.xlu1 %v393_v38 }
 0x1fe   : > { %v392_v39 = vpop.xlane.xlu1 %391 }
 0x1ff   : > { %633 = vrsqrt.f32 %v392_v39  ;;  %vm398_vm7 = vcmp.eq.f32.partialorder %v392_v39, inf  ;;  %v401_v43 = vand.u32 2147483648, %v392_v39  ;;  %vm400_vm8 = vcmp.eq.f32.partialorder %v392_v39, 0.0 }
 0x202   : > { %v395_v40 = vpop.xlane.xlu1 %394 }
 0x203   : > { %635 = vrsqrt.f32 %v395_v40  ;;  %vm405_vm9 = vcmp.eq.f32.partialorder %v395_v40, inf  ;;  %v408_v49 = vand.u32 2147483648, %v395_v40  ;;  %vm407_vm10 = vcmp.eq.f32.partialorder %v395_v40, 0.0 }
 0x209   : > { %v634_v41 = vpop.eup %633 }
 0x20a   : > { %v397_v42 = vmul.f32 %v634_v41, %v392_v39 }
 0x20c   : > { %v399_v44 = vsel %vm398_vm7, %v392_v39, %v397_v42 }
 0x20d   : > { %v636_v45 = vpop.eup %635  ;;  %v402_v46 = vsel %vm400_vm8, %v401_v43, %v399_v44 }
 0x20e   : > { %v410_v47 = vmax.f32 %v402_v46, 1e-12  ;;  %v404_v48 = vmul.f32 %v636_v45, %v395_v40 }
 0x210   : > { %637 = vrcp.f32 %v410_v47  ;;  %v406_v50 = vsel %vm405_vm9, %v395_v40, %v404_v48 }
 0x211   : > { %v409_v52 = vsel %vm407_vm10, %v408_v49, %v406_v50 }
 0x212   : > { %v411_v53 = vmax.f32 %v409_v52, 1e-12 }
 0x214   : > { %639 = vrcp.f32 %v411_v53 }
 0x21a   : > { %v638_v58 = vpop.eup %637 }
 0x21b   : > { %v413_v61 = vmul.f32 %v638_v58, %v381_v30 }
 0x21d   : > { %v422_v63 = vmul.f32 %v573_v59, %v413_v61 }
 0x21e   : > { %v640_v0 = vpop.eup %639 }
 0x21f   : > { %v424_v2 = vmul.f32 4.0, %v422_v63  ;;  %v415_v3 = vmul.f32 %v640_v0, %v384_v33 }
 0x221   : > { %v432_v4 = vmul.f32 %v431_v62, %v424_v2  ;;  %v423_v5 = vmul.f32 %v573_v59, %v415_v3 }
 0x223   : > { %v438_v6 = vadd.f32 %v437_v1, %v432_v4  ;;  %v425_v7 = vmul.f32 4.0, %v423_v5 }
 0x225   : > { %v574_v8 = vmul.f32 -1.442695, %v438_v6  ;;  %v433_v9 = vmul.f32 %v431_v62, %v425_v7 }
 0x227   : > { %641 = vpow2.f32 %v574_v8  ;;  %v439_v10 = vadd.f32 %v437_v1, %v433_v9 }
 0x229   : > { %v575_v11 = vmul.f32 -1.442695, %v439_v10 }
 0x22b   : > { %643 = vpow2.f32 %v575_v11 }
 0x231   : > { %v642_v12 = vpop.eup %641 }
 0x232   : > { %v446_v13 = vadd.f32 1.0, %v642_v12 }
 0x234   : > { %645 = vrcp.f32 %v446_v13 }
 0x235   : > { %v644_v14 = vpop.eup %643 }
 0x236   : > { %v447_v15 = vadd.f32 1.0, %v644_v14 }
 0x238   : > { %647 = vrcp.f32 %v447_v15 }
 0x23e   : > { %v646_v16 = vpop.eup %645 }
 0x23f   : > { %v452_v17 = vmul.f32 %v646_v16, %v438_v6 }
 0x241   : > { %v582_v18 = vpack.c.bf16 %v452_v17, %v452_v17 }
 0x242   : > { %v648_v19 = vpop.eup %647 }
 0x243   : > { %463 = vst.msk [vmem:[%s263_s23] sm:$0xf] %vm462_vm11, %v582_v18  ;;  %v453_v20 = vmul.f32 %v648_v19, %v439_v10 }
 0x245   : > { %v583_v21 = vpack.c.bf16 %v453_v20, %v453_v20 }
 0x247   : > { %464 = vst.msk [vmem:[%s263_s23 + $0x4] sm:$0xf] %vm462_vm11, %v583_v21 }
 0x248 PF: > { %s15_s20 = sadd.s32 1, %s671_s20   ;;  %s775_s18 = smov %s667_s19 }
 0x249   : > { %p12_p5 = scmp.ge.s32.totalorder %s15_s20, 4   ;;  %s776_s19 = smov %s778_s21 }
 0x24b   :  { %14 = sbr.rel (!%p12_p5) target bundleno = 2 (0x2), region = 73 }

// kernel: model_forward.65
= control target key start
LH: loop header
LB: loop body
LE: loop exit
PB: predicated region body
PF: predicated region fallthrough
CT: control target
= control target key end

     0   :  { %s552_s12 = smov 0   ;;  %s554_s13 = smov 0   ;;  %s600_s0 = inlined_call_operand.vmem [shape: f32[2,16,2], index: 0, kind: input, shape index: {}]   ;;  %s601_s1 = inlined_call_operand.vmem [shape: bf16[14,16], index: 1, kind: input, shape index: {}]   ;;  %s602_s2 = inlined_call_operand.vmem [shape: f32[1,16], index: 2, kind: input, shape index: {}]   ;;  %s603_s3 = inlined_call_operand.vmem [shape: bf16[2,16,16], index: 3, kind: output, shape index: {}]  }
   0x1   :  { %s556_s14 = smov 0  }
   0x2 LB: > { %s25_s15 = sadd.s32 1, %s518_s13  ;;  %p443_p0 = scmp.ge.s32.totalorder %s522_s14, 1  ;;  %s522_s14 = sphi %s556_s14, %s13_s14   ;;  %s518_s13 = sphi %s554_s13, %s605_s13   ;;  %s514_s12 = sphi %s552_s12, %s604_s12  }
   0x3   : > { %p27_p1 = scmp.ge.s32.totalorder %s25_s15, 2  ;;  %p151_p2 = scmp.lt.s32.totalorder %s522_s14, 3 }
   0x5   : > { %s607_s15 = smov (%p27_p1, %s25_s15), 0  ;;  %p152_p3 = pnand %p443_p0, %p151_p2 }
   0x6   : > { %p179_p4 = scmp.lt.s32.totalorder (!%p152_p3), %s514_s12, 1  ;;  %vm199_vm0 = vcmask (!%p152_p3), 1042432   ;;  %v499_v4 = vld [vmem:[%s601_s1] sm:$0x7f] (!%p152_p3)   ;;  %vm227_vm1 = vcmask (!%p152_p3), 1046528   ;;  %v524_v8 = vmov (!%p152_p3), 0.0  }
   0x7   : > { %155 = sbr.rel (%p152_p3) target bundleno = 371 (0x173), region = 32  ;;  %461 = vmatprep.subr.bf16.mxu0 (!%p152_p3), %v524_v8  ;;  %v304_v9 = vsel (!%p152_p3), %vm227_vm1, %v499_v4, 0  ;;  %vm245_vm2 = vcmask (!%p152_p3), 1045504   ;;  %vm210_vm3 = vsmask.f32 (!%p152_p3), 7424  ;;  %vm525_vm4 = vmmov (!%p152_p3), 0  }
   0x8   : > { %462 = vmatpush3.bf16.msra.mxu0 (!%p152_p3), %v304_v9  ;;  %463 = vmatprep.mubr.msk.bf16.mxu0 (!%p152_p3), %vm525_vm4, %v524_v8  ;;  %vm233_vm5 = vsmask.f32 (!%p152_p3), 6400  ;;  %vm251_vm6 = vsmask.f32 (!%p152_p3), 5376  ;;  %s526_s22 = smov (!%p152_p3), 4   ;;  %s527_s23 = smov (!%p152_p3), 8  }
   0x9   : > { %vm261_vm7 = vcmask (!%p152_p3), 1044480   ;;  %s528_s24 = smov (!%p152_p3), 2   ;;  %s529_s25 = smov (!%p152_p3), 6   ;;  %vm267_vm8 = vcmask (!%p152_p3), 15360   ;;  %vm270_vm9 = vcmask (!%p152_p3), 31744   ;;  %vm273_vm10 = vcmask (!%p152_p3), 48128  }
   0xa   : > { %s530_s26 = smov (!%p152_p3), 10   ;;  %s531_s27 = smov (!%p152_p3), 12   ;;  %vm276_vm11 = vcmask (!%p152_p3), 64512   ;;  %vm279_vm12 = vcmask (!%p152_p3), 80896   ;;  %vm282_vm13 = vcmask (!%p152_p3), 97280   ;;  %vm299_vm14 = vcmask (!%p152_p3), 113664  }
   0xb   : > { %v448_v55 = vld [vmem:[%s602_s2] ss:$0 sm:$0xff] (!%p152_p3)  ;;  %vm355_vm15 = vcmask (!%p152_p3), 125952  }
   0xe   : > { %s609_s12 = smov (!%p179_p4, %s514_s12), 1 }
   0xf   : > { %s455_s16 = sshll.u32 %s609_s12, 4  ;;  %s456_s30 = sshll.u32 %s609_s12, 3 }
  0x10   : > { %s183_s19 = scalar_lea.vmem %s600_s0, %s455_s16  ;;  %s192_s6 = scalar_lea.vmem %s603_s3, %s456_s30 }
  0x11   : > { %v195_v0 = vld [vmem:[%s183_s19] sm:$0xff]  ;;  %v196_v1 = vld [vmem:[%s183_s19 + $0x8] sm:$0xff] }
  0x12   : > { %v200_v2 = vrot.slane %v195_v0, 5  ;;  %v201_v3 = vrot.slane %v196_v1, 5 }
  0x14   : > { %v202_v5 = vsel %vm199_vm0, %v200_v2, %v201_v3  ;;  %v206_v6 = vsel %vm199_vm0, 0.0, %v200_v2  ;;  %v207_v7 = vsel %vm199_vm0, %v201_v3, 0.0 }
  0x15   : > { %v208_v10 = vpack.c.bf16 %v202_v5, %v206_v6  ;;  %v209_v11 = vpack.c.bf16 %v207_v7, %v207_v7 }
  0x17   : > { %v228_v12 = vrot.slane %v208_v10, 1  ;;  %v229_v13 = vrot.slane %v209_v11, 1  ;;  %v246_v14 = vrot.slane %v208_v10, 2  ;;  %v247_v15 = vrot.slane %v209_v11, 2 }
  0x18   : > { %v212_v16 = vshrl.u32 %v208_v10, 16  ;;  %v214_v17 = vshll.u32 %v208_v10, 16  ;;  %v219_v18 = vshll.u32 %v209_v11, 16  ;;  %v237_v19 = vshrl.u32 %v209_v11, 16 }
  0x19   : > { %v230_v20 = vsel %vm227_vm1, %v228_v12, %v229_v13  ;;  %v248_v21 = vsel %vm245_vm2, %v246_v14, %v247_v15  ;;  %v262_v36 = vrot.slane %v208_v10, 3  ;;  %v263_v37 = vrot.slane %v209_v11, 3 }
  0x1a   : > { %231 = vrot.lane.b32.xlu0 %v230_v20, %s526_s22  ;;  %249 = vrot.lane.b32.xlu1 %v248_v21, %s527_s23  ;;  %v216_v22 = vrot.slane %v214_v17, 1  ;;  %v221_v23 = vrot.slane %v219_v18, 1  ;;  %v234_v24 = vrot.slane %v212_v16, 1  ;;  %v235_v25 = vrot.slane %v214_v17, 2 }
  0x1b   : > { %v239_v26 = vrot.slane %v237_v19, 1  ;;  %v240_v27 = vrot.slane %v219_v18, 2  ;;  %v252_v28 = vrot.slane %v212_v16, 2  ;;  %v253_v29 = vrot.slane %v214_v17, 3 }
  0x1c   : > { %v217_v30 = vor.u32 %v216_v22, %v212_v16  ;;  %v236_v31 = vor.u32 %v235_v25, %v234_v24  ;;  %v255_v32 = vrot.slane %v237_v19, 2  ;;  %v256_v33 = vrot.slane %v219_v18, 3 }
  0x1d   : > { %v241_v34 = vor.u32 %v240_v27, %v239_v26  ;;  %v254_v35 = vor.u32 %v253_v29, %v252_v28  ;;  %v264_v42 = vsel %vm261_vm7, %v262_v36, %v263_v37 }
  0x1e   : > { %v222_v38 = vsel %vm210_vm3, %v217_v30, %v221_v23  ;;  %v257_v39 = vor.u32 %v256_v33, %v255_v32 }
  0x1f   : > { %223 = vrot.lane.b32.xlu0 %v222_v38, %s528_s24  ;;  %v242_v40 = vsel %vm233_vm5, %v236_v31, %v241_v34 }
  0x20   : > { %243 = vrot.lane.b32.xlu1 %v242_v40, %s529_s25  ;;  %v258_v41 = vsel %vm251_vm6, %v254_v35, %v257_v39 }
  0x23   : > { %259 = vrot.lane.b32.xlu0 %v258_v41, %s530_s26 }
  0x24   : > { %265 = vrot.lane.b32.xlu1 %v264_v42, %s531_s27 }
  0x8c   : > { %v232_v43 = vpop.permute.xlu0 %231  ;;  %v250_v44 = vpop.permute.xlu1 %249 }
  0x91   : > { %v224_v45 = vpop.permute.xlu0 %223 }
  0x92   : > { %v269_v46 = vsel %vm267_vm8, %v208_v10, %v224_v45  ;;  %v244_v47 = vpop.permute.xlu1 %243 }
  0x93   : > { %v272_v48 = vsel %vm270_vm9, %v269_v46, %v232_v43 }
  0x94   : > { %v275_v49 = vsel %vm273_vm10, %v272_v48, %v244_v47 }
  0x95   : > { %v278_v50 = vsel %vm276_vm11, %v275_v49, %v250_v44  ;;  %v260_v51 = vpop.permute.xlu0 %259 }
  0x96   : > { %v281_v52 = vsel %vm279_vm12, %v278_v50, %v260_v51  ;;  %v266_v53 = vpop.permute.xlu1 %265 }
  0x97   : > { %v284_v54 = vsel %vm282_vm13, %v281_v52, %v266_v53 }
  0x98   : > { %464 = vmatmul.mubr.msk.bf16.vlgmr.msra.gmra.mrb[0].mxu0 %vm299_vm14, %v284_v54 }
 0x16b   : > { %v340_v56 = vpop.f32.mrb[0].mxu0 }
 0x16c   : > { %v341_v57 = vadd.f32 %v448_v55, %v340_v56  ;;  %v465_v58 = vpop.f32.mrb[1].mxu0 }
 0x16d   : > { %v343_v59 = vpop.f32.mrb[2].mxu0 }
 0x16e   : > { %v457_v60 = vpack.c.bf16 %v341_v57, %v341_v57  ;;  %v344_v61 = vadd.f32 %v448_v55, %v343_v59  ;;  %v466_v62 = vpop.f32.mrb[3].mxu0 }
 0x170   : > { %356 = vst.msk [vmem:[%s192_s6] sm:$0xf] %vm355_vm15, %v457_v60  ;;  %v458_v63 = vpack.c.bf16 %v344_v61, %v344_v61 }
 0x172   : > { %357 = vst.msk [vmem:[%s192_s6 + $0x4] sm:$0xf] %vm355_vm15, %v458_v63 }
 0x173 PF: > { %s13_s14 = sadd.s32 1, %s522_s14   ;;  %s604_s12 = smov %s518_s13 }
 0x174   : > { %p10_p5 = scmp.ge.s32.totalorder %s13_s14, 4   ;;  %s605_s13 = smov %s607_s15 }
 0x176   :  { %12 = sbr.rel (!%p10_p5) target bundleno = 2 (0x2), region = 62 }

// kernel: model_forward.67
= control target key start
LH: loop header
LB: loop body
LE: loop exit
PB: predicated region body
PF: predicated region fallthrough
CT: control target
= control target key end

     0   :  { %s631_s15 = smov 0   ;;  %s633_s16 = smov 0   ;;  %s689_s0 = inlined_call_operand.vmem [shape: bf16[2,16,16], index: 0, kind: input, shape index: {}]   ;;  %s690_s1 = inlined_call_operand.vmem [shape: bf16[48,16], index: 1, kind: input, shape index: {}]   ;;  %s691_s2 = inlined_call_operand.vmem [shape: f32[1,16], index: 2, kind: input, shape index: {}]   ;;  %s692_s3 = inlined_call_operand.vmem [shape: f32[1,16], index: 3, kind: input, shape index: {}]   ;;  %s693_s4 = inlined_call_operand.vmem [shape: bf16[2,16,16], index: 4, kind: output, shape index: {}]  }
   0x1   :  { %s635_s17 = smov 0  }
   0x2 LB: > { %s26_s18 = sadd.s32 1, %s596_s16  ;;  %p492_p0 = scmp.ge.s32.totalorder %s600_s17, 1  ;;  %s600_s17 = sphi %s635_s17, %s14_s17   ;;  %s596_s16 = sphi %s633_s16, %s695_s16   ;;  %s592_s15 = sphi %s631_s15, %s694_s15  }
   0x3   : > { %p28_p1 = scmp.ge.s32.totalorder %s26_s18, 2  ;;  %p176_p2 = scmp.lt.s32.totalorder %s600_s17, 3 }
   0x5   : > { %s697_s18 = smov (%p28_p1, %s26_s18), 0  ;;  %p177_p3 = pnand %p492_p0, %p176_p2 }
   0x6   : > { %p206_p4 = scmp.lt.s32.totalorder (!%p177_p3), %s592_s15, 1  ;;  %v602_v0 = vmov (!%p177_p3), 0.0   ;;  %v559_v1 = vld [vmem:[%s690_s1] sm:$0xff] (!%p177_p3)   ;;  %v560_v2 = vld [vmem:[%s690_s1 + $0x8] sm:$0xff] (!%p177_p3)   ;;  %vm228_vm0 = vcmask (!%p177_p3), 1040384   ;;  %v561_v6 = vld [vmem:[%s690_s1 + $0x10] sm:$0xff] (!%p177_p3)  }
   0x7   : > { %180 = sbr.rel (%p177_p3) target bundleno = 580 (0x244), region = 36  ;;  %521 = vmatprep.subr.bf16.mxu0 (!%p177_p3), %v602_v0  ;;  %vm603_vm1 = vmmov (!%p177_p3), 0   ;;  %vm239_vm2 = vsmask.f32 (!%p177_p3), 7424  ;;  %vm256_vm3 = vcmask (!%p177_p3), 1046528   ;;  %s604_s29 = smov (!%p177_p3), 16  }
   0x8   : > { %522 = vmatpush3.bf16.msra.mxu0 (!%p177_p3), %v559_v1  ;;  %527 = vmatprep.mubr.msk.bf16.mxu0 (!%p177_p3), %vm603_vm1, %v602_v0  ;;  %s605_s30 = smov (!%p177_p3), 32   ;;  %vm262_vm4 = vcmask (!%p177_p3), 130048   ;;  %vm265_vm5 = vcmask (!%p177_p3), 261120   ;;  %vm299_vm6 = vcmask (!%p177_p3), 392192   ;;  %v497_v28 = vld [vmem:[%s691_s2] ss:$0 sm:$0xff] (!%p177_p3) }
   0x9   : > { %523 = vmatprep.subr.bf16.mxu0 (!%p177_p3), %v602_v0  ;;  %v502_v54 = vld [vmem:[%s692_s3] ss:$0 sm:$0xff] (!%p177_p3)  ;;  %vm404_vm11 = vcmask (!%p177_p3), 125952  }
   0xc   : > { %524 = vmatpush3.bf16.msra.mxu0 (!%p177_p3), %v560_v2 }
   0xd   : > { %525 = vmatprep.subr.bf16.mxu0 (!%p177_p3), %v602_v0 }
   0xe   : > { %s699_s15 = smov (!%p206_p4, %s592_s15), 1 }
   0xf   : > { %s509_s21 = sshll.u32 %s699_s15, 3 }
  0x10   : > { %s210_s26 = scalar_lea.vmem %s689_s0, %s509_s21  ;;  %526 = vmatpush3.bf16.msra.mxu0 %v561_v6  ;;  %s219_s11 = scalar_lea.vmem %s693_s4, %s509_s21 }
  0x11   : > { %v514_v3 = vld [vmem:[%s210_s26] sm:$0xff]  }
  0x12   : > { %v515_v4 = vunpack.c.l.bf16 %v514_v3  ;;  %v516_v5 = vunpack.c.h.bf16 %v514_v3 }
  0x14   : > { %v229_v7 = vrot.slane %v515_v4, 7  ;;  %v230_v8 = vrot.slane %v516_v5, 7 }
  0x16   : > { %v231_v9 = vsel %vm228_vm0, %v229_v7, %v230_v8  ;;  %v235_v10 = vsel %vm228_vm0, 0.0, %v229_v7  ;;  %v236_v11 = vsel %vm228_vm0, %v230_v8, 0.0 }
  0x17   : > { %v237_v12 = vpack.c.bf16 %v231_v9, %v235_v10  ;;  %v238_v13 = vpack.c.bf16 %v236_v11, %v236_v11 }
  0x19   : > { %v241_v14 = vshrl.u32 %v237_v12, 16  ;;  %v243_v15 = vshll.u32 %v237_v12, 16  ;;  %v248_v16 = vshll.u32 %v238_v13, 16  ;;  %v257_v20 = vrot.slane %v237_v12, 1 }
  0x1a   : > { %v258_v21 = vrot.slane %v238_v13, 1 }
  0x1b   : > { %v245_v17 = vrot.slane %v243_v15, 1  ;;  %v250_v18 = vrot.slane %v248_v16, 1 }
  0x1c   : > { %v259_v23 = vsel %vm256_vm3, %v257_v20, %v258_v21 }
  0x1d   : > { %v246_v19 = vor.u32 %v245_v17, %v241_v14 }
  0x1f   : > { %v251_v22 = vsel %vm239_vm2, %v246_v19, %v250_v18 }
  0x20   : > { %252 = vrot.lane.b32.xlu0 %v251_v22, %s604_s29 }
  0x24   : > { %260 = vrot.lane.b32.xlu0 %v259_v23, %s605_s30 }
  0x92   : > { %v253_v24 = vpop.permute.xlu0 %252 }
  0x93   : > { %v264_v25 = vsel %vm262_vm4, %v237_v12, %v253_v24 }
  0x96   : > { %v261_v26 = vpop.permute.xlu0 %260 }
  0x97   : > { %v267_v27 = vsel %vm265_vm5, %v264_v25, %v261_v26 }
  0x98   : > { %528 = vmatmul.mubr.msk.bf16.vlgmr.msra.gmra.mrb[0].mxu0 %vm299_vm6, %v267_v27 }
 0x16b   : > { %v336_v29 = vpop.f32.mrb[0].mxu0 }
 0x16c   : > { %v337_v30 = vadd.f32 %v497_v28, %v336_v29  ;;  %v529_v31 = vpop.f32.mrb[1].mxu0 }
 0x16d   : > { %v339_v32 = vpop.f32.mrb[2].mxu0 }
 0x16e   : > { %v340_v33 = vadd.f32 %v497_v28, %v339_v32  ;;  %v530_v34 = vpop.f32.mrb[3].mxu0  ;;  %v344_v35 = vmul.f32 %v337_v30, %v337_v30 }
 0x170   : > { %v346_v36 = vsel %vm262_vm4, %v344_v35, 0.0  ;;  %v345_v37 = vmul.f32 %v340_v33, %v340_v33 }
 0x171   : > { %347 = vadd.xlane.f32.xlu1 %v346_v36 }
 0x172   : > { %v349_v38 = vsel %vm262_vm4, %v345_v37, 0.0 }
 0x175   : > { %350 = vadd.xlane.f32.xlu1 %v349_v38 }
 0x1fe   : > { %v348_v39 = vpop.xlane.xlu1 %347 }
 0x1ff   : > { %562 = vrsqrt.f32 %v348_v39  ;;  %vm354_vm7 = vcmp.eq.f32.partialorder %v348_v39, inf  ;;  %v357_v43 = vand.u32 2147483648, %v348_v39  ;;  %vm356_vm8 = vcmp.eq.f32.partialorder %v348_v39, 0.0 }
 0x202   : > { %v351_v40 = vpop.xlane.xlu1 %350 }
 0x203   : > { %564 = vrsqrt.f32 %v351_v40  ;;  %vm361_vm9 = vcmp.eq.f32.partialorder %v351_v40, inf  ;;  %v364_v49 = vand.u32 2147483648, %v351_v40  ;;  %vm363_vm10 = vcmp.eq.f32.partialorder %v351_v40, 0.0 }
 0x209   : > { %v563_v41 = vpop.eup %562 }
 0x20a   : > { %v353_v42 = vmul.f32 %v563_v41, %v348_v39 }
 0x20c   : > { %v355_v44 = vsel %vm354_vm7, %v348_v39, %v353_v42 }
 0x20d   : > { %v565_v45 = vpop.eup %564  ;;  %v358_v46 = vsel %vm356_vm8, %v357_v43, %v355_v44 }
 0x20e   : > { %v366_v47 = vmax.f32 %v358_v46, 1e-12  ;;  %v360_v48 = vmul.f32 %v565_v45, %v351_v40 }
 0x210   : > { %566 = vrcp.f32 %v366_v47  ;;  %v362_v50 = vsel %vm361_vm9, %v351_v40, %v360_v48 }
 0x211   : > { %v365_v51 = vsel %vm363_vm10, %v364_v49, %v362_v50 }
 0x212   : > { %v367_v52 = vmax.f32 %v365_v51, 1e-12 }
 0x214   : > { %568 = vrcp.f32 %v367_v52 }
 0x21a   : > { %v567_v53 = vpop.eup %566 }
 0x21b   : > { %v369_v55 = vmul.f32 %v567_v53, %v337_v30 }
 0x21d   : > { %v378_v56 = vmul.f32 %v502_v54, %v369_v55 }
 0x21e   : > { %v569_v57 = vpop.eup %568 }
 0x21f   : > { %v503_v58 = vmul.f32 -4.0, %v378_v56  ;;  %v371_v59 = vmul.f32 %v569_v57, %v340_v33  ;;  %v380_v4 = vmul.f32 4.0, %v378_v56 }
 0x221   : > { %v384_v60 = vmul.f32 1.442695, %v503_v58  ;;  %v379_v61 = vmul.f32 %v502_v54, %v371_v59 }
 0x223   : > { %570 = vpow2.f32 %v384_v60  ;;  %v504_v62 = vmul.f32 -4.0, %v379_v61  ;;  %v381_v8 = vmul.f32 4.0, %v379_v61 }
 0x225   : > { %v386_v63 = vmul.f32 1.442695, %v504_v62 }
 0x227   : > { %572 = vpow2.f32 %v386_v63 }
 0x22d   : > { %v571_v0 = vpop.eup %570 }
 0x22e   : > { %v388_v1 = vadd.f32 1.0, %v571_v0 }
 0x230   : > { %574 = vrcp.f32 %v388_v1 }
 0x231   : > { %v573_v2 = vpop.eup %572 }
 0x232   : > { %v389_v3 = vadd.f32 1.0, %v573_v2 }
 0x234   : > { %576 = vrcp.f32 %v389_v3 }
 0x23a   : > { %v575_v5 = vpop.eup %574 }
 0x23b   : > { %v394_v6 = vmul.f32 %v575_v5, %v380_v4 }
 0x23d   : > { %v511_v7 = vpack.c.bf16 %v394_v6, %v394_v6 }
 0x23e   : > { %v577_v9 = vpop.eup %576 }
 0x23f   : > { %405 = vst.msk [vmem:[%s219_s11] sm:$0xf] %vm404_vm11, %v511_v7  ;;  %v395_v10 = vmul.f32 %v577_v9, %v381_v8 }
 0x241   : > { %v512_v11 = vpack.c.bf16 %v395_v10, %v395_v10 }
 0x243   : > { %406 = vst.msk [vmem:[%s219_s11 + $0x4] sm:$0xf] %vm404_vm11, %v512_v11 }
 0x244 PF: > { %s14_s17 = sadd.s32 1, %s600_s17   ;;  %s694_s15 = smov %s596_s16 }
 0x245   : > { %p11_p5 = scmp.ge.s32.totalorder %s14_s17, 4   ;;  %s695_s16 = smov %s697_s18 }
 0x247   :  { %13 = sbr.rel (!%p11_p5) target bundleno = 2 (0x2), region = 66 }

// kernel: model_forward.70
= control target key start
LH: loop header
LB: loop body
LE: loop exit
PB: predicated region body
PF: predicated region fallthrough
CT: control target
= control target key end

     0   :  { %s633_s15 = smov 0   ;;  %s635_s16 = smov 0   ;;  %s689_s0 = inlined_call_operand.vmem [shape: bf16[2,16,16], index: 0, kind: input, shape index: {}]   ;;  %s690_s1 = inlined_call_operand.vmem [shape: bf16[16,384], index: 1, kind: input, shape index: {}]   ;;  %s691_s2 = inlined_call_operand.vmem [shape: f32[1,384], index: 2, kind: input, shape index: {}]   ;;  %s692_s3 = inlined_call_operand.vmem [shape: f32[1,16], index: 3, kind: input, shape index: {}]   ;;  %s693_s4 = inlined_call_operand.vmem [shape: bf16[2,16,384], index: 4, kind: output, shape index: {}]  }
   0x1   :  { %s637_s17 = smov 0  }
   0x2 LB: > { %s26_s18 = sadd.s32 1, %s599_s16  ;;  %p508_p0 = scmp.ge.s32.totalorder %s603_s17, 1  ;;  %s603_s17 = sphi %s637_s17, %s14_s17   ;;  %s599_s16 = sphi %s635_s16, %s695_s16   ;;  %s595_s15 = sphi %s633_s15, %s694_s15  }
   0x3   : > { %p28_p1 = scmp.ge.s32.totalorder %s26_s18, 2  ;;  %p176_p2 = scmp.lt.s32.totalorder %s603_s17, 3 }
   0x5   : > { %s697_s18 = smov (%p28_p1, %s26_s18), 0  ;;  %p177_p3 = pnand %p508_p0, %p176_p2 }
   0x6   : > { %p207_p4 = scmp.lt.s32.totalorder (!%p177_p3), %s595_s15, 1  ;;  %vm231_vm0 = vcmask (!%p177_p3), 130048   ;;  %v569_v7 = vld [vmem:[%s690_s1 + $0x4] ss:$12 sps:$4 sm:$0xff] (!%p177_p3)   ;;  %v571_v8 = vld [vmem:[%s690_s1] ss:$12 sps:$4 sm:$0xff] (!%p177_p3)   ;;  %v275_v36 = vlaneseq (!%p177_p3) }
   0x7   : > { %180 = sbr.rel (%p177_p3) target bundleno = 425 (0x1a9), region = 36  ;;  %v605_v9 = vmov (!%p177_p3), 0.0   ;;  %v572_v10 = vld [vmem:[%s690_s1 + $0x8] ss:$12 sps:$4 sm:$0xff] (!%p177_p3)   ;;  %v606_v11 = vmov (!%p177_p3), 0   ;;  %309 = vmatprep.subr.bf16.mxu0 (!%p177_p3), %v569_v7  ;;  %vm607_vm1 = vmmov (!%p177_p3), 0  }
   0x8   : > { %535 = vmatprep.subr.bf16.mxu1 (!%p177_p3), %v605_v9  ;;  %341 = vmatprep.mubr.bf16.mxu0 (!%p177_p3), %v606_v11  ;;  %v512_v28 = vld [vmem:[%s692_s3] ss:$0 sm:$0xff] (!%p177_p3)  ;;  %v276_v37 = vshrl.u32 (!%p177_p3), %v275_v36, 7 }
   0x9   : > { %537 = vmatprep.mubr.msk.bf16.mxu1 (!%p177_p3), %vm607_vm1, %v605_v9  ;;  %310 = vmatpush1.bf16.msra.mxu0 (!%p177_p3), %v571_v8  ;;  %v273_v40 = vld [vmem:[%s691_s2] sm:$0x7] (!%p177_p3) }
   0xa   : > { %536 = vmatpush3.bf16.msra.mxu1 (!%p177_p3), %v572_v10  ;;  %v277_v38 = vsub.s32 (!%p177_p3), 0, %v276_v37  ;;  %v285_v39 = vsub.s32 (!%p177_p3), 2, %v276_v37  ;;  %v281_v41 = vsub.s32 (!%p177_p3), 1, %v276_v37 }
   0xc   : > { %v278_v42 = vrot.slane (!%p177_p3), %v273_v40, %v277_v38  ;;  %v286_v43 = vrot.slane (!%p177_p3), %v273_v40, %v285_v39  ;;  %v282_v44 = vrot.slane (!%p177_p3), %v273_v40, %v281_v41 }
   0xe   : > { %s699_s15 = smov (!%p207_p4, %s595_s15), 1 }
   0xf   : > { %s524_s19 = sshll.u32 %s699_s15, 3  ;;  %s541_s7 = smul.u32 24, %s699_s15 }
  0x10   : > { %s211_s22 = scalar_lea.vmem %s689_s0, %s524_s19 }
  0x11   : > { %v530_v0 = vld [vmem:[%s211_s22] sm:$0xff]   ;;  %s221_s10 = scalar_lea.vmem %s693_s4, %s541_s7 }
  0x12   : > { %v531_v1 = vunpack.c.l.bf16 %v530_v0  ;;  %v532_v2 = vunpack.c.h.bf16 %v530_v0 }
  0x14   : > { %v229_v3 = vmul.f32 %v531_v1, %v531_v1  ;;  %v230_v4 = vmul.f32 %v532_v2, %v532_v2 }
  0x16   : > { %v232_v5 = vsel %vm231_vm0, %v229_v3, 0.0  ;;  %v235_v6 = vsel %vm231_vm0, %v230_v4, 0.0 }
  0x17   : > { %233 = vadd.xlane.f32.xlu0 %v232_v5 }
  0x1b   : > { %236 = vadd.xlane.f32.xlu0 %v235_v6 }
  0xa4   : > { %v234_v12 = vpop.xlane.xlu0 %233 }
  0xa5   : > { %573 = vrsqrt.f32 %v234_v12  ;;  %vm240_vm2 = vcmp.eq.f32.partialorder %v234_v12, inf  ;;  %v243_v16 = vand.u32 2147483648, %v234_v12  ;;  %vm242_vm3 = vcmp.eq.f32.partialorder %v234_v12, 0.0 }
  0xa8   : > { %v237_v13 = vpop.xlane.xlu0 %236 }
  0xa9   : > { %575 = vrsqrt.f32 %v237_v13  ;;  %vm247_vm4 = vcmp.eq.f32.partialorder %v237_v13, inf  ;;  %v250_v22 = vand.u32 2147483648, %v237_v13  ;;  %vm249_vm5 = vcmp.eq.f32.partialorder %v237_v13, 0.0 }
  0xaf   : > { %v574_v14 = vpop.eup %573 }
  0xb0   : > { %v239_v15 = vmul.f32 %v574_v14, %v234_v12 }
  0xb2   : > { %v241_v17 = vsel %vm240_vm2, %v234_v12, %v239_v15 }
  0xb3   : > { %v576_v18 = vpop.eup %575  ;;  %v244_v19 = vsel %vm242_vm3, %v243_v16, %v241_v17 }
  0xb4   : > { %v252_v20 = vmax.f32 %v244_v19, 1e-12  ;;  %v246_v21 = vmul.f32 %v576_v18, %v237_v13 }
  0xb6   : > { %577 = vrcp.f32 %v252_v20  ;;  %v248_v23 = vsel %vm247_vm4, %v237_v13, %v246_v21 }
  0xb7   : > { %v251_v24 = vsel %vm249_vm5, %v250_v22, %v248_v23 }
  0xb8   : > { %v253_v25 = vmax.f32 %v251_v24, 1e-12 }
  0xba   : > { %579 = vrcp.f32 %v253_v25 }
  0xc0   : > { %v578_v26 = vpop.eup %577 }
  0xc1   : > { %v255_v27 = vmul.f32 %v578_v26, %v531_v1 }
  0xc3   : > { %v264_v31 = vmul.f32 %v512_v28, %v255_v27 }
  0xc4   : > { %v580_v29 = vpop.eup %579 }
  0xc5   : > { %v257_v30 = vmul.f32 %v580_v29, %v532_v2  ;;  %v266_v33 = vmul.f32 4.0, %v264_v31 }
  0xc7   : > { %v265_v32 = vmul.f32 %v512_v28, %v257_v30 }
  0xc9   : > { %v267_v34 = vmul.f32 4.0, %v265_v32 }
  0xcb   : > { %v268_v35 = vpack.c.bf16 %v267_v34, %v266_v33 }
  0xcd   : > { %516 = vmatmul.mubr.msk.bf16.vlgmr.msra.gmra.mrb[0].mxu0 %vm231_vm0, %v268_v35  ;;  %538 = vmatmul.mubr.msk.bf16.vlgmr.msra.gmra.mrb[0].mxu1 %vm231_vm0, %v268_v35 }
 0x1a0   : > { %v343_v45 = vpop.f32.mrb[0].mxu0  ;;  %v386_v46 = vpop.f32.mrb[0].mxu1 }
 0x1a1   : > { %v344_v47 = vadd.f32 %v343_v45, %v278_v42  ;;  %v387_v48 = vadd.f32 %v386_v46, %v286_v43  ;;  %v345_v49 = vpop.f32.mrb[1].mxu0  ;;  %v539_v50 = vpop.f32.mrb[1].mxu1 }
 0x1a2   : > { %v346_v51 = vadd.f32 %v345_v49, %v282_v44  ;;  %v347_v52 = vpop.f32.mrb[2].mxu0  ;;  %v389_v53 = vpop.f32.mrb[2].mxu1 }
 0x1a3   : > { %v526_v54 = vpack.c.bf16 %v387_v48, %v387_v48  ;;  %v348_v55 = vadd.f32 %v347_v52, %v278_v42  ;;  %v390_v56 = vadd.f32 %v389_v53, %v286_v43  ;;  %v349_v57 = vpop.f32.mrb[3].mxu0  ;;  %v540_v58 = vpop.f32.mrb[3].mxu1 }
 0x1a4   : > { %v525_v59 = vpack.c.bf16 %v346_v51, %v344_v47  ;;  %v350_v60 = vadd.f32 %v349_v57, %v282_v44 }
 0x1a5   : > { %414 = vst [vmem:[%s221_s10 + $0x8] sm:$0xf] %v526_v54  ;;  %v528_v61 = vpack.c.bf16 %v390_v56, %v390_v56 }
 0x1a6   : > { %413 = vst [vmem:[%s221_s10] sm:$0xff] %v525_v59  ;;  %v527_v62 = vpack.c.bf16 %v350_v60, %v348_v55 }
 0x1a7   : > { %416 = vst [vmem:[%s221_s10 + $0x14] sm:$0xf] %v528_v61 }
 0x1a8   : > { %415 = vst [vmem:[%s221_s10 + $0xc] sm:$0xff] %v527_v62 }
 0x1a9 PF: > { %s14_s17 = sadd.s32 1, %s603_s17   ;;  %s694_s15 = smov %s599_s16 }
 0x1aa   : > { %p11_p5 = scmp.ge.s32.totalorder %s14_s17, 4   ;;  %s695_s16 = smov %s697_s18 }
 0x1ac   :  { %13 = sbr.rel (!%p11_p5) target bundleno = 2 (0x2), region = 66 }

// kernel: model_forward.72
= control target key start
LH: loop header
LB: loop body
LE: loop exit
PB: predicated region body
PF: predicated region fallthrough
CT: control target
= control target key end

     0   :  { %s625_s15 = smov 0   ;;  %s627_s16 = smov 0   ;;  %s695_s0 = inlined_call_operand.vmem [shape: bf16[2,16,128], index: 0, kind: input, shape index: {}]   ;;  %s696_s1 = inlined_call_operand.vmem [shape: bf16[128,16], index: 1, kind: input, shape index: {}]   ;;  %s697_s2 = inlined_call_operand.vmem [shape: f32[1,16], index: 2, kind: input, shape index: {}]   ;;  %s698_s3 = inlined_call_operand.vmem [shape: f32[1,16], index: 3, kind: input, shape index: {}]   ;;  %s699_s4 = inlined_call_operand.vmem [shape: bf16[2,16,16], index: 4, kind: output, shape index: {}]  }
   0x1   :  { %s629_s17 = smov 0  }
   0x2 LB: > { %s26_s18 = sadd.s32 1, %s592_s16  ;;  %p478_p0 = scmp.ge.s32.totalorder %s596_s17, 1  ;;  %s596_s17 = sphi %s629_s17, %s14_s17   ;;  %s592_s16 = sphi %s627_s16, %s701_s16   ;;  %s588_s15 = sphi %s625_s15, %s700_s15  }
   0x3   : > { %p28_p1 = scmp.ge.s32.totalorder %s26_s18, 2  ;;  %p176_p2 = scmp.lt.s32.totalorder %s596_s17, 3 }
   0x5   : > { %s703_s18 = smov (%p28_p1, %s26_s18), 0  ;;  %p177_p3 = pnand %p478_p0, %p176_p2 }
   0x6   : > { %v557_v0 = vld [vmem:[%s696_s1] sm:$0xff] (!%p177_p3)   ;;  %v598_v1 = vmov (!%p177_p3), 0.0   ;;  %v558_v2 = vld [vmem:[%s696_s1 + $0x8] sm:$0xff] (!%p177_p3)   ;;  %vm599_vm0 = vmmov (!%p177_p3), 0   ;;  %p206_p4 = scmp.lt.s32.totalorder (!%p177_p3), %s588_s15, 1  ;;  %v559_v3 = vld [vmem:[%s696_s1 + $0x10] sm:$0xff] (!%p177_p3)  }
   0x7   : > { %180 = sbr.rel (%p177_p3) target bundleno = 439 (0x1b7), region = 36  ;;  %511 = vmatprep.subr.bf16.mxu0 (!%p177_p3), %v598_v1  ;;  %527 = vmatprep.mubr.msk.bf16.mxu0 (!%p177_p3), %vm599_vm0, %v598_v1  ;;  %v560_v4 = vld [vmem:[%s696_s1 + $0x18] sm:$0xff] (!%p177_p3)   ;;  %v561_v5 = vld [vmem:[%s696_s1 + $0x20] sm:$0xff] (!%p177_p3)   ;;  %v562_v6 = vld [vmem:[%s696_s1 + $0x28] sm:$0xff] (!%p177_p3)   ;;  %vm345_vm1 = vcmask (!%p177_p3), 130048   ;;  %vm390_vm6 = vcmask (!%p177_p3), 125952  }
   0x8   : > { %512 = vmatpush3.bf16.msra.mxu0 (!%p177_p3), %v557_v0  ;;  %v563_v7 = vld [vmem:[%s696_s1 + $0x30] sm:$0xff] (!%p177_p3)   ;;  %v564_v8 = vld [vmem:[%s696_s1 + $0x38] sm:$0xff] (!%p177_p3)   ;;  %v483_v10 = vld [vmem:[%s697_s2] ss:$0 sm:$0xff] (!%p177_p3) }
   0x9   : > { %513 = vmatprep.subr.bf16.mxu0 (!%p177_p3), %v598_v1  ;;  %v493_v36 = vld [vmem:[%s698_s3] ss:$0 sm:$0xff] (!%p177_p3) }
   0xc   : > { %514 = vmatpush3.bf16.msra.mxu0 (!%p177_p3), %v558_v2 }
   0xd   : > { %515 = vmatprep.subr.bf16.mxu0 (!%p177_p3), %v598_v1 }
   0xe   : > { %s705_s15 = smov (!%p206_p4, %s588_s15), 1 }
   0xf   : > { %s498_s25 = sshll.u32 %s705_s15, 3 }
  0x10   : > { %s210_s28 = scalar_lea.vmem %s695_s0, %s498_s25  ;;  %516 = vmatpush3.bf16.msra.mxu0 %v559_v3  ;;  %s219_s23 = scalar_lea.vmem %s699_s4, %s498_s25 }
  0x11   : > { %517 = vmatprep.subr.bf16.mxu0 %v598_v1  ;;  %v565_v9 = vld [vmem:[%s210_s28] sm:$0xff]  }
  0x14   : > { %518 = vmatpush3.bf16.msra.mxu0 %v560_v4 }
  0x15   : > { %519 = vmatprep.subr.bf16.mxu0 %v598_v1 }
  0x18   : > { %520 = vmatpush3.bf16.msra.mxu0 %v561_v5 }
  0x19   : > { %521 = vmatprep.subr.bf16.mxu0 %v598_v1 }
  0x1c   : > { %522 = vmatpush3.bf16.msra.mxu0 %v562_v6 }
  0x1d   : > { %523 = vmatprep.subr.bf16.mxu0 %v598_v1 }
  0x20   : > { %524 = vmatpush3.bf16.msra.mxu0 %v563_v7 }
  0x21   : > { %525 = vmatprep.subr.bf16.mxu0 %v598_v1 }
  0x24   : > { %526 = vmatpush3.bf16.msra.mxu0 %v564_v8 }
  0x27   : > { %528 = vmatmul.mubr.bf16.vlgmr.msra.gmra.mrb[0].mxu0 %v565_v9 }
  0xfa   : > { %v335_v11 = vpop.f32.mrb[0].mxu0 }
  0xfb   : > { %v336_v12 = vadd.f32 %v483_v10, %v335_v11  ;;  %v529_v13 = vpop.f32.mrb[1].mxu0 }
  0xfc   : > { %v338_v14 = vpop.f32.mrb[2].mxu0 }
  0xfd   : > { %v339_v15 = vadd.f32 %v483_v10, %v338_v14  ;;  %v530_v16 = vpop.f32.mrb[3].mxu0  ;;  %v343_v17 = vmul.f32 %v336_v12, %v336_v12 }
  0xff   : > { %v346_v18 = vsel %vm345_vm1, %v343_v17, 0.0  ;;  %v344_v19 = vmul.f32 %v339_v15, %v339_v15 }
 0x100   : > { %347 = vadd.xlane.f32.xlu0 %v346_v18 }
 0x101   : > { %v349_v20 = vsel %vm345_vm1, %v344_v19, 0.0 }
 0x104   : > { %350 = vadd.xlane.f32.xlu0 %v349_v20 }
 0x18d   : > { %v348_v21 = vpop.xlane.xlu0 %347 }
 0x18e   : > { %566 = vrsqrt.f32 %v348_v21  ;;  %vm354_vm2 = vcmp.eq.f32.partialorder %v348_v21, inf  ;;  %v357_v25 = vand.u32 2147483648, %v348_v21  ;;  %vm356_vm3 = vcmp.eq.f32.partialorder %v348_v21, 0.0 }
 0x191   : > { %v351_v22 = vpop.xlane.xlu0 %350 }
 0x192   : > { %568 = vrsqrt.f32 %v351_v22  ;;  %vm361_vm4 = vcmp.eq.f32.partialorder %v351_v22, inf  ;;  %v364_v31 = vand.u32 2147483648, %v351_v22  ;;  %vm363_vm5 = vcmp.eq.f32.partialorder %v351_v22, 0.0 }
 0x198   : > { %v567_v23 = vpop.eup %566 }
 0x199   : > { %v353_v24 = vmul.f32 %v567_v23, %v348_v21 }
 0x19b   : > { %v355_v26 = vsel %vm354_vm2, %v348_v21, %v353_v24 }
 0x19c   : > { %v569_v27 = vpop.eup %568  ;;  %v358_v28 = vsel %vm356_vm3, %v357_v25, %v355_v26 }
 0x19d   : > { %v366_v29 = vmax.f32 %v358_v28, 1e-12  ;;  %v360_v30 = vmul.f32 %v569_v27, %v351_v22 }
 0x19f   : > { %570 = vrcp.f32 %v366_v29  ;;  %v362_v32 = vsel %vm361_vm4, %v351_v22, %v360_v30 }
 0x1a0   : > { %v365_v33 = vsel %vm363_vm5, %v364_v31, %v362_v32 }
 0x1a1   : > { %v367_v34 = vmax.f32 %v365_v33, 1e-12 }
 0x1a3   : > { %572 = vrcp.f32 %v367_v34 }
 0x1a9   : > { %v571_v35 = vpop.eup %570 }
 0x1aa   : > { %v369_v37 = vmul.f32 %v571_v35, %v336_v12 }
 0x1ac   : > { %v378_v38 = vmul.f32 %v493_v36, %v369_v37 }
 0x1ad   : > { %v573_v39 = vpop.eup %572 }
 0x1ae   : > { %v380_v40 = vmul.f32 4.0, %v378_v38  ;;  %v371_v41 = vmul.f32 %v573_v39, %v339_v15 }
 0x1b0   : > { %v500_v42 = vpack.c.bf16 %v380_v40, %v380_v40  ;;  %v379_v43 = vmul.f32 %v493_v36, %v371_v41 }
 0x1b2   : > { %391 = vst.msk [vmem:[%s219_s23] sm:$0xf] %vm390_vm6, %v500_v42  ;;  %v381_v44 = vmul.f32 4.0, %v379_v43 }
 0x1b4   : > { %v501_v45 = vpack.c.bf16 %v381_v44, %v381_v44 }
 0x1b6   : > { %392 = vst.msk [vmem:[%s219_s23 + $0x4] sm:$0xf] %vm390_vm6, %v501_v45 }
 0x1b7 PF: > { %s14_s17 = sadd.s32 1, %s596_s17   ;;  %s700_s15 = smov %s592_s16 }
 0x1b8   : > { %p11_p5 = scmp.ge.s32.totalorder %s14_s17, 4   ;;  %s701_s16 = smov %s703_s18 }
 0x1ba   :  { %13 = sbr.rel (!%p11_p5) target bundleno = 2 (0x2), region = 66 }

// kernel: model_forward.73
= control target key start
LH: loop header
LB: loop body
LE: loop exit
PB: predicated region body
PF: predicated region fallthrough
CT: control target
= control target key end

     0   :  { %s559_s12 = smov 0   ;;  %s561_s13 = smov 0   ;;  %s614_s0 = inlined_call_operand.vmem [shape: bf16[2,16,16], index: 0, kind: input, shape index: {}]   ;;  %s615_s1 = inlined_call_operand.vmem [shape: bf16[64,16], index: 1, kind: input, shape index: {}]   ;;  %s616_s2 = inlined_call_operand.vmem [shape: f32[1,16], index: 2, kind: input, shape index: {}]   ;;  %s617_s3 = inlined_call_operand.vmem [shape: bf16[2,15,16], index: 3, kind: output, shape index: {}]  }
   0x1   :  { %s563_s14 = smov 0  }
   0x2 LB: > { %s25_s15 = sadd.s32 1, %s528_s13  ;;  %p437_p0 = scmp.ge.s32.totalorder %s532_s14, 1  ;;  %s532_s14 = sphi %s563_s14, %s13_s14   ;;  %s528_s13 = sphi %s561_s13, %s619_s13   ;;  %s524_s12 = sphi %s559_s12, %s618_s12  }
   0x3   : > { %p27_p1 = scmp.ge.s32.totalorder %s25_s15, 2  ;;  %p151_p2 = scmp.lt.s32.totalorder %s532_s14, 3 }
   0x5   : > { %s621_s15 = smov (%p27_p1, %s25_s15), 0  ;;  %p152_p3 = pnand %p437_p0, %p151_p2 }
   0x6   : > { %p179_p4 = scmp.lt.s32.totalorder (!%p152_p3), %s524_s12, 1  ;;  %v506_v0 = vld [vmem:[%s615_s1] sm:$0xff] (!%p152_p3)   ;;  %v534_v1 = vmov (!%p152_p3), 0.0   ;;  %v507_v2 = vld [vmem:[%s615_s1 + $0x8] sm:$0xff] (!%p152_p3)   ;;  %v508_v6 = vld [vmem:[%s615_s1 + $0x10] sm:$0xff] (!%p152_p3)   ;;  %vm201_vm0 = vcmask (!%p152_p3), 1040384  }
   0x7   : > { %155 = sbr.rel (%p152_p3) target bundleno = 372 (0x174), region = 32  ;;  %465 = vmatprep.subr.bf16.mxu0 (!%p152_p3), %v534_v1  ;;  %v509_v12 = vld [vmem:[%s615_s1 + $0x18] sm:$0xff] (!%p152_p3)   ;;  %vm535_vm1 = vmmov (!%p152_p3), 0   ;;  %vm223_vm2 = vcmask (!%p152_p3), 1046528   ;;  %vm229_vm3 = vsmask.f32 (!%p152_p3), 6400 }
   0x8   : > { %466 = vmatpush3.bf16.msra.mxu0 (!%p152_p3), %v506_v0  ;;  %473 = vmatprep.mubr.msk.bf16.mxu0 (!%p152_p3), %vm535_vm1, %v534_v1  ;;  %s536_s28 = smov (!%p152_p3), 16   ;;  %s537_s29 = smov (!%p152_p3), 48   ;;  %vm244_vm4 = vcmask (!%p152_p3), 130048   ;;  %vm247_vm5 = vcmask (!%p152_p3), 261120   ;;  %vm250_vm6 = vcmask (!%p152_p3), 392192   ;;  %vm292_vm7 = vcmask (!%p152_p3), 523264  }
   0x9   : > { %467 = vmatprep.subr.bf16.mxu0 (!%p152_p3), %v534_v1  ;;  %s538_s30 = smov (!%p152_p3), 32   ;;  %v442_v37 = vld [vmem:[%s616_s2] ss:$0 sm:$0xff] (!%p152_p3)  ;;  %vm344_vm8 = vcmask (!%p152_p3), 125952   ;;  %vm347_vm9 = vsmask.f32 (!%p152_p3), 3328 }
   0xa   : > { %vm348_vm10 = vmand (!%p152_p3), %vm344_vm8, %vm347_vm9 }
   0xc   : > { %468 = vmatpush3.bf16.msra.mxu0 (!%p152_p3), %v507_v2 }
   0xd   : > { %469 = vmatprep.subr.bf16.mxu0 (!%p152_p3), %v534_v1 }
   0xe   : > { %s623_s12 = smov (!%p179_p4, %s524_s12), 1 }
   0xf   : > { %s452_s20 = sshll.u32 %s623_s12, 3 }
  0x10   : > { %s183_s23 = scalar_lea.vmem %s614_s0, %s452_s20  ;;  %470 = vmatpush3.bf16.msra.mxu0 %v508_v6  ;;  %s192_s8 = scalar_lea.vmem %s617_s3, %s452_s20 }
  0x11   : > { %v457_v3 = vld [vmem:[%s183_s23] sm:$0xff]   ;;  %471 = vmatprep.subr.bf16.mxu0 %v534_v1 }
  0x12   : > { %v458_v4 = vunpack.c.l.bf16 %v457_v3  ;;  %v459_v5 = vunpack.c.h.bf16 %v457_v3  ;;  %v349_v45 = vld [vmem:[%s192_s8 + $0x4] sm:$0xf] }
  0x14   : > { %v202_v7 = vrot.slane %v458_v4, 7  ;;  %v203_v8 = vrot.slane %v459_v5, 7  ;;  %472 = vmatpush3.bf16.msra.mxu0 %v509_v12 }
  0x16   : > { %v204_v9 = vsel %vm201_vm0, %v202_v7, %v203_v8  ;;  %v208_v10 = vsel %vm201_vm0, 0.0, %v202_v7  ;;  %v209_v11 = vsel %vm201_vm0, %v203_v8, 0.0 }
  0x17   : > { %v210_v13 = vpack.c.bf16 %v204_v9, %v208_v10  ;;  %v211_v14 = vpack.c.bf16 %v209_v11, %v209_v11 }
  0x19   : > { %v213_v15 = vshrl.u32 %v210_v13, 16  ;;  %v215_v16 = vshll.u32 %v210_v13, 16  ;;  %v234_v17 = vshrl.u32 %v211_v14, 16  ;;  %v237_v18 = vshll.u32 %v211_v14, 16 }
  0x1a   : > { %v224_v22 = vrot.slane %v210_v13, 1  ;;  %v225_v23 = vrot.slane %v211_v14, 1 }
  0x1b   : > { %v217_v19 = vrot.slane %v215_v16, 1  ;;  %v230_v20 = vrot.slane %v213_v15, 1  ;;  %v231_v21 = vrot.slane %v215_v16, 2  ;;  %v236_v24 = vrot.slane %v234_v17, 1 }
  0x1c   : > { %v239_v25 = vrot.slane %v237_v18, 2  ;;  %v226_v29 = vsel %vm223_vm2, %v224_v22, %v225_v23 }
  0x1d   : > { %v218_v26 = vor.u32 %v217_v19, %v213_v15  ;;  %v232_v27 = vor.u32 %v231_v21, %v230_v20 }
  0x1e   : > { %v240_v28 = vor.u32 %v239_v25, %v236_v24 }
  0x1f   : > { %219 = vrot.lane.b32.xlu0 %v218_v26, %s536_s28 }
  0x20   : > { %v241_v30 = vsel %vm229_vm3, %v232_v27, %v240_v28 }
  0x21   : > { %242 = vrot.lane.b32.xlu1 %v241_v30, %s537_s29 }
  0x23   : > { %227 = vrot.lane.b32.xlu0 %v226_v29, %s538_s30 }
  0x91   : > { %v220_v31 = vpop.permute.xlu0 %219 }
  0x92   : > { %v246_v33 = vsel %vm244_vm4, %v210_v13, %v220_v31 }
  0x93   : > { %v243_v32 = vpop.permute.xlu1 %242 }
  0x95   : > { %v228_v34 = vpop.permute.xlu0 %227 }
  0x96   : > { %v249_v35 = vsel %vm247_vm5, %v246_v33, %v228_v34 }
  0x97   : > { %v252_v36 = vsel %vm250_vm6, %v249_v35, %v243_v32 }
  0x98   : > { %474 = vmatmul.mubr.msk.bf16.vlgmr.msra.gmra.mrb[0].mxu0 %vm292_vm7, %v252_v36 }
 0x16b   : > { %v329_v38 = vpop.f32.mrb[0].mxu0 }
 0x16c   : > { %v330_v39 = vadd.f32 %v442_v37, %v329_v38  ;;  %v475_v40 = vpop.f32.mrb[1].mxu0 }
 0x16d   : > { %v332_v41 = vpop.f32.mrb[2].mxu0 }
 0x16e   : > { %v454_v42 = vpack.c.bf16 %v330_v39, %v330_v39  ;;  %v333_v43 = vadd.f32 %v442_v37, %v332_v41  ;;  %v476_v44 = vpop.f32.mrb[3].mxu0 }
 0x170   : > { %345 = vst.msk [vmem:[%s192_s8] sm:$0xf] %vm344_vm8, %v454_v42  ;;  %v455_v46 = vpack.c.bf16 %v333_v43, %v333_v43 }
 0x172   : > { %v350_v47 = vsel %vm348_vm10, %v455_v46, %v349_v45 }
 0x173   : > { %351 = vst [vmem:[%s192_s8 + $0x4] sm:$0xf] %v350_v47 }
 0x174 PF: > { %s13_s14 = sadd.s32 1, %s532_s14   ;;  %s618_s12 = smov %s528_s13 }
 0x175   : > { %p10_p5 = scmp.ge.s32.totalorder %s13_s14, 4   ;;  %s619_s13 = smov %s621_s15 }
 0x177   :  { %12 = sbr.rel (!%p10_p5) target bundleno = 2 (0x2), region = 62 }

// kernel: model_forward.71
= control target key start
LH: loop header
LB: loop body
LE: loop exit
PB: predicated region body
PF: predicated region fallthrough
CT: control target
= control target key end

     0   :  { %s1189_s6 = smov 0   ;;  %s1369_s0 = inlined_call_operand.vmem [shape: bf16[2,16,384], index: 0, kind: input, shape index: {}]   ;;  %s1370_s1 = inlined_call_operand.vmem [shape: bf16[2,16,128], index: 1, kind: output, shape index: {}]  }
   0x1 LB: > { %s966_s7 = sadd.s32 4294967295, %s1172_s6   ;;  %p970_p0 = scmp.ge.s32.totalorder %s1172_s6, 1  ;;  %s1172_s6 = sphi %s1189_s6, %s11_s6  }
   0x2   : > { %p87_p1 = scmp.lt.s32.totalorder %s1172_s6, 3 }
   0x4   : > { %p88_p2 = pnand %p970_p0, %p87_p1 }
   0x5   : > { %p107_p3 = scmp.lt.s32.totalorder (!%p88_p2), %s966_s7, 1  ;;  %vm301_vm0 = vcmask (!%p88_p2), 523520   ;;  %vm491_vm1 = vcmask (!%p88_p2), 785920   ;;  %vm680_vm2 = vcmask (!%p88_p2), 1048320   ;;  %vm128_vm3 = vcmask (!%p88_p2), 261120   ;;  %s1174_s12 = smov (!%p88_p2), 96  }
   0x6   : > { %91 = sbr.rel (%p88_p2) target bundleno = 1003 (0x3eb), region = 24  ;;  %s1175_s13 = smov (!%p88_p2), 64   ;;  %vm198_vm4 = vcmask (!%p88_p2), 130048   ;;  %vm1178_vm5 = vmmov (!%p88_p2), 0   ;;  %vm895_vm6 = vcmask (!%p88_p2), 523264   ;;  %vm898_vm7 = vcmask (!%p88_p2), 785408  }
   0x7   : > { %s1176_s14 = smov (!%p88_p2), 32  }
   0xd   : > { %s1372_s7 = smov (!%p107_p3, %s966_s7), 1 }
   0xe   : > { %s1079_s8 = smul.u32 24, %s1372_s7  ;;  %s991_s15 = sshll.u32 %s1372_s7, 3 }
   0xf   : > { %s116_s18 = scalar_lea.vmem %s1370_s1, %s991_s15 }
  0x10   : > { %s111_s11 = scalar_lea.vmem %s1369_s0, %s1079_s8 }
  0x11   : > { %v118_v0 = vld [vmem:[%s111_s11] sm:$0xff]  ;;  %v120_v1 = vld [vmem:[%s111_s11 + $0xc] sm:$0xff]  ;;  %v1211_v6 = vld [vmem:[%s111_s11 + $0x8] ss:$12 sps:$4 sm:$0xff]  }
  0x12   : > { %v1203_v2 = vunpack.c.l.bf16 %v118_v0  ;;  %v1205_v3 = vunpack.c.h.bf16 %v118_v0  ;;  %v1207_v4 = vunpack.c.h.bf16 %v120_v1  ;;  %v1209_v5 = vunpack.c.l.bf16 %v120_v1  ;;  %1023 = vmatprep.subr.bf16.mxu0 %v1211_v6 }
  0x13   : > { %1024 = vmatpush3.bf16.msra.mxu0 %v1211_v6 }
  0x14   : > { %v302_v7 = vsel %vm301_vm0, %v1203_v2, -inf  ;;  %v334_v8 = vsel %vm301_vm0, %v1205_v3, -inf  ;;  %v335_v9 = vsel %vm301_vm0, %v1207_v4, -inf  ;;  %v524_v11 = vsel %vm491_vm1, %v1205_v3, -inf }
  0x15   : > { %v336_v10 = vmax.f32 %v334_v8, %v335_v9  ;;  %303 = vmax.xlane.f32.xlu1 %v302_v7  ;;  %v525_v12 = vsel %vm491_vm1, %v1207_v4, -inf  ;;  %v305_v13 = vsel %vm301_vm0, %v1209_v5, -inf  ;;  %v492_v14 = vsel %vm491_vm1, %v1203_v2, -inf }
  0x16   : > { %v526_v15 = vmax.f32 %v524_v11, %v525_v12  ;;  %306 = vmax.xlane.f32.xlu0 %v305_v13  ;;  %v713_v16 = vsel %vm680_vm2, %v1205_v3, -inf  ;;  %v714_v17 = vsel %vm680_vm2, %v1207_v4, -inf  ;;  %v153_v21 = vsel %vm128_vm3, %v1205_v3, -inf }
  0x17   : > { %v337_v18 = vrot.slane %v336_v10, 4  ;;  %v715_v19 = vmax.f32 %v713_v16, %v714_v17  ;;  %v154_v22 = vsel %vm128_vm3, %v1207_v4, -inf  ;;  %v495_v27 = vsel %vm491_vm1, %v1209_v5, -inf }
  0x18   : > { %v527_v20 = vrot.slane %v526_v15, 4  ;;  %v155_v25 = vmax.f32 %v153_v21, %v154_v22 }
  0x19   : > { %v338_v23 = vmax.f32 %v336_v10, %v337_v18  ;;  %493 = vmax.xlane.f32.xlu1 %v492_v14  ;;  %v716_v24 = vrot.slane %v715_v19, 4 }
  0x1a   : > { %v528_v26 = vmax.f32 %v526_v15, %v527_v20  ;;  %v156_v30 = vrot.slane %v155_v25, 4 }
  0x1b   : > { %v339_v28 = vrot.slane %v338_v23, 2  ;;  %v717_v29 = vmax.f32 %v715_v19, %v716_v24 }
  0x1c   : > { %v529_v31 = vrot.slane %v528_v26, 2  ;;  %v157_v34 = vmax.f32 %v155_v25, %v156_v30 }
  0x1d   : > { %496 = vmax.xlane.f32.xlu1 %v495_v27  ;;  %v340_v32 = vmax.f32 %v338_v23, %v339_v28  ;;  %v718_v33 = vrot.slane %v717_v29, 2 }
  0x1e   : > { %v530_v35 = vmax.f32 %v528_v26, %v529_v31  ;;  %v158_v38 = vrot.slane %v157_v34, 2 }
  0x1f   : > { %v341_v36 = vrot.slane %v340_v32, 1  ;;  %v719_v37 = vmax.f32 %v717_v29, %v718_v33 }
  0x20   : > { %v531_v39 = vrot.slane %v530_v35, 1  ;;  %v159_v42 = vmax.f32 %v157_v34, %v158_v38 }
  0x21   : > { %v342_v40 = vmax.f32 %v340_v32, %v341_v36  ;;  %v720_v41 = vrot.slane %v719_v37, 1 }
  0x22   : > { %v532_v43 = vmax.f32 %v530_v35, %v531_v39  ;;  %v160_v47 = vrot.slane %v159_v42, 1 }
  0x23   : > { %v343_v44 = vsub.f32 %v1205_v3, %v342_v40  ;;  %v344_v45 = vsub.f32 %v1207_v4, %v342_v40  ;;  %v721_v46 = vmax.f32 %v719_v37, %v720_v41 }
  0x24   : > { %v533_v48 = vsub.f32 %v1205_v3, %v532_v43  ;;  %v534_v49 = vsub.f32 %v1207_v4, %v532_v43  ;;  %v161_v54 = vmax.f32 %v159_v42, %v160_v47 }
  0x25   : > { %v345_v50 = vmul.f32 1.442695, %v343_v44  ;;  %v347_v51 = vmul.f32 1.442695, %v344_v45  ;;  %v722_v52 = vsub.f32 %v1205_v3, %v721_v46  ;;  %v723_v53 = vsub.f32 %v1207_v4, %v721_v46 }
  0x26   : > { %v535_v57 = vmul.f32 1.442695, %v533_v48  ;;  %v537_v58 = vmul.f32 1.442695, %v534_v49  ;;  %v162_v59 = vsub.f32 %v1205_v3, %v161_v54  ;;  %v163_v60 = vsub.f32 %v1207_v4, %v161_v54 }
  0x27   : > { %1110 = vpow2.f32 %v345_v50  ;;  %v724_v55 = vmul.f32 1.442695, %v722_v52  ;;  %v726_v56 = vmul.f32 1.442695, %v723_v53 }
  0x28   : > { %1112 = vpow2.f32 %v347_v51  ;;  %v164_v61 = vmul.f32 1.442695, %v162_v59  ;;  %v166_v62 = vmul.f32 1.442695, %v163_v60 }
  0x29   : > { %1114 = vpow2.f32 %v724_v55 }
  0x2a   : > { %1116 = vpow2.f32 %v726_v56 }
  0x2b   : > { %1118 = vpow2.f32 %v535_v57 }
  0x2c   : > { %383 = vrot.lane.b32.xlu0 %v1211_v6, %s1174_s12  ;;  %1120 = vpow2.f32 %v537_v58 }
  0x2d   : > { %1122 = vpow2.f32 %v164_v61 }
  0x2e   : > { %572 = vrot.lane.b32.xlu1 %v1211_v6, %s1175_s13  ;;  %1124 = vpow2.f32 %v166_v62  ;;  %v681_v62 = vsel %vm680_vm2, %v1203_v2, -inf }
  0x31   : > { %v1111_v63 = vpop.eup %1110 }
  0x32   : > { %v1113_v0 = vpop.eup %1112  ;;  %v349_v1 = vsel %vm301_vm0, %v1111_v63, 0.0 }
  0x33   : > { %v1115_v3 = vpop.eup %1114  ;;  %v350_v4 = vsel %vm301_vm0, %v1113_v0, 0.0 }
  0x34   : > { %v1117_v7 = vpop.eup %1116  ;;  %v351_v8 = vadd.f32 %v350_v4, %v349_v1  ;;  %v728_v9 = vsel %vm680_vm2, %v1115_v3, 0.0 }
  0x35   : > { %v1119_v10 = vpop.eup %1118  ;;  %v729_v11 = vsel %vm680_vm2, %v1117_v7, 0.0 }
  0x36   : > { %v1121_v12 = vpop.eup %1120  ;;  %v352_v13 = vrot.slane %v351_v8, 4  ;;  %v730_v14 = vadd.f32 %v729_v11, %v728_v9  ;;  %v539_v15 = vsel %vm491_vm1, %v1119_v10, 0.0 }
  0x37   : > { %v1123_v16 = vpop.eup %1122  ;;  %v540_v17 = vsel %vm491_vm1, %v1121_v12, 0.0 }
  0x38   : > { %v1125_v18 = vpop.eup %1124  ;;  %v353_v19 = vadd.f32 %v352_v13, %v351_v8  ;;  %v731_v20 = vrot.slane %v730_v14, 4  ;;  %v541_v21 = vadd.f32 %v540_v17, %v539_v15  ;;  %v168_v22 = vsel %vm128_vm3, %v1123_v16, 0.0 }
  0x39   : > { %v169_v23 = vsel %vm128_vm3, %v1125_v18, 0.0 }
  0x3a   : > { %v354_v24 = vrot.slane %v353_v19, 2  ;;  %v732_v25 = vadd.f32 %v731_v20, %v730_v14  ;;  %v542_v26 = vrot.slane %v541_v21, 4  ;;  %v170_v27 = vadd.f32 %v169_v23, %v168_v22 }
  0x3c   : > { %v355_v28 = vadd.f32 %v354_v24, %v353_v19  ;;  %v733_v29 = vrot.slane %v732_v25, 2  ;;  %v543_v30 = vadd.f32 %v542_v26, %v541_v21  ;;  %v171_v31 = vrot.slane %v170_v27, 4 }
  0x3e   : > { %v356_v32 = vrot.slane %v355_v28, 1  ;;  %v734_v33 = vadd.f32 %v733_v29, %v732_v25  ;;  %v544_v34 = vrot.slane %v543_v30, 2  ;;  %v172_v35 = vadd.f32 %v171_v31, %v170_v27 }
  0x40   : > { %v357_v36 = vadd.f32 %v356_v32, %v355_v28  ;;  %v735_v37 = vrot.slane %v734_v33, 1  ;;  %v545_v38 = vadd.f32 %v544_v34, %v543_v30  ;;  %v173_v39 = vrot.slane %v172_v35, 2 }
  0x42   : > { %1126 = vrcp.f32 %v357_v36  ;;  %v736_v40 = vadd.f32 %v735_v37, %v734_v33  ;;  %v546_v41 = vrot.slane %v545_v38, 1  ;;  %v174_v42 = vadd.f32 %v173_v39, %v172_v35 }
  0x43   : > { %v129_v35 = vsel %vm128_vm3, %v1203_v2, -inf  ;;  %v132_v39 = vsel %vm128_vm3, %v1209_v5, -inf }
  0x44   : > { %1128 = vrcp.f32 %v736_v40  ;;  %v547_v43 = vadd.f32 %v546_v41, %v545_v38  ;;  %v175_v44 = vrot.slane %v174_v42, 1 }
  0x46   : > { %1130 = vrcp.f32 %v547_v43  ;;  %v176_v45 = vadd.f32 %v175_v44, %v174_v42 }
  0x48   : > { %1132 = vrcp.f32 %v176_v45 }
  0x4c   : > { %v1127_v46 = vpop.eup %1126 }
  0x4d   : > { %v359_v47 = vmul.f32 %v1127_v46, %v1111_v63  ;;  %v360_v48 = vmul.f32 %v1127_v46, %v1113_v0  ;;  %v684_v63 = vsel %vm680_vm2, %v1209_v5, -inf }
  0x4e   : > { %v1129_v49 = vpop.eup %1128 }
  0x4f   : > { %v361_v50 = vpack.c.bf16 %v360_v48, %v359_v47  ;;  %v738_v51 = vmul.f32 %v1129_v49, %v1115_v3  ;;  %v739_v52 = vmul.f32 %v1129_v49, %v1117_v7 }
  0x50   : > { %v1131_v53 = vpop.eup %1130 }
  0x51   : > { %363 = vrot.lane.b32.xlu0 %v361_v50, %s1174_s12  ;;  %v740_v54 = vpack.c.bf16 %v739_v52, %v738_v51  ;;  %v549_v55 = vmul.f32 %v1131_v53, %v1119_v10  ;;  %v550_v56 = vmul.f32 %v1131_v53, %v1121_v12 }
  0x52   : > { %v1133_v57 = vpop.eup %1132 }
  0x53   : > { %742 = vrot.lane.b32.xlu1 %v740_v54, %s1176_s14  ;;  %v551_v58 = vpack.c.bf16 %v550_v56, %v549_v55  ;;  %v178_v59 = vmul.f32 %v1133_v57, %v1123_v16  ;;  %v179_v60 = vmul.f32 %v1133_v57, %v1125_v18  ;;  %v1177_v54 = vmov 0.0  }
  0x54   : > { %1029 = vmatprep.subr.bf16.mxu1 %v1177_v54  ;;  %1033 = vmatprep.mubr.msk.bf16.mxu1 %vm1178_vm5, %v1177_v54 }
  0x55   : > { %553 = vrot.lane.b32.xlu0 %v551_v58, %s1175_s13  ;;  %v180_v61 = vpack.c.bf16 %v179_v60, %v178_v59 }
  0x74   : > { %682 = vmax.xlane.f32.xlu0 %v681_v62 }
  0x77   : > { %685 = vmax.xlane.f32.xlu1 %v684_v63 }
  0x88   : > { %761 = vrot.lane.b32.xlu1 %v1211_v6, %s1176_s14 }
  0xa1   : > { %182 = vxpose.xlu0.c.b16.start.end [1/1] (short) (narrow) %v180_v61, 32 }
  0xa2   : > { %v304_v3 = vpop.xlane.xlu1 %303 }
  0xa3   : > { %v307_v0 = vpop.xlane.xlu0 %306  ;;  %v308_v6 = vsub.f32 %v1203_v2, %v304_v3 }
  0xa4   : > { %v309_v7 = vsub.f32 %v1209_v5, %v307_v0 }
  0xa5   : > { %v310_v16 = vmul.f32 1.442695, %v308_v6 }
  0xa6   : > { %v494_v4 = vpop.xlane.xlu1 %493  ;;  %v312_v9 = vmul.f32 1.442695, %v309_v7 }
  0xa7   : > { %v384_v1 = vpop.permute.xlu0 %383  ;;  %v498_v17 = vsub.f32 %v1203_v2, %v494_v4 }
  0xa8   : > { %1037 = vmatprep.subr.bf16.mxu0 %v384_v1  ;;  %1134 = vpow2.f32 %v312_v9 }
  0xa9   : > { %v500_v20 = vmul.f32 1.442695, %v498_v17 }
  0xaa   : > { %v497_v8 = vpop.xlane.xlu1 %496 }
  0xab   : > { %v499_v10 = vsub.f32 %v1209_v5, %v497_v8 }
  0xad   : > { %v502_v11 = vmul.f32 1.442695, %v499_v10 }
  0xae   : > { %v573_v13 = vpop.permute.xlu1 %572 }
  0xaf   : > { %1136 = vpow2.f32 %v502_v11 }
  0xb0   : > { %1138 = vpow2.f32 %v310_v16 }
  0xb1   : > { %1140 = vpow2.f32 %v500_v20 }
  0xb2   : > { %v1271_v15 = vpop.eup %1134 }
  0xb9   : > { %v1276_v19 = vpop.eup %1136 }
  0xba   : > { %v1280_v21 = vpop.eup %1138 }
  0xbb   : > { %v1284_v22 = vpop.eup %1140 }
  0xc3   : > { %v364_v12 = vpop.permute.xlu0 %363 }
  0xc4   : > { %366 = vxpose.xlu1.c.b16.start.end [1/1] (short) (narrow) %v364_v12, 32 }
  0xc5   : > { %v743_v18 = vpop.permute.xlu1 %742 }
  0xc7   : > { %v554_v14 = vpop.permute.xlu0 %553 }
  0xc8   : > { %556 = vxpose.xlu0.c.b16.start.end [1/1] (short) (narrow) %v554_v14, 32 }
  0xcc   : > { %318 = vrot.lane.b32.xlu1 %v1271_v15, %s1174_s12 }
  0xcd   : > { %745 = vxpose.xlu0.c.b16.start.end [1/1] (short) (narrow) %v743_v18, 32 }
  0xd0   : > { %508 = vrot.lane.b32.xlu1 %v1276_v19, %s1175_s13 }
  0xda   : > { %316 = vrot.lane.b32.xlu0 %v1280_v21, %s1174_s12 }
  0xde   : > { %506 = vrot.lane.b32.xlu0 %v1284_v22, %s1175_s13 }
 0x101   : > { %v683_v23 = vpop.xlane.xlu0 %682 }
 0x102   : > { %v687_v24 = vsub.f32 %v1203_v2, %v683_v23 }
 0x104   : > { %v689_v25 = vmul.f32 1.442695, %v687_v24  ;;  %v686_v26 = vpop.xlane.xlu1 %685 }
 0x105   : > { %v688_v27 = vsub.f32 %v1209_v5, %v686_v26 }
 0x106   : > { %1142 = vpow2.f32 %v689_v25 }
 0x107   : > { %v691_v28 = vmul.f32 1.442695, %v688_v27  ;;  %v190_v29 = vpop.trf.xlu0 }
 0x108   : > { %1025 = vmatprep.mubr.msk.bf16.mxu0 %vm198_vm4, %v190_v29  ;;  %v762_v33 = vpop.permute.xlu1 %761 }
 0x109   : > { %1144 = vpow2.f32 %v691_v28 }
 0x10b   : > { %v191_v30 = vpop.trf.xlu0 }
 0x10c   : > { %1026 = vmatmul.mubr.msk.bf16.vlgmr.msra.gmra.mrb[0].mxu0 %vm198_vm4, %v191_v30 }
 0x10d   : > { %1038 = vmatpush3.bf16.msra.mxu0 %v384_v1 }
 0x10e   : > { %1051 = vmatprep.subr.bf16.mxu0 %v573_v13 }
 0x110   : > { %v1292_v31 = vpop.eup %1142 }
 0x111   : > { %695 = vrot.lane.b32.xlu0 %v1292_v31, %s1176_s14 }
 0x113   : > { %v1296_v32 = vpop.eup %1144 }
 0x114   : > { %697 = vrot.lane.b32.xlu1 %v1296_v32, %s1176_s14 }
 0x12a   : > { %v374_v34 = vpop.trf.xlu1 }
 0x12b   : > { %1039 = vmatprep.mubr.msk.bf16.mxu0 %vm198_vm4, %v374_v34 }
 0x12e   : > { %v375_v36 = vpop.trf.xlu1  ;;  %v564_v37 = vpop.trf.xlu0 }
 0x12f   : > { %1040 = vmatmul.mubr.msk.bf16.vlgmr.msra.gmra.mrb[4].mxu0 %vm198_vm4, %v375_v36 }
 0x130   : > { %1052 = vmatpush3.bf16.msra.mxu0 %v573_v13  ;;  %130 = vmax.xlane.f32.xlu0 %v129_v35 }
 0x131   : > { %1053 = vmatprep.mubr.msk.bf16.mxu0 %vm198_vm4, %v564_v37  ;;  %1065 = vmatprep.subr.bf16.mxu0 %v762_v33 }
 0x132   : > { %v565_v38 = vpop.trf.xlu0 }
 0x136   : > { %v753_v40 = vpop.trf.xlu0 }
 0x137   : > { %1054 = vmatmul.mubr.msk.bf16.vlgmr.msra.gmra.mrb[8].mxu0 %vm198_vm4, %v565_v38 }
 0x138   : > { %133 = vmax.xlane.f32.xlu1 %v132_v39  ;;  %1066 = vmatpush3.bf16.msra.mxu0 %v762_v33 }
 0x139   : > { %1067 = vmatprep.mubr.msk.bf16.mxu0 %vm198_vm4, %v753_v40 }
 0x13a   : > { %v754_v41 = vpop.trf.xlu0 }
 0x13e   : > { %v319_v42 = vpop.permute.xlu1 %318 }
 0x13f   : > { %1068 = vmatmul.mubr.msk.bf16.vlgmr.msra.gmra.mrb[12].mxu0 %vm198_vm4, %v754_v41  ;;  %v325_v47 = vsel %vm128_vm3, %v319_v42, 0.0 }
 0x142   : > { %v509_v48 = vpop.permute.xlu1 %508 }
 0x143   : > { %v515_v49 = vsel %vm128_vm3, %v509_v48, 0.0 }
 0x14c   : > { %v317_v43 = vpop.permute.xlu0 %316 }
 0x14d   : > { %v322_v44 = vsel %vm128_vm3, %v317_v43, 0.0 }
 0x14e   : > { %323 = vadd.xlane.f32.xlu0 %v322_v44 }
 0x150   : > { %v507_v45 = vpop.permute.xlu0 %506 }
 0x151   : > { %v512_v46 = vsel %vm128_vm3, %v507_v45, 0.0 }
 0x152   : > { %513 = vadd.xlane.f32.xlu1 %v512_v46  ;;  %326 = vadd.xlane.f32.xlu0 %v325_v47 }
 0x156   : > { %516 = vadd.xlane.f32.xlu0 %v515_v49 }
 0x183   : > { %v696_v50 = vpop.permute.xlu0 %695 }
 0x184   : > { %v701_v51 = vsel %vm128_vm3, %v696_v50, 0.0 }
 0x185   : > { %702 = vadd.xlane.f32.xlu1 %v701_v51 }
 0x186   : > { %v698_v52 = vpop.permute.xlu1 %697 }
 0x187   : > { %v704_v53 = vsel %vm128_vm3, %v698_v52, 0.0 }
 0x188   : > { %705 = vadd.xlane.f32.xlu0 %v704_v53 }
 0x1bd   : > { %v131_v55 = vpop.xlane.xlu0 %130 }
 0x1be   : > { %v135_v56 = vsub.f32 %v1203_v2, %v131_v55 }
 0x1c0   : > { %v137_v57 = vmul.f32 1.442695, %v135_v56 }
 0x1c2   : > { %1146 = vpow2.f32 %v137_v57 }
 0x1c5   : > { %v134_v58 = vpop.xlane.xlu1 %133 }
 0x1c6   : > { %v136_v59 = vsub.f32 %v1209_v5, %v134_v58 }
 0x1c8   : > { %v139_v60 = vmul.f32 1.442695, %v136_v59 }
 0x1ca   : > { %1148 = vpow2.f32 %v139_v60 }
 0x1cc   : > { %v1319_v61 = vpop.eup %1146 }
 0x1cd   : > { %v141_v62 = vsel %vm128_vm3, %v1319_v61, 0.0 }
 0x1ce   : > { %142 = vadd.xlane.f32.xlu1 %v141_v62 }
 0x1d4   : > { %v1323_v63 = vpop.eup %1148 }
 0x1d5   : > { %v144_v0 = vsel %vm128_vm3, %v1323_v63, 0.0 }
 0x1d6   : > { %145 = vadd.xlane.f32.xlu0 %v144_v0 }
 0x1db   : > { %v324_v2 = vpop.xlane.xlu0 %323 }
 0x1dc   : > { %1150 = vrcp.f32 %v324_v2 }
 0x1df   : > { %v514_v1 = vpop.xlane.xlu1 %513  ;;  %v327_v3 = vpop.xlane.xlu0 %326 }
 0x1e0   : > { %1152 = vrcp.f32 %v514_v1  ;;  %v1027_v5 = vpop.f32.mrb[0].mxu0 }
 0x1e1   : > { %1154 = vrcp.f32 %v327_v3  ;;  %v239_v4 = vpop.f32.mrb[1].mxu0 }
 0x1e2   : > { %v1028_v7 = vpop.f32.mrb[2].mxu0 }
 0x1e3   : > { %v517_v8 = vpop.xlane.xlu0 %516  ;;  %v256_v9 = vpack.c.bf16 %v1028_v7, %v1027_v5  ;;  %v242_v10 = vpop.f32.mrb[3].mxu0 }
 0x1e4   : > { %1156 = vrcp.f32 %v517_v8  ;;  %v255_v11 = vpack.c.bf16 %v242_v10, %v239_v4 }
 0x1e6   : > { %1030 = vmatpush3.bf16.msra.mxu1 %v255_v11  ;;  %v1151_v12 = vpop.eup %1150 }
 0x1e7   : > { %1031 = vmatprep.subr.bf16.mxu1 %v1177_v54  ;;  %v330_v6 = vmul.f32 %v1151_v12, %v1280_v21 }
 0x1e9   : > { %v332_v20 = vmul.f32 0.17677669, %v330_v6 }
 0x1ea   : > { %v1153_v13 = vpop.eup %1152  ;;  %1032 = vmatpush3.bf16.msra.mxu1 %v256_v9 }
 0x1eb   : > { %v1155_v14 = vpop.eup %1154  ;;  %1043 = vmatprep.subr.bf16.mxu1 %v1177_v54  ;;  %v520_v17 = vmul.f32 %v1153_v13, %v1284_v22 }
 0x1ec   : > { %v331_v16 = vmul.f32 %v1155_v14, %v1271_v15 }
 0x1ed   : > { %v522_v26 = vmul.f32 0.17677669, %v520_v17 }
 0x1ee   : > { %v1157_v18 = vpop.eup %1156  ;;  %v333_v23 = vmul.f32 0.17677669, %v331_v16 }
 0x1ef   : > { %v521_v24 = vmul.f32 %v1157_v18, %v1276_v19 }
 0x1f0   : > { %v441_v25 = vpack.c.bf16 %v333_v23, %v332_v20 }
 0x1f1   : > { %v523_v27 = vmul.f32 0.17677669, %v521_v24 }
 0x1f2   : > { %445 = vrot.lane.b32.xlu1 %v441_v25, %s1174_s12 }
 0x1f3   : > { %v630_v28 = vpack.c.bf16 %v523_v27, %v522_v26 }
 0x1f5   : > { %634 = vrot.lane.b32.xlu0 %v630_v28, %s1175_s13 }
 0x202   : > { %v1041_v21 = vpop.f32.mrb[4].mxu0 }
 0x203   : > { %v426_v29 = vpop.f32.mrb[5].mxu0 }
 0x204   : > { %v1042_v30 = vpop.f32.mrb[6].mxu0 }
 0x205   : > { %v443_v33 = vpack.c.bf16 %v1042_v30, %v1041_v21  ;;  %v429_v15 = vpop.f32.mrb[7].mxu0 }
 0x206   : > { %v442_v34 = vpack.c.bf16 %v429_v15, %v426_v29 }
 0x20a   : > { %v1055_v22 = vpop.f32.mrb[8].mxu0 }
 0x20b   : > { %v615_v35 = vpop.f32.mrb[9].mxu0 }
 0x20c   : > { %v1056_v36 = vpop.f32.mrb[10].mxu0 }
 0x20d   : > { %v632_v37 = vpack.c.bf16 %v1056_v36, %v1055_v22  ;;  %v618_v38 = vpop.f32.mrb[11].mxu0 }
 0x20e   : > { %v631_v19 = vpack.c.bf16 %v618_v38, %v615_v35 }
 0x212   : > { %v703_v39 = vpop.xlane.xlu1 %702  ;;  %v1069_v40 = vpop.f32.mrb[12].mxu0 }
 0x213   : > { %1158 = vrcp.f32 %v703_v39  ;;  %v804_v41 = vpop.f32.mrb[13].mxu0 }
 0x214   : > { %v1070_v42 = vpop.f32.mrb[14].mxu0 }
 0x215   : > { %v706_v43 = vpop.xlane.xlu0 %705  ;;  %v821_v44 = vpack.c.bf16 %v1070_v42, %v1069_v40  ;;  %v807_v45 = vpop.f32.mrb[15].mxu0 }
 0x216   : > { %1160 = vrcp.f32 %v706_v43  ;;  %v820_v46 = vpack.c.bf16 %v807_v45, %v804_v41 }
 0x21d   : > { %v1159_v47 = vpop.eup %1158 }
 0x21e   : > { %v709_v48 = vmul.f32 %v1159_v47, %v1292_v31 }
 0x220   : > { %v1161_v49 = vpop.eup %1160  ;;  %v711_v51 = vmul.f32 0.17677669, %v709_v48 }
 0x221   : > { %v710_v50 = vmul.f32 %v1161_v49, %v1296_v32 }
 0x223   : > { %v712_v52 = vmul.f32 0.17677669, %v710_v50 }
 0x225   : > { %v819_v53 = vpack.c.bf16 %v712_v52, %v711_v51 }
 0x227   : > { %823 = vrot.lane.b32.xlu1 %v819_v53, %s1176_s14 }
 0x25b   : > { %v143_v55 = vpop.xlane.xlu1 %142 }
 0x25c   : > { %1162 = vrcp.f32 %v143_v55 }
 0x263   : > { %v146_v56 = vpop.xlane.xlu0 %145 }
 0x264   : > { %1164 = vrcp.f32 %v146_v56  ;;  %v446_v32 = vpop.permute.xlu1 %445 }
 0x266   : > { %v1163_v57 = vpop.eup %1162 }
 0x267   : > { %v149_v58 = vmul.f32 %v1163_v57, %v1319_v61  ;;  %v635_v61 = vpop.permute.xlu0 %634 }
 0x269   : > { %v151_v62 = vmul.f32 0.17677669, %v149_v58 }
 0x26e   : > { %v1165_v59 = vpop.eup %1164 }
 0x26f   : > { %v150_v60 = vmul.f32 %v1165_v59, %v1323_v63 }
 0x271   : > { %v152_v31 = vmul.f32 0.17677669, %v150_v60 }
 0x273   : > { %v254_v0 = vpack.c.bf16 %v152_v31, %v151_v62 }
 0x275   : > { %1034 = vmatmul.mubr.msk.bf16.vlgmr.msra.gmra.mrb[0].mxu1 %vm128_vm3, %v254_v0 }
 0x276   : > { %1044 = vmatpush3.bf16.msra.mxu1 %v442_v34  ;;  %1047 = vmatprep.mubr.msk.bf16.mxu1 %vm1178_vm5, %v1177_v54 }
 0x277   : > { %1045 = vmatprep.subr.bf16.mxu1 %v1177_v54 }
 0x27a   : > { %1046 = vmatpush3.bf16.msra.mxu1 %v443_v33 }
 0x27b   : > { %1057 = vmatprep.subr.bf16.mxu1 %v1177_v54 }
 0x27d   : > { %1048 = vmatmul.mubr.msk.bf16.vlgmr.msra.gmra.mrb[4].mxu1 %vm128_vm3, %v446_v32 }
 0x27e   : > { %1058 = vmatpush3.bf16.msra.mxu1 %v631_v19  ;;  %1061 = vmatprep.mubr.msk.bf16.mxu1 %vm1178_vm5, %v1177_v54 }
 0x27f   : > { %1059 = vmatprep.subr.bf16.mxu1 %v1177_v54 }
 0x282   : > { %1060 = vmatpush3.bf16.msra.mxu1 %v632_v37 }
 0x283   : > { %1071 = vmatprep.subr.bf16.mxu1 %v1177_v54 }
 0x285   : > { %1062 = vmatmul.mubr.msk.bf16.vlgmr.msra.gmra.mrb[8].mxu1 %vm128_vm3, %v635_v61 }
 0x286   : > { %1072 = vmatpush3.bf16.msra.mxu1 %v820_v46  ;;  %1075 = vmatprep.mubr.msk.bf16.mxu1 %vm1178_vm5, %v1177_v54 }
 0x287   : > { %1073 = vmatprep.subr.bf16.mxu1 %v1177_v54 }
 0x28a   : > { %1074 = vmatpush3.bf16.msra.mxu1 %v821_v44 }
 0x299   : > { %v824_v63 = vpop.permute.xlu1 %823 }
 0x29a   : > { %1076 = vmatmul.mubr.msk.bf16.vlgmr.msra.gmra.mrb[12].mxu1 %vm128_vm3, %v824_v63 }
 0x348   : > { %v294_v2 = vpop.f32.mrb[0].mxu1 }
 0x349   : > { %v1035_v1 = vpop.f32.mrb[1].mxu1 }
 0x34a   : > { %v297_v3 = vpop.f32.mrb[2].mxu1 }
 0x34b   : > { %v1036_v5 = vpop.f32.mrb[3].mxu1 }
 0x350   : > { %v484_v4 = vpop.f32.mrb[4].mxu1 }
 0x351   : > { %v1049_v7 = vpop.f32.mrb[5].mxu1 }
 0x352   : > { %v487_v8 = vpop.f32.mrb[6].mxu1 }
 0x353   : > { %v1094_v9 = vpack.i.bf16 %v487_v8, %v484_v4  ;;  %v1050_v10 = vpop.f32.mrb[7].mxu1 }
 0x355   : > { %1095 = vrot.lane.b32.xlu1 %v1094_v9, %s1176_s14 }
 0x358   : > { %v673_v11 = vpop.f32.mrb[8].mxu1 }
 0x359   : > { %v1063_v12 = vpop.f32.mrb[9].mxu1 }
 0x35a   : > { %v676_v13 = vpop.f32.mrb[10].mxu1 }
 0x35b   : > { %v1099_v6 = vpack.i.bf16 %v676_v13, %v673_v11  ;;  %v1064_v54 = vpop.f32.mrb[11].mxu1 }
 0x35d   : > { %1100 = vrot.lane.b32.xlu0 %v1099_v6, %s1175_s13 }
 0x36d   : > { %v862_v14 = vpop.f32.mrb[12].mxu1 }
 0x36e   : > { %v1077_v16 = vpop.f32.mrb[13].mxu1 }
 0x36f   : > { %v865_v17 = vpop.f32.mrb[14].mxu1 }
 0x370   : > { %v1104_v18 = vpack.i.bf16 %v865_v17, %v862_v14  ;;  %v1078_v20 = vpop.f32.mrb[15].mxu1 }
 0x372   : > { %1105 = vrot.lane.b32.xlu1 %v1104_v18, %s1174_s12 }
 0x3c7   : > { %v1096_v23 = vpop.permute.xlu1 %1095 }
 0x3c8   : > { %v1098_v25 = vunpack.i.h.bf16 %v1096_v23  ;;  %v1097_v26 = vunpack.i.l.bf16 %v1096_v23 }
 0x3ca   : > { %v894_v29 = vsel %vm128_vm3, %v297_v3, %v1098_v25  ;;  %v893_v30 = vsel %vm128_vm3, %v294_v2, %v1097_v26 }
 0x3cf   : > { %v1101_v24 = vpop.permute.xlu0 %1100 }
 0x3d0   : > { %v1103_v27 = vunpack.i.h.bf16 %v1101_v24  ;;  %v1102_v28 = vunpack.i.l.bf16 %v1101_v24 }
 0x3d2   : > { %v897_v34 = vsel %vm895_vm6, %v894_v29, %v1103_v27  ;;  %v896_v22 = vsel %vm895_vm6, %v893_v30, %v1102_v28 }
 0x3e4   : > { %v1106_v21 = vpop.permute.xlu1 %1105 }
 0x3e5   : > { %v1108_v33 = vunpack.i.h.bf16 %v1106_v21  ;;  %v1107_v15 = vunpack.i.l.bf16 %v1106_v21 }
 0x3e7   : > { %v900_v35 = vsel %vm898_vm7, %v897_v34, %v1108_v33  ;;  %v899_v36 = vsel %vm898_vm7, %v896_v22, %v1107_v15 }
 0x3e8   : > { %v997_v37 = vpack.c.bf16 %v900_v35, %v899_v36 }
 0x3ea   : > { %998 = vst [vmem:[%s116_s18] sm:$0xff] %v997_v37  }
 0x3eb PF: > { %s11_s6 = sadd.s32 1, %s1172_s6  }
 0x3ec   : > { %p8_p4 = scmp.ge.s32.totalorder %s11_s6, 4  }
 0x3ee   :  { %10 = sbr.rel (!%p8_p4) target bundleno = 1 (0x1), region = 54 }

// kernel: model_forward.74
= control target key start
LH: loop header
LB: loop body
LE: loop exit
PB: predicated region body
PF: predicated region fallthrough
CT: control target
= control target key end

     0   :  { %s616_s18 = smov 0   ;;  %s618_s19 = smov 0   ;;  %s675_s0 = inlined_call_operand.vmem [shape: bf16[2,8,16], index: 0, kind: input, shape index: {}]   ;;  %s676_s1 = inlined_call_operand.vmem [shape: bf16[48,16], index: 1, kind: input, shape index: {}]   ;;  %s677_s2 = inlined_call_operand.vmem [shape: f32[1,16], index: 2, kind: input, shape index: {}]   ;;  %s678_s3 = inlined_call_operand.vmem [shape: f32[1,16], index: 3, kind: input, shape index: {}]   ;;  %s679_s4 = inlined_call_operand.vmem [shape: f32[2,2,16], index: 4, kind: input, shape index: {}]   ;;  %s680_s5 = inlined_call_operand.vmem [shape: bf16[2,8,16], index: 5, kind: output, shape index: {}]  }
   0x1   :  { %s620_s20 = smov 0  }
   0x2 LB: > { %s27_s21 = sadd.s32 1, %s576_s19  ;;  %p492_p0 = scmp.ge.s32.totalorder %s580_s20, 1  ;;  %s580_s20 = sphi %s620_s20, %s15_s20   ;;  %s576_s19 = sphi %s618_s19, %s682_s19   ;;  %s572_s18 = sphi %s616_s18, %s681_s18  }
   0x3   : > { %p29_p1 = scmp.ge.s32.totalorder %s27_s21, 2  ;;  %p209_p2 = scmp.lt.s32.totalorder %s580_s20, 3 }
   0x5   : > { %s684_s21 = smov (%p29_p1, %s27_s21), 0  ;;  %p210_p3 = pnand %p492_p0, %p209_p2 }
   0x6   : > { %p242_p4 = scmp.lt.s32.totalorder (!%p210_p3), %s572_s18, 1  ;;  %v582_v0 = vmov (!%p210_p3), 0.0   ;;  %v547_v1 = vld [vmem:[%s676_s1] sm:$0xff] (!%p210_p3)   ;;  %v548_v2 = vld [vmem:[%s676_s1 + $0x8] sm:$0xff] (!%p210_p3)   ;;  %v549_v5 = vld [vmem:[%s676_s1 + $0x10] sm:$0xff] (!%p210_p3)   ;;  %vm263_vm0 = vcmask (!%p210_p3), 1040384   ;;  %v385_v34 = vlaneseq (!%p210_p3) }
   0x7   : > { %213 = sbr.rel (%p210_p3) target bundleno = 579 (0x243), region = 40  ;;  %509 = vmatprep.subr.bf16.mxu0 (!%p210_p3), %v582_v0  ;;  %vm583_vm1 = vmmov (!%p210_p3), 0   ;;  %s584_s7 = smov (!%p210_p3), 16   ;;  %vm280_vm2 = vcmask (!%p210_p3), 130048   ;;  %vm283_vm3 = vcmask (!%p210_p3), 261120   ;;  %vm317_vm4 = vcmask (!%p210_p3), 392192  }
   0x8   : > { %510 = vmatpush3.bf16.msra.mxu0 (!%p210_p3), %v547_v1  ;;  %515 = vmatprep.mubr.msk.bf16.mxu0 (!%p210_p3), %vm583_vm1, %v582_v0  ;;  %s585_s8 = smov (!%p210_p3), 32   ;;  %v496_v19 = vld [vmem:[%s677_s2] ss:$0 sm:$0xff] (!%p210_p3)  ;;  %v386_v35 = vshrl.u32 (!%p210_p3), %v385_v34, 7  ;;  %vm403_vm7 = vcmask (!%p210_p3), 125952  }
   0x9   : > { %511 = vmatprep.subr.bf16.mxu0 (!%p210_p3), %v582_v0  ;;  %v501_v40 = vld [vmem:[%s678_s3] ss:$0 sm:$0xff] (!%p210_p3) }
   0xa   : > { %v387_v38 = vsub.s32 (!%p210_p3), 0, %v386_v35  ;;  %v392_v41 = vsub.s32 (!%p210_p3), 1, %v386_v35 }
   0xc   : > { %512 = vmatpush3.bf16.msra.mxu0 (!%p210_p3), %v548_v2 }
   0xd   : > { %513 = vmatprep.subr.bf16.mxu0 (!%p210_p3), %v582_v0 }
   0xe   : > { %s686_s18 = smov (!%p242_p4, %s572_s18), 1 }
   0xf   : > { %s493_s26 = sshll.u32 %s686_s18, 2  ;;  %s494_s11 = sshll.u32 %s686_s18, 1 }
  0x10   : > { %s245_s29 = scalar_lea.vmem %s675_s0, %s493_s26  ;;  %514 = vmatpush3.bf16.msra.mxu0 %v549_v5  ;;  %s249_s14 = scalar_lea.vmem %s679_s4, %s494_s11 }
  0x11   : > { %v258_v3 = vld [vmem:[%s245_s29] sm:$0xf]  ;;  %s256_s23 = scalar_lea.vmem %s680_s5, %s493_s26 }
  0x12   : > { %v259_v4 = vunpack.c.l.bf16 %v258_v3  ;;  %v383_v36 = vld [vmem:[%s249_s14] sm:$0x3] }
  0x13   : > { %v384_v37 = vadd.f32 1.0, %v383_v36  ;;  %v393_v45 = vrot.slane %v383_v36, %v392_v41 }
  0x14   : > { %v261_v6 = vrot.slane %v259_v4, 7 }
  0x15   : > { %v388_v43 = vrot.slane %v384_v37, %v387_v38 }
  0x16   : > { %v264_v7 = vsel %vm263_vm0, 0.0, %v261_v6  ;;  %v265_v8 = vsel %vm263_vm0, %v261_v6, 0.0 }
  0x17   : > { %v266_v9 = vpack.c.bf16 %v265_v8, %v264_v7 }
  0x19   : > { %v268_v10 = vshrl.u32 %v266_v9, 16  ;;  %v270_v11 = vshll.u32 %v266_v9, 16  ;;  %v277_v14 = vrot.slane %v266_v9, 1 }
  0x1b   : > { %v272_v12 = vrot.slane %v270_v11, 1 }
  0x1d   : > { %v273_v13 = vor.u32 %v272_v12, %v268_v10 }
  0x1f   : > { %274 = vrot.lane.b32.xlu0 %v273_v13, %s584_s7 }
  0x23   : > { %278 = vrot.lane.b32.xlu0 %v277_v14, %s585_s8 }
  0x91   : > { %v275_v15 = vpop.permute.xlu0 %274 }
  0x92   : > { %v282_v16 = vsel %vm280_vm2, %v266_v9, %v275_v15 }
  0x95   : > { %v279_v17 = vpop.permute.xlu0 %278 }
  0x96   : > { %v285_v18 = vsel %vm283_vm3, %v282_v16, %v279_v17 }
  0x97   : > { %516 = vmatmul.mubr.msk.bf16.vlgmr.msra.gmra.mrb[0].mxu0 %vm317_vm4, %v285_v18 }
 0x16a   : > { %v354_v20 = vpop.f32.mrb[0].mxu0 }
 0x16b   : > { %v355_v21 = vadd.f32 %v496_v19, %v354_v20  ;;  %v517_v22 = vpop.f32.mrb[1].mxu0 }
 0x16c   : > { %v357_v23 = vpop.f32.mrb[2].mxu0 }
 0x16d   : > { %v518_v24 = vpop.f32.mrb[3].mxu0  ;;  %v361_v25 = vmul.f32 %v355_v21, %v355_v21 }
 0x16f   : > { %v362_v26 = vsel %vm280_vm2, %v361_v25, 0.0 }
 0x170   : > { %363 = vadd.xlane.f32.xlu1 %v362_v26 }
 0x1fd   : > { %v364_v27 = vpop.xlane.xlu1 %363 }
 0x1fe   : > { %550 = vrsqrt.f32 %v364_v27  ;;  %vm367_vm5 = vcmp.eq.f32.partialorder %v364_v27, inf  ;;  %v370_v30 = vand.u32 2147483648, %v364_v27  ;;  %vm369_vm6 = vcmp.eq.f32.partialorder %v364_v27, 0.0 }
 0x208   : > { %v551_v28 = vpop.eup %550 }
 0x209   : > { %v366_v29 = vmul.f32 %v551_v28, %v364_v27 }
 0x20b   : > { %v368_v31 = vsel %vm367_vm5, %v364_v27, %v366_v29 }
 0x20c   : > { %v371_v32 = vsel %vm369_vm6, %v370_v30, %v368_v31 }
 0x20d   : > { %v372_v33 = vmax.f32 %v371_v32, 1e-12 }
 0x20f   : > { %552 = vrcp.f32 %v372_v33 }
 0x219   : > { %v553_v39 = vpop.eup %552 }
 0x21a   : > { %v374_v42 = vmul.f32 %v553_v39, %v355_v21 }
 0x21c   : > { %v381_v44 = vmul.f32 %v501_v40, %v374_v42 }
 0x21e   : > { %v382_v46 = vmul.f32 4.0, %v381_v44 }
 0x220   : > { %v389_v47 = vmul.f32 %v388_v43, %v382_v46 }
 0x222   : > { %v394_v48 = vadd.f32 %v393_v45, %v389_v47 }
 0x224   : > { %v502_v49 = vmul.f32 -1.442695, %v394_v48 }
 0x226   : > { %554 = vpow2.f32 %v502_v49 }
 0x230   : > { %v555_v50 = vpop.eup %554 }
 0x231   : > { %v398_v51 = vadd.f32 1.0, %v555_v50 }
 0x233   : > { %556 = vrcp.f32 %v398_v51 }
 0x23d   : > { %v557_v52 = vpop.eup %556 }
 0x23e   : > { %v401_v53 = vmul.f32 %v557_v52, %v394_v48 }
 0x240   : > { %v402_v54 = vpack.c.bf16 %v401_v53, %v401_v53 }
 0x242   : > { %404 = vst.msk [vmem:[%s256_s23] sm:$0xf] %vm403_vm7, %v402_v54 }
 0x243 PF: > { %s15_s20 = sadd.s32 1, %s580_s20   ;;  %s681_s18 = smov %s576_s19 }
 0x244   : > { %p12_p5 = scmp.ge.s32.totalorder %s15_s20, 4   ;;  %s682_s19 = smov %s684_s21 }
 0x246   :  { %14 = sbr.rel (!%p12_p5) target bundleno = 2 (0x2), region = 73 }

// kernel: model_forward.75
= control target key start
LH: loop header
LB: loop body
LE: loop exit
PB: predicated region body
PF: predicated region fallthrough
CT: control target
= control target key end

     0   :  { %s542_s15 = smov 0   ;;  %s544_s16 = smov 0   ;;  %s597_s0 = inlined_call_operand.vmem [shape: bf16[2,8,16], index: 0, kind: input, shape index: {}]   ;;  %s598_s1 = inlined_call_operand.vmem [shape: bf16[48,16], index: 1, kind: input, shape index: {}]   ;;  %s599_s2 = inlined_call_operand.vmem [shape: f32[1,16], index: 2, kind: input, shape index: {}]   ;;  %s600_s3 = inlined_call_operand.vmem [shape: f32[1,16], index: 3, kind: input, shape index: {}]   ;;  %s601_s4 = inlined_call_operand.vmem [shape: bf16[2,8,16], index: 4, kind: output, shape index: {}]  }
   0x1   :  { %s546_s17 = smov 0  }
   0x2 LB: > { %s26_s18 = sadd.s32 1, %s507_s16  ;;  %p424_p0 = scmp.ge.s32.totalorder %s511_s17, 1  ;;  %s511_s17 = sphi %s546_s17, %s14_s17   ;;  %s507_s16 = sphi %s544_s16, %s603_s16   ;;  %s503_s15 = sphi %s542_s15, %s602_s15  }
   0x3   : > { %p28_p1 = scmp.ge.s32.totalorder %s26_s18, 2  ;;  %p175_p2 = scmp.lt.s32.totalorder %s511_s17, 3 }
   0x5   : > { %s605_s18 = smov (%p28_p1, %s26_s18), 0  ;;  %p176_p3 = pnand %p424_p0, %p175_p2 }
   0x6   : > { %p202_p4 = scmp.lt.s32.totalorder (!%p176_p3), %s503_s15, 1  ;;  %v513_v0 = vmov (!%p176_p3), 0.0   ;;  %v478_v1 = vld [vmem:[%s598_s1] sm:$0xff] (!%p176_p3)   ;;  %v479_v2 = vld [vmem:[%s598_s1 + $0x8] sm:$0xff] (!%p176_p3)   ;;  %v480_v5 = vld [vmem:[%s598_s1 + $0x10] sm:$0xff] (!%p176_p3)   ;;  %vm219_vm0 = vcmask (!%p176_p3), 1040384  }
   0x7   : > { %179 = sbr.rel (%p176_p3) target bundleno = 575 (0x23f), region = 36  ;;  %440 = vmatprep.subr.bf16.mxu0 (!%p176_p3), %v513_v0  ;;  %vm514_vm1 = vmmov (!%p176_p3), 0   ;;  %s515_s29 = smov (!%p176_p3), 16   ;;  %vm236_vm2 = vcmask (!%p176_p3), 130048   ;;  %vm239_vm3 = vcmask (!%p176_p3), 261120   ;;  %vm273_vm4 = vcmask (!%p176_p3), 392192  }
   0x8   : > { %441 = vmatpush3.bf16.msra.mxu0 (!%p176_p3), %v478_v1  ;;  %446 = vmatprep.mubr.msk.bf16.mxu0 (!%p176_p3), %vm514_vm1, %v513_v0  ;;  %s516_s30 = smov (!%p176_p3), 32   ;;  %v427_v19 = vld [vmem:[%s599_s2] ss:$0 sm:$0xff] (!%p176_p3)  ;;  %vm347_vm7 = vcmask (!%p176_p3), 125952  }
   0x9   : > { %442 = vmatprep.subr.bf16.mxu0 (!%p176_p3), %v513_v0  ;;  %v432_v35 = vld [vmem:[%s600_s3] ss:$0 sm:$0xff] (!%p176_p3) }
   0xc   : > { %443 = vmatpush3.bf16.msra.mxu0 (!%p176_p3), %v479_v2 }
   0xd   : > { %444 = vmatprep.subr.bf16.mxu0 (!%p176_p3), %v513_v0 }
   0xe   : > { %s607_s15 = smov (!%p202_p4, %s503_s15), 1 }
   0xf   : > { %s425_s23 = sshll.u32 %s607_s15, 2 }
  0x10   : > { %s205_s26 = scalar_lea.vmem %s597_s0, %s425_s23  ;;  %445 = vmatpush3.bf16.msra.mxu0 %v480_v5  ;;  %s212_s11 = scalar_lea.vmem %s601_s4, %s425_s23 }
  0x11   : > { %v214_v3 = vld [vmem:[%s205_s26] sm:$0xf] }
  0x12   : > { %v215_v4 = vunpack.c.l.bf16 %v214_v3 }
  0x14   : > { %v217_v6 = vrot.slane %v215_v4, 7 }
  0x16   : > { %v220_v7 = vsel %vm219_vm0, 0.0, %v217_v6  ;;  %v221_v8 = vsel %vm219_vm0, %v217_v6, 0.0 }
  0x17   : > { %v222_v9 = vpack.c.bf16 %v221_v8, %v220_v7 }
  0x19   : > { %v224_v10 = vshrl.u32 %v222_v9, 16  ;;  %v226_v11 = vshll.u32 %v222_v9, 16  ;;  %v233_v14 = vrot.slane %v222_v9, 1 }
  0x1b   : > { %v228_v12 = vrot.slane %v226_v11, 1 }
  0x1d   : > { %v229_v13 = vor.u32 %v228_v12, %v224_v10 }
  0x1f   : > { %230 = vrot.lane.b32.xlu0 %v229_v13, %s515_s29 }
  0x23   : > { %234 = vrot.lane.b32.xlu0 %v233_v14, %s516_s30 }
  0x91   : > { %v231_v15 = vpop.permute.xlu0 %230 }
  0x92   : > { %v238_v16 = vsel %vm236_vm2, %v222_v9, %v231_v15 }
  0x95   : > { %v235_v17 = vpop.permute.xlu0 %234 }
  0x96   : > { %v241_v18 = vsel %vm239_vm3, %v238_v16, %v235_v17 }
  0x97   : > { %447 = vmatmul.mubr.msk.bf16.vlgmr.msra.gmra.mrb[0].mxu0 %vm273_vm4, %v241_v18 }
 0x16a   : > { %v310_v20 = vpop.f32.mrb[0].mxu0 }
 0x16b   : > { %v311_v21 = vadd.f32 %v427_v19, %v310_v20  ;;  %v448_v22 = vpop.f32.mrb[1].mxu0 }
 0x16c   : > { %v313_v23 = vpop.f32.mrb[2].mxu0 }
 0x16d   : > { %v449_v24 = vpop.f32.mrb[3].mxu0  ;;  %v317_v25 = vmul.f32 %v311_v21, %v311_v21 }
 0x16f   : > { %v318_v26 = vsel %vm236_vm2, %v317_v25, 0.0 }
 0x170   : > { %319 = vadd.xlane.f32.xlu1 %v318_v26 }
 0x1fd   : > { %v320_v27 = vpop.xlane.xlu1 %319 }
 0x1fe   : > { %481 = vrsqrt.f32 %v320_v27  ;;  %vm323_vm5 = vcmp.eq.f32.partialorder %v320_v27, inf  ;;  %v326_v30 = vand.u32 2147483648, %v320_v27  ;;  %vm325_vm6 = vcmp.eq.f32.partialorder %v320_v27, 0.0 }
 0x208   : > { %v482_v28 = vpop.eup %481 }
 0x209   : > { %v322_v29 = vmul.f32 %v482_v28, %v320_v27 }
 0x20b   : > { %v324_v31 = vsel %vm323_vm5, %v320_v27, %v322_v29 }
 0x20c   : > { %v327_v32 = vsel %vm325_vm6, %v326_v30, %v324_v31 }
 0x20d   : > { %v328_v33 = vmax.f32 %v327_v32, 1e-12 }
 0x20f   : > { %483 = vrcp.f32 %v328_v33 }
 0x219   : > { %v484_v34 = vpop.eup %483 }
 0x21a   : > { %v330_v36 = vmul.f32 %v484_v34, %v311_v21 }
 0x21c   : > { %v337_v37 = vmul.f32 %v432_v35, %v330_v36 }
 0x21e   : > { %v433_v38 = vmul.f32 -4.0, %v337_v37  ;;  %v338_v42 = vmul.f32 4.0, %v337_v37 }
 0x220   : > { %v340_v39 = vmul.f32 1.442695, %v433_v38 }
 0x222   : > { %485 = vpow2.f32 %v340_v39 }
 0x22c   : > { %v486_v40 = vpop.eup %485 }
 0x22d   : > { %v342_v41 = vadd.f32 1.0, %v486_v40 }
 0x22f   : > { %487 = vrcp.f32 %v342_v41 }
 0x239   : > { %v488_v43 = vpop.eup %487 }
 0x23a   : > { %v345_v44 = vmul.f32 %v488_v43, %v338_v42 }
 0x23c   : > { %v346_v45 = vpack.c.bf16 %v345_v44, %v345_v44 }
 0x23e   : > { %348 = vst.msk [vmem:[%s212_s11] sm:$0xf] %vm347_vm7, %v346_v45 }
 0x23f PF: > { %s14_s17 = sadd.s32 1, %s511_s17   ;;  %s602_s15 = smov %s507_s16 }
 0x240   : > { %p11_p5 = scmp.ge.s32.totalorder %s14_s17, 4   ;;  %s603_s16 = smov %s605_s18 }
 0x242   :  { %13 = sbr.rel (!%p11_p5) target bundleno = 2 (0x2), region = 66 }

// kernel: model_forward.78
= control target key start
LH: loop header
LB: loop body
LE: loop exit
PB: predicated region body
PF: predicated region fallthrough
CT: control target
= control target key end

     0   :  { %s579_s15 = smov 0   ;;  %s581_s16 = smov 0   ;;  %s634_s0 = inlined_call_operand.vmem [shape: bf16[2,8,16], index: 0, kind: input, shape index: {}]   ;;  %s635_s1 = inlined_call_operand.vmem [shape: bf16[16,384], index: 1, kind: input, shape index: {}]   ;;  %s636_s2 = inlined_call_operand.vmem [shape: f32[1,384], index: 2, kind: input, shape index: {}]   ;;  %s637_s3 = inlined_call_operand.vmem [shape: f32[1,16], index: 3, kind: input, shape index: {}]   ;;  %s638_s4 = inlined_call_operand.vmem [shape: bf16[2,8,384], index: 4, kind: output, shape index: {}]  }
   0x1   :  { %s583_s17 = smov 0  }
   0x2 LB: > { %s26_s18 = sadd.s32 1, %s545_s16  ;;  %p468_p0 = scmp.ge.s32.totalorder %s549_s17, 1  ;;  %s549_s17 = sphi %s583_s17, %s14_s17   ;;  %s545_s16 = sphi %s581_s16, %s640_s16   ;;  %s541_s15 = sphi %s579_s15, %s639_s15  }
   0x3   : > { %p28_p1 = scmp.ge.s32.totalorder %s26_s18, 2  ;;  %p175_p2 = scmp.lt.s32.totalorder %s549_s17, 3 }
   0x5   : > { %s642_s18 = smov (%p28_p1, %s26_s18), 0  ;;  %p176_p3 = pnand %p468_p0, %p175_p2 }
   0x6   : > { %p204_p4 = scmp.lt.s32.totalorder (!%p176_p3), %s541_s15, 1  ;;  %vm222_vm0 = vcmask (!%p176_p3), 130048   ;;  %v519_v4 = vld [vmem:[%s635_s1 + $0x4] ss:$12 sps:$4 sm:$0xff] (!%p176_p3)   ;;  %v521_v5 = vld [vmem:[%s635_s1] ss:$12 sps:$4 sm:$0xff] (!%p176_p3)   ;;  %v251_v22 = vlaneseq (!%p176_p3) }
   0x7   : > { %179 = sbr.rel (%p176_p3) target bundleno = 419 (0x1a3), region = 36  ;;  %v551_v6 = vmov (!%p176_p3), 0.0   ;;  %v522_v7 = vld [vmem:[%s635_s1 + $0x8] ss:$12 sps:$4 sm:$0xff] (!%p176_p3)   ;;  %v552_v8 = vmov (!%p176_p3), 0   ;;  %285 = vmatprep.subr.bf16.mxu0 (!%p176_p3), %v519_v4  ;;  %vm553_vm1 = vmmov (!%p176_p3), 0  }
   0x8   : > { %485 = vmatprep.subr.bf16.mxu1 (!%p176_p3), %v551_v6  ;;  %317 = vmatprep.mubr.bf16.mxu0 (!%p176_p3), %v552_v8  ;;  %v471_v17 = vld [vmem:[%s637_s3] ss:$0 sm:$0xff] (!%p176_p3)  ;;  %v252_v23 = vshrl.u32 (!%p176_p3), %v251_v22, 7 }
   0x9   : > { %487 = vmatprep.mubr.msk.bf16.mxu1 (!%p176_p3), %vm553_vm1, %v551_v6  ;;  %286 = vmatpush1.bf16.msra.mxu0 (!%p176_p3), %v521_v5  ;;  %v249_v26 = vld [vmem:[%s636_s2] sm:$0x7] (!%p176_p3) }
   0xa   : > { %486 = vmatpush3.bf16.msra.mxu1 (!%p176_p3), %v522_v7  ;;  %v253_v24 = vsub.s32 (!%p176_p3), 0, %v252_v23  ;;  %v261_v25 = vsub.s32 (!%p176_p3), 2, %v252_v23  ;;  %v257_v27 = vsub.s32 (!%p176_p3), 1, %v252_v23 }
   0xc   : > { %v254_v28 = vrot.slane (!%p176_p3), %v249_v26, %v253_v24  ;;  %v262_v29 = vrot.slane (!%p176_p3), %v249_v26, %v261_v25  ;;  %v258_v30 = vrot.slane (!%p176_p3), %v249_v26, %v257_v27 }
   0xe   : > { %s644_s15 = smov (!%p204_p4, %s541_s15), 1 }
   0xf   : > { %s469_s19 = sshll.u32 %s644_s15, 2  ;;  %s491_s7 = smul.u32 12, %s644_s15 }
  0x10   : > { %s207_s22 = scalar_lea.vmem %s634_s0, %s469_s19 }
  0x11   : > { %v218_v0 = vld [vmem:[%s207_s22] sm:$0xf]  ;;  %s216_s10 = scalar_lea.vmem %s638_s4, %s491_s7 }
  0x12   : > { %v219_v1 = vunpack.c.l.bf16 %v218_v0 }
  0x14   : > { %v221_v2 = vmul.f32 %v219_v1, %v219_v1 }
  0x16   : > { %v223_v3 = vsel %vm222_vm0, %v221_v2, 0.0 }
  0x17   : > { %224 = vadd.xlane.f32.xlu0 %v223_v3 }
  0xa4   : > { %v225_v9 = vpop.xlane.xlu0 %224 }
  0xa5   : > { %523 = vrsqrt.f32 %v225_v9  ;;  %vm228_vm2 = vcmp.eq.f32.partialorder %v225_v9, inf  ;;  %v231_v12 = vand.u32 2147483648, %v225_v9  ;;  %vm230_vm3 = vcmp.eq.f32.partialorder %v225_v9, 0.0 }
  0xaf   : > { %v524_v10 = vpop.eup %523 }
  0xb0   : > { %v227_v11 = vmul.f32 %v524_v10, %v225_v9 }
  0xb2   : > { %v229_v13 = vsel %vm228_vm2, %v225_v9, %v227_v11 }
  0xb3   : > { %v232_v14 = vsel %vm230_vm3, %v231_v12, %v229_v13 }
  0xb4   : > { %v233_v15 = vmax.f32 %v232_v14, 1e-12 }
  0xb6   : > { %525 = vrcp.f32 %v233_v15 }
  0xc0   : > { %v526_v16 = vpop.eup %525 }
  0xc1   : > { %v235_v18 = vmul.f32 %v526_v16, %v219_v1 }
  0xc3   : > { %v242_v19 = vmul.f32 %v471_v17, %v235_v18 }
  0xc5   : > { %v243_v20 = vmul.f32 4.0, %v242_v19 }
  0xc7   : > { %v244_v21 = vpack.c.bf16 %v243_v20, %v243_v20 }
  0xc9   : > { %475 = vmatmul.mubr.msk.bf16.vlgmr.msra.gmra.mrb[0].mxu0 %vm222_vm0, %v244_v21  ;;  %488 = vmatmul.mubr.msk.bf16.vlgmr.msra.gmra.mrb[0].mxu1 %vm222_vm0, %v244_v21 }
 0x19c   : > { %v319_v31 = vpop.f32.mrb[0].mxu0  ;;  %v360_v32 = vpop.f32.mrb[0].mxu1 }
 0x19d   : > { %v320_v33 = vadd.f32 %v319_v31, %v254_v28  ;;  %v361_v34 = vadd.f32 %v360_v32, %v262_v29  ;;  %v321_v35 = vpop.f32.mrb[1].mxu0  ;;  %v489_v36 = vpop.f32.mrb[1].mxu1 }
 0x19e   : > { %v322_v37 = vadd.f32 %v321_v35, %v258_v30  ;;  %v323_v38 = vpop.f32.mrb[2].mxu0  ;;  %v363_v39 = vpop.f32.mrb[2].mxu1 }
 0x19f   : > { %v482_v40 = vpack.c.bf16 %v361_v34, %v361_v34  ;;  %v324_v41 = vpop.f32.mrb[3].mxu0  ;;  %v490_v42 = vpop.f32.mrb[3].mxu1 }
 0x1a0   : > { %v481_v43 = vpack.c.bf16 %v322_v37, %v320_v33 }
 0x1a1   : > { %380 = vst [vmem:[%s216_s10 + $0x8] sm:$0xf] %v482_v40 }
 0x1a2   : > { %379 = vst [vmem:[%s216_s10] sm:$0xff] %v481_v43 }
 0x1a3 PF: > { %s14_s17 = sadd.s32 1, %s549_s17   ;;  %s639_s15 = smov %s545_s16 }
 0x1a4   : > { %p11_p5 = scmp.ge.s32.totalorder %s14_s17, 4   ;;  %s640_s16 = smov %s642_s18 }
 0x1a6   :  { %13 = sbr.rel (!%p11_p5) target bundleno = 2 (0x2), region = 66 }

// kernel: model_forward.80
= control target key start
LH: loop header
LB: loop body
LE: loop exit
PB: predicated region body
PF: predicated region fallthrough
CT: control target
= control target key end

     0   :  { %s561_s15 = smov 0   ;;  %s563_s16 = smov 0   ;;  %s635_s0 = inlined_call_operand.vmem [shape: bf16[2,8,128], index: 0, kind: input, shape index: {}]   ;;  %s636_s1 = inlined_call_operand.vmem [shape: bf16[128,16], index: 1, kind: input, shape index: {}]   ;;  %s637_s2 = inlined_call_operand.vmem [shape: f32[1,16], index: 2, kind: input, shape index: {}]   ;;  %s638_s3 = inlined_call_operand.vmem [shape: f32[1,16], index: 3, kind: input, shape index: {}]   ;;  %s639_s4 = inlined_call_operand.vmem [shape: bf16[2,8,16], index: 4, kind: output, shape index: {}]  }
   0x1   :  { %s565_s17 = smov 0  }
   0x2 LB: > { %s26_s18 = sadd.s32 1, %s528_s16  ;;  %p428_p0 = scmp.ge.s32.totalorder %s532_s17, 1  ;;  %s532_s17 = sphi %s565_s17, %s14_s17   ;;  %s528_s16 = sphi %s563_s16, %s641_s16   ;;  %s524_s15 = sphi %s561_s15, %s640_s15  }
   0x3   : > { %p28_p1 = scmp.ge.s32.totalorder %s26_s18, 2  ;;  %p175_p2 = scmp.lt.s32.totalorder %s532_s17, 3 }
   0x5   : > { %s643_s18 = smov (%p28_p1, %s26_s18), 0  ;;  %p176_p3 = pnand %p428_p0, %p175_p2 }
   0x6   : > { %v498_v0 = vld [vmem:[%s636_s1] sm:$0xff] (!%p176_p3)   ;;  %v534_v1 = vmov (!%p176_p3), 0.0   ;;  %v499_v2 = vld [vmem:[%s636_s1 + $0x8] sm:$0xff] (!%p176_p3)   ;;  %vm535_vm0 = vmmov (!%p176_p3), 0   ;;  %v500_v3 = vld [vmem:[%s636_s1 + $0x10] sm:$0xff] (!%p176_p3)   ;;  %p202_p4 = scmp.lt.s32.totalorder (!%p176_p3), %s524_s15, 1 }
   0x7   : > { %179 = sbr.rel (%p176_p3) target bundleno = 435 (0x1b3), region = 36  ;;  %452 = vmatprep.subr.bf16.mxu0 (!%p176_p3), %v534_v1  ;;  %468 = vmatprep.mubr.msk.bf16.mxu0 (!%p176_p3), %vm535_vm0, %v534_v1  ;;  %v501_v4 = vld [vmem:[%s636_s1 + $0x18] sm:$0xff] (!%p176_p3)   ;;  %v502_v5 = vld [vmem:[%s636_s1 + $0x20] sm:$0xff] (!%p176_p3)   ;;  %v503_v6 = vld [vmem:[%s636_s1 + $0x28] sm:$0xff] (!%p176_p3)   ;;  %vm328_vm1 = vcmask (!%p176_p3), 130048   ;;  %vm351_vm4 = vcmask (!%p176_p3), 125952  }
   0x8   : > { %453 = vmatpush3.bf16.msra.mxu0 (!%p176_p3), %v498_v0  ;;  %v504_v7 = vld [vmem:[%s636_s1 + $0x30] sm:$0xff] (!%p176_p3)   ;;  %v505_v8 = vld [vmem:[%s636_s1 + $0x38] sm:$0xff] (!%p176_p3)   ;;  %v431_v10 = vld [vmem:[%s637_s2] ss:$0 sm:$0xff] (!%p176_p3) }
   0x9   : > { %454 = vmatprep.subr.bf16.mxu0 (!%p176_p3), %v534_v1  ;;  %v440_v26 = vld [vmem:[%s638_s3] ss:$0 sm:$0xff] (!%p176_p3) }
   0xc   : > { %455 = vmatpush3.bf16.msra.mxu0 (!%p176_p3), %v499_v2 }
   0xd   : > { %456 = vmatprep.subr.bf16.mxu0 (!%p176_p3), %v534_v1 }
   0xe   : > { %s645_s15 = smov (!%p202_p4, %s524_s15), 1 }
   0xf   : > { %s429_s7 = sshll.u32 %s645_s15, 2 }
  0x10   : > { %457 = vmatpush3.bf16.msra.mxu0 %v500_v3  ;;  %s205_s12 = scalar_lea.vmem %s635_s0, %s429_s7  ;;  %s212_s23 = scalar_lea.vmem %s639_s4, %s429_s7 }
  0x11   : > { %458 = vmatprep.subr.bf16.mxu0 %v534_v1  ;;  %v214_v9 = vld [vmem:[%s205_s12] sm:$0xf] }
  0x14   : > { %459 = vmatpush3.bf16.msra.mxu0 %v501_v4 }
  0x15   : > { %460 = vmatprep.subr.bf16.mxu0 %v534_v1 }
  0x18   : > { %461 = vmatpush3.bf16.msra.mxu0 %v502_v5 }
  0x19   : > { %462 = vmatprep.subr.bf16.mxu0 %v534_v1 }
  0x1c   : > { %463 = vmatpush3.bf16.msra.mxu0 %v503_v6 }
  0x1d   : > { %464 = vmatprep.subr.bf16.mxu0 %v534_v1 }
  0x20   : > { %465 = vmatpush3.bf16.msra.mxu0 %v504_v7 }
  0x21   : > { %466 = vmatprep.subr.bf16.mxu0 %v534_v1 }
  0x24   : > { %467 = vmatpush3.bf16.msra.mxu0 %v505_v8 }
  0x27   : > { %469 = vmatmul.mubr.bf16.vlgmr.msra.gmra.mrb[0].mxu0 %v214_v9 }
  0xfa   : > { %v320_v11 = vpop.f32.mrb[0].mxu0 }
  0xfb   : > { %v321_v12 = vadd.f32 %v431_v10, %v320_v11  ;;  %v470_v13 = vpop.f32.mrb[1].mxu0 }
  0xfc   : > { %v323_v14 = vpop.f32.mrb[2].mxu0 }
  0xfd   : > { %v471_v15 = vpop.f32.mrb[3].mxu0  ;;  %v327_v16 = vmul.f32 %v321_v12, %v321_v12 }
  0xff   : > { %v329_v17 = vsel %vm328_vm1, %v327_v16, 0.0 }
 0x100   : > { %330 = vadd.xlane.f32.xlu0 %v329_v17 }
 0x18d   : > { %v331_v18 = vpop.xlane.xlu0 %330 }
 0x18e   : > { %506 = vrsqrt.f32 %v331_v18  ;;  %vm334_vm2 = vcmp.eq.f32.partialorder %v331_v18, inf  ;;  %v337_v21 = vand.u32 2147483648, %v331_v18  ;;  %vm336_vm3 = vcmp.eq.f32.partialorder %v331_v18, 0.0 }
 0x198   : > { %v507_v19 = vpop.eup %506 }
 0x199   : > { %v333_v20 = vmul.f32 %v507_v19, %v331_v18 }
 0x19b   : > { %v335_v22 = vsel %vm334_vm2, %v331_v18, %v333_v20 }
 0x19c   : > { %v338_v23 = vsel %vm336_vm3, %v337_v21, %v335_v22 }
 0x19d   : > { %v339_v24 = vmax.f32 %v338_v23, 1e-12 }
 0x19f   : > { %508 = vrcp.f32 %v339_v24 }
 0x1a9   : > { %v509_v25 = vpop.eup %508 }
 0x1aa   : > { %v341_v27 = vmul.f32 %v509_v25, %v321_v12 }
 0x1ac   : > { %v348_v28 = vmul.f32 %v440_v26, %v341_v27 }
 0x1ae   : > { %v349_v29 = vmul.f32 4.0, %v348_v28 }
 0x1b0   : > { %v350_v30 = vpack.c.bf16 %v349_v29, %v349_v29 }
 0x1b2   : > { %352 = vst.msk [vmem:[%s212_s23] sm:$0xf] %vm351_vm4, %v350_v30 }
 0x1b3 PF: > { %s14_s17 = sadd.s32 1, %s532_s17   ;;  %s640_s15 = smov %s528_s16 }
 0x1b4   : > { %p11_p5 = scmp.ge.s32.totalorder %s14_s17, 4   ;;  %s641_s16 = smov %s643_s18 }
 0x1b6   :  { %13 = sbr.rel (!%p11_p5) target bundleno = 2 (0x2), region = 66 }

// kernel: model_forward.79
= control target key start
LH: loop header
LB: loop body
LE: loop exit
PB: predicated region body
PF: predicated region fallthrough
CT: control target
= control target key end

     0   :  { %s1025_s6 = smov 0   ;;  %s1153_s0 = inlined_call_operand.vmem [shape: bf16[2,8,384], index: 0, kind: input, shape index: {}]   ;;  %s1154_s1 = inlined_call_operand.vmem [shape: bf16[2,8,128], index: 1, kind: output, shape index: {}]  }
   0x1 LB: > { %s848_s7 = sadd.s32 4294967295, %s1008_s6   ;;  %p852_p0 = scmp.ge.s32.totalorder %s1008_s6, 1  ;;  %s1008_s6 = sphi %s1025_s6, %s11_s6  }
   0x2   : > { %p87_p1 = scmp.lt.s32.totalorder %s1008_s6, 3 }
   0x4   : > { %p88_p2 = pnand %p852_p0, %p87_p1 }
   0x5   : > { %p106_p3 = scmp.lt.s32.totalorder (!%p88_p2), %s848_s7, 1  ;;  %vm444_vm0 = vcmask (!%p88_p2), 785920   ;;  %vm178_vm1 = vcmask (!%p88_p2), 1043456   ;;  %vm277_vm2 = vcmask (!%p88_p2), 523520   ;;  %vm610_vm3 = vcmask (!%p88_p2), 1048320   ;;  %s1010_s12 = smov (!%p88_p2), 96  }
   0x6   : > { %91 = sbr.rel (%p88_p2) target bundleno = 990 (0x3de), region = 24  ;;  %vm121_vm4 = vcmask (!%p88_p2), 261120   ;;  %s1011_s13 = smov (!%p88_p2), 32   ;;  %vm171_vm5 = vcmask (!%p88_p2), 64512   ;;  %vm1014_vm6 = vmmov (!%p88_p2), 0   ;;  %vm789_vm7 = vcmask (!%p88_p2), 523264  }
   0x7   : > { %s1012_s14 = smov (!%p88_p2), 64   ;;  %vm791_vm8 = vcmask (!%p88_p2), 785408  }
   0xd   : > { %s1156_s7 = smov (!%p106_p3, %s848_s7), 1 }
   0xe   : > { %s954_s8 = smul.u32 12, %s1156_s7  ;;  %s854_s15 = sshll.u32 %s1156_s7, 2 }
   0xf   : > { %s114_s18 = scalar_lea.vmem %s1154_s1, %s854_s15 }
  0x10   : > { %s110_s11 = scalar_lea.vmem %s1153_s0, %s954_s8 }
  0x11   : > { %v1039_v0 = vld [vmem:[%s110_s11 + $0x8] ss:$0 sps:$4 sm:$0xff]   ;;  %v116_v1 = vld [vmem:[%s110_s11] sm:$0xff] }
  0x12   : > { %v1041_v2 = vunpack.c.l.bf16 %v116_v1  ;;  %v1043_v3 = vunpack.c.h.bf16 %v116_v1  ;;  %335 = vrot.lane.b32.xlu0 %v1039_v0, %s1010_s12  ;;  %950 = vmatprep.subr.msk.bf16.mxu0 %vm178_vm1, %v1039_v0  ;;  %v180_v4 = vsel %vm178_vm1, %v1039_v0, 0 }
  0x13   : > { %895 = vmatpush3.bf16.msra.mxu0 %v180_v4 }
  0x14   : > { %v461_v5 = vsel %vm444_vm0, %v1043_v3, -inf  ;;  %v278_v6 = vsel %vm277_vm2, %v1041_v2, -inf  ;;  %v294_v7 = vsel %vm277_vm2, %v1043_v3, -inf  ;;  %v627_v10 = vsel %vm610_vm3, %v1043_v3, -inf }
  0x15   : > { %v462_v8 = vrot.slane %v461_v5, 4  ;;  %v295_v9 = vrot.slane %v294_v7, 4  ;;  %279 = vmax.xlane.f32.xlu1 %v278_v6  ;;  %v628_v11 = vrot.slane %v627_v10, 4  ;;  %v445_v34 = vsel %vm444_vm0, %v1041_v2, -inf }
  0x16   : > { %v134_v58 = vsel %vm121_vm4, %v1043_v3, -inf }
  0x17   : > { %v463_v12 = vmax.f32 %v461_v5, %v462_v8  ;;  %v296_v13 = vmax.f32 %v294_v7, %v295_v9  ;;  %v629_v14 = vmax.f32 %v627_v10, %v628_v11  ;;  %v135_v59 = vrot.slane %v134_v58, 4 }
  0x19   : > { %v464_v15 = vrot.slane %v463_v12, 2  ;;  %v297_v16 = vrot.slane %v296_v13, 2  ;;  %v630_v17 = vrot.slane %v629_v14, 2  ;;  %v136_v60 = vmax.f32 %v134_v58, %v135_v59 }
  0x1b   : > { %v465_v18 = vmax.f32 %v463_v12, %v464_v15  ;;  %v298_v19 = vmax.f32 %v296_v13, %v297_v16  ;;  %v631_v20 = vmax.f32 %v629_v14, %v630_v17  ;;  %v137_v63 = vrot.slane %v136_v60, 2 }
  0x1c   : > { %v611_v16 = vsel %vm610_vm3, %v1041_v2, -inf }
  0x1d   : > { %v466_v21 = vrot.slane %v465_v18, 1  ;;  %v299_v22 = vrot.slane %v298_v19, 1  ;;  %v632_v23 = vrot.slane %v631_v20, 1  ;;  %v138_v9 = vmax.f32 %v136_v60, %v137_v63 }
  0x1f   : > { %v467_v24 = vmax.f32 %v465_v18, %v466_v21  ;;  %v300_v25 = vmax.f32 %v298_v19, %v299_v22  ;;  %v633_v26 = vmax.f32 %v631_v20, %v632_v23  ;;  %v139_v11 = vrot.slane %v138_v9, 1 }
  0x21   : > { %v468_v27 = vsub.f32 %v1043_v3, %v467_v24  ;;  %v301_v28 = vsub.f32 %v1043_v3, %v300_v25  ;;  %v634_v29 = vsub.f32 %v1043_v3, %v633_v26  ;;  %v140_v12 = vmax.f32 %v138_v9, %v139_v11 }
  0x23   : > { %v469_v30 = vmul.f32 1.442695, %v468_v27  ;;  %v302_v31 = vmul.f32 1.442695, %v301_v28  ;;  %v635_v32 = vmul.f32 1.442695, %v634_v29  ;;  %v141_v13 = vsub.f32 %v1043_v3, %v140_v12 }
  0x25   : > { %970 = vpow2.f32 %v469_v30  ;;  %v142_v14 = vmul.f32 1.442695, %v141_v13 }
  0x26   : > { %972 = vpow2.f32 %v302_v31 }
  0x27   : > { %974 = vpow2.f32 %v635_v32 }
  0x2f   : > { %v971_v33 = vpop.eup %970 }
  0x30   : > { %v973_v35 = vpop.eup %972  ;;  %v471_v36 = vsel %vm444_vm0, %v971_v33, 0.0 }
  0x31   : > { %v975_v37 = vpop.eup %974  ;;  %v472_v38 = vrot.slane %v471_v36, 4  ;;  %v304_v39 = vsel %vm277_vm2, %v973_v35, 0.0  ;;  %446 = vmax.xlane.f32.xlu0 %v445_v34 }
  0x32   : > { %v305_v40 = vrot.slane %v304_v39, 4  ;;  %v637_v41 = vsel %vm610_vm3, %v975_v37, 0.0 }
  0x33   : > { %v473_v42 = vadd.f32 %v472_v38, %v471_v36  ;;  %v638_v43 = vrot.slane %v637_v41, 4 }
  0x34   : > { %v306_v44 = vadd.f32 %v305_v40, %v304_v39 }
  0x35   : > { %v474_v45 = vrot.slane %v473_v42, 2  ;;  %v639_v46 = vadd.f32 %v638_v43, %v637_v41 }
  0x36   : > { %v307_v47 = vrot.slane %v306_v44, 2 }
  0x37   : > { %v475_v48 = vadd.f32 %v474_v45, %v473_v42  ;;  %v640_v49 = vrot.slane %v639_v46, 2 }
  0x38   : > { %v308_v50 = vadd.f32 %v307_v47, %v306_v44 }
  0x39   : > { %v476_v51 = vrot.slane %v475_v48, 1  ;;  %v641_v52 = vadd.f32 %v640_v49, %v639_v46 }
  0x3a   : > { %v309_v53 = vrot.slane %v308_v50, 1 }
  0x3b   : > { %v477_v54 = vadd.f32 %v476_v51, %v475_v48  ;;  %v642_v55 = vrot.slane %v641_v52, 1 }
  0x3c   : > { %v310_v56 = vadd.f32 %v309_v53, %v308_v50 }
  0x3d   : > { %976 = vrcp.f32 %v477_v54  ;;  %v643_v57 = vadd.f32 %v642_v55, %v641_v52 }
  0x3e   : > { %978 = vrcp.f32 %v310_v56 }
  0x3f   : > { %980 = vrcp.f32 %v643_v57 }
  0x40   : > { %982 = vpow2.f32 %v142_v14 }
  0x47   : > { %v977_v61 = vpop.eup %976 }
  0x48   : > { %v979_v62 = vpop.eup %978  ;;  %v479_v5 = vmul.f32 %v977_v61, %v971_v33 }
  0x49   : > { %v981_v1 = vpop.eup %980  ;;  %v312_v4 = vmul.f32 %v979_v62, %v973_v35 }
  0x4a   : > { %v645_v6 = vmul.f32 %v981_v1, %v975_v37  ;;  %v480_v10 = vpack.c.bf16 %v479_v5, %v479_v5  ;;  %v983_v15 = vpop.eup %982  ;;  %v122_v37 = vsel %vm121_vm4, %v1041_v2, -inf  ;;  %v1013_v5 = vmov 0.0  }
  0x4b   : > { %v313_v7 = vpack.c.bf16 %v312_v4, %v312_v4  ;;  %v144_v17 = vsel %vm121_vm4, %v983_v15, 0.0  ;;  %900 = vmatprep.subr.bf16.mxu1 %v1013_v5  ;;  %904 = vmatprep.mubr.msk.bf16.mxu1 %vm1014_vm6, %v1013_v5 }
  0x4c   : > { %v646_v8 = vpack.c.bf16 %v645_v6, %v645_v6  ;;  %v145_v18 = vrot.slane %v144_v17, 4 }
  0x4d   : > { %315 = vrot.lane.b32.xlu0 %v313_v7, %s1010_s12 }
  0x4e   : > { %648 = vrot.lane.b32.xlu1 %v646_v8, %s1011_s13  ;;  %v146_v19 = vadd.f32 %v145_v18, %v144_v17 }
  0x50   : > { %v147_v20 = vrot.slane %v146_v19, 2 }
  0x51   : > { %482 = vrot.lane.b32.xlu0 %v480_v10, %s1012_s14 }
  0x52   : > { %501 = vrot.lane.b32.xlu1 %v1039_v0, %s1012_s14  ;;  %v148_v21 = vadd.f32 %v147_v20, %v146_v19 }
  0x54   : > { %v149_v22 = vrot.slane %v148_v21, 1 }
  0x56   : > { %667 = vrot.lane.b32.xlu1 %v1039_v0, %s1011_s13  ;;  %v150_v23 = vadd.f32 %v149_v22, %v148_v21 }
  0x58   : > { %984 = vrcp.f32 %v150_v23 }
  0x62   : > { %v985_v0 = vpop.eup %984 }
  0x63   : > { %v152_v3 = vmul.f32 %v985_v0, %v983_v15 }
  0x65   : > { %v153_v25 = vpack.c.bf16 %v152_v3, %v152_v3 }
  0x70   : > { %612 = vmax.xlane.f32.xlu0 %v611_v16 }
  0x84   : > { %v336_v24 = vpop.permute.xlu0 %335 }
  0x85   : > { %951 = vmatprep.subr.msk.bf16.mxu0 %vm178_vm1, %v336_v24  ;;  %v344_v43 = vsel %vm178_vm1, %v336_v24, 0 }
  0x9d   : > { %155 = vxpose.xlu0.c.b16.start.end [1/1] (short) (narrow) %v153_v25, 32 }
  0xa2   : > { %v280_v26 = vpop.xlane.xlu1 %279 }
  0xa3   : > { %v281_v29 = vsub.f32 %v1041_v2, %v280_v26 }
  0xa5   : > { %v282_v32 = vmul.f32 1.442695, %v281_v29 }
  0xbe   : > { %v447_v27 = vpop.xlane.xlu0 %446 }
  0xbf   : > { %v448_v28 = vsub.f32 %v1041_v2, %v447_v27 }
  0xc0   : > { %v649_v33 = vpop.permute.xlu1 %648 }
  0xc1   : > { %v449_v30 = vmul.f32 1.442695, %v448_v28 }
  0xc2   : > { %v316_v31 = vpop.permute.xlu0 %315 }
  0xc3   : > { %986 = vpow2.f32 %v449_v30  ;;  %318 = vxpose.xlu1.c.b16.start.end [1/1] (short) (narrow) %v316_v31, 32 }
  0xc4   : > { %988 = vpow2.f32 %v282_v32  ;;  %v502_v44 = vpop.permute.xlu1 %501 }
  0xc5   : > { %v510_v48 = vsel %vm178_vm1, %v502_v44, 0 }
  0xc6   : > { %v483_v34 = vpop.permute.xlu0 %482 }
  0xc7   : > { %485 = vxpose.xlu0.c.b16.start.end [1/1] (short) (narrow) %v483_v34, 32 }
  0xc8   : > { %651 = vxpose.xlu1.c.b16.start.end [1/1] (short) (narrow) %v649_v33, 32  ;;  %v668_v46 = vpop.permute.xlu1 %667 }
  0xc9   : > { %v676_v51 = vsel %vm178_vm1, %v668_v46, 0 }
  0xcd   : > { %v1083_v35 = vpop.eup %986 }
  0xce   : > { %v1087_v36 = vpop.eup %988 }
  0xd0   : > { %452 = vrot.lane.b32.xlu1 %v1083_v35, %s1012_s14 }
  0xd4   : > { %285 = vrot.lane.b32.xlu0 %v1087_v36, %s1010_s12 }
  0xf3   : > { %123 = vmax.xlane.f32.xlu0 %v122_v37 }
  0xfd   : > { %v613_v38 = vpop.xlane.xlu0 %612 }
  0xfe   : > { %v614_v39 = vsub.f32 %v1041_v2, %v613_v38 }
 0x100   : > { %v615_v40 = vmul.f32 1.442695, %v614_v39 }
 0x102   : > { %990 = vpow2.f32 %v615_v40 }
 0x103   : > { %v163_v41 = vpop.trf.xlu0 }
 0x104   : > { %896 = vmatprep.mubr.msk.bf16.mxu0 %vm171_vm5, %v163_v41 }
 0x107   : > { %v164_v42 = vpop.trf.xlu0 }
 0x108   : > { %897 = vmatmul.mubr.msk.bf16.vlgmr.msra.gmra.mrb[0].mxu0 %vm171_vm5, %v164_v42 }
 0x109   : > { %909 = vmatpush3.bf16.msra.mxu0 %v344_v43 }
 0x10a   : > { %952 = vmatprep.subr.msk.bf16.mxu0 %vm178_vm1, %v502_v44 }
 0x10c   : > { %v1098_v45 = vpop.eup %990 }
 0x10d   : > { %618 = vrot.lane.b32.xlu1 %v1098_v45, %s1011_s13 }
 0x129   : > { %v326_v47 = vpop.trf.xlu1 }
 0x12a   : > { %910 = vmatprep.mubr.msk.bf16.mxu0 %vm171_vm5, %v326_v47 }
 0x12d   : > { %v327_v49 = vpop.trf.xlu1  ;;  %v493_v50 = vpop.trf.xlu0 }
 0x12e   : > { %911 = vmatmul.mubr.msk.bf16.vlgmr.msra.gmra.mrb[4].mxu0 %vm171_vm5, %v327_v49 }
 0x12f   : > { %923 = vmatpush3.bf16.msra.mxu0 %v510_v48  ;;  %924 = vmatprep.mubr.msk.bf16.mxu0 %vm171_vm5, %v493_v50 }
 0x130   : > { %953 = vmatprep.subr.msk.bf16.mxu0 %vm178_vm1, %v668_v46 }
 0x131   : > { %v494_v52 = vpop.trf.xlu0  ;;  %v659_v53 = vpop.trf.xlu1 }
 0x135   : > { %v660_v54 = vpop.trf.xlu1 }
 0x136   : > { %925 = vmatmul.mubr.msk.bf16.vlgmr.msra.gmra.mrb[8].mxu0 %vm171_vm5, %v494_v52 }
 0x137   : > { %937 = vmatpush3.bf16.msra.mxu0 %v676_v51  ;;  %938 = vmatprep.mubr.msk.bf16.mxu0 %vm171_vm5, %v659_v53 }
 0x13e   : > { %939 = vmatmul.mubr.msk.bf16.vlgmr.msra.gmra.mrb[12].mxu0 %vm171_vm5, %v660_v54 }
 0x142   : > { %v453_v55 = vpop.permute.xlu1 %452 }
 0x143   : > { %v455_v56 = vsel %vm121_vm4, %v453_v55, 0.0 }
 0x144   : > { %456 = vadd.xlane.f32.xlu0 %v455_v56 }
 0x146   : > { %v286_v57 = vpop.permute.xlu0 %285 }
 0x147   : > { %v288_v58 = vsel %vm121_vm4, %v286_v57, 0.0 }
 0x148   : > { %289 = vadd.xlane.f32.xlu1 %v288_v58 }
 0x17f   : > { %v619_v59 = vpop.permute.xlu1 %618 }
 0x180   : > { %v621_v60 = vsel %vm121_vm4, %v619_v59, 0.0  ;;  %v124_v61 = vpop.xlane.xlu0 %123 }
 0x181   : > { %622 = vadd.xlane.f32.xlu0 %v621_v60  ;;  %v125_v62 = vsub.f32 %v1041_v2, %v124_v61 }
 0x183   : > { %v126_v63 = vmul.f32 1.442695, %v125_v62 }
 0x185   : > { %992 = vpow2.f32 %v126_v63 }
 0x18f   : > { %v993_v1 = vpop.eup %992 }
 0x190   : > { %v128_v4 = vsel %vm121_vm4, %v993_v1, 0.0 }
 0x191   : > { %129 = vadd.xlane.f32.xlu0 %v128_v4 }
 0x1d1   : > { %v457_v6 = vpop.xlane.xlu0 %456 }
 0x1d2   : > { %994 = vrcp.f32 %v457_v6 }
 0x1d5   : > { %v290_v7 = vpop.xlane.xlu1 %289 }
 0x1d6   : > { %996 = vrcp.f32 %v290_v7 }
 0x1db   : > { %v898_v8 = vpop.f32.mrb[0].mxu0 }
 0x1dc   : > { %v216_v9 = vpop.f32.mrb[1].mxu0  ;;  %v995_v2 = vpop.eup %994 }
 0x1dd   : > { %v899_v10 = vpop.f32.mrb[2].mxu0  ;;  %v459_v11 = vmul.f32 %v995_v2, %v1083_v35 }
 0x1de   : > { %v233_v12 = vpack.c.bf16 %v899_v10, %v898_v8  ;;  %v219_v13 = vpop.f32.mrb[3].mxu0 }
 0x1df   : > { %v232_v14 = vpack.c.bf16 %v219_v13, %v216_v9  ;;  %v460_v15 = vmul.f32 0.17677669, %v459_v11 }
 0x1e0   : > { %v997_v16 = vpop.eup %996 }
 0x1e1   : > { %901 = vmatpush3.bf16.msra.mxu1 %v232_v14  ;;  %v561_v17 = vpack.c.bf16 %v460_v15, %v460_v15  ;;  %v292_v18 = vmul.f32 %v997_v16, %v1087_v36 }
 0x1e2   : > { %902 = vmatprep.subr.bf16.mxu1 %v1013_v5 }
 0x1e3   : > { %565 = vrot.lane.b32.xlu0 %v561_v17, %s1012_s14  ;;  %v293_v19 = vmul.f32 0.17677669, %v292_v18 }
 0x1e5   : > { %903 = vmatpush3.bf16.msra.mxu1 %v233_v12  ;;  %v395_v20 = vpack.c.bf16 %v293_v19, %v293_v19 }
 0x1e6   : > { %914 = vmatprep.subr.bf16.mxu1 %v1013_v5 }
 0x1e7   : > { %399 = vrot.lane.b32.xlu1 %v395_v20, %s1010_s12 }
 0x201   : > { %v912_v21 = vpop.f32.mrb[4].mxu0 }
 0x202   : > { %v380_v22 = vpop.f32.mrb[5].mxu0 }
 0x203   : > { %v913_v23 = vpop.f32.mrb[6].mxu0 }
 0x204   : > { %v397_v24 = vpack.c.bf16 %v913_v23, %v912_v21  ;;  %v383_v0 = vpop.f32.mrb[7].mxu0 }
 0x205   : > { %v396_v3 = vpack.c.bf16 %v383_v0, %v380_v22 }
 0x209   : > { %v926_v25 = vpop.f32.mrb[8].mxu0 }
 0x20a   : > { %v546_v26 = vpop.f32.mrb[9].mxu0 }
 0x20b   : > { %v927_v27 = vpop.f32.mrb[10].mxu0 }
 0x20c   : > { %v563_v28 = vpack.c.bf16 %v927_v27, %v926_v25  ;;  %v549_v29 = vpop.f32.mrb[11].mxu0 }
 0x20d   : > { %v562_v31 = vpack.c.bf16 %v549_v29, %v546_v26 }
 0x20e   : > { %v623_v30 = vpop.xlane.xlu0 %622 }
 0x20f   : > { %998 = vrcp.f32 %v623_v30 }
 0x211   : > { %v940_v32 = vpop.f32.mrb[12].mxu0 }
 0x212   : > { %v712_v33 = vpop.f32.mrb[13].mxu0 }
 0x213   : > { %v941_v34 = vpop.f32.mrb[14].mxu0 }
 0x214   : > { %v729_v35 = vpack.c.bf16 %v941_v34, %v940_v32  ;;  %v715_v36 = vpop.f32.mrb[15].mxu0 }
 0x215   : > { %v728_v37 = vpack.c.bf16 %v715_v36, %v712_v33 }
 0x219   : > { %v999_v38 = vpop.eup %998 }
 0x21a   : > { %v625_v39 = vmul.f32 %v999_v38, %v1098_v45 }
 0x21c   : > { %v626_v40 = vmul.f32 0.17677669, %v625_v39 }
 0x21e   : > { %v727_v41 = vpack.c.bf16 %v626_v40, %v626_v40  ;;  %v130_v42 = vpop.xlane.xlu0 %129 }
 0x21f   : > { %1000 = vrcp.f32 %v130_v42 }
 0x220   : > { %731 = vrot.lane.b32.xlu1 %v727_v41, %s1011_s13 }
 0x229   : > { %v1001_v43 = vpop.eup %1000 }
 0x22a   : > { %v132_v44 = vmul.f32 %v1001_v43, %v993_v1 }
 0x22c   : > { %v133_v46 = vmul.f32 0.17677669, %v132_v44 }
 0x22e   : > { %v231_v47 = vpack.c.bf16 %v133_v46, %v133_v46 }
 0x230   : > { %905 = vmatmul.mubr.msk.bf16.vlgmr.msra.gmra.mrb[0].mxu1 %vm121_vm4, %v231_v47 }
 0x231   : > { %915 = vmatpush3.bf16.msra.mxu1 %v396_v3  ;;  %918 = vmatprep.mubr.msk.bf16.mxu1 %vm1014_vm6, %v1013_v5 }
 0x232   : > { %916 = vmatprep.subr.bf16.mxu1 %v1013_v5 }
 0x235   : > { %917 = vmatpush3.bf16.msra.mxu1 %v397_v24 }
 0x236   : > { %928 = vmatprep.subr.bf16.mxu1 %v1013_v5 }
 0x255   : > { %v566_v48 = vpop.permute.xlu0 %565 }
 0x259   : > { %v400_v45 = vpop.permute.xlu1 %399 }
 0x25a   : > { %919 = vmatmul.mubr.msk.bf16.vlgmr.msra.gmra.mrb[4].mxu1 %vm121_vm4, %v400_v45 }
 0x25b   : > { %929 = vmatpush3.bf16.msra.mxu1 %v562_v31  ;;  %932 = vmatprep.mubr.msk.bf16.mxu1 %vm1014_vm6, %v1013_v5 }
 0x25c   : > { %930 = vmatprep.subr.bf16.mxu1 %v1013_v5 }
 0x25f   : > { %931 = vmatpush3.bf16.msra.mxu1 %v563_v28 }
 0x260   : > { %942 = vmatprep.subr.bf16.mxu1 %v1013_v5 }
 0x262   : > { %933 = vmatmul.mubr.msk.bf16.vlgmr.msra.gmra.mrb[8].mxu1 %vm121_vm4, %v566_v48 }
 0x263   : > { %943 = vmatpush3.bf16.msra.mxu1 %v728_v37  ;;  %946 = vmatprep.mubr.msk.bf16.mxu1 %vm1014_vm6, %v1013_v5 }
 0x264   : > { %944 = vmatprep.subr.bf16.mxu1 %v1013_v5 }
 0x267   : > { %945 = vmatpush3.bf16.msra.mxu1 %v729_v35 }
 0x292   : > { %v732_v49 = vpop.permute.xlu1 %731 }
 0x293   : > { %947 = vmatmul.mubr.msk.bf16.vlgmr.msra.gmra.mrb[12].mxu1 %vm121_vm4, %v732_v49 }
 0x303   : > { %v271_v50 = vpop.f32.mrb[0].mxu1 }
 0x304   : > { %v906_v51 = vpop.f32.mrb[1].mxu1 }
 0x305   : > { %v274_v52 = vpop.f32.mrb[2].mxu1 }
 0x306   : > { %v907_v53 = vpop.f32.mrb[3].mxu1 }
 0x32d   : > { %v438_v54 = vpop.f32.mrb[4].mxu1 }
 0x32e   : > { %777 = vrot.lane.b32.xlu1 %v438_v54, %s1011_s13  ;;  %v920_v55 = vpop.f32.mrb[5].mxu1 }
 0x32f   : > { %v441_v56 = vpop.f32.mrb[6].mxu1 }
 0x330   : > { %v921_v57 = vpop.f32.mrb[7].mxu1 }
 0x335   : > { %v604_v58 = vpop.f32.mrb[8].mxu1 }
 0x336   : > { %781 = vrot.lane.b32.xlu1 %v604_v58, %s1012_s14  ;;  %v934_v59 = vpop.f32.mrb[9].mxu1 }
 0x337   : > { %v607_v60 = vpop.f32.mrb[10].mxu1 }
 0x338   : > { %v935_v61 = vpop.f32.mrb[11].mxu1 }
 0x366   : > { %v770_v62 = vpop.f32.mrb[12].mxu1 }
 0x367   : > { %785 = vrot.lane.b32.xlu0 %v770_v62, %s1010_s12  ;;  %v948_v63 = vpop.f32.mrb[13].mxu1 }
 0x368   : > { %v773_v1 = vpop.f32.mrb[14].mxu1 }
 0x369   : > { %v949_v4 = vpop.f32.mrb[15].mxu1 }
 0x3a0   : > { %v778_v5 = vpop.permute.xlu1 %777 }
 0x3a1   : > { %v788_v7 = vsel %vm121_vm4, %v271_v50, %v778_v5 }
 0x3a8   : > { %v782_v6 = vpop.permute.xlu1 %781 }
 0x3a9   : > { %v790_v8 = vsel %vm789_vm7, %v788_v7, %v782_v6 }
 0x3d9   : > { %v786_v9 = vpop.permute.xlu0 %785 }
 0x3da   : > { %v792_v2 = vsel %vm791_vm8, %v790_v8, %v786_v9 }
 0x3db   : > { %v793_v10 = vpack.c.bf16 %v792_v2, %v792_v2 }
 0x3dd   : > { %794 = vst [vmem:[%s114_s18] sm:$0xf] %v793_v10 }
 0x3de PF: > { %s11_s6 = sadd.s32 1, %s1008_s6  }
 0x3df   : > { %p8_p4 = scmp.ge.s32.totalorder %s11_s6, 4  }
 0x3e1   :  { %10 = sbr.rel (!%p8_p4) target bundleno = 1 (0x1), region = 54 }

// kernel: model_forward.81
= control target key start
LH: loop header
LB: loop body
LE: loop exit
PB: predicated region body
PF: predicated region fallthrough
CT: control target
= control target key end

     0   :  { %s470_s12 = smov 0   ;;  %s472_s13 = smov 0   ;;  %s522_s0 = inlined_call_operand.vmem [shape: bf16[2,8,16], index: 0, kind: input, shape index: {}]   ;;  %s523_s1 = inlined_call_operand.vmem [shape: bf16[48,32], index: 1, kind: input, shape index: {}]   ;;  %s524_s2 = inlined_call_operand.vmem [shape: f32[1,32], index: 2, kind: input, shape index: {}]   ;;  %s525_s3 = inlined_call_operand.vmem [shape: bf16[2,8,32], index: 3, kind: output, shape index: {}]  }
   0x1   :  { %s474_s14 = smov 0  }
   0x2 LB: > { %s25_s15 = sadd.s32 1, %s440_s13  ;;  %p367_p0 = scmp.ge.s32.totalorder %s444_s14, 1  ;;  %s444_s14 = sphi %s474_s14, %s13_s14   ;;  %s440_s13 = sphi %s472_s13, %s527_s13   ;;  %s436_s12 = sphi %s470_s12, %s526_s12  }
   0x3   : > { %p27_p1 = scmp.ge.s32.totalorder %s25_s15, 2  ;;  %p150_p2 = scmp.lt.s32.totalorder %s444_s14, 3 }
   0x5   : > { %s529_s15 = smov (%p27_p1, %s25_s15), 0  ;;  %p151_p3 = pnand %p367_p0, %p150_p2 }
   0x6   : > { %p175_p4 = scmp.lt.s32.totalorder (!%p151_p3), %s436_s12, 1  ;;  %v446_v0 = vmov (!%p151_p3), 0.0   ;;  %v419_v1 = vld [vmem:[%s523_s1] sm:$0xff] (!%p151_p3)   ;;  %v420_v2 = vld [vmem:[%s523_s1 + $0x8] sm:$0xff] (!%p151_p3)   ;;  %v421_v5 = vld [vmem:[%s523_s1 + $0x10] sm:$0xff] (!%p151_p3)   ;;  %vm192_vm0 = vcmask (!%p151_p3), 1040384  }
   0x7   : > { %154 = sbr.rel (%p151_p3) target bundleno = 368 (0x170), region = 32  ;;  %381 = vmatprep.subr.bf16.mxu0 (!%p151_p3), %v446_v0  ;;  %vm447_vm1 = vmmov (!%p151_p3), 0   ;;  %s448_s26 = smov (!%p151_p3), 16   ;;  %vm209_vm2 = vcmask (!%p151_p3), 130048   ;;  %vm212_vm3 = vcmask (!%p151_p3), 261120   ;;  %vm246_vm4 = vcmask (!%p151_p3), 392192  }
   0x8   : > { %382 = vmatpush3.bf16.msra.mxu0 (!%p151_p3), %v419_v1  ;;  %387 = vmatprep.mubr.msk.bf16.mxu0 (!%p151_p3), %vm447_vm1, %v446_v0  ;;  %s449_s27 = smov (!%p151_p3), 32   ;;  %v370_v19 = vld [vmem:[%s524_s2] ss:$0 sm:$0xff] (!%p151_p3)  ;;  %vm290_vm5 = vcmask (!%p151_p3), 257024  }
   0x9   : > { %383 = vmatprep.subr.bf16.mxu0 (!%p151_p3), %v446_v0 }
   0xc   : > { %384 = vmatpush3.bf16.msra.mxu0 (!%p151_p3), %v420_v2 }
   0xd   : > { %385 = vmatprep.subr.bf16.mxu0 (!%p151_p3), %v446_v0 }
   0xe   : > { %s531_s12 = smov (!%p175_p4, %s436_s12), 1 }
   0xf   : > { %s368_s20 = sshll.u32 %s531_s12, 2 }
  0x10   : > { %s178_s23 = scalar_lea.vmem %s522_s0, %s368_s20  ;;  %386 = vmatpush3.bf16.msra.mxu0 %v421_v5  ;;  %s185_s5 = scalar_lea.vmem %s525_s3, %s368_s20 }
  0x11   : > { %v187_v3 = vld [vmem:[%s178_s23] sm:$0xf] }
  0x12   : > { %v188_v4 = vunpack.c.l.bf16 %v187_v3 }
  0x14   : > { %v190_v6 = vrot.slane %v188_v4, 7 }
  0x16   : > { %v193_v7 = vsel %vm192_vm0, 0.0, %v190_v6  ;;  %v194_v8 = vsel %vm192_vm0, %v190_v6, 0.0 }
  0x17   : > { %v195_v9 = vpack.c.bf16 %v194_v8, %v193_v7 }
  0x19   : > { %v197_v10 = vshrl.u32 %v195_v9, 16  ;;  %v199_v11 = vshll.u32 %v195_v9, 16  ;;  %v206_v14 = vrot.slane %v195_v9, 1 }
  0x1b   : > { %v201_v12 = vrot.slane %v199_v11, 1 }
  0x1d   : > { %v202_v13 = vor.u32 %v201_v12, %v197_v10 }
  0x1f   : > { %203 = vrot.lane.b32.xlu0 %v202_v13, %s448_s26 }
  0x23   : > { %207 = vrot.lane.b32.xlu0 %v206_v14, %s449_s27 }
  0x91   : > { %v204_v15 = vpop.permute.xlu0 %203 }
  0x92   : > { %v211_v16 = vsel %vm209_vm2, %v195_v9, %v204_v15 }
  0x95   : > { %v208_v17 = vpop.permute.xlu0 %207 }
  0x96   : > { %v214_v18 = vsel %vm212_vm3, %v211_v16, %v208_v17 }
  0x97   : > { %388 = vmatmul.mubr.msk.bf16.vlgmr.msra.gmra.mrb[0].mxu0 %vm246_vm4, %v214_v18 }
 0x16a   : > { %v283_v20 = vpop.f32.mrb[0].mxu0 }
 0x16b   : > { %v284_v21 = vadd.f32 %v370_v19, %v283_v20  ;;  %v389_v22 = vpop.f32.mrb[1].mxu0 }
 0x16c   : > { %v286_v23 = vpop.f32.mrb[2].mxu0 }
 0x16d   : > { %v289_v24 = vpack.c.bf16 %v284_v21, %v284_v21  ;;  %v390_v25 = vpop.f32.mrb[3].mxu0 }
 0x16f   : > { %291 = vst.msk [vmem:[%s185_s5] sm:$0xf] %vm290_vm5, %v289_v24 }
 0x170 PF: > { %s13_s14 = sadd.s32 1, %s444_s14   ;;  %s526_s12 = smov %s440_s13 }
 0x171   : > { %p10_p5 = scmp.ge.s32.totalorder %s13_s14, 4   ;;  %s527_s13 = smov %s529_s15 }
 0x173   :  { %12 = sbr.rel (!%p10_p5) target bundleno = 2 (0x2), region = 62 }

// kernel: model_forward.83
= control target key start
LH: loop header
LB: loop body
LE: loop exit
PB: predicated region body
PF: predicated region fallthrough
CT: control target
= control target key end

     0   :  { %s581_s15 = smov 0   ;;  %s583_s16 = smov 0   ;;  %s645_s0 = inlined_call_operand.vmem [shape: bf16[2,8,32], index: 0, kind: input, shape index: {}]   ;;  %s646_s1 = inlined_call_operand.vmem [shape: bf16[96,32], index: 1, kind: input, shape index: {}]   ;;  %s647_s2 = inlined_call_operand.vmem [shape: f32[1,32], index: 2, kind: input, shape index: {}]   ;;  %s648_s3 = inlined_call_operand.vmem [shape: f32[1,32], index: 3, kind: input, shape index: {}]   ;;  %s649_s4 = inlined_call_operand.vmem [shape: bf16[2,8,32], index: 4, kind: output, shape index: {}]  }
   0x1   :  { %s585_s17 = smov 0  }
   0x2 LB: > { %s26_s18 = sadd.s32 1, %s546_s16  ;;  %p448_p0 = scmp.ge.s32.totalorder %s550_s17, 1  ;;  %s550_s17 = sphi %s585_s17, %s14_s17   ;;  %s546_s16 = sphi %s583_s16, %s651_s16   ;;  %s542_s15 = sphi %s581_s15, %s650_s15  }
   0x3   : > { %p28_p1 = scmp.ge.s32.totalorder %s26_s18, 2  ;;  %p175_p2 = scmp.lt.s32.totalorder %s550_s17, 3 }
   0x5   : > { %s653_s18 = smov (%p28_p1, %s26_s18), 0  ;;  %p176_p3 = pnand %p448_p0, %p175_p2 }
   0x6   : > { %p202_p4 = scmp.lt.s32.totalorder (!%p176_p3), %s542_s15, 1  ;;  %v552_v0 = vmov (!%p176_p3), 0.0   ;;  %v514_v1 = vld [vmem:[%s646_s1] sm:$0xff] (!%p176_p3)   ;;  %v515_v2 = vld [vmem:[%s646_s1 + $0x8] sm:$0xff] (!%p176_p3)   ;;  %v516_v5 = vld [vmem:[%s646_s1 + $0x10] sm:$0xff] (!%p176_p3)   ;;  %vm219_vm0 = vcmask (!%p176_p3), 1040384  }
   0x7   : > { %179 = sbr.rel (%p176_p3) target bundleno = 575 (0x23f), region = 36  ;;  %470 = vmatprep.subr.bf16.mxu0 (!%p176_p3), %v552_v0  ;;  %v517_v9 = vld [vmem:[%s646_s1 + $0x18] sm:$0xff] (!%p176_p3)   ;;  %vm553_vm1 = vmmov (!%p176_p3), 0   ;;  %v518_v13 = vld [vmem:[%s646_s1 + $0x20] sm:$0xff] (!%p176_p3)   ;;  %v519_v16 = vld [vmem:[%s646_s1 + $0x28] sm:$0xff] (!%p176_p3)   ;;  %s554_s9 = smov (!%p176_p3), 32  }
   0x8   : > { %471 = vmatpush3.bf16.msra.mxu0 (!%p176_p3), %v514_v1  ;;  %482 = vmatprep.mubr.msk.bf16.mxu0 (!%p176_p3), %vm553_vm1, %v552_v0  ;;  %s555_s10 = smov (!%p176_p3), 64   ;;  %vm236_vm2 = vcmask (!%p176_p3), 261120   ;;  %vm239_vm3 = vcmask (!%p176_p3), 523264   ;;  %vm297_vm4 = vcmask (!%p176_p3), 785408   ;;  %v451_v22 = vld [vmem:[%s647_s2] ss:$0 sm:$0xff] (!%p176_p3) }
   0x9   : > { %472 = vmatprep.subr.bf16.mxu0 (!%p176_p3), %v552_v0  ;;  %v459_v38 = vld [vmem:[%s648_s3] ss:$0 sm:$0xff] (!%p176_p3)  ;;  %vm371_vm7 = vcmask (!%p176_p3), 257024  }
   0xc   : > { %473 = vmatpush3.bf16.msra.mxu0 (!%p176_p3), %v515_v2 }
   0xd   : > { %474 = vmatprep.subr.bf16.mxu0 (!%p176_p3), %v552_v0 }
   0xe   : > { %s655_s15 = smov (!%p202_p4, %s542_s15), 1 }
   0xf   : > { %s449_s23 = sshll.u32 %s655_s15, 2 }
  0x10   : > { %s205_s26 = scalar_lea.vmem %s645_s0, %s449_s23  ;;  %475 = vmatpush3.bf16.msra.mxu0 %v516_v5  ;;  %s212_s21 = scalar_lea.vmem %s649_s4, %s449_s23 }
  0x11   : > { %v214_v3 = vld [vmem:[%s205_s26] sm:$0xf]  ;;  %476 = vmatprep.subr.bf16.mxu0 %v552_v0 }
  0x12   : > { %v215_v4 = vunpack.c.l.bf16 %v214_v3 }
  0x14   : > { %v217_v6 = vrot.slane %v215_v4, 7  ;;  %477 = vmatpush3.bf16.msra.mxu0 %v517_v9 }
  0x15   : > { %478 = vmatprep.subr.bf16.mxu0 %v552_v0 }
  0x16   : > { %v220_v7 = vsel %vm219_vm0, 0.0, %v217_v6  ;;  %v221_v8 = vsel %vm219_vm0, %v217_v6, 0.0 }
  0x17   : > { %v222_v10 = vpack.c.bf16 %v221_v8, %v220_v7 }
  0x18   : > { %479 = vmatpush3.bf16.msra.mxu0 %v518_v13 }
  0x19   : > { %v224_v11 = vshrl.u32 %v222_v10, 16  ;;  %v226_v12 = vshll.u32 %v222_v10, 16  ;;  %v233_v17 = vrot.slane %v222_v10, 1  ;;  %480 = vmatprep.subr.bf16.mxu0 %v552_v0 }
  0x1b   : > { %v228_v14 = vrot.slane %v226_v12, 1 }
  0x1c   : > { %481 = vmatpush3.bf16.msra.mxu0 %v519_v16 }
  0x1d   : > { %v229_v15 = vor.u32 %v228_v14, %v224_v11 }
  0x1f   : > { %230 = vrot.lane.b32.xlu0 %v229_v15, %s554_s9 }
  0x23   : > { %234 = vrot.lane.b32.xlu0 %v233_v17, %s555_s10 }
  0x91   : > { %v231_v18 = vpop.permute.xlu0 %230 }
  0x92   : > { %v238_v19 = vsel %vm236_vm2, %v222_v10, %v231_v18 }
  0x95   : > { %v235_v20 = vpop.permute.xlu0 %234 }
  0x96   : > { %v241_v21 = vsel %vm239_vm3, %v238_v19, %v235_v20 }
  0x97   : > { %483 = vmatmul.mubr.msk.bf16.vlgmr.msra.gmra.mrb[0].mxu0 %vm297_vm4, %v241_v21 }
 0x16a   : > { %v334_v23 = vpop.f32.mrb[0].mxu0 }
 0x16b   : > { %v335_v24 = vadd.f32 %v451_v22, %v334_v23  ;;  %v484_v25 = vpop.f32.mrb[1].mxu0 }
 0x16c   : > { %v337_v26 = vpop.f32.mrb[2].mxu0 }
 0x16d   : > { %v485_v27 = vpop.f32.mrb[3].mxu0  ;;  %v341_v28 = vmul.f32 %v335_v24, %v335_v24 }
 0x16f   : > { %v342_v29 = vsel %vm236_vm2, %v341_v28, 0.0 }
 0x170   : > { %343 = vadd.xlane.f32.xlu1 %v342_v29 }
 0x1fd   : > { %v344_v30 = vpop.xlane.xlu1 %343 }
 0x1fe   : > { %520 = vrsqrt.f32 %v344_v30  ;;  %vm347_vm5 = vcmp.eq.f32.partialorder %v344_v30, inf  ;;  %v350_v33 = vand.u32 2147483648, %v344_v30  ;;  %vm349_vm6 = vcmp.eq.f32.partialorder %v344_v30, 0.0 }
 0x208   : > { %v521_v31 = vpop.eup %520 }
 0x209   : > { %v346_v32 = vmul.f32 %v521_v31, %v344_v30 }
 0x20b   : > { %v348_v34 = vsel %vm347_vm5, %v344_v30, %v346_v32 }
 0x20c   : > { %v351_v35 = vsel %vm349_vm6, %v350_v33, %v348_v34 }
 0x20d   : > { %v352_v36 = vmax.f32 %v351_v35, 1e-12 }
 0x20f   : > { %522 = vrcp.f32 %v352_v36 }
 0x219   : > { %v523_v37 = vpop.eup %522 }
 0x21a   : > { %v354_v39 = vmul.f32 %v523_v37, %v335_v24 }
 0x21c   : > { %v361_v40 = vmul.f32 %v459_v38, %v354_v39 }
 0x21e   : > { %v460_v41 = vmul.f32 -5.656854, %v361_v40  ;;  %v362_v45 = vmul.f32 5.656854, %v361_v40 }
 0x220   : > { %v364_v42 = vmul.f32 1.442695, %v460_v41 }
 0x222   : > { %524 = vpow2.f32 %v364_v42 }
 0x22c   : > { %v525_v43 = vpop.eup %524 }
 0x22d   : > { %v366_v44 = vadd.f32 1.0, %v525_v43 }
 0x22f   : > { %526 = vrcp.f32 %v366_v44 }
 0x239   : > { %v527_v46 = vpop.eup %526 }
 0x23a   : > { %v369_v47 = vmul.f32 %v527_v46, %v362_v45 }
 0x23c   : > { %v370_v48 = vpack.c.bf16 %v369_v47, %v369_v47 }
 0x23e   : > { %372 = vst.msk [vmem:[%s212_s21] sm:$0xf] %vm371_vm7, %v370_v48 }
 0x23f PF: > { %s14_s17 = sadd.s32 1, %s550_s17   ;;  %s650_s15 = smov %s546_s16 }
 0x240   : > { %p11_p5 = scmp.ge.s32.totalorder %s14_s17, 4   ;;  %s651_s16 = smov %s653_s18 }
 0x242   :  { %13 = sbr.rel (!%p11_p5) target bundleno = 2 (0x2), region = 66 }

// kernel: model_forward.82
= control target key start
LH: loop header
LB: loop body
LE: loop exit
PB: predicated region body
PF: predicated region fallthrough
CT: control target
= control target key end

     0   :  { %s655_s18 = smov 0   ;;  %s657_s19 = smov 0   ;;  %s723_s0 = inlined_call_operand.vmem [shape: bf16[2,8,32], index: 0, kind: input, shape index: {}]   ;;  %s724_s1 = inlined_call_operand.vmem [shape: bf16[96,32], index: 1, kind: input, shape index: {}]   ;;  %s725_s2 = inlined_call_operand.vmem [shape: f32[1,32], index: 2, kind: input, shape index: {}]   ;;  %s726_s3 = inlined_call_operand.vmem [shape: f32[1,32], index: 3, kind: input, shape index: {}]   ;;  %s727_s4 = inlined_call_operand.vmem [shape: f32[2,2,32], index: 4, kind: input, shape index: {}]   ;;  %s728_s5 = inlined_call_operand.vmem [shape: bf16[2,8,32], index: 5, kind: output, shape index: {}]  }
   0x1   :  { %s659_s20 = smov 0  }
   0x2 LB: > { %s27_s21 = sadd.s32 1, %s615_s19  ;;  %p516_p0 = scmp.ge.s32.totalorder %s619_s20, 1  ;;  %s619_s20 = sphi %s659_s20, %s15_s20   ;;  %s615_s19 = sphi %s657_s19, %s730_s19   ;;  %s611_s18 = sphi %s655_s18, %s729_s18  }
   0x3   : > { %p29_p1 = scmp.ge.s32.totalorder %s27_s21, 2  ;;  %p209_p2 = scmp.lt.s32.totalorder %s619_s20, 3 }
   0x5   : > { %s732_s21 = smov (%p29_p1, %s27_s21), 0  ;;  %p210_p3 = pnand %p516_p0, %p209_p2 }
   0x6   : > { %p242_p4 = scmp.lt.s32.totalorder (!%p210_p3), %s611_s18, 1  ;;  %v621_v0 = vmov (!%p210_p3), 0.0   ;;  %v583_v1 = vld [vmem:[%s724_s1] sm:$0xff] (!%p210_p3)   ;;  %v584_v2 = vld [vmem:[%s724_s1 + $0x8] sm:$0xff] (!%p210_p3)   ;;  %v585_v5 = vld [vmem:[%s724_s1 + $0x10] sm:$0xff] (!%p210_p3)   ;;  %vm263_vm0 = vcmask (!%p210_p3), 1040384   ;;  %v409_v37 = vlaneseq (!%p210_p3) }
   0x7   : > { %213 = sbr.rel (%p210_p3) target bundleno = 579 (0x243), region = 40  ;;  %539 = vmatprep.subr.bf16.mxu0 (!%p210_p3), %v621_v0  ;;  %v586_v9 = vld [vmem:[%s724_s1 + $0x18] sm:$0xff] (!%p210_p3)   ;;  %vm622_vm1 = vmmov (!%p210_p3), 0   ;;  %v587_v13 = vld [vmem:[%s724_s1 + $0x20] sm:$0xff] (!%p210_p3)   ;;  %v588_v16 = vld [vmem:[%s724_s1 + $0x28] sm:$0xff] (!%p210_p3)   ;;  %s623_s13 = smov (!%p210_p3), 32  }
   0x8   : > { %540 = vmatpush3.bf16.msra.mxu0 (!%p210_p3), %v583_v1  ;;  %551 = vmatprep.mubr.msk.bf16.mxu0 (!%p210_p3), %vm622_vm1, %v621_v0  ;;  %s624_s14 = smov (!%p210_p3), 64   ;;  %vm280_vm2 = vcmask (!%p210_p3), 261120   ;;  %vm283_vm3 = vcmask (!%p210_p3), 523264   ;;  %vm341_vm4 = vcmask (!%p210_p3), 785408   ;;  %v520_v22 = vld [vmem:[%s725_s2] ss:$0 sm:$0xff] (!%p210_p3) }
   0x9   : > { %541 = vmatprep.subr.bf16.mxu0 (!%p210_p3), %v621_v0  ;;  %v410_v38 = vshrl.u32 (!%p210_p3), %v409_v37, 7  ;;  %v528_v43 = vld [vmem:[%s726_s3] ss:$0 sm:$0xff] (!%p210_p3)  ;;  %vm427_vm7 = vcmask (!%p210_p3), 257024  }
   0xb   : > { %v411_v41 = vsub.s32 (!%p210_p3), 0, %v410_v38  ;;  %v416_v44 = vsub.s32 (!%p210_p3), 1, %v410_v38 }
   0xc   : > { %542 = vmatpush3.bf16.msra.mxu0 (!%p210_p3), %v584_v2 }
   0xd   : > { %543 = vmatprep.subr.bf16.mxu0 (!%p210_p3), %v621_v0 }
   0xe   : > { %s734_s18 = smov (!%p242_p4, %s611_s18), 1 }
   0xf   : > { %s517_s26 = sshll.u32 %s734_s18, 2  ;;  %s518_s17 = sshll.u32 %s734_s18, 1 }
  0x10   : > { %s245_s29 = scalar_lea.vmem %s723_s0, %s517_s26  ;;  %544 = vmatpush3.bf16.msra.mxu0 %v585_v5  ;;  %s249_s24 = scalar_lea.vmem %s727_s4, %s518_s17 }
  0x11   : > { %v258_v3 = vld [vmem:[%s245_s29] sm:$0xf]  ;;  %545 = vmatprep.subr.bf16.mxu0 %v621_v0  ;;  %s256_s30 = scalar_lea.vmem %s728_s5, %s517_s26 }
  0x12   : > { %v259_v4 = vunpack.c.l.bf16 %v258_v3  ;;  %v407_v39 = vld [vmem:[%s249_s24] sm:$0x3] }
  0x13   : > { %v408_v40 = vadd.f32 1.0, %v407_v39  ;;  %v417_v48 = vrot.slane %v407_v39, %v416_v44 }
  0x14   : > { %v261_v6 = vrot.slane %v259_v4, 7  ;;  %546 = vmatpush3.bf16.msra.mxu0 %v586_v9 }
  0x15   : > { %547 = vmatprep.subr.bf16.mxu0 %v621_v0  ;;  %v412_v46 = vrot.slane %v408_v40, %v411_v41 }
  0x16   : > { %v264_v7 = vsel %vm263_vm0, 0.0, %v261_v6  ;;  %v265_v8 = vsel %vm263_vm0, %v261_v6, 0.0 }
  0x17   : > { %v266_v10 = vpack.c.bf16 %v265_v8, %v264_v7 }
  0x18   : > { %548 = vmatpush3.bf16.msra.mxu0 %v587_v13 }
  0x19   : > { %v268_v11 = vshrl.u32 %v266_v10, 16  ;;  %v270_v12 = vshll.u32 %v266_v10, 16  ;;  %v277_v17 = vrot.slane %v266_v10, 1  ;;  %549 = vmatprep.subr.bf16.mxu0 %v621_v0 }
  0x1b   : > { %v272_v14 = vrot.slane %v270_v12, 1 }
  0x1c   : > { %550 = vmatpush3.bf16.msra.mxu0 %v588_v16 }
  0x1d   : > { %v273_v15 = vor.u32 %v272_v14, %v268_v11 }
  0x1f   : > { %274 = vrot.lane.b32.xlu0 %v273_v15, %s623_s13 }
  0x23   : > { %278 = vrot.lane.b32.xlu0 %v277_v17, %s624_s14 }
  0x91   : > { %v275_v18 = vpop.permute.xlu0 %274 }
  0x92   : > { %v282_v19 = vsel %vm280_vm2, %v266_v10, %v275_v18 }
  0x95   : > { %v279_v20 = vpop.permute.xlu0 %278 }
  0x96   : > { %v285_v21 = vsel %vm283_vm3, %v282_v19, %v279_v20 }
  0x97   : > { %552 = vmatmul.mubr.msk.bf16.vlgmr.msra.gmra.mrb[0].mxu0 %vm341_vm4, %v285_v21 }
 0x16a   : > { %v378_v23 = vpop.f32.mrb[0].mxu0 }
 0x16b   : > { %v379_v24 = vadd.f32 %v520_v22, %v378_v23  ;;  %v553_v25 = vpop.f32.mrb[1].mxu0 }
 0x16c   : > { %v381_v26 = vpop.f32.mrb[2].mxu0 }
 0x16d   : > { %v554_v27 = vpop.f32.mrb[3].mxu0  ;;  %v385_v28 = vmul.f32 %v379_v24, %v379_v24 }
 0x16f   : > { %v386_v29 = vsel %vm280_vm2, %v385_v28, 0.0 }
 0x170   : > { %387 = vadd.xlane.f32.xlu1 %v386_v29 }
 0x1fd   : > { %v388_v30 = vpop.xlane.xlu1 %387 }
 0x1fe   : > { %589 = vrsqrt.f32 %v388_v30  ;;  %vm391_vm5 = vcmp.eq.f32.partialorder %v388_v30, inf  ;;  %v394_v33 = vand.u32 2147483648, %v388_v30  ;;  %vm393_vm6 = vcmp.eq.f32.partialorder %v388_v30, 0.0 }
 0x208   : > { %v590_v31 = vpop.eup %589 }
 0x209   : > { %v390_v32 = vmul.f32 %v590_v31, %v388_v30 }
 0x20b   : > { %v392_v34 = vsel %vm391_vm5, %v388_v30, %v390_v32 }
 0x20c   : > { %v395_v35 = vsel %vm393_vm6, %v394_v33, %v392_v34 }
 0x20d   : > { %v396_v36 = vmax.f32 %v395_v35, 1e-12 }
 0x20f   : > { %591 = vrcp.f32 %v396_v36 }
 0x219   : > { %v592_v42 = vpop.eup %591 }
 0x21a   : > { %v398_v45 = vmul.f32 %v592_v42, %v379_v24 }
 0x21c   : > { %v405_v47 = vmul.f32 %v528_v43, %v398_v45 }
 0x21e   : > { %v406_v49 = vmul.f32 5.656854, %v405_v47 }
 0x220   : > { %v413_v50 = vmul.f32 %v412_v46, %v406_v49 }
 0x222   : > { %v418_v51 = vadd.f32 %v417_v48, %v413_v50 }
 0x224   : > { %v529_v52 = vmul.f32 -1.442695, %v418_v51 }
 0x226   : > { %593 = vpow2.f32 %v529_v52 }
 0x230   : > { %v594_v53 = vpop.eup %593 }
 0x231   : > { %v422_v54 = vadd.f32 1.0, %v594_v53 }
 0x233   : > { %595 = vrcp.f32 %v422_v54 }
 0x23d   : > { %v596_v55 = vpop.eup %595 }
 0x23e   : > { %v425_v56 = vmul.f32 %v596_v55, %v418_v51 }
 0x240   : > { %v426_v57 = vpack.c.bf16 %v425_v56, %v425_v56 }
 0x242   : > { %428 = vst.msk [vmem:[%s256_s30] sm:$0xf] %vm427_vm7, %v426_v57 }
 0x243 PF: > { %s15_s20 = sadd.s32 1, %s619_s20   ;;  %s729_s18 = smov %s615_s19 }
 0x244   : > { %p12_p5 = scmp.ge.s32.totalorder %s15_s20, 4   ;;  %s730_s19 = smov %s732_s21 }
 0x246   :  { %14 = sbr.rel (!%p12_p5) target bundleno = 2 (0x2), region = 73 }

// kernel: model_forward.84
= control target key start
LH: loop header
LB: loop body
LE: loop exit
PB: predicated region body
PF: predicated region fallthrough
CT: control target
= control target key end

     0   :  { %s609_s15 = smov 0   ;;  %s611_s16 = smov 0   ;;  %s673_s0 = inlined_call_operand.vmem [shape: bf16[2,8,32], index: 0, kind: input, shape index: {}]   ;;  %s674_s1 = inlined_call_operand.vmem [shape: bf16[32,384], index: 1, kind: input, shape index: {}]   ;;  %s675_s2 = inlined_call_operand.vmem [shape: f32[1,384], index: 2, kind: input, shape index: {}]   ;;  %s676_s3 = inlined_call_operand.vmem [shape: f32[1,32], index: 3, kind: input, shape index: {}]   ;;  %s677_s4 = inlined_call_operand.vmem [shape: bf16[2,8,384], index: 4, kind: output, shape index: {}]  }
   0x1   :  { %s613_s17 = smov 0  }
   0x2 LB: > { %s26_s18 = sadd.s32 1, %s575_s16  ;;  %p488_p0 = scmp.ge.s32.totalorder %s579_s17, 1  ;;  %s579_s17 = sphi %s613_s17, %s14_s17   ;;  %s575_s16 = sphi %s611_s16, %s679_s16   ;;  %s571_s15 = sphi %s609_s15, %s678_s15  }
   0x3   : > { %p28_p1 = scmp.ge.s32.totalorder %s26_s18, 2  ;;  %p175_p2 = scmp.lt.s32.totalorder %s579_s17, 3 }
   0x5   : > { %s681_s18 = smov (%p28_p1, %s26_s18), 0  ;;  %p176_p3 = pnand %p488_p0, %p175_p2 }
   0x6   : > { %p204_p4 = scmp.lt.s32.totalorder (!%p176_p3), %s571_s15, 1  ;;  %vm222_vm0 = vcmask (!%p176_p3), 261120   ;;  %v545_v4 = vld [vmem:[%s674_s1 + $0x4] ss:$12 sps:$4 sm:$0xff] (!%p176_p3)   ;;  %v547_v5 = vld [vmem:[%s674_s1] ss:$12 sps:$4 sm:$0xff] (!%p176_p3)   ;;  %v255_v25 = vlaneseq (!%p176_p3) }
   0x7   : > { %179 = sbr.rel (%p176_p3) target bundleno = 419 (0x1a3), region = 36  ;;  %v581_v6 = vmov (!%p176_p3), 0.0   ;;  %v548_v7 = vld [vmem:[%s674_s1 + $0x8] ss:$12 sps:$4 sm:$0xff] (!%p176_p3)   ;;  %v582_v9 = vmov (!%p176_p3), 0   ;;  %305 = vmatprep.subr.bf16.mxu0 (!%p176_p3), %v545_v4  ;;  %vm583_vm1 = vmmov (!%p176_p3), 0  }
   0x8   : > { %509 = vmatprep.subr.bf16.mxu1 (!%p176_p3), %v581_v6  ;;  %v549_v8 = vld [vmem:[%s674_s1 + $0x1c] ss:$12 sps:$4 sm:$0xff] (!%p176_p3)   ;;  %337 = vmatprep.mubr.bf16.mxu0 (!%p176_p3), %v582_v9  ;;  %v551_v10 = vld [vmem:[%s674_s1 + $0x18] ss:$12 sps:$4 sm:$0xff] (!%p176_p3)   ;;  %v552_v11 = vld [vmem:[%s674_s1 + $0x20] ss:$12 sps:$4 sm:$0xff] (!%p176_p3)  }
   0x9   : > { %306 = vmatpush1.bf16.msra.mxu0 (!%p176_p3), %v547_v5  ;;  %510 = vmatpush3.bf16.msra.mxu1 (!%p176_p3), %v548_v7  ;;  %v491_v20 = vld [vmem:[%s676_s3] ss:$0 sm:$0xff] (!%p176_p3)  ;;  %v256_v26 = vshrl.u32 (!%p176_p3), %v255_v25, 7 }
   0xa   : > { %307 = vmatprep.subr.bf16.mxu0 (!%p176_p3), %v549_v8  ;;  %511 = vmatprep.subr.bf16.mxu1 (!%p176_p3), %v581_v6  ;;  %v253_v29 = vld [vmem:[%s675_s2] sm:$0x7] (!%p176_p3) }
   0xb   : > { %513 = vmatprep.mubr.msk.bf16.mxu1 (!%p176_p3), %vm583_vm1, %v581_v6  ;;  %v257_v27 = vsub.s32 (!%p176_p3), 0, %v256_v26  ;;  %v265_v28 = vsub.s32 (!%p176_p3), 2, %v256_v26  ;;  %v261_v30 = vsub.s32 (!%p176_p3), 1, %v256_v26 }
   0xd   : > { %308 = vmatpush1.bf16.msra.mxu0 (!%p176_p3), %v551_v10  ;;  %512 = vmatpush3.bf16.msra.mxu1 (!%p176_p3), %v552_v11  ;;  %v258_v31 = vrot.slane (!%p176_p3), %v253_v29, %v257_v27  ;;  %v266_v32 = vrot.slane (!%p176_p3), %v253_v29, %v265_v28  ;;  %v262_v33 = vrot.slane (!%p176_p3), %v253_v29, %v261_v30 }
   0xe   : > { %s683_s15 = smov (!%p204_p4, %s571_s15), 1 }
   0xf   : > { %s489_s19 = sshll.u32 %s683_s15, 2  ;;  %s517_s13 = smul.u32 12, %s683_s15 }
  0x10   : > { %s207_s22 = scalar_lea.vmem %s673_s0, %s489_s19 }
  0x11   : > { %v218_v0 = vld [vmem:[%s207_s22] sm:$0xf]  ;;  %s216_s20 = scalar_lea.vmem %s677_s4, %s517_s13 }
  0x12   : > { %v219_v1 = vunpack.c.l.bf16 %v218_v0 }
  0x14   : > { %v221_v2 = vmul.f32 %v219_v1, %v219_v1 }
  0x16   : > { %v223_v3 = vsel %vm222_vm0, %v221_v2, 0.0 }
  0x17   : > { %224 = vadd.xlane.f32.xlu0 %v223_v3 }
  0xa4   : > { %v225_v12 = vpop.xlane.xlu0 %224 }
  0xa5   : > { %553 = vrsqrt.f32 %v225_v12  ;;  %vm228_vm2 = vcmp.eq.f32.partialorder %v225_v12, inf  ;;  %v231_v15 = vand.u32 2147483648, %v225_v12  ;;  %vm230_vm3 = vcmp.eq.f32.partialorder %v225_v12, 0.0 }
  0xaf   : > { %v554_v13 = vpop.eup %553 }
  0xb0   : > { %v227_v14 = vmul.f32 %v554_v13, %v225_v12 }
  0xb2   : > { %v229_v16 = vsel %vm228_vm2, %v225_v12, %v227_v14 }
  0xb3   : > { %v232_v17 = vsel %vm230_vm3, %v231_v15, %v229_v16 }
  0xb4   : > { %v233_v18 = vmax.f32 %v232_v17, 1e-12 }
  0xb6   : > { %555 = vrcp.f32 %v233_v18 }
  0xc0   : > { %v556_v19 = vpop.eup %555 }
  0xc1   : > { %v235_v21 = vmul.f32 %v556_v19, %v219_v1 }
  0xc3   : > { %v242_v22 = vmul.f32 %v491_v20, %v235_v21 }
  0xc5   : > { %v243_v23 = vmul.f32 5.656854, %v242_v22 }
  0xc7   : > { %v244_v24 = vpack.c.bf16 %v243_v23, %v243_v23 }
  0xc9   : > { %498 = vmatmul.mubr.msk.bf16.vlgmr.msra.gmra.mrb[0].mxu0 %vm222_vm0, %v244_v24  ;;  %514 = vmatmul.mubr.msk.bf16.vlgmr.msra.gmra.mrb[0].mxu1 %vm222_vm0, %v244_v24 }
 0x19c   : > { %v339_v34 = vpop.f32.mrb[0].mxu0  ;;  %v380_v35 = vpop.f32.mrb[0].mxu1 }
 0x19d   : > { %v340_v36 = vadd.f32 %v339_v34, %v258_v31  ;;  %v381_v37 = vadd.f32 %v380_v35, %v266_v32  ;;  %v341_v38 = vpop.f32.mrb[1].mxu0  ;;  %v515_v39 = vpop.f32.mrb[1].mxu1 }
 0x19e   : > { %v342_v40 = vadd.f32 %v341_v38, %v262_v33  ;;  %v343_v41 = vpop.f32.mrb[2].mxu0  ;;  %v383_v42 = vpop.f32.mrb[2].mxu1 }
 0x19f   : > { %v505_v43 = vpack.c.bf16 %v381_v37, %v381_v37  ;;  %v344_v44 = vpop.f32.mrb[3].mxu0  ;;  %v516_v45 = vpop.f32.mrb[3].mxu1 }
 0x1a0   : > { %v504_v46 = vpack.c.bf16 %v342_v40, %v340_v36 }
 0x1a1   : > { %400 = vst [vmem:[%s216_s20 + $0x8] sm:$0xf] %v505_v43 }
 0x1a2   : > { %399 = vst [vmem:[%s216_s20] sm:$0xff] %v504_v46 }
 0x1a3 PF: > { %s14_s17 = sadd.s32 1, %s579_s17   ;;  %s678_s15 = smov %s575_s16 }
 0x1a4   : > { %p11_p5 = scmp.ge.s32.totalorder %s14_s17, 4   ;;  %s679_s16 = smov %s681_s18 }
 0x1a6   :  { %13 = sbr.rel (!%p11_p5) target bundleno = 2 (0x2), region = 66 }

// kernel: model_forward.86
= control target key start
LH: loop header
LB: loop body
LE: loop exit
PB: predicated region body
PF: predicated region fallthrough
CT: control target
= control target key end

     0   :  { %s500_s12 = smov 0   ;;  %s502_s13 = smov 0   ;;  %s564_s0 = inlined_call_operand.vmem [shape: bf16[2,8,128], index: 0, kind: input, shape index: {}]   ;;  %s565_s1 = inlined_call_operand.vmem [shape: bf16[128,32], index: 1, kind: input, shape index: {}]   ;;  %s566_s2 = inlined_call_operand.vmem [shape: f32[1,32], index: 2, kind: input, shape index: {}]   ;;  %s567_s3 = inlined_call_operand.vmem [shape: bf16[2,8,32], index: 3, kind: output, shape index: {}]  }
   0x1   :  { %s504_s14 = smov 0  }
   0x2 LB: > { %s25_s15 = sadd.s32 1, %s472_s13  ;;  %p377_p0 = scmp.ge.s32.totalorder %s476_s14, 1  ;;  %s476_s14 = sphi %s504_s14, %s13_s14   ;;  %s472_s13 = sphi %s502_s13, %s569_s13   ;;  %s468_s12 = sphi %s500_s12, %s568_s12  }
   0x3   : > { %p27_p1 = scmp.ge.s32.totalorder %s25_s15, 2  ;;  %p150_p2 = scmp.lt.s32.totalorder %s476_s14, 3 }
   0x5   : > { %s571_s15 = smov (%p27_p1, %s25_s15), 0  ;;  %p151_p3 = pnand %p377_p0, %p150_p2 }
   0x6   : > { %v446_v0 = vld [vmem:[%s565_s1] sm:$0xff] (!%p151_p3)   ;;  %v478_v1 = vmov (!%p151_p3), 0.0   ;;  %v447_v2 = vld [vmem:[%s565_s1 + $0x8] sm:$0xff] (!%p151_p3)   ;;  %vm479_vm0 = vmmov (!%p151_p3), 0   ;;  %v448_v3 = vld [vmem:[%s565_s1 + $0x10] sm:$0xff] (!%p151_p3)   ;;  %p175_p4 = scmp.lt.s32.totalorder (!%p151_p3), %s468_s12, 1 }
   0x7   : > { %154 = sbr.rel (%p151_p3) target bundleno = 256 (0x100), region = 32  ;;  %400 = vmatprep.subr.bf16.mxu0 (!%p151_p3), %v478_v1  ;;  %416 = vmatprep.mubr.msk.bf16.mxu0 (!%p151_p3), %vm479_vm0, %v478_v1  ;;  %v449_v4 = vld [vmem:[%s565_s1 + $0x18] sm:$0xff] (!%p151_p3)   ;;  %v450_v5 = vld [vmem:[%s565_s1 + $0x20] sm:$0xff] (!%p151_p3)   ;;  %v451_v6 = vld [vmem:[%s565_s1 + $0x28] sm:$0xff] (!%p151_p3)   ;;  %vm300_vm1 = vcmask (!%p151_p3), 257024  }
   0x8   : > { %401 = vmatpush3.bf16.msra.mxu0 (!%p151_p3), %v446_v0  ;;  %v452_v7 = vld [vmem:[%s565_s1 + $0x30] sm:$0xff] (!%p151_p3)   ;;  %v453_v8 = vld [vmem:[%s565_s1 + $0x38] sm:$0xff] (!%p151_p3)   ;;  %v380_v10 = vld [vmem:[%s566_s2] ss:$0 sm:$0xff] (!%p151_p3) }
   0x9   : > { %402 = vmatprep.subr.bf16.mxu0 (!%p151_p3), %v478_v1 }
   0xc   : > { %403 = vmatpush3.bf16.msra.mxu0 (!%p151_p3), %v447_v2 }
   0xd   : > { %404 = vmatprep.subr.bf16.mxu0 (!%p151_p3), %v478_v1 }
   0xe   : > { %s573_s12 = smov (!%p175_p4, %s468_s12), 1 }
   0xf   : > { %s378_s30 = sshll.u32 %s573_s12, 2 }
  0x10   : > { %405 = vmatpush3.bf16.msra.mxu0 %v448_v3  ;;  %s178_s8 = scalar_lea.vmem %s564_s0, %s378_s30  ;;  %s185_s16 = scalar_lea.vmem %s567_s3, %s378_s30 }
  0x11   : > { %406 = vmatprep.subr.bf16.mxu0 %v478_v1  ;;  %v187_v9 = vld [vmem:[%s178_s8] sm:$0xf] }
  0x14   : > { %407 = vmatpush3.bf16.msra.mxu0 %v449_v4 }
  0x15   : > { %408 = vmatprep.subr.bf16.mxu0 %v478_v1 }
  0x18   : > { %409 = vmatpush3.bf16.msra.mxu0 %v450_v5 }
  0x19   : > { %410 = vmatprep.subr.bf16.mxu0 %v478_v1 }
  0x1c   : > { %411 = vmatpush3.bf16.msra.mxu0 %v451_v6 }
  0x1d   : > { %412 = vmatprep.subr.bf16.mxu0 %v478_v1 }
  0x20   : > { %413 = vmatpush3.bf16.msra.mxu0 %v452_v7 }
  0x21   : > { %414 = vmatprep.subr.bf16.mxu0 %v478_v1 }
  0x24   : > { %415 = vmatpush3.bf16.msra.mxu0 %v453_v8 }
  0x27   : > { %417 = vmatmul.mubr.bf16.vlgmr.msra.gmra.mrb[0].mxu0 %v187_v9 }
  0xfa   : > { %v293_v11 = vpop.f32.mrb[0].mxu0 }
  0xfb   : > { %v294_v12 = vadd.f32 %v380_v10, %v293_v11  ;;  %v418_v13 = vpop.f32.mrb[1].mxu0 }
  0xfc   : > { %v296_v14 = vpop.f32.mrb[2].mxu0 }
  0xfd   : > { %v299_v15 = vpack.c.bf16 %v294_v12, %v294_v12  ;;  %v419_v16 = vpop.f32.mrb[3].mxu0 }
  0xff   : > { %301 = vst.msk [vmem:[%s185_s16] sm:$0xf] %vm300_vm1, %v299_v15 }
 0x100 PF: > { %s13_s14 = sadd.s32 1, %s476_s14   ;;  %s568_s12 = smov %s472_s13 }
 0x101   : > { %p10_p5 = scmp.ge.s32.totalorder %s13_s14, 4   ;;  %s569_s13 = smov %s571_s15 }
 0x103   :  { %12 = sbr.rel (!%p10_p5) target bundleno = 2 (0x2), region = 62 }

// kernel: model_forward.85
= control target key start
LH: loop header
LB: loop body
LE: loop exit
PB: predicated region body
PF: predicated region fallthrough
CT: control target
= control target key end

     0   :  { %s775_s6 = smov 0   ;;  %s870_s0 = inlined_call_operand.vmem [shape: bf16[2,8,384], index: 0, kind: input, shape index: {}]   ;;  %s871_s1 = inlined_call_operand.vmem [shape: bf16[2,8,128], index: 1, kind: output, shape index: {}]  }
   0x1 LB: > { %s637_s7 = sadd.s32 4294967295, %s758_s6   ;;  %p641_p0 = scmp.ge.s32.totalorder %s758_s6, 1  ;;  %s758_s6 = sphi %s775_s6, %s11_s6  }
   0x2   : > { %p87_p1 = scmp.lt.s32.totalorder %s758_s6, 3 }
   0x4   : > { %p88_p2 = pnand %p641_p0, %p87_p1 }
   0x5   : > { %p106_p3 = scmp.lt.s32.totalorder (!%p88_p2), %s637_s7, 1  ;;  %v760_v0 = vmov (!%p88_p2), 0.0   ;;  %vm761_vm0 = vmmov (!%p88_p2), 0   ;;  %vm124_vm1 = vcmask (!%p88_p2), 261120   ;;  %vm171_vm2 = vcmask (!%p88_p2), 64512   ;;  %s762_s12 = smov (!%p88_p2), 96  }
   0x6   : > { %91 = sbr.rel (%p88_p2) target bundleno = 1476 (0x5c4), region = 24  ;;  %672 = vmatprep.subr.bf16.mxu0 (!%p88_p2), %v760_v0  ;;  %674 = vmatprep.mubr.msk.bf16.mxu0 (!%p88_p2), %vm761_vm0, %v760_v0  ;;  %s763_s13 = smov (!%p88_p2), 64   ;;  %vm188_vm3 = vcmask (!%p88_p2), 1043456   ;;  %vm578_vm4 = vcmask (!%p88_p2), 523264   ;;  %vm580_vm5 = vcmask (!%p88_p2), 785408  }
   0x7   : > { %678 = vmatprep.subr.bf16.mxu1 (!%p88_p2), %v760_v0  ;;  %680 = vmatprep.mubr.msk.bf16.mxu1 (!%p88_p2), %vm761_vm0, %v760_v0  ;;  %s764_s14 = smov (!%p88_p2), 32  }
   0xd   : > { %s873_s7 = smov (!%p106_p3, %s637_s7), 1 }
   0xe   : > { %s720_s8 = smul.u32 12, %s873_s7  ;;  %s643_s15 = sshll.u32 %s873_s7, 2 }
   0xf   : > { %s114_s18 = scalar_lea.vmem %s871_s1, %s643_s15 }
  0x10   : > { %s795_s11 = scalar_lea.vmem %s870_s0, %s720_s8 }
  0x11   : > { %v116_v1 = vld [vmem:[%s795_s11] sm:$0xff]  ;;  %v811_v17 = vld [vmem:[%s795_s11 + $0x8] ss:$0 sps:$4 sm:$0xff]  }
  0x12   : > { %v644_v2 = vcombine.high %v116_v1, %v116_v1  ;;  %v118_v3 = vunpack.c.l.bf16 %v116_v1  ;;  %v190_v18 = vsel %vm188_vm3, %v811_v17, 0 }
  0x13   : > { %679 = vmatpush3.bf16.msra.mxu1 %v190_v18 }
  0x14   : > { %v129_v4 = vsel %vm124_vm1, %v644_v2, 0  ;;  %v121_v5 = vmul.f32 0.17677669, %v118_v3  ;;  %236 = vrot.lane.b32.xlu1 %v644_v2, %s762_s12  ;;  %684 = vmatprep.subr.bf16.mxu1 %v760_v0 }
  0x15   : > { %673 = vmatpush3.bf16.xpose.msra.mxu0 %v129_v4 }
  0x16   : > { %690 = vmatprep.subr.bf16.mxu0 %v760_v0  ;;  %v122_v6 = vpack.c.bf16 %v121_v5, %v121_v5 }
  0x18   : > { %233 = vrot.lane.b32.xlu1 %v122_v6, %s762_s12 }
  0x1c   : > { %675 = vmatmul.mubr.msk.bf16.vlgmr.msra.gmra.mrb[0].mxu0 %vm124_vm1, %v122_v6  ;;  %345 = vrot.lane.b32.xlu1 %v122_v6, %s763_s13 }
  0x1d   : > { %692 = vmatprep.mubr.msk.bf16.mxu0 %vm761_vm0, %v760_v0 }
  0x20   : > { %457 = vrot.lane.b32.xlu1 %v644_v2, %s764_s14 }
  0x24   : > { %455 = vrot.lane.b32.xlu1 %v122_v6, %s764_s14 }
  0x86   : > { %v237_v21 = vpop.permute.xlu1 %236 }
  0x87   : > { %v242_v23 = vsel %vm124_vm1, %v237_v21, 0 }
  0x8a   : > { %v234_v25 = vpop.permute.xlu1 %233 }
  0x8e   : > { %v346_v27 = vpop.permute.xlu1 %345 }
  0x92   : > { %v458_v29 = vpop.permute.xlu1 %457 }
  0x93   : > { %v463_v30 = vsel %vm124_vm1, %v458_v29, 0 }
  0x96   : > { %v456_v31 = vpop.permute.xlu1 %455 }
  0xef   : > { %v165_v7 = vpop.f32.mrb[0].mxu0 }
  0xf0   : > { %v676_v8 = vpop.f32.mrb[1].mxu0  ;;  %v172_v9 = vsel %vm171_vm2, %v165_v7, -inf }
  0xf1   : > { %173 = vmax.xlane.f32.xlu0 %v172_v9  ;;  %v168_v10 = vpop.f32.mrb[2].mxu0 }
  0xf2   : > { %v677_v11 = vpop.f32.mrb[3].mxu0 }
 0x17e   : > { %v174_v12 = vpop.xlane.xlu0 %173 }
 0x17f   : > { %v175_v13 = vsub.f32 %v165_v7, %v174_v12 }
 0x181   : > { %v176_v14 = vmul.f32 1.442695, %v175_v13 }
 0x183   : > { %736 = vpow2.f32 %v176_v14 }
 0x18d   : > { %v737_v15 = vpop.eup %736 }
 0x18e   : > { %v178_v16 = vsel %vm171_vm2, %v737_v15, 0.0 }
 0x18f   : > { %179 = vadd.xlane.f32.xlu0 %v178_v16 }
 0x1a5   : > { %347 = vrot.lane.b32.xlu0 %v644_v2, %s763_s13 }
 0x21c   : > { %v180_v19 = vpop.xlane.xlu0 %179 }
 0x21d   : > { %738 = vrcp.f32 %v180_v19 }
 0x220   : > { %v348_v26 = vpop.permute.xlu0 %347 }
 0x221   : > { %v353_v28 = vsel %vm124_vm1, %v348_v26, 0 }
 0x227   : > { %v739_v20 = vpop.eup %738 }
 0x228   : > { %v182_v22 = vmul.f32 %v739_v20, %v737_v15 }
 0x22a   : > { %v183_v24 = vpack.c.bf16 %v182_v22, %v182_v22 }
 0x22c   : > { %681 = vmatmul.mubr.msk.bf16.vlgmr.msra.gmra.mrb[0].mxu1 %vm171_vm2, %v183_v24 }
 0x22d   : > { %685 = vmatpush3.bf16.xpose.msra.mxu1 %v242_v23  ;;  %686 = vmatprep.mubr.msk.bf16.mxu1 %vm761_vm0, %v760_v0 }
 0x22e   : > { %696 = vmatprep.subr.bf16.mxu1 %v760_v0 }
 0x234   : > { %687 = vmatmul.mubr.msk.bf16.vlgmr.msra.gmra.mrb[4].mxu1 %vm124_vm1, %v234_v25 }
 0x235   : > { %697 = vmatpush3.bf16.xpose.msra.mxu1 %v353_v28  ;;  %698 = vmatprep.mubr.msk.bf16.mxu1 %vm761_vm0, %v760_v0 }
 0x236   : > { %708 = vmatprep.subr.bf16.mxu1 %v760_v0 }
 0x23c   : > { %699 = vmatmul.mubr.msk.bf16.vlgmr.msra.gmra.mrb[8].mxu1 %vm124_vm1, %v346_v27 }
 0x23d   : > { %709 = vmatpush3.bf16.xpose.msra.mxu1 %v463_v30  ;;  %710 = vmatprep.mubr.msk.bf16.mxu1 %vm761_vm0, %v760_v0 }
 0x244   : > { %711 = vmatmul.mubr.msk.bf16.vlgmr.msra.gmra.mrb[12].mxu1 %vm124_vm1, %v456_v31 }
 0x2ff   : > { %v832_v32 = vpop.f32.mrb[0].mxu1 }
 0x300   : > { %v682_v33 = vpop.f32.mrb[1].mxu1 }
 0x301   : > { %v229_v34 = vpop.f32.mrb[2].mxu1 }
 0x302   : > { %v683_v35 = vpop.f32.mrb[3].mxu1 }
 0x307   : > { %v278_v36 = vpop.f32.mrb[4].mxu1 }
 0x308   : > { %v688_v37 = vpop.f32.mrb[5].mxu1  ;;  %v284_v38 = vsel %vm171_vm2, %v278_v36, -inf }
 0x309   : > { %285 = vmax.xlane.f32.xlu1 %v284_v38  ;;  %v281_v39 = vpop.f32.mrb[6].mxu1 }
 0x30a   : > { %v689_v40 = vpop.f32.mrb[7].mxu1 }
 0x30f   : > { %v389_v41 = vpop.f32.mrb[8].mxu1 }
 0x310   : > { %v395_v42 = vsel %vm171_vm2, %v389_v41, -inf  ;;  %v700_v43 = vpop.f32.mrb[9].mxu1 }
 0x311   : > { %396 = vmax.xlane.f32.xlu0 %v395_v42  ;;  %v392_v44 = vpop.f32.mrb[10].mxu1 }
 0x312   : > { %v701_v45 = vpop.f32.mrb[11].mxu1 }
 0x317   : > { %v499_v46 = vpop.f32.mrb[12].mxu1 }
 0x318   : > { %v505_v47 = vsel %vm171_vm2, %v499_v46, -inf  ;;  %v712_v48 = vpop.f32.mrb[13].mxu1 }
 0x319   : > { %506 = vmax.xlane.f32.xlu1 %v505_v47  ;;  %v502_v49 = vpop.f32.mrb[14].mxu1 }
 0x31a   : > { %v713_v50 = vpop.f32.mrb[15].mxu1 }
 0x396   : > { %v286_v51 = vpop.xlane.xlu1 %285 }
 0x397   : > { %v287_v52 = vsub.f32 %v278_v36, %v286_v51 }
 0x399   : > { %v288_v53 = vmul.f32 1.442695, %v287_v52 }
 0x39b   : > { %740 = vpow2.f32 %v288_v53 }
 0x39e   : > { %v397_v54 = vpop.xlane.xlu0 %396 }
 0x39f   : > { %v398_v55 = vsub.f32 %v389_v41, %v397_v54 }
 0x3a1   : > { %v399_v56 = vmul.f32 1.442695, %v398_v55 }
 0x3a3   : > { %742 = vpow2.f32 %v399_v56 }
 0x3a5   : > { %v741_v57 = vpop.eup %740 }
 0x3a6   : > { %v290_v58 = vsel %vm171_vm2, %v741_v57, 0.0  ;;  %v507_v61 = vpop.xlane.xlu1 %506 }
 0x3a7   : > { %291 = vadd.xlane.f32.xlu1 %v290_v58  ;;  %v508_v62 = vsub.f32 %v499_v46, %v507_v61 }
 0x3a9   : > { %v509_v63 = vmul.f32 1.442695, %v508_v62 }
 0x3ab   : > { %744 = vpow2.f32 %v509_v63 }
 0x3ad   : > { %v743_v59 = vpop.eup %742 }
 0x3ae   : > { %v401_v60 = vsel %vm171_vm2, %v743_v59, 0.0 }
 0x3af   : > { %402 = vadd.xlane.f32.xlu0 %v401_v60 }
 0x3b5   : > { %v745_v1 = vpop.eup %744 }
 0x3b6   : > { %v511_v2 = vsel %vm171_vm2, %v745_v1, 0.0 }
 0x3b8   : > { %407 = vrot.lane.b32.xlu1 %v811_v17, %s763_s13 }
 0x3c5   : > { %297 = vrot.lane.b32.xlu0 %v811_v17, %s762_s12 }
 0x3dc   : > { %512 = vadd.xlane.f32.xlu1 %v511_v2 }
 0x3ed   : > { %517 = vrot.lane.b32.xlu1 %v811_v17, %s764_s14 }
 0x434   : > { %v292_v3 = vpop.xlane.xlu1 %291 }
 0x435   : > { %746 = vrcp.f32 %v292_v3 }
 0x438   : > { %v408_v9 = vpop.permute.xlu1 %407 }
 0x439   : > { %v413_v11 = vsel %vm188_vm3, %v408_v9, 0 }
 0x43c   : > { %v403_v4 = vpop.xlane.xlu0 %402 }
 0x43d   : > { %748 = vrcp.f32 %v403_v4 }
 0x43f   : > { %v747_v5 = vpop.eup %746 }
 0x440   : > { %v294_v6 = vmul.f32 %v747_v5, %v741_v57  ;;  %v298_v7 = vpop.permute.xlu0 %297 }
 0x441   : > { %v303_v8 = vsel %vm188_vm3, %v298_v7, 0 }
 0x442   : > { %691 = vmatpush3.bf16.msra.mxu0 %v303_v8  ;;  %v295_v10 = vpack.c.bf16 %v294_v6, %v294_v6 }
 0x443   : > { %702 = vmatprep.subr.bf16.mxu0 %v760_v0 }
 0x445   : > { %693 = vmatmul.mubr.msk.bf16.vlgmr.msra.gmra.mrb[4].mxu0 %vm171_vm2, %v295_v10 }
 0x446   : > { %703 = vmatpush3.bf16.msra.mxu0 %v413_v11  ;;  %704 = vmatprep.mubr.msk.bf16.mxu0 %vm761_vm0, %v760_v0 }
 0x447   : > { %v749_v12 = vpop.eup %748  ;;  %714 = vmatprep.subr.bf16.mxu0 %v760_v0 }
 0x448   : > { %v405_v13 = vmul.f32 %v749_v12, %v743_v59 }
 0x44a   : > { %v406_v14 = vpack.c.bf16 %v405_v13, %v405_v13 }
 0x44d   : > { %705 = vmatmul.mubr.msk.bf16.vlgmr.msra.gmra.mrb[8].mxu0 %vm171_vm2, %v406_v14 }
 0x44e   : > { %716 = vmatprep.mubr.msk.bf16.mxu0 %vm761_vm0, %v760_v0 }
 0x469   : > { %v513_v15 = vpop.xlane.xlu1 %512 }
 0x46a   : > { %750 = vrcp.f32 %v513_v15 }
 0x46d   : > { %v518_v16 = vpop.permute.xlu1 %517 }
 0x46e   : > { %v523_v17 = vsel %vm188_vm3, %v518_v16, 0 }
 0x46f   : > { %715 = vmatpush3.bf16.msra.mxu0 %v523_v17 }
 0x474   : > { %v751_v18 = vpop.eup %750 }
 0x475   : > { %v515_v19 = vmul.f32 %v751_v18, %v745_v1 }
 0x477   : > { %v516_v20 = vpack.c.bf16 %v515_v19, %v515_v19 }
 0x479   : > { %717 = vmatmul.mubr.msk.bf16.vlgmr.msra.gmra.mrb[12].mxu0 %vm171_vm2, %v516_v20 }
 0x518   : > { %v339_v21 = vpop.f32.mrb[4].mxu0 }
 0x519   : > { %566 = vrot.lane.b32.xlu0 %v339_v21, %s764_s14  ;;  %v694_v22 = vpop.f32.mrb[5].mxu0 }
 0x51a   : > { %v342_v23 = vpop.f32.mrb[6].mxu0 }
 0x51b   : > { %v695_v24 = vpop.f32.mrb[7].mxu0 }
 0x520   : > { %v449_v25 = vpop.f32.mrb[8].mxu0 }
 0x521   : > { %570 = vrot.lane.b32.xlu1 %v449_v25, %s763_s13  ;;  %v706_v0 = vpop.f32.mrb[9].mxu0 }
 0x522   : > { %v452_v26 = vpop.f32.mrb[10].mxu0 }
 0x523   : > { %v707_v27 = vpop.f32.mrb[11].mxu0 }
 0x54c   : > { %v559_v28 = vpop.f32.mrb[12].mxu0 }
 0x54d   : > { %574 = vrot.lane.b32.xlu0 %v559_v28, %s762_s12  ;;  %v718_v29 = vpop.f32.mrb[13].mxu0 }
 0x54e   : > { %v562_v30 = vpop.f32.mrb[14].mxu0 }
 0x54f   : > { %v719_v31 = vpop.f32.mrb[15].mxu0 }
 0x58b   : > { %v567_v33 = vpop.permute.xlu0 %566 }
 0x58c   : > { %v577_v35 = vsel %vm124_vm1, %v832_v32, %v567_v33 }
 0x593   : > { %v571_v34 = vpop.permute.xlu1 %570 }
 0x594   : > { %v579_v36 = vsel %vm578_vm4, %v577_v35, %v571_v34 }
 0x5bf   : > { %v575_v37 = vpop.permute.xlu0 %574 }
 0x5c0   : > { %v581_v38 = vsel %vm580_vm5, %v579_v36, %v575_v37 }
 0x5c1   : > { %v582_v39 = vpack.c.bf16 %v581_v38, %v581_v38 }
 0x5c3   : > { %583 = vst [vmem:[%s114_s18] sm:$0xf] %v582_v39 }
 0x5c4 PF: > { %s11_s6 = sadd.s32 1, %s758_s6  }
 0x5c5   : > { %p8_p4 = scmp.ge.s32.totalorder %s11_s6, 4  }
 0x5c7   :  { %10 = sbr.rel (!%p8_p4) target bundleno = 1 (0x1), region = 54 }

// kernel: model_forward.91
= control target key start
LH: loop header
LB: loop body
LE: loop exit
PB: predicated region body
PF: predicated region fallthrough
CT: control target
= control target key end

     0   :  { %s514_s15 = smov 0   ;;  %s516_s16 = smov 0   ;;  %s567_s0 = inlined_call_operand.vmem [shape: bf16[2,8,32], index: 0, kind: input, shape index: {}]   ;;  %s568_s1 = inlined_call_operand.vmem [shape: bf16[2,8,16], index: 1, kind: input, shape index: {}]   ;;  %s569_s2 = inlined_call_operand.vmem [shape: bf16[48,32], index: 2, kind: input, shape index: {}]   ;;  %s570_s3 = inlined_call_operand.vmem [shape: f32[1,32], index: 3, kind: input, shape index: {}]   ;;  %s571_s4 = inlined_call_operand.vmem [shape: bf16[2,8,32], index: 4, kind: output, shape index: {}]  }
   0x1   :  { %s518_s17 = smov 0  }
   0x2 LB: > { %s26_s18 = sadd.s32 1, %s480_s16  ;;  %p407_p0 = scmp.ge.s32.totalorder %s484_s17, 1  ;;  %s484_s17 = sphi %s518_s17, %s14_s17   ;;  %s480_s16 = sphi %s516_s16, %s573_s16   ;;  %s476_s15 = sphi %s514_s15, %s572_s15  }
   0x3   : > { %p28_p1 = scmp.ge.s32.totalorder %s26_s18, 2  ;;  %p184_p2 = scmp.lt.s32.totalorder %s484_s17, 3 }
   0x5   : > { %s575_s18 = smov (%p28_p1, %s26_s18), 0  ;;  %p185_p3 = pnand %p407_p0, %p184_p2 }
   0x6   : > { %p215_p4 = scmp.lt.s32.totalorder (!%p185_p3), %s476_s15, 1  ;;  %v459_v0 = vld [vmem:[%s569_s2] sm:$0xff] (!%p185_p3)   ;;  %v486_v1 = vmov (!%p185_p3), 0.0   ;;  %v460_v2 = vld [vmem:[%s569_s2 + $0x8] sm:$0xff] (!%p185_p3)   ;;  %vm487_vm0 = vmmov (!%p185_p3), 0   ;;  %v461_v4 = vld [vmem:[%s569_s2 + $0x10] sm:$0xff] (!%p185_p3)  }
   0x7   : > { %188 = sbr.rel (%p185_p3) target bundleno = 355 (0x163), region = 36  ;;  %422 = vmatprep.subr.bf16.mxu0 (!%p185_p3), %v486_v1  ;;  %428 = vmatprep.mubr.msk.bf16.mxu0 (!%p185_p3), %vm487_vm0, %v486_v1  ;;  %s488_s29 = smov (!%p185_p3), 32   ;;  %vm239_vm1 = vcmask (!%p185_p3), 261120   ;;  %vm273_vm2 = vcmask (!%p185_p3), 392192   ;;  %v411_v11 = vld [vmem:[%s570_s3] ss:$0 sm:$0xff] (!%p185_p3) }
   0x8   : > { %423 = vmatpush3.bf16.msra.mxu0 (!%p185_p3), %v459_v0  ;;  %vm318_vm3 = vcmask (!%p185_p3), 257024  }
   0x9   : > { %424 = vmatprep.subr.bf16.mxu0 (!%p185_p3), %v486_v1 }
   0xc   : > { %425 = vmatpush3.bf16.msra.mxu0 (!%p185_p3), %v460_v2 }
   0xd   : > { %426 = vmatprep.subr.bf16.mxu0 (!%p185_p3), %v486_v1 }
   0xe   : > { %s577_s15 = smov (!%p215_p4, %s476_s15), 1 }
   0xf   : > { %s538_s23 = sshll.u32 %s577_s15, 2 }
  0x10   : > { %s222_s26 = scalar_lea.vmem %s568_s1, %s538_s23  ;;  %427 = vmatpush3.bf16.msra.mxu0 %v461_v4  ;;  %s218_s6 = scalar_lea.vmem %s567_s0, %s538_s23 }
  0x11   : > { %v233_v3 = vld [vmem:[%s222_s26] sm:$0xf]  ;;  %s229_s11 = scalar_lea.vmem %s571_s4, %s538_s23 }
  0x12   : > { %v234_v5 = vunpack.c.l.bf16 %v233_v3  ;;  %v231_v6 = vld [vmem:[%s218_s6] sm:$0xf] }
  0x13   : > { %v232_v7 = vunpack.c.l.bf16 %v231_v6 }
  0x14   : > { %236 = vrot.lane.b32.xlu0 %v234_v5, %s488_s29 }
  0x86   : > { %v237_v8 = vpop.permute.xlu0 %236 }
  0x87   : > { %v240_v9 = vsel %vm239_vm1, %v232_v7, %v237_v8 }
  0x88   : > { %v241_v10 = vpack.c.bf16 %v240_v9, %v240_v9 }
  0x8a   : > { %429 = vmatmul.mubr.msk.bf16.vlgmr.msra.gmra.mrb[0].mxu0 %vm273_vm2, %v241_v10 }
 0x15d   : > { %v311_v12 = vpop.f32.mrb[0].mxu0 }
 0x15e   : > { %v312_v13 = vadd.f32 %v411_v11, %v311_v12  ;;  %v430_v14 = vpop.f32.mrb[1].mxu0 }
 0x15f   : > { %v314_v15 = vpop.f32.mrb[2].mxu0 }
 0x160   : > { %v317_v16 = vpack.c.bf16 %v312_v13, %v312_v13  ;;  %v431_v17 = vpop.f32.mrb[3].mxu0 }
 0x162   : > { %319 = vst.msk [vmem:[%s229_s11] sm:$0xf] %vm318_vm3, %v317_v16 }
 0x163 PF: > { %s14_s17 = sadd.s32 1, %s484_s17   ;;  %s572_s15 = smov %s480_s16 }
 0x164   : > { %p11_p5 = scmp.ge.s32.totalorder %s14_s17, 4   ;;  %s573_s16 = smov %s575_s18 }
 0x166   :  { %13 = sbr.rel (!%p11_p5) target bundleno = 2 (0x2), region = 69 }

// kernel: model_forward.89
= control target key start
LH: loop header
LB: loop body
LE: loop exit
PB: predicated region body
PF: predicated region fallthrough
CT: control target
= control target key end

     0   :  { %s733_s21 = smov 0   ;;  %s735_s22 = smov 0   ;;  %s816_s0 = inlined_call_operand.vmem [shape: bf16[2,8,32], index: 0, kind: input, shape index: {}]   ;;  %s817_s1 = inlined_call_operand.vmem [shape: bf16[2,8,16], index: 1, kind: input, shape index: {}]   ;;  %s818_s2 = inlined_call_operand.vmem [shape: bf16[144,32], index: 2, kind: input, shape index: {}]   ;;  %s819_s3 = inlined_call_operand.vmem [shape: f32[1,32], index: 3, kind: input, shape index: {}]   ;;  %s820_s4 = inlined_call_operand.vmem [shape: f32[1,32], index: 4, kind: input, shape index: {}]   ;;  %s821_s5 = inlined_call_operand.vmem [shape: f32[2,2,32], index: 5, kind: input, shape index: {}]   ;;  %s822_s6 = inlined_call_operand.vmem [shape: bf16[2,8,32], index: 6, kind: output, shape index: {}]  }
   0x1   :  { %s737_s23 = smov 0  }
   0x2 LB: > { %s28_s24 = sadd.s32 1, %s688_s22  ;;  %p605_p0 = scmp.ge.s32.totalorder %s692_s23, 1  ;;  %s692_s23 = sphi %s737_s23, %s16_s23   ;;  %s688_s22 = sphi %s735_s22, %s824_s22   ;;  %s684_s21 = sphi %s733_s21, %s823_s21  }
   0x3   : > { %p30_p1 = scmp.ge.s32.totalorder %s28_s24, 2  ;;  %p243_p2 = scmp.lt.s32.totalorder %s692_s23, 3 }
   0x5   : > { %s826_s24 = smov (%p30_p1, %s28_s24), 0  ;;  %p244_p3 = pnand %p605_p0, %p243_p2 }
   0x6   : > { %p282_p4 = scmp.lt.s32.totalorder (!%p244_p3), %s684_s21, 1  ;;  %v653_v2 = vld [vmem:[%s818_s2] sm:$0xff] (!%p244_p3)   ;;  %s694_s7 = smov (!%p244_p3), 32   ;;  %v695_v3 = vmov (!%p244_p3), 0   ;;  %v654_v4 = vld [vmem:[%s818_s2 + $0x8] sm:$0xff] (!%p244_p3)   ;;  %v655_v5 = vld [vmem:[%s818_s2 + $0x10] sm:$0xff] (!%p244_p3)   ;;  %v486_v44 = vlaneseq (!%p244_p3) }
   0x7   : > { %247 = sbr.rel (%p244_p3) target bundleno = 692 (0x2b4), region = 44  ;;  %421 = vmatprep.subr.bf16.mxu0 (!%p244_p3), %v695_v3  ;;  %v656_v6 = vld [vmem:[%s818_s2 + $0x18] sm:$0xff] (!%p244_p3)   ;;  %v657_v7 = vld [vmem:[%s818_s2 + $0x20] sm:$0xff] (!%p244_p3)   ;;  %v658_v8 = vld [vmem:[%s818_s2 + $0x28] sm:$0xff] (!%p244_p3)   ;;  %vm310_vm0 = vcmask (!%p244_p3), 261120   ;;  %vm315_vm1 = vcmask (!%p244_p3), 1040384  }
   0x8   : > { %422 = vmatpush1.bf16.msra.mxu0 (!%p244_p3), %v653_v2  ;;  %v659_v9 = vld [vmem:[%s818_s2 + $0x30] sm:$0xff] (!%p244_p3)   ;;  %v660_v10 = vld [vmem:[%s818_s2 + $0x38] sm:$0xff] (!%p244_p3)   ;;  %v661_v12 = vld [vmem:[%s818_s2 + $0x40] sm:$0xff] (!%p244_p3)   ;;  %s696_s8 = smov (!%p244_p3), 96   ;;  %s697_s9 = smov (!%p244_p3), 48   ;;  %vm418_vm2 = vcmask (!%p244_p3), 130048  }
   0x9   : > { %423 = vmatprep.subr.bf16.mxu0 (!%p244_p3), %v695_v3  ;;  %vm332_vm3 = vcmask (!%p244_p3), 392192   ;;  %vm335_vm4 = vcmask (!%p244_p3), 785408   ;;  %v610_v29 = vld [vmem:[%s819_s3] ss:$0 sm:$0xff] (!%p244_p3)  ;;  %v487_v45 = vshrl.u32 (!%p244_p3), %v486_v44, 7  ;;  %vm504_vm7 = vcmask (!%p244_p3), 257024  }
   0xa   : > { %v621_v50 = vld [vmem:[%s820_s4] ss:$0 sm:$0xff] (!%p244_p3) }
   0xb   : > { %v488_v48 = vsub.s32 (!%p244_p3), 0, %v487_v45  ;;  %v493_v51 = vsub.s32 (!%p244_p3), 1, %v487_v45 }
   0xc   : > { %424 = vmatpush1.bf16.msra.mxu0 (!%p244_p3), %v654_v4 }
   0xd   : > { %425 = vmatprep.subr.bf16.mxu0 (!%p244_p3), %v695_v3 }
   0xe   : > { %s828_s21 = smov (!%p282_p4, %s684_s21), 1 }
   0xf   : > { %s754_s25 = sshll.u32 %s828_s21, 2  ;;  %s608_s12 = sshll.u32 %s828_s21, 1 }
  0x10   : > { %s289_s28 = scalar_lea.vmem %s817_s1, %s754_s25  ;;  %426 = vmatpush1.bf16.msra.mxu0 %v655_v5  ;;  %s285_s29 = scalar_lea.vmem %s816_s0, %s754_s25 }
  0x11   : > { %v304_v0 = vld [vmem:[%s289_s28] sm:$0xf]  ;;  %427 = vmatprep.subr.bf16.mxu0 %v695_v3  ;;  %s293_s15 = scalar_lea.vmem %s821_s5, %s608_s12  ;;  %s300_s19 = scalar_lea.vmem %s822_s6, %s754_s25 }
  0x12   : > { %v305_v1 = vunpack.c.l.bf16 %v304_v0  ;;  %v302_v11 = vld [vmem:[%s285_s29] sm:$0xf] }
  0x13   : > { %v303_v13 = vunpack.c.l.bf16 %v302_v11  ;;  %v484_v46 = vld [vmem:[%s293_s15] sm:$0x3] }
  0x14   : > { %307 = vrot.lane.b32.xlu0 %v305_v1, %s694_s7  ;;  %428 = vmatpush1.bf16.msra.mxu0 %v656_v6  ;;  %v485_v47 = vadd.f32 1.0, %v484_v46  ;;  %v494_v55 = vrot.slane %v484_v46, %v493_v51 }
  0x15   : > { %429 = vmatprep.subr.bf16.mxu0 %v695_v3 }
  0x16   : > { %v489_v53 = vrot.slane %v485_v47, %v488_v48 }
  0x18   : > { %430 = vmatpush1.bf16.msra.mxu0 %v657_v7 }
  0x19   : > { %431 = vmatprep.subr.bf16.mxu0 %v695_v3 }
  0x1c   : > { %432 = vmatpush1.bf16.msra.mxu0 %v658_v8 }
  0x1d   : > { %433 = vmatprep.subr.bf16.mxu0 %v695_v3 }
  0x20   : > { %434 = vmatpush1.bf16.msra.mxu0 %v659_v9 }
  0x21   : > { %435 = vmatprep.subr.bf16.mxu0 %v695_v3 }
  0x24   : > { %436 = vmatpush1.bf16.msra.mxu0 %v660_v10 }
  0x25   : > { %437 = vmatprep.subr.bf16.mxu0 %v695_v3 }
  0x28   : > { %438 = vmatpush1.bf16.msra.mxu0 %v661_v12 }
  0x86   : > { %v308_v14 = vpop.permute.xlu0 %307 }
  0x87   : > { %v311_v15 = vsel %vm310_vm0, %v303_v13, %v308_v14 }
  0x88   : > { %v313_v16 = vrot.slane %v311_v15, 7 }
  0x8a   : > { %v316_v17 = vsel %vm315_vm1, 0.0, %v313_v16  ;;  %v317_v18 = vsel %vm315_vm1, %v313_v16, 0.0 }
  0x8b   : > { %v318_v19 = vpack.c.bf16 %v317_v18, %v316_v17 }
  0x8d   : > { %v329_v20 = vrot.slane %v318_v19, 1  ;;  %v322_v21 = vshll.u32 %v318_v19, 16  ;;  %v320_v22 = vshrl.u32 %v318_v19, 16 }
  0x8f   : > { %330 = vrot.lane.b32.xlu1 %v329_v20, %s696_s8  ;;  %v324_v23 = vrot.slane %v322_v21, 1 }
  0x91   : > { %v325_v24 = vor.u32 %v324_v23, %v320_v22 }
  0x93   : > { %326 = vrot.lane.b32.xlu0 %v325_v24, %s697_s9 }
 0x101   : > { %v331_v25 = vpop.permute.xlu1 %330 }
 0x102   : > { %620 = vmatprep.mubr.msk.bf16.mxu0 %vm418_vm2, %v331_v25 }
 0x105   : > { %v327_v26 = vpop.permute.xlu0 %326 }
 0x106   : > { %v334_v27 = vsel %vm332_vm3, %v318_v19, %v327_v26 }
 0x107   : > { %v337_v28 = vsel %vm335_vm4, %v334_v27, %v331_v25 }
 0x108   : > { %454 = vmatmul.mubr.bf16.vlgmr.msra.gmra.mrb[0].mxu0 %v337_v28 }
 0x1db   : > { %v455_v30 = vpop.f32.mrb[0].mxu0 }
 0x1dc   : > { %v456_v31 = vadd.f32 %v610_v29, %v455_v30  ;;  %v457_v32 = vpop.f32.mrb[1].mxu0 }
 0x1dd   : > { %v458_v33 = vpop.f32.mrb[2].mxu0 }
 0x1de   : > { %v459_v34 = vpop.f32.mrb[3].mxu0  ;;  %v462_v35 = vmul.f32 %v456_v31, %v456_v31 }
 0x1e0   : > { %v463_v36 = vsel %vm310_vm0, %v462_v35, 0.0 }
 0x1e1   : > { %464 = vadd.xlane.f32.xlu1 %v463_v36 }
 0x26e   : > { %v465_v37 = vpop.xlane.xlu1 %464 }
 0x26f   : > { %662 = vrsqrt.f32 %v465_v37  ;;  %vm468_vm5 = vcmp.eq.f32.partialorder %v465_v37, inf  ;;  %v471_v40 = vand.u32 2147483648, %v465_v37  ;;  %vm470_vm6 = vcmp.eq.f32.partialorder %v465_v37, 0.0 }
 0x279   : > { %v663_v38 = vpop.eup %662 }
 0x27a   : > { %v467_v39 = vmul.f32 %v663_v38, %v465_v37 }
 0x27c   : > { %v469_v41 = vsel %vm468_vm5, %v465_v37, %v467_v39 }
 0x27d   : > { %v472_v42 = vsel %vm470_vm6, %v471_v40, %v469_v41 }
 0x27e   : > { %v473_v43 = vmax.f32 %v472_v42, 1e-12 }
 0x280   : > { %664 = vrcp.f32 %v473_v43 }
 0x28a   : > { %v665_v49 = vpop.eup %664 }
 0x28b   : > { %v475_v52 = vmul.f32 %v665_v49, %v456_v31 }
 0x28d   : > { %v482_v54 = vmul.f32 %v621_v50, %v475_v52 }
 0x28f   : > { %v483_v56 = vmul.f32 5.656854, %v482_v54 }
 0x291   : > { %v490_v57 = vmul.f32 %v489_v53, %v483_v56 }
 0x293   : > { %v495_v58 = vadd.f32 %v494_v55, %v490_v57 }
 0x295   : > { %v622_v59 = vmul.f32 -1.442695, %v495_v58 }
 0x297   : > { %666 = vpow2.f32 %v622_v59 }
 0x2a1   : > { %v667_v60 = vpop.eup %666 }
 0x2a2   : > { %v499_v61 = vadd.f32 1.0, %v667_v60 }
 0x2a4   : > { %668 = vrcp.f32 %v499_v61 }
 0x2ae   : > { %v669_v62 = vpop.eup %668 }
 0x2af   : > { %v502_v63 = vmul.f32 %v669_v62, %v495_v58 }
 0x2b1   : > { %v503_v0 = vpack.c.bf16 %v502_v63, %v502_v63 }
 0x2b3   : > { %505 = vst.msk [vmem:[%s300_s19] sm:$0xf] %vm504_vm7, %v503_v0 }
 0x2b4 PF: > { %s16_s23 = sadd.s32 1, %s692_s23   ;;  %s823_s21 = smov %s688_s22 }
 0x2b5   : > { %p13_p5 = scmp.ge.s32.totalorder %s16_s23, 4   ;;  %s824_s22 = smov %s826_s24 }
 0x2b7   :  { %15 = sbr.rel (!%p13_p5) target bundleno = 2 (0x2), region = 80 }

// kernel: model_forward.97
= control target key start
LH: loop header
LB: loop body
LE: loop exit
PB: predicated region body
PF: predicated region fallthrough
CT: control target
= control target key end

     0   :  { %s561_s15 = smov 0   ;;  %s563_s16 = smov 0   ;;  %s635_s0 = inlined_call_operand.vmem [shape: bf16[2,8,128], index: 0, kind: input, shape index: {}]   ;;  %s636_s1 = inlined_call_operand.vmem [shape: bf16[128,32], index: 1, kind: input, shape index: {}]   ;;  %s637_s2 = inlined_call_operand.vmem [shape: f32[1,32], index: 2, kind: input, shape index: {}]   ;;  %s638_s3 = inlined_call_operand.vmem [shape: f32[1,32], index: 3, kind: input, shape index: {}]   ;;  %s639_s4 = inlined_call_operand.vmem [shape: bf16[2,8,32], index: 4, kind: output, shape index: {}]  }
   0x1   :  { %s565_s17 = smov 0  }
   0x2 LB: > { %s26_s18 = sadd.s32 1, %s528_s16  ;;  %p428_p0 = scmp.ge.s32.totalorder %s532_s17, 1  ;;  %s532_s17 = sphi %s565_s17, %s14_s17   ;;  %s528_s16 = sphi %s563_s16, %s641_s16   ;;  %s524_s15 = sphi %s561_s15, %s640_s15  }
   0x3   : > { %p28_p1 = scmp.ge.s32.totalorder %s26_s18, 2  ;;  %p175_p2 = scmp.lt.s32.totalorder %s532_s17, 3 }
   0x5   : > { %s643_s18 = smov (%p28_p1, %s26_s18), 0  ;;  %p176_p3 = pnand %p428_p0, %p175_p2 }
   0x6   : > { %v498_v0 = vld [vmem:[%s636_s1] sm:$0xff] (!%p176_p3)   ;;  %v534_v1 = vmov (!%p176_p3), 0.0   ;;  %v499_v2 = vld [vmem:[%s636_s1 + $0x8] sm:$0xff] (!%p176_p3)   ;;  %vm535_vm0 = vmmov (!%p176_p3), 0   ;;  %v500_v3 = vld [vmem:[%s636_s1 + $0x10] sm:$0xff] (!%p176_p3)   ;;  %p202_p4 = scmp.lt.s32.totalorder (!%p176_p3), %s524_s15, 1 }
   0x7   : > { %179 = sbr.rel (%p176_p3) target bundleno = 435 (0x1b3), region = 36  ;;  %452 = vmatprep.subr.bf16.mxu0 (!%p176_p3), %v534_v1  ;;  %468 = vmatprep.mubr.msk.bf16.mxu0 (!%p176_p3), %vm535_vm0, %v534_v1  ;;  %v501_v4 = vld [vmem:[%s636_s1 + $0x18] sm:$0xff] (!%p176_p3)   ;;  %v502_v5 = vld [vmem:[%s636_s1 + $0x20] sm:$0xff] (!%p176_p3)   ;;  %v503_v6 = vld [vmem:[%s636_s1 + $0x28] sm:$0xff] (!%p176_p3)   ;;  %vm328_vm1 = vcmask (!%p176_p3), 261120   ;;  %vm351_vm4 = vcmask (!%p176_p3), 257024  }
   0x8   : > { %453 = vmatpush3.bf16.msra.mxu0 (!%p176_p3), %v498_v0  ;;  %v504_v7 = vld [vmem:[%s636_s1 + $0x30] sm:$0xff] (!%p176_p3)   ;;  %v505_v8 = vld [vmem:[%s636_s1 + $0x38] sm:$0xff] (!%p176_p3)   ;;  %v431_v10 = vld [vmem:[%s637_s2] ss:$0 sm:$0xff] (!%p176_p3) }
   0x9   : > { %454 = vmatprep.subr.bf16.mxu0 (!%p176_p3), %v534_v1  ;;  %v440_v26 = vld [vmem:[%s638_s3] ss:$0 sm:$0xff] (!%p176_p3) }
   0xc   : > { %455 = vmatpush3.bf16.msra.mxu0 (!%p176_p3), %v499_v2 }
   0xd   : > { %456 = vmatprep.subr.bf16.mxu0 (!%p176_p3), %v534_v1 }
   0xe   : > { %s645_s15 = smov (!%p202_p4, %s524_s15), 1 }
   0xf   : > { %s429_s7 = sshll.u32 %s645_s15, 2 }
  0x10   : > { %457 = vmatpush3.bf16.msra.mxu0 %v500_v3  ;;  %s205_s12 = scalar_lea.vmem %s635_s0, %s429_s7  ;;  %s212_s23 = scalar_lea.vmem %s639_s4, %s429_s7 }
  0x11   : > { %458 = vmatprep.subr.bf16.mxu0 %v534_v1  ;;  %v214_v9 = vld [vmem:[%s205_s12] sm:$0xf] }
  0x14   : > { %459 = vmatpush3.bf16.msra.mxu0 %v501_v4 }
  0x15   : > { %460 = vmatprep.subr.bf16.mxu0 %v534_v1 }
  0x18   : > { %461 = vmatpush3.bf16.msra.mxu0 %v502_v5 }
  0x19   : > { %462 = vmatprep.subr.bf16.mxu0 %v534_v1 }
  0x1c   : > { %463 = vmatpush3.bf16.msra.mxu0 %v503_v6 }
  0x1d   : > { %464 = vmatprep.subr.bf16.mxu0 %v534_v1 }
  0x20   : > { %465 = vmatpush3.bf16.msra.mxu0 %v504_v7 }
  0x21   : > { %466 = vmatprep.subr.bf16.mxu0 %v534_v1 }
  0x24   : > { %467 = vmatpush3.bf16.msra.mxu0 %v505_v8 }
  0x27   : > { %469 = vmatmul.mubr.bf16.vlgmr.msra.gmra.mrb[0].mxu0 %v214_v9 }
  0xfa   : > { %v320_v11 = vpop.f32.mrb[0].mxu0 }
  0xfb   : > { %v321_v12 = vadd.f32 %v431_v10, %v320_v11  ;;  %v470_v13 = vpop.f32.mrb[1].mxu0 }
  0xfc   : > { %v323_v14 = vpop.f32.mrb[2].mxu0 }
  0xfd   : > { %v471_v15 = vpop.f32.mrb[3].mxu0  ;;  %v327_v16 = vmul.f32 %v321_v12, %v321_v12 }
  0xff   : > { %v329_v17 = vsel %vm328_vm1, %v327_v16, 0.0 }
 0x100   : > { %330 = vadd.xlane.f32.xlu0 %v329_v17 }
 0x18d   : > { %v331_v18 = vpop.xlane.xlu0 %330 }
 0x18e   : > { %506 = vrsqrt.f32 %v331_v18  ;;  %vm334_vm2 = vcmp.eq.f32.partialorder %v331_v18, inf  ;;  %v337_v21 = vand.u32 2147483648, %v331_v18  ;;  %vm336_vm3 = vcmp.eq.f32.partialorder %v331_v18, 0.0 }
 0x198   : > { %v507_v19 = vpop.eup %506 }
 0x199   : > { %v333_v20 = vmul.f32 %v507_v19, %v331_v18 }
 0x19b   : > { %v335_v22 = vsel %vm334_vm2, %v331_v18, %v333_v20 }
 0x19c   : > { %v338_v23 = vsel %vm336_vm3, %v337_v21, %v335_v22 }
 0x19d   : > { %v339_v24 = vmax.f32 %v338_v23, 1e-12 }
 0x19f   : > { %508 = vrcp.f32 %v339_v24 }
 0x1a9   : > { %v509_v25 = vpop.eup %508 }
 0x1aa   : > { %v341_v27 = vmul.f32 %v509_v25, %v321_v12 }
 0x1ac   : > { %v348_v28 = vmul.f32 %v440_v26, %v341_v27 }
 0x1ae   : > { %v349_v29 = vmul.f32 5.656854, %v348_v28 }
 0x1b0   : > { %v350_v30 = vpack.c.bf16 %v349_v29, %v349_v29 }
 0x1b2   : > { %352 = vst.msk [vmem:[%s212_s23] sm:$0xf] %vm351_vm4, %v350_v30 }
 0x1b3 PF: > { %s14_s17 = sadd.s32 1, %s532_s17   ;;  %s640_s15 = smov %s528_s16 }
 0x1b4   : > { %p11_p5 = scmp.ge.s32.totalorder %s14_s17, 4   ;;  %s641_s16 = smov %s643_s18 }
 0x1b6   :  { %13 = sbr.rel (!%p11_p5) target bundleno = 2 (0x2), region = 66 }

// kernel: model_forward.98
= control target key start
LH: loop header
LB: loop body
LE: loop exit
PB: predicated region body
PF: predicated region fallthrough
CT: control target
= control target key end

     0   :  { %s566_s12 = smov 0   ;;  %s568_s13 = smov 0   ;;  %s627_s0 = inlined_call_operand.vmem [shape: bf16[2,16,32], index: 0, kind: input, shape index: {}]   ;;  %s628_s1 = inlined_call_operand.vmem [shape: bf16[96,16], index: 1, kind: input, shape index: {}]   ;;  %s629_s2 = inlined_call_operand.vmem [shape: f32[1,16], index: 2, kind: input, shape index: {}]   ;;  %s630_s3 = inlined_call_operand.vmem [shape: bf16[2,16,16], index: 3, kind: output, shape index: {}]  }
   0x1   :  { %s570_s14 = smov 0  }
   0x2 LB: > { %s25_s15 = sadd.s32 1, %s536_s13  ;;  %p436_p0 = scmp.ge.s32.totalorder %s540_s14, 1  ;;  %s540_s14 = sphi %s570_s14, %s13_s14   ;;  %s536_s13 = sphi %s568_s13, %s632_s13   ;;  %s532_s12 = sphi %s566_s12, %s631_s12  }
   0x3   : > { %p27_p1 = scmp.ge.s32.totalorder %s25_s15, 2  ;;  %p151_p2 = scmp.lt.s32.totalorder %s540_s14, 3 }
   0x5   : > { %s634_s15 = smov (%p27_p1, %s25_s15), 0  ;;  %p152_p3 = pnand %p436_p0, %p151_p2 }
   0x6   : > { %p179_p4 = scmp.lt.s32.totalorder (!%p152_p3), %s532_s12, 1  ;;  %v542_v0 = vmov (!%p152_p3), 0.0   ;;  %v512_v1 = vld [vmem:[%s628_s1] sm:$0xff] (!%p152_p3)   ;;  %v513_v2 = vld [vmem:[%s628_s1 + $0x8] sm:$0xff] (!%p152_p3)   ;;  %vm201_vm0 = vcmask (!%p152_p3), 1040384   ;;  %v514_v6 = vld [vmem:[%s628_s1 + $0x10] sm:$0xff] (!%p152_p3)  }
   0x7   : > { %155 = sbr.rel (%p152_p3) target bundleno = 371 (0x173), region = 32  ;;  %468 = vmatprep.subr.bf16.mxu0 (!%p152_p3), %v542_v0  ;;  %v515_v14 = vld [vmem:[%s628_s1 + $0x18] sm:$0xff] (!%p152_p3)   ;;  %vm543_vm1 = vmmov (!%p152_p3), 0   ;;  %v516_v20 = vld [vmem:[%s628_s1 + $0x20] sm:$0xff] (!%p152_p3)   ;;  %vm212_vm2 = vsmask.f32 (!%p152_p3), 7424 }
   0x8   : > { %469 = vmatpush3.bf16.msra.mxu0 (!%p152_p3), %v512_v1  ;;  %480 = vmatprep.mubr.msk.bf16.mxu0 (!%p152_p3), %vm543_vm1, %v542_v0  ;;  %vm229_vm3 = vcmask (!%p152_p3), 1046528   ;;  %v517_v25 = vld [vmem:[%s628_s1 + $0x28] sm:$0xff] (!%p152_p3)   ;;  %s544_s5 = smov (!%p152_p3), 32   ;;  %s545_s6 = smov (!%p152_p3), 64   ;;  %vm235_vm4 = vcmask (!%p152_p3), 261120   ;;  %vm238_vm5 = vcmask (!%p152_p3), 523264  }
   0x9   : > { %470 = vmatprep.subr.bf16.mxu0 (!%p152_p3), %v542_v0  ;;  %vm296_vm6 = vcmask (!%p152_p3), 785408   ;;  %v441_v31 = vld [vmem:[%s629_s2] ss:$0 sm:$0xff] (!%p152_p3)  ;;  %vm348_vm7 = vcmask (!%p152_p3), 125952  }
   0xc   : > { %471 = vmatpush3.bf16.msra.mxu0 (!%p152_p3), %v513_v2 }
   0xd   : > { %472 = vmatprep.subr.bf16.mxu0 (!%p152_p3), %v542_v0 }
   0xe   : > { %s636_s12 = smov (!%p179_p4, %s532_s12), 1 }
   0xf   : > { %s453_s18 = sshll.u32 %s636_s12, 3 }
  0x10   : > { %s183_s23 = scalar_lea.vmem %s627_s0, %s453_s18  ;;  %473 = vmatpush3.bf16.msra.mxu0 %v514_v6  ;;  %s192_s11 = scalar_lea.vmem %s630_s3, %s453_s18 }
  0x11   : > { %v458_v3 = vld [vmem:[%s183_s23] sm:$0xff]   ;;  %474 = vmatprep.subr.bf16.mxu0 %v542_v0 }
  0x12   : > { %v459_v4 = vunpack.c.l.bf16 %v458_v3  ;;  %v460_v5 = vunpack.c.h.bf16 %v458_v3 }
  0x14   : > { %v202_v7 = vrot.slane %v459_v4, 7  ;;  %v203_v8 = vrot.slane %v460_v5, 7  ;;  %475 = vmatpush3.bf16.msra.mxu0 %v515_v14 }
  0x15   : > { %476 = vmatprep.subr.bf16.mxu0 %v542_v0 }
  0x16   : > { %v204_v9 = vsel %vm201_vm0, %v202_v7, %v203_v8  ;;  %v208_v10 = vsel %vm201_vm0, 0.0, %v202_v7  ;;  %v209_v11 = vsel %vm201_vm0, %v203_v8, 0.0 }
  0x17   : > { %v210_v12 = vpack.c.bf16 %v204_v9, %v208_v10  ;;  %v211_v13 = vpack.c.bf16 %v209_v11, %v209_v11 }
  0x18   : > { %477 = vmatpush3.bf16.msra.mxu0 %v516_v20 }
  0x19   : > { %v214_v15 = vshrl.u32 %v210_v12, 16  ;;  %v216_v16 = vshll.u32 %v210_v12, 16  ;;  %v221_v17 = vshll.u32 %v211_v13, 16  ;;  %v230_v22 = vrot.slane %v210_v12, 1  ;;  %478 = vmatprep.subr.bf16.mxu0 %v542_v0 }
  0x1a   : > { %v231_v23 = vrot.slane %v211_v13, 1 }
  0x1b   : > { %v218_v18 = vrot.slane %v216_v16, 1  ;;  %v223_v19 = vrot.slane %v221_v17, 1 }
  0x1c   : > { %v232_v26 = vsel %vm229_vm3, %v230_v22, %v231_v23  ;;  %479 = vmatpush3.bf16.msra.mxu0 %v517_v25 }
  0x1d   : > { %v219_v21 = vor.u32 %v218_v18, %v214_v15 }
  0x1f   : > { %v224_v24 = vsel %vm212_vm2, %v219_v21, %v223_v19 }
  0x20   : > { %225 = vrot.lane.b32.xlu0 %v224_v24, %s544_s5 }
  0x24   : > { %233 = vrot.lane.b32.xlu0 %v232_v26, %s545_s6 }
  0x92   : > { %v226_v27 = vpop.permute.xlu0 %225 }
  0x93   : > { %v237_v28 = vsel %vm235_vm4, %v210_v12, %v226_v27 }
  0x96   : > { %v234_v29 = vpop.permute.xlu0 %233 }
  0x97   : > { %v240_v30 = vsel %vm238_vm5, %v237_v28, %v234_v29 }
  0x98   : > { %481 = vmatmul.mubr.msk.bf16.vlgmr.msra.gmra.mrb[0].mxu0 %vm296_vm6, %v240_v30 }
 0x16b   : > { %v333_v32 = vpop.f32.mrb[0].mxu0 }
 0x16c   : > { %v334_v33 = vadd.f32 %v441_v31, %v333_v32  ;;  %v482_v34 = vpop.f32.mrb[1].mxu0 }
 0x16d   : > { %v336_v35 = vpop.f32.mrb[2].mxu0 }
 0x16e   : > { %v455_v36 = vpack.c.bf16 %v334_v33, %v334_v33  ;;  %v337_v37 = vadd.f32 %v441_v31, %v336_v35  ;;  %v483_v38 = vpop.f32.mrb[3].mxu0 }
 0x170   : > { %349 = vst.msk [vmem:[%s192_s11] sm:$0xf] %vm348_vm7, %v455_v36  ;;  %v456_v39 = vpack.c.bf16 %v337_v37, %v337_v37 }
 0x172   : > { %350 = vst.msk [vmem:[%s192_s11 + $0x4] sm:$0xf] %vm348_vm7, %v456_v39 }
 0x173 PF: > { %s13_s14 = sadd.s32 1, %s540_s14   ;;  %s631_s12 = smov %s536_s13 }
 0x174   : > { %p10_p5 = scmp.ge.s32.totalorder %s13_s14, 4   ;;  %s632_s13 = smov %s634_s15 }
 0x176   :  { %12 = sbr.rel (!%p10_p5) target bundleno = 2 (0x2), region = 62 }

// kernel: model_forward.101
= control target key start
LH: loop header
LB: loop body
LE: loop exit
PB: predicated region body
PF: predicated region fallthrough
CT: control target
= control target key end

     0   :  { %s563_s15 = smov 0   ;;  %s565_s16 = smov 0   ;;  %s608_s0 = inlined_call_operand.vmem [shape: bf16[2,16,16], index: 0, kind: input, shape index: {}]   ;;  %s609_s1 = inlined_call_operand.vmem [shape: bf16[2,16,16], index: 1, kind: input, shape index: {}]   ;;  %s610_s2 = inlined_call_operand.vmem [shape: bf16[32,16], index: 2, kind: input, shape index: {}]   ;;  %s611_s3 = inlined_call_operand.vmem [shape: f32[1,16], index: 3, kind: input, shape index: {}]   ;;  %s612_s4 = inlined_call_operand.vmem [shape: bf16[2,16,16], index: 4, kind: output, shape index: {}]  }
   0x1   :  { %s567_s17 = smov 0  }
   0x2 LB: > { %s26_s18 = sadd.s32 1, %s529_s16  ;;  %p438_p0 = scmp.ge.s32.totalorder %s533_s17, 1  ;;  %s533_s17 = sphi %s567_s17, %s14_s17   ;;  %s529_s16 = sphi %s565_s16, %s614_s16   ;;  %s525_s15 = sphi %s563_s15, %s613_s15  }
   0x3   : > { %p28_p1 = scmp.ge.s32.totalorder %s26_s18, 2  ;;  %p186_p2 = scmp.lt.s32.totalorder %s533_s17, 3 }
   0x5   : > { %s616_s18 = smov (%p28_p1, %s26_s18), 0  ;;  %p187_p3 = pnand %p438_p0, %p186_p2 }
   0x6   : > { %p221_p4 = scmp.lt.s32.totalorder (!%p187_p3), %s525_s15, 1  ;;  %v509_v0 = vld [vmem:[%s610_s2] sm:$0xff] (!%p187_p3)   ;;  %v535_v1 = vmov (!%p187_p3), 0.0   ;;  %v510_v2 = vld [vmem:[%s610_s2 + $0x8] sm:$0xff] (!%p187_p3)   ;;  %vm536_vm0 = vmmov (!%p187_p3), 0   ;;  %s537_s27 = smov (!%p187_p3), 16  }
   0x7   : > { %190 = sbr.rel (%p187_p3) target bundleno = 361 (0x169), region = 36  ;;  %469 = vmatprep.subr.bf16.mxu0 (!%p187_p3), %v535_v1  ;;  %473 = vmatprep.mubr.msk.bf16.mxu0 (!%p187_p3), %vm536_vm0, %v535_v1  ;;  %vm258_vm1 = vcmask (!%p187_p3), 130048   ;;  %vm285_vm2 = vcmask (!%p187_p3), 261120   ;;  %v445_v16 = vld [vmem:[%s611_s3] ss:$0 sm:$0xff] (!%p187_p3)  ;;  %vm338_vm3 = vcmask (!%p187_p3), 125952  }
   0x8   : > { %470 = vmatpush3.bf16.msra.mxu0 (!%p187_p3), %v509_v0 }
   0x9   : > { %471 = vmatprep.subr.bf16.mxu0 (!%p187_p3), %v535_v1 }
   0xc   : > { %472 = vmatpush3.bf16.msra.mxu0 (!%p187_p3), %v510_v2 }
   0xe   : > { %s618_s15 = smov (!%p221_p4, %s525_s15), 1 }
   0xf   : > { %s453_s23 = sshll.u32 %s618_s15, 3 }
  0x10   : > { %s230_s26 = scalar_lea.vmem %s609_s1, %s453_s23  ;;  %s225_s30 = scalar_lea.vmem %s608_s0, %s453_s23 }
  0x11   : > { %v463_v3 = vld [vmem:[%s230_s26] sm:$0xff]   ;;  %s239_s9 = scalar_lea.vmem %s612_s4, %s453_s23 }
  0x12   : > { %v464_v4 = vunpack.c.l.bf16 %v463_v3  ;;  %v465_v5 = vunpack.c.h.bf16 %v463_v3  ;;  %v459_v7 = vld [vmem:[%s225_s30] sm:$0xff]  }
  0x13   : > { %v460_v8 = vunpack.c.l.bf16 %v459_v7  ;;  %v461_v9 = vunpack.c.h.bf16 %v459_v7 }
  0x14   : > { %v504_v6 = vpack.i.bf16 %v465_v5, %v464_v4 }
  0x16   : > { %505 = vrot.lane.b32.xlu0 %v504_v6, %s537_s27 }
  0x88   : > { %v506_v10 = vpop.permute.xlu0 %505 }
  0x89   : > { %v508_v11 = vunpack.i.h.bf16 %v506_v10  ;;  %v507_v12 = vunpack.i.l.bf16 %v506_v10 }
  0x8b   : > { %v259_v13 = vsel %vm258_vm1, %v460_v8, %v507_v12  ;;  %v260_v14 = vsel %vm258_vm1, %v461_v9, %v508_v11 }
  0x8c   : > { %v261_v15 = vpack.c.bf16 %v260_v14, %v259_v13 }
  0x8e   : > { %474 = vmatmul.mubr.msk.bf16.vlgmr.msra.gmra.mrb[0].mxu0 %vm285_vm2, %v261_v15 }
 0x161   : > { %v323_v17 = vpop.f32.mrb[0].mxu0 }
 0x162   : > { %v324_v18 = vadd.f32 %v445_v16, %v323_v17  ;;  %v475_v19 = vpop.f32.mrb[1].mxu0 }
 0x163   : > { %v326_v20 = vpop.f32.mrb[2].mxu0 }
 0x164   : > { %v456_v21 = vpack.c.bf16 %v324_v18, %v324_v18  ;;  %v327_v22 = vadd.f32 %v445_v16, %v326_v20  ;;  %v476_v23 = vpop.f32.mrb[3].mxu0 }
 0x166   : > { %339 = vst.msk [vmem:[%s239_s9] sm:$0xf] %vm338_vm3, %v456_v21  ;;  %v457_v24 = vpack.c.bf16 %v327_v22, %v327_v22 }
 0x168   : > { %340 = vst.msk [vmem:[%s239_s9 + $0x4] sm:$0xf] %vm338_vm3, %v457_v24 }
 0x169 PF: > { %s14_s17 = sadd.s32 1, %s533_s17   ;;  %s613_s15 = smov %s529_s16 }
 0x16a   : > { %p11_p5 = scmp.ge.s32.totalorder %s14_s17, 4   ;;  %s614_s16 = smov %s616_s18 }
 0x16c   :  { %13 = sbr.rel (!%p11_p5) target bundleno = 2 (0x2), region = 69 }

// kernel: model_forward.108
= control target key start
LH: loop header
LB: loop body
LE: loop exit
PB: predicated region body
PF: predicated region fallthrough
CT: control target
= control target key end

     0   :  { %s527_s12 = smov 0   ;;  %s529_s13 = smov 0   ;;  %s579_s0 = inlined_call_operand.vmem [shape: bf16[2,16,16], index: 0, kind: input, shape index: {}]   ;;  %s580_s1 = inlined_call_operand.vmem [shape: bf16[48,16], index: 1, kind: input, shape index: {}]   ;;  %s581_s2 = inlined_call_operand.vmem [shape: f32[1,16], index: 2, kind: input, shape index: {}]   ;;  %s582_s3 = inlined_call_operand.vmem [shape: bf16[2,16,16], index: 3, kind: output, shape index: {}]  }
   0x1   :  { %s531_s14 = smov 0  }
   0x2 LB: > { %s25_s15 = sadd.s32 1, %s497_s13  ;;  %p412_p0 = scmp.ge.s32.totalorder %s501_s14, 1  ;;  %s501_s14 = sphi %s531_s14, %s13_s14   ;;  %s497_s13 = sphi %s529_s13, %s584_s13   ;;  %s493_s12 = sphi %s527_s12, %s583_s12  }
   0x3   : > { %p27_p1 = scmp.ge.s32.totalorder %s25_s15, 2  ;;  %p151_p2 = scmp.lt.s32.totalorder %s501_s14, 3 }
   0x5   : > { %s586_s15 = smov (%p27_p1, %s25_s15), 0  ;;  %p152_p3 = pnand %p412_p0, %p151_p2 }
   0x6   : > { %p179_p4 = scmp.lt.s32.totalorder (!%p152_p3), %s493_s12, 1  ;;  %v503_v0 = vmov (!%p152_p3), 0.0   ;;  %v476_v1 = vld [vmem:[%s580_s1] sm:$0xff] (!%p152_p3)   ;;  %v477_v2 = vld [vmem:[%s580_s1 + $0x8] sm:$0xff] (!%p152_p3)   ;;  %vm201_vm0 = vcmask (!%p152_p3), 1040384   ;;  %v478_v6 = vld [vmem:[%s580_s1 + $0x10] sm:$0xff] (!%p152_p3)  }
   0x7   : > { %155 = sbr.rel (%p152_p3) target bundleno = 371 (0x173), region = 32  ;;  %438 = vmatprep.subr.bf16.mxu0 (!%p152_p3), %v503_v0  ;;  %vm504_vm1 = vmmov (!%p152_p3), 0   ;;  %vm212_vm2 = vsmask.f32 (!%p152_p3), 7424  ;;  %vm229_vm3 = vcmask (!%p152_p3), 1046528   ;;  %s505_s26 = smov (!%p152_p3), 16  }
   0x8   : > { %439 = vmatpush3.bf16.msra.mxu0 (!%p152_p3), %v476_v1  ;;  %444 = vmatprep.mubr.msk.bf16.mxu0 (!%p152_p3), %vm504_vm1, %v503_v0  ;;  %s506_s27 = smov (!%p152_p3), 32   ;;  %vm235_vm4 = vcmask (!%p152_p3), 130048   ;;  %vm238_vm5 = vcmask (!%p152_p3), 261120   ;;  %vm272_vm6 = vcmask (!%p152_p3), 392192   ;;  %v417_v28 = vld [vmem:[%s581_s2] ss:$0 sm:$0xff] (!%p152_p3) }
   0x9   : > { %440 = vmatprep.subr.bf16.mxu0 (!%p152_p3), %v503_v0  ;;  %vm324_vm7 = vcmask (!%p152_p3), 125952  }
   0xc   : > { %441 = vmatpush3.bf16.msra.mxu0 (!%p152_p3), %v477_v2 }
   0xd   : > { %442 = vmatprep.subr.bf16.mxu0 (!%p152_p3), %v503_v0 }
   0xe   : > { %s588_s12 = smov (!%p179_p4, %s493_s12), 1 }
   0xf   : > { %s426_s18 = sshll.u32 %s588_s12, 3 }
  0x10   : > { %s183_s23 = scalar_lea.vmem %s579_s0, %s426_s18  ;;  %443 = vmatpush3.bf16.msra.mxu0 %v478_v6  ;;  %s192_s5 = scalar_lea.vmem %s582_s3, %s426_s18 }
  0x11   : > { %v431_v3 = vld [vmem:[%s183_s23] sm:$0xff]  }
  0x12   : > { %v432_v4 = vunpack.c.l.bf16 %v431_v3  ;;  %v433_v5 = vunpack.c.h.bf16 %v431_v3 }
  0x14   : > { %v202_v7 = vrot.slane %v432_v4, 7  ;;  %v203_v8 = vrot.slane %v433_v5, 7 }
  0x16   : > { %v204_v9 = vsel %vm201_vm0, %v202_v7, %v203_v8  ;;  %v208_v10 = vsel %vm201_vm0, 0.0, %v202_v7  ;;  %v209_v11 = vsel %vm201_vm0, %v203_v8, 0.0 }
  0x17   : > { %v210_v12 = vpack.c.bf16 %v204_v9, %v208_v10  ;;  %v211_v13 = vpack.c.bf16 %v209_v11, %v209_v11 }
  0x19   : > { %v214_v14 = vshrl.u32 %v210_v12, 16  ;;  %v216_v15 = vshll.u32 %v210_v12, 16  ;;  %v221_v16 = vshll.u32 %v211_v13, 16  ;;  %v230_v20 = vrot.slane %v210_v12, 1 }
  0x1a   : > { %v231_v21 = vrot.slane %v211_v13, 1 }
  0x1b   : > { %v218_v17 = vrot.slane %v216_v15, 1  ;;  %v223_v18 = vrot.slane %v221_v16, 1 }
  0x1c   : > { %v232_v23 = vsel %vm229_vm3, %v230_v20, %v231_v21 }
  0x1d   : > { %v219_v19 = vor.u32 %v218_v17, %v214_v14 }
  0x1f   : > { %v224_v22 = vsel %vm212_vm2, %v219_v19, %v223_v18 }
  0x20   : > { %225 = vrot.lane.b32.xlu0 %v224_v22, %s505_s26 }
  0x24   : > { %233 = vrot.lane.b32.xlu0 %v232_v23, %s506_s27 }
  0x92   : > { %v226_v24 = vpop.permute.xlu0 %225 }
  0x93   : > { %v237_v25 = vsel %vm235_vm4, %v210_v12, %v226_v24 }
  0x96   : > { %v234_v26 = vpop.permute.xlu0 %233 }
  0x97   : > { %v240_v27 = vsel %vm238_vm5, %v237_v25, %v234_v26 }
  0x98   : > { %445 = vmatmul.mubr.msk.bf16.vlgmr.msra.gmra.mrb[0].mxu0 %vm272_vm6, %v240_v27 }
 0x16b   : > { %v309_v29 = vpop.f32.mrb[0].mxu0 }
 0x16c   : > { %v310_v30 = vadd.f32 %v417_v28, %v309_v29  ;;  %v446_v31 = vpop.f32.mrb[1].mxu0 }
 0x16d   : > { %v312_v32 = vpop.f32.mrb[2].mxu0 }
 0x16e   : > { %v428_v33 = vpack.c.bf16 %v310_v30, %v310_v30  ;;  %v313_v34 = vadd.f32 %v417_v28, %v312_v32  ;;  %v447_v35 = vpop.f32.mrb[3].mxu0 }
 0x170   : > { %325 = vst.msk [vmem:[%s192_s5] sm:$0xf] %vm324_vm7, %v428_v33  ;;  %v429_v36 = vpack.c.bf16 %v313_v34, %v313_v34 }
 0x172   : > { %326 = vst.msk [vmem:[%s192_s5 + $0x4] sm:$0xf] %vm324_vm7, %v429_v36 }
 0x173 PF: > { %s13_s14 = sadd.s32 1, %s501_s14   ;;  %s583_s12 = smov %s497_s13 }
 0x174   : > { %p10_p5 = scmp.ge.s32.totalorder %s13_s14, 4   ;;  %s584_s13 = smov %s586_s15 }
 0x176   :  { %12 = sbr.rel (!%p10_p5) target bundleno = 2 (0x2), region = 62 }

// kernel: model_forward.99
= control target key start
LH: loop header
LB: loop body
LE: loop exit
PB: predicated region body
PF: predicated region fallthrough
CT: control target
= control target key end

     0   :  { %s839_s21 = smov 0   ;;  %s841_s22 = smov 0   ;;  %s915_s0 = inlined_call_operand.vmem [shape: bf16[2,16,16], index: 0, kind: input, shape index: {}]   ;;  %s916_s1 = inlined_call_operand.vmem [shape: bf16[2,16,16], index: 1, kind: input, shape index: {}]   ;;  %s917_s2 = inlined_call_operand.vmem [shape: bf16[96,16], index: 2, kind: input, shape index: {}]   ;;  %s918_s3 = inlined_call_operand.vmem [shape: f32[1,16], index: 3, kind: input, shape index: {}]   ;;  %s919_s4 = inlined_call_operand.vmem [shape: f32[1,16], index: 4, kind: input, shape index: {}]   ;;  %s920_s5 = inlined_call_operand.vmem [shape: f32[2,2,16], index: 5, kind: input, shape index: {}]   ;;  %s921_s6 = inlined_call_operand.vmem [shape: bf16[2,16,16], index: 6, kind: output, shape index: {}]  }
   0x1   :  { %s843_s23 = smov 0  }
   0x2 LB: > { %s28_s24 = sadd.s32 1, %s793_s22  ;;  %p660_p0 = scmp.ge.s32.totalorder %s797_s23, 1  ;;  %s797_s23 = sphi %s843_s23, %s16_s23   ;;  %s793_s22 = sphi %s841_s22, %s923_s22   ;;  %s789_s21 = sphi %s839_s21, %s922_s21  }
   0x3   : > { %p30_p1 = scmp.ge.s32.totalorder %s28_s24, 2  ;;  %p245_p2 = scmp.lt.s32.totalorder %s797_s23, 3 }
   0x5   : > { %s925_s24 = smov (%p30_p1, %s28_s24), 0  ;;  %p246_p3 = pnand %p660_p0, %p245_p2 }
   0x6   : > { %p288_p4 = scmp.lt.s32.totalorder (!%p246_p3), %s789_s21, 1  ;;  %s799_s29 = smov (!%p246_p3), 16   ;;  %v753_v4 = vld [vmem:[%s917_s2] sm:$0xff] (!%p246_p3)   ;;  %v800_v5 = vmov (!%p246_p3), 0.0   ;;  %v754_v6 = vld [vmem:[%s917_s2 + $0x8] sm:$0xff] (!%p246_p3)   ;;  %v755_v7 = vld [vmem:[%s917_s2 + $0x10] sm:$0xff] (!%p246_p3)  }
   0x7   : > { %249 = sbr.rel (%p246_p3) target bundleno = 699 (0x2bb), region = 44  ;;  %703 = vmatprep.subr.bf16.mxu0 (!%p246_p3), %v800_v5  ;;  %v756_v8 = vld [vmem:[%s917_s2 + $0x18] sm:$0xff] (!%p246_p3)   ;;  %v757_v9 = vld [vmem:[%s917_s2 + $0x20] sm:$0xff] (!%p246_p3)   ;;  %v758_v11 = vld [vmem:[%s917_s2 + $0x28] sm:$0xff] (!%p246_p3)   ;;  %vm329_vm0 = vcmask (!%p246_p3), 130048   ;;  %vm334_vm1 = vcmask (!%p246_p3), 1040384  }
   0x8   : > { %704 = vmatpush3.bf16.msra.mxu0 (!%p246_p3), %v753_v4  ;;  %vm801_vm2 = vmmov (!%p246_p3), 0   ;;  %vm362_vm3 = vcmask (!%p246_p3), 1046528   ;;  %s802_s26 = smov (!%p246_p3), 64   ;;  %vm345_vm4 = vsmask.f32 (!%p246_p3), 7424  ;;  %s803_s27 = smov (!%p246_p3), 32  }
   0x9   : > { %705 = vmatprep.subr.bf16.mxu0 (!%p246_p3), %v800_v5  ;;  %715 = vmatprep.mubr.msk.bf16.mxu0 (!%p246_p3), %vm801_vm2, %v800_v5  ;;  %vm368_vm5 = vcmask (!%p246_p3), 261120   ;;  %vm371_vm6 = vcmask (!%p246_p3), 523264   ;;  %vm429_vm7 = vcmask (!%p246_p3), 785408   ;;  %v668_v40 = vld [vmem:[%s918_s3] ss:$0 sm:$0xff] (!%p246_p3)  ;;  %vm548_vm12 = vcmask (!%p246_p3), 125952  }
   0xc   : > { %706 = vmatpush3.bf16.msra.mxu0 (!%p246_p3), %v754_v6 }
   0xd   : > { %707 = vmatprep.subr.bf16.mxu0 (!%p246_p3), %v800_v5 }
   0xe   : > { %s927_s21 = smov (!%p288_p4, %s789_s21), 1 }
   0xf   : > { %s860_s25 = sshll.u32 %s927_s21, 3  ;;  %s665_s30 = sshll.u32 %s927_s21, 1 }
  0x10   : > { %s297_s28 = scalar_lea.vmem %s916_s1, %s860_s25  ;;  %708 = vmatpush3.bf16.msra.mxu0 %v755_v7  ;;  %s292_s18 = scalar_lea.vmem %s915_s0, %s860_s25  ;;  %v676_v7 = vld [vmem:[%s919_s4] ss:$0 sm:$0xff] }
  0x11   : > { %v693_v0 = vld [vmem:[%s297_s28] sm:$0xff]   ;;  %709 = vmatprep.subr.bf16.mxu0 %v800_v5  ;;  %s301_s9 = scalar_lea.vmem %s920_s5, %s665_s30  ;;  %s310_s13 = scalar_lea.vmem %s921_s6, %s860_s25 }
  0x12   : > { %v694_v1 = vunpack.c.l.bf16 %v693_v0  ;;  %v695_v2 = vunpack.c.h.bf16 %v693_v0  ;;  %v689_v10 = vld [vmem:[%s292_s18] sm:$0xff]  }
  0x13   : > { %v690_v12 = vunpack.c.l.bf16 %v689_v10  ;;  %v691_v13 = vunpack.c.h.bf16 %v689_v10 }
  0x14   : > { %v748_v3 = vpack.i.bf16 %v695_v2, %v694_v1  ;;  %710 = vmatpush3.bf16.msra.mxu0 %v756_v8  ;;  %v514_v1 = vlaneseq }
  0x15   : > { %711 = vmatprep.subr.bf16.mxu0 %v800_v5 }
  0x16   : > { %749 = vrot.lane.b32.xlu0 %v748_v3, %s799_s29  ;;  %v515_v2 = vshrl.u32 %v514_v1, 7  ;;  %v512_v3 = vld [vmem:[%s301_s9] sm:$0x3] }
  0x17   : > { %v513_v4 = vadd.f32 1.0, %v512_v3 }
  0x18   : > { %712 = vmatpush3.bf16.msra.mxu0 %v757_v9  ;;  %v522_v8 = vsub.s32 1, %v515_v2 }
  0x19   : > { %713 = vmatprep.subr.bf16.mxu0 %v800_v5  ;;  %v516_v5 = vsub.s32 0, %v515_v2 }
  0x1c   : > { %714 = vmatpush3.bf16.msra.mxu0 %v758_v11  ;;  %v517_v11 = vrot.slane %v513_v4, %v516_v5 }
  0x88   : > { %v750_v14 = vpop.permute.xlu0 %749 }
  0x89   : > { %v752_v15 = vunpack.i.h.bf16 %v750_v14  ;;  %v751_v16 = vunpack.i.l.bf16 %v750_v14  ;;  %v523_v14 = vrot.slane %v512_v3, %v522_v8 }
  0x8b   : > { %v330_v17 = vsel %vm329_vm0, %v690_v12, %v751_v16  ;;  %v331_v18 = vsel %vm329_vm0, %v691_v13, %v752_v15 }
  0x8c   : > { %v335_v19 = vrot.slane %v330_v17, 7  ;;  %v336_v20 = vrot.slane %v331_v18, 7 }
  0x8e   : > { %v337_v21 = vsel %vm334_vm1, %v335_v19, %v336_v20  ;;  %v341_v22 = vsel %vm334_vm1, 0.0, %v335_v19  ;;  %v342_v23 = vsel %vm334_vm1, %v336_v20, 0.0 }
  0x8f   : > { %v343_v24 = vpack.c.bf16 %v337_v21, %v341_v22  ;;  %v344_v25 = vpack.c.bf16 %v342_v23, %v342_v23 }
  0x91   : > { %v363_v26 = vrot.slane %v343_v24, 1  ;;  %v364_v27 = vrot.slane %v344_v25, 1  ;;  %v349_v28 = vshll.u32 %v343_v24, 16  ;;  %v354_v29 = vshll.u32 %v344_v25, 16 }
  0x92   : > { %v347_v31 = vshrl.u32 %v343_v24, 16 }
  0x93   : > { %v365_v30 = vsel %vm362_vm3, %v363_v26, %v364_v27  ;;  %v351_v32 = vrot.slane %v349_v28, 1  ;;  %v356_v34 = vrot.slane %v354_v29, 1 }
  0x94   : > { %366 = vrot.lane.b32.xlu1 %v365_v30, %s802_s26 }
  0x95   : > { %v352_v33 = vor.u32 %v351_v32, %v347_v31 }
  0x97   : > { %v357_v35 = vsel %vm345_vm4, %v352_v33, %v356_v34 }
  0x98   : > { %358 = vrot.lane.b32.xlu0 %v357_v35, %s803_s27 }
 0x106   : > { %v367_v37 = vpop.permute.xlu1 %366 }
 0x10a   : > { %v359_v36 = vpop.permute.xlu0 %358 }
 0x10b   : > { %v370_v38 = vsel %vm368_vm5, %v343_v24, %v359_v36 }
 0x10c   : > { %v373_v39 = vsel %vm371_vm6, %v370_v38, %v367_v37 }
 0x10d   : > { %716 = vmatmul.mubr.msk.bf16.vlgmr.msra.gmra.mrb[0].mxu0 %vm429_vm7, %v373_v39 }
 0x1e0   : > { %v466_v41 = vpop.f32.mrb[0].mxu0 }
 0x1e1   : > { %v467_v42 = vadd.f32 %v668_v40, %v466_v41  ;;  %v717_v43 = vpop.f32.mrb[1].mxu0 }
 0x1e2   : > { %v469_v44 = vpop.f32.mrb[2].mxu0 }
 0x1e3   : > { %v470_v45 = vadd.f32 %v668_v40, %v469_v44  ;;  %v718_v46 = vpop.f32.mrb[3].mxu0  ;;  %v474_v47 = vmul.f32 %v467_v42, %v467_v42 }
 0x1e5   : > { %v476_v48 = vsel %vm329_vm0, %v474_v47, 0.0  ;;  %v475_v49 = vmul.f32 %v470_v45, %v470_v45 }
 0x1e6   : > { %477 = vadd.xlane.f32.xlu1 %v476_v48 }
 0x1e7   : > { %v479_v50 = vsel %vm329_vm0, %v475_v49, 0.0 }
 0x1e8   : > { %480 = vadd.xlane.f32.xlu0 %v479_v50 }
 0x273   : > { %v478_v51 = vpop.xlane.xlu1 %477 }
 0x274   : > { %759 = vrsqrt.f32 %v478_v51  ;;  %vm484_vm8 = vcmp.eq.f32.partialorder %v478_v51, inf  ;;  %v487_v56 = vand.u32 2147483648, %v478_v51  ;;  %vm486_vm9 = vcmp.eq.f32.partialorder %v478_v51, 0.0 }
 0x275   : > { %v481_v52 = vpop.xlane.xlu0 %480 }
 0x276   : > { %761 = vrsqrt.f32 %v481_v52  ;;  %vm491_vm10 = vcmp.eq.f32.partialorder %v481_v52, inf  ;;  %v494_v60 = vand.u32 2147483648, %v481_v52  ;;  %vm493_vm11 = vcmp.eq.f32.partialorder %v481_v52, 0.0 }
 0x27e   : > { %v760_v53 = vpop.eup %759 }
 0x27f   : > { %v483_v54 = vmul.f32 %v760_v53, %v478_v51 }
 0x280   : > { %v762_v55 = vpop.eup %761 }
 0x281   : > { %v485_v57 = vsel %vm484_vm8, %v478_v51, %v483_v54  ;;  %v490_v58 = vmul.f32 %v762_v55, %v481_v52 }
 0x282   : > { %v488_v59 = vsel %vm486_vm9, %v487_v56, %v485_v57 }
 0x283   : > { %v496_v61 = vmax.f32 %v488_v59, 1e-12  ;;  %v492_v62 = vsel %vm491_vm10, %v481_v52, %v490_v58 }
 0x284   : > { %v495_v63 = vsel %vm493_vm11, %v494_v60, %v492_v62 }
 0x285   : > { %763 = vrcp.f32 %v496_v61  ;;  %v497_v0 = vmax.f32 %v495_v63, 1e-12 }
 0x287   : > { %765 = vrcp.f32 %v497_v0 }
 0x28f   : > { %v764_v6 = vpop.eup %763 }
 0x290   : > { %v499_v9 = vmul.f32 %v764_v6, %v467_v42 }
 0x291   : > { %v766_v10 = vpop.eup %765 }
 0x292   : > { %v508_v12 = vmul.f32 %v676_v7, %v499_v9  ;;  %v501_v13 = vmul.f32 %v766_v10, %v470_v45 }
 0x294   : > { %v510_v15 = vmul.f32 4.0, %v508_v12  ;;  %v509_v16 = vmul.f32 %v676_v7, %v501_v13 }
 0x296   : > { %v518_v17 = vmul.f32 %v517_v11, %v510_v15  ;;  %v511_v18 = vmul.f32 4.0, %v509_v16 }
 0x298   : > { %v524_v19 = vadd.f32 %v523_v14, %v518_v17  ;;  %v519_v20 = vmul.f32 %v517_v11, %v511_v18 }
 0x29a   : > { %v677_v21 = vmul.f32 -1.442695, %v524_v19  ;;  %v525_v22 = vadd.f32 %v523_v14, %v519_v20 }
 0x29c   : > { %767 = vpow2.f32 %v677_v21  ;;  %v678_v23 = vmul.f32 -1.442695, %v525_v22 }
 0x29e   : > { %769 = vpow2.f32 %v678_v23 }
 0x2a6   : > { %v768_v24 = vpop.eup %767 }
 0x2a7   : > { %v532_v25 = vadd.f32 1.0, %v768_v24 }
 0x2a8   : > { %v770_v26 = vpop.eup %769 }
 0x2a9   : > { %771 = vrcp.f32 %v532_v25  ;;  %v533_v27 = vadd.f32 1.0, %v770_v26 }
 0x2ab   : > { %773 = vrcp.f32 %v533_v27 }
 0x2b3   : > { %v772_v28 = vpop.eup %771 }
 0x2b4   : > { %v538_v29 = vmul.f32 %v772_v28, %v524_v19 }
 0x2b5   : > { %v774_v30 = vpop.eup %773 }
 0x2b6   : > { %v686_v31 = vpack.c.bf16 %v538_v29, %v538_v29  ;;  %v539_v32 = vmul.f32 %v774_v30, %v525_v22 }
 0x2b8   : > { %549 = vst.msk [vmem:[%s310_s13] sm:$0xf] %vm548_vm12, %v686_v31  ;;  %v687_v33 = vpack.c.bf16 %v539_v32, %v539_v32 }
 0x2ba   : > { %550 = vst.msk [vmem:[%s310_s13 + $0x4] sm:$0xf] %vm548_vm12, %v687_v33 }
 0x2bb PF: > { %s16_s23 = sadd.s32 1, %s797_s23   ;;  %s922_s21 = smov %s793_s22 }
 0x2bc   : > { %p13_p5 = scmp.ge.s32.totalorder %s16_s23, 4   ;;  %s923_s22 = smov %s925_s24 }
 0x2be   :  { %15 = sbr.rel (!%p13_p5) target bundleno = 2 (0x2), region = 80 }

// kernel: model_forward.112
= control target key start
LH: loop header
LB: loop body
LE: loop exit
PB: predicated region body
PF: predicated region fallthrough
CT: control target
= control target key end

     0   :  { %s445_s12 = smov 0   ;;  %s447_s13 = smov 0   ;;  %s484_s0 = inlined_call_operand.vmem [shape: bf16[2,16,16], index: 0, kind: input, shape index: {}]   ;;  %s485_s1 = inlined_call_operand.vmem [shape: bf16[16,2], index: 1, kind: input, shape index: {}]   ;;  %s486_s2 = inlined_call_operand.vmem [shape: f32[1,2], index: 2, kind: input, shape index: {}]   ;;  %s487_s3 = inlined_call_operand.vmem [shape: f32[2,16,2], index: 3, kind: output, shape index: {}]  }
   0x1   :  { %s449_s14 = smov 0  }
   0x2 LB: > { %s25_s15 = sadd.s32 1, %s417_s13  ;;  %p350_p0 = scmp.ge.s32.totalorder %s421_s14, 1  ;;  %s421_s14 = sphi %s449_s14, %s13_s14   ;;  %s417_s13 = sphi %s447_s13, %s489_s13   ;;  %s413_s12 = sphi %s445_s12, %s488_s12  }
   0x3   : > { %p27_p1 = scmp.ge.s32.totalorder %s25_s15, 2  ;;  %p151_p2 = scmp.lt.s32.totalorder %s421_s14, 3 }
   0x5   : > { %s491_s15 = smov (%p27_p1, %s25_s15), 0  ;;  %p152_p3 = pnand %p350_p0, %p151_p2 }
   0x6   : > { %v397_v0 = vld [vmem:[%s485_s1] sm:$0xff] (!%p152_p3)   ;;  %v423_v1 = vmov (!%p152_p3), 0.0   ;;  %p179_p4 = scmp.lt.s32.totalorder (!%p152_p3), %s413_s12, 1  ;;  %vm424_vm0 = vmmov (!%p152_p3), 0   ;;  %vm217_vm1 = vcmask (!%p152_p3), 130048   ;;  %vm262_vm2 = vcmask (!%p152_p3), 15360  }
   0x7   : > { %155 = sbr.rel (%p152_p3) target bundleno = 235 (0xeb), region = 32  ;;  %365 = vmatprep.subr.bf16.mxu0 (!%p152_p3), %v423_v1  ;;  %367 = vmatprep.mubr.msk.bf16.mxu0 (!%p152_p3), %vm424_vm0, %v423_v1  ;;  %v355_v3 = vld [vmem:[%s486_s2] ss:$0 sm:$0xff] (!%p152_p3) }
   0x8   : > { %366 = vmatpush3.bf16.msra.mxu0 (!%p152_p3), %v397_v0 }
   0xe   : > { %s493_s12 = smov (!%p179_p4, %s413_s12), 1 }
   0xf   : > { %s361_s18 = sshll.u32 %s493_s12, 3  ;;  %s362_s22 = sshll.u32 %s493_s12, 4 }
  0x10   : > { %s183_s21 = scalar_lea.vmem %s484_s0, %s361_s18  ;;  %s192_s27 = scalar_lea.vmem %s487_s3, %s362_s22 }
  0x11   : > { %v398_v2 = vld [vmem:[%s183_s21] sm:$0xff]  }
  0x12   : > { %368 = vmatmul.mubr.msk.bf16.vlgmr.msra.gmra.mrb[0].mxu0 %vm217_vm1, %v398_v2 }
  0xe5   : > { %v255_v4 = vpop.f32.mrb[0].mxu0 }
  0xe6   : > { %v256_v5 = vadd.f32 %v355_v3, %v255_v4  ;;  %v369_v6 = vpop.f32.mrb[1].mxu0 }
  0xe7   : > { %v258_v7 = vpop.f32.mrb[2].mxu0 }
  0xe8   : > { %263 = vst.msk [vmem:[%s192_s27] sm:$0xff] %vm262_vm2, %v256_v5  ;;  %v259_v8 = vadd.f32 %v355_v3, %v258_v7  ;;  %v370_v9 = vpop.f32.mrb[3].mxu0 }
  0xea   : > { %264 = vst.msk [vmem:[%s192_s27 + $0x8] sm:$0xff] %vm262_vm2, %v259_v8 }
  0xeb PF: > { %s13_s14 = sadd.s32 1, %s421_s14   ;;  %s488_s12 = smov %s417_s13 }
  0xec   : > { %p10_p5 = scmp.ge.s32.totalorder %s13_s14, 4   ;;  %s489_s13 = smov %s491_s15 }
  0xee   :  { %12 = sbr.rel (!%p10_p5) target bundleno = 2 (0x2), region = 62 }

// kernel: model_forward.113
= control target key start
LH: loop header
LB: loop body
LE: loop exit
PB: predicated region body
PF: predicated region fallthrough
CT: control target
= control target key end

     0   :  { %s349_s12 = smov 0   ;;  %s377_s0 = inlined_call_operand.vmem [shape: f32[2,16,2], index: 0, kind: input, shape index: {}]   ;;  %s378_s1 = inlined_call_operand.vmem [shape: f32[2,16,2], index: 1, kind: input, shape index: {}]   ;;  %s379_s2 = inlined_call_operand.vmem [shape: f32[2,1,1], index: 2, kind: input, shape index: {}]   ;;  %s380_s3 = inlined_call_operand.vmem [shape: f32[2,1,1], index: 3, kind: output, shape index: {}]  }
   0x1 LB: > { %s300_s13 = sadd.s32 4294967295, %s327_s12   ;;  %p304_p0 = scmp.ge.s32.totalorder %s327_s12, 1  ;;  %s327_s12 = sphi %s349_s12, %s13_s12  }
   0x2   : > { %p155_p1 = scmp.lt.s32.totalorder %s327_s12, 3 }
   0x4   : > { %p156_p2 = pnand %p304_p0, %p155_p1 }
   0x5   : > { %p185_p3 = scmp.lt.s32.totalorder (!%p156_p2), %s300_s13, 1  ;;  %vm209_vm0 = vcmask (!%p156_p2), 15360   ;;  %vm230_vm1 = vcmask (!%p156_p2), 0  }
   0x6   : > { %159 = sbr.rel (%p156_p2) target bundleno = 190 (0xbe), region = 32 }
   0xd   : > { %s382_s13 = smov (!%p185_p3, %s300_s13), 1 }
   0xe   : > { %s311_s14 = sshll.u32 %s382_s13, 4  ;;  %s197_s23 = scalar_lea.vmem %s379_s2, %s382_s13 }
   0xf   : > { %s189_s17 = scalar_lea.vmem %s377_s0, %s311_s14  ;;  %s194_s20 = scalar_lea.vmem %s378_s1, %s311_s14  ;;  %v228_v21 = vld [vmem:[%s197_s23] sm:$0x1] }
  0x10   : > { %v201_v0 = vld [vmem:[%s189_s17] sm:$0xff]  ;;  %v202_v2 = vld [vmem:[%s189_s17 + $0x8] sm:$0xff]  ;;  %s200_s26 = scalar_lea.vmem %s380_s3, %s382_s13 }
  0x11   : > { %v203_v1 = vld [vmem:[%s194_s20] sm:$0xff]  ;;  %v204_v4 = vld [vmem:[%s194_s20 + $0x8] sm:$0xff] }
  0x12   : > { %v205_v3 = vsub.f32 %v201_v0, %v203_v1  ;;  %v206_v5 = vsub.f32 %v202_v2, %v204_v4 }
  0x14   : > { %v207_v6 = vmul.f32 %v205_v3, %v205_v3  ;;  %v208_v7 = vmul.f32 %v206_v5, %v206_v5 }
  0x16   : > { %v210_v8 = vsel %vm209_vm0, %v207_v6, 0.0  ;;  %v213_v9 = vsel %vm209_vm0, %v208_v7, 0.0 }
  0x17   : > { %211 = vadd.xlane.f32.xlu0 %v210_v8 }
  0x1b   : > { %214 = vadd.xlane.f32.xlu0 %v213_v9 }
  0xa4   : > { %v212_v10 = vpop.xlane.xlu0 %211 }
  0xa5   : > { %v217_v12 = vmul.f32 0.5, %v212_v10 }
  0xa8   : > { %v215_v11 = vpop.xlane.xlu0 %214 }
  0xa9   : > { %v218_v13 = vmul.f32 0.5, %v215_v11 }
  0xab   : > { %v219_v14 = vadd.f32 %v218_v13, %v217_v12 }
  0xad   : > { %v220_v15 = vrot.slane %v219_v14, 4 }
  0xaf   : > { %v221_v16 = vadd.f32 %v220_v15, %v219_v14 }
  0xb1   : > { %v222_v17 = vrot.slane %v221_v16, 2 }
  0xb3   : > { %v223_v18 = vadd.f32 %v222_v17, %v221_v16 }
  0xb5   : > { %v224_v19 = vrot.slane %v223_v18, 1 }
  0xb7   : > { %v225_v20 = vadd.f32 %v224_v19, %v223_v18 }
  0xb9   : > { %v227_v22 = vmul.f32 0.0625, %v225_v20 }
  0xbb   : > { %v229_v23 = vmul.f32 %v228_v21, %v227_v22 }
  0xbd   : > { %231 = vst.msk [vmem:[%s200_s26] sm:$0x1] %vm230_vm1, %v229_v23 }
  0xbe PF: > { %s13_s12 = sadd.s32 1, %s327_s12  }
  0xbf   : > { %p10_p4 = scmp.ge.s32.totalorder %s13_s12, 4  }
  0xc1   :  { %12 = sbr.rel (!%p10_p4) target bundleno = 1 (0x1), region = 68 }

</bundles_post_ra>
